<compile_context>
chip_gen: v7x
topology: tpu7x:2x2x1
jax: 0.10.0
libtpu: 0.0.40
codegen_flags: <defaults>
</compile_context>

<pallas_src>
import numpy as np
import jax
import jax.numpy as jnp
from jax.experimental import pallas as pl
from jax.experimental.pallas import tpu as pltpu

KERNEL_SIZE = 4          # chebyshev polynomial degree
N_NEIGHBOURS = 8
NSIDE_LIST = [8, 4, 2, 1]
IN_CH = 1
N_PARAMS = 2
FC_DIMS = [[-1, 128], [128, 128], [128, 64]]
CONV_CONFIG = [(IN_CH, 16), (16, 32), (32, 64), (64, 128)]   # len(NSIDE_LIST) == 4


def nside2npix(nside):
    return 12 * nside * nside


# TODO(synk): get_healpix_laplacians needs healpy; build deterministic synthetic ring-graph
# combinatorial laplacians (rescaled to [-1, 1] like deepsphere: 2L/lmax - I) instead.
def make_laplacian(npix, n_neighbours=N_NEIGHBOURS):
    A = np.zeros((npix, npix), np.float32)
    idx = np.arange(npix)
    for d in range(1, n_neighbours // 2 + 1):
        A[idx, (idx + d) % npix] = 1.0
        A[idx, (idx - d) % npix] = 1.0
    deg = A.sum(axis=1)
    L = np.diag(deg) - A
    lmax = 2.0 * float(deg.max())
    L = (2.0 / lmax) * L - np.eye(npix, dtype=np.float32)
    return L.astype(np.float32)


def build_pixel_orders():
    """Per-level pixel permutations so the nested healpix 4->1 max-pool becomes a max of
    four contiguous lane slices.

    orders[i][c] = nested pixel index (at level i) held in working column c.  The 4
    children of the coarse pixel in output column q sit at working columns
    {q, npool+q, 2*npool+q, 3*npool+q}, and the pooled output columns are already in the
    next level's working order.
    """
    orders = [np.arange(nside2npix(NSIDE_LIST[-1]) // 4)]
    for nside in reversed(NSIDE_LIST):
        n = nside2npix(nside)
        npool = n // 4
        coarse = orders[0]
        cur = np.empty(n, dtype=np.int64)
        for r in range(4):
            cur[r * npool:(r + 1) * npool] = 4 * coarse + r
        orders.insert(0, cur)
    return orders          # orders[0..3] = layer input orders, orders[4] = final 3 pixels


def _cheb_bn_pool(x, L, wt, scale, shift):
    """One SphericalChebBNPool layer, per-sample, pixels-on-lanes layout.

    x     : (cin, n)        f32   columns = pixels in this level's working order
    L     : (n, n)          bf16  permuted rescaled graph Laplacian (symmetric)
    wt    : (cout, K*cin)   bf16  Chebyshev weight, rows (k, cin)-ordered on the K axis
    scale : (cout, 1)       f32   folded eval-BatchNorm gamma/sqrt(var+eps)
    shift : (cout, 1)       f32   folded conv bias + BatchNorm beta
    returns (cout, n//4) f32 in the next level's working order.
    """
    n = L.shape[-1]
    npool = n // 4

    # Chebyshev recursion T0=x, T1=xL, Tk=2*T(k-1)L - T(k-2); pixel dim stays on lanes.
    ts = [x]
    for k in range(1, KERNEL_SIZE):
        t = jnp.dot(ts[-1].astype(jnp.bfloat16), L, preferred_element_type=jnp.float32)
        if k > 1:
            t = 2.0 * t - ts[-2]
        ts.append(t)

    # Stack the K terms along rows (sublanes) -> one (cout, K*cin) @ (K*cin, n) conv matmul.
    t_all = jnp.concatenate(ts, axis=0).astype(jnp.bfloat16)          # (K*cin, n)
    y = jnp.dot(wt, t_all, preferred_element_type=jnp.float32)        # (cout, n)

    # Folded BatchNorm (eval) + conv bias, then ReLU (lane-dense).
    y = jnp.maximum(y * scale + shift, 0.0)

    # Healpix max-pool: children of coarse pixel q live in the 4 contiguous lane quarters.
    p = y[:, 0:npool]
    for r in range(1, 4):
        p = jnp.maximum(p, y[:, r * npool:(r + 1) * npool])
    return p


def _fused_forward_kernel(x_ref, th_ref,
                          l0_ref, w0_ref, s0_ref, b0_ref,
                          l1_ref, w1_ref, s1_ref, b1_ref,
                          l2_ref, w2_ref, s2_ref, b2_ref,
                          l3_ref, w3_ref, s3_ref, b3_ref,
                          fw1a_ref, fw1b_ref, fb1_ref,
                          fw2_ref, fb2_ref, fw3_ref, fb3_ref,
                          o_ref):
    # One grid step == one batch element (grid axis is "parallel" -> v7x dual-TC).
    x = x_ref[...]                                           # (in_ch, 768) f32

    layer_refs = ((l0_ref, w0_ref, s0_ref, b0_ref),
                  (l1_ref, w1_ref, s1_ref, b1_ref),
                  (l2_ref, w2_ref, s2_ref, b2_ref),
                  (l3_ref, w3_ref, s3_ref, b3_ref))
    for l_ref, w_ref, s_ref, b_ref in layer_refs:
        x = _cheb_bn_pool(x, l_ref[...], w_ref[...], s_ref[...], b_ref[...])

    # pooling_end == 'average': mean over the remaining pixels -> (128, 1) feature column.
    xm = jnp.mean(x, axis=-1, keepdims=True)

    # FC head in column orientation (weights kept in PyTorch (out, in) layout, bf16 MXU).
    # torch.cat([pooled, theta], -1) is handled as a split matmul on the first Linear;
    # the unsqueeze(1)/[:, 0, :] in the reference is a no-op around per-row Linears.
    h = jnp.dot(fw1a_ref[...], xm.astype(jnp.bfloat16),
                preferred_element_type=jnp.float32)
    h = h + jnp.dot(fw1b_ref[...], th_ref[...].astype(jnp.bfloat16),
                    preferred_element_type=jnp.float32)
    h = jnp.maximum(h + fb1_ref[...], 0.0)
    h = jnp.maximum(jnp.dot(fw2_ref[...], h.astype(jnp.bfloat16),
                            preferred_element_type=jnp.float32) + fb2_ref[...], 0.0)
    o_ref[...] = jnp.dot(fw3_ref[...], h.astype(jnp.bfloat16),
                         preferred_element_type=jnp.float32) + fb3_ref[...]


def init_params(key):
    params = {"conv": [], "fc": []}
    eps = 1e-5
    for (cin, cout) in CONV_CONFIG:
        key, kw, kb, kg, kbe = jax.random.split(key, 5)
        W = jax.random.normal(kw, (KERNEL_SIZE, cin, cout), jnp.float32) / np.sqrt(cin * KERNEL_SIZE)
        bias = 0.1 * jax.random.normal(kb, (cout,), jnp.float32)
        gamma = 1.0 + 0.1 * jax.random.normal(kg, (cout,), jnp.float32)
        beta = 0.1 * jax.random.normal(kbe, (cout,), jnp.float32)
        run_mean = jnp.zeros((cout,), jnp.float32)
        run_var = jnp.ones((cout,), jnp.float32)
        scale = gamma / jnp.sqrt(run_var + eps)               # eval-mode BN fold
        shift = beta + (bias - run_mean) * scale
        params["conv"].append({"W": W, "scale": scale, "shift": shift})
    fc_dims = [list(d) for d in FC_DIMS]
    fc_dims[0][0] = CONV_CONFIG[-1][-1] + N_PARAMS            # pooling_end == 'average'
    for din, dout in fc_dims:
        key, kw, kb = jax.random.split(key, 3)
        W = jax.random.normal(kw, (dout, din), jnp.float32) / np.sqrt(din)   # torch (out,in)
        b = 0.1 * jax.random.normal(kb, (dout,), jnp.float32)
        params["fc"].append({"W": W, "b": b})
    return params


def pack_params(params, laps_np):
    """One-time host-side packing: per-level pixel permutation of the Laplacians (makes the
    pool a contiguous-slice max), bf16 matmul operands, (cout,1) BN scale/shift columns,
    and the theta-concat split of the first FC weight."""
    orders = build_pixel_orders()
    ops = []
    for i, ((cin, cout), p) in enumerate(zip(CONV_CONFIG, params["conv"])):
        sig = orders[i]
        Lp = laps_np[i][np.ix_(sig, sig)]                     # permuted (symmetric) Laplacian
        ops.append(jnp.asarray(Lp, dtype=jnp.bfloat16))
        Wt = np.asarray(p["W"]).reshape(KERNEL_SIZE * cin, cout).T    # (cout, K*cin)
        ops.append(jnp.asarray(Wt, dtype=jnp.bfloat16))
        ops.append(jnp.asarray(p["scale"], dtype=jnp.float32).reshape(cout, 1))
        ops.append(jnp.asarray(p["shift"], dtype=jnp.float32).reshape(cout, 1))
    fc = params["fc"]
    c_last = CONV_CONFIG[-1][-1]
    W1 = np.asarray(fc[0]["W"])                               # (128, 130), torch (out,in)
    ops += [jnp.asarray(W1[:, :c_last], jnp.bfloat16),        # pooled-feature part
            jnp.asarray(W1[:, c_last:], jnp.bfloat16),        # theta part (torch.cat order)
            jnp.asarray(fc[0]["b"], jnp.float32).reshape(-1, 1),
            jnp.asarray(fc[1]["W"], jnp.bfloat16),
            jnp.asarray(fc[1]["b"], jnp.float32).reshape(-1, 1),
            jnp.asarray(fc[2]["W"], jnp.bfloat16),
            jnp.asarray(fc[2]["b"], jnp.float32).reshape(-1, 1)]
    return {"operands": ops, "order0": orders[0]}


def spherical_graph_cnn_forward(x, theta, packed):
    npix0 = nside2npix(NSIDE_LIST[0])
    x_map = x.reshape(-1, npix0, IN_CH)                       # x.view(-1, npix_init, in_ch)
    B = x_map.shape[0]
    # mask is None in this configuration -> no masking (module wraps it in try/except).
    # Wrapper-side layout prep: pixels on lanes, columns in the layer-0 working order.
    x_work = jnp.transpose(x_map, (0, 2, 1))[:, :, packed["order0"]]   # (B, in_ch, npix0)
    theta_col = theta.reshape(B, N_PARAMS, 1)

    const_specs = [pl.BlockSpec(op.shape, lambda b: (0, 0))   # resident across grid steps
                   for op in packed["operands"]]
    in_specs = [pl.BlockSpec((None, IN_CH, npix0), lambda b: (b, 0, 0)),
                pl.BlockSpec((None, N_PARAMS, 1), lambda b: (b, 0, 0))] + const_specs

    out = pl.pallas_call(
        _fused_forward_kernel,
        grid=(B,),
        in_specs=in_specs,
        out_specs=pl.BlockSpec((None, FC_DIMS[-1][-1], 1), lambda b: (b, 0, 0)),
        out_shape=jax.ShapeDtypeStruct((B, FC_DIMS[-1][-1], 1), jnp.float32),
        compiler_params=pltpu.CompilerParams(dimension_semantics=("parallel",)),
    )(x_work, theta_col, *packed["operands"])
    return out.reshape(B, FC_DIMS[-1][-1])


if __name__ == "__main__":
    key = jax.random.PRNGKey(0)
    key, kx, kt, kp = jax.random.split(key, 4)

    B = 2
    npix_init = nside2npix(NSIDE_LIST[0])                     # 768
    x = jax.random.normal(kx, (B, npix_init, IN_CH), jnp.float32)
    theta = jax.random.normal(kt, (B, N_PARAMS), jnp.float32)

    laps = [make_laplacian(nside2npix(ns)) for ns in NSIDE_LIST]
    params = init_params(kp)
    packed = pack_params(params, laps)

    out = spherical_graph_cnn_forward(x, theta, packed)
    out = jax.block_until_ready(out)
    assert out.shape == (B, FC_DIMS[-1][-1]) and out.dtype == jnp.float32
    assert bool(jnp.all(jnp.isfinite(out)))
    print("KERNEL_OK")
</pallas_src>

<mosaic_0001>
module attributes {stable_mosaic.version = 11 : i64} {
  func.func @_fused_forward_kernel(%arg0: i32, %arg1: memref<1x1x768xf32, #tpu.memory_space<vmem>>, %arg2: memref<1x2x1xf32, #tpu.memory_space<vmem>>, %arg3: memref<768x768xbf16, #tpu.memory_space<vmem>>, %arg4: memref<16x4xbf16, #tpu.memory_space<vmem>>, %arg5: memref<16x1xf32, #tpu.memory_space<vmem>>, %arg6: memref<16x1xf32, #tpu.memory_space<vmem>>, %arg7: memref<192x192xbf16, #tpu.memory_space<vmem>>, %arg8: memref<32x64xbf16, #tpu.memory_space<vmem>>, %arg9: memref<32x1xf32, #tpu.memory_space<vmem>>, %arg10: memref<32x1xf32, #tpu.memory_space<vmem>>, %arg11: memref<48x48xbf16, #tpu.memory_space<vmem>>, %arg12: memref<64x128xbf16, #tpu.memory_space<vmem>>, %arg13: memref<64x1xf32, #tpu.memory_space<vmem>>, %arg14: memref<64x1xf32, #tpu.memory_space<vmem>>, %arg15: memref<12x12xbf16, #tpu.memory_space<vmem>>, %arg16: memref<128x256xbf16, #tpu.memory_space<vmem>>, %arg17: memref<128x1xf32, #tpu.memory_space<vmem>>, %arg18: memref<128x1xf32, #tpu.memory_space<vmem>>, %arg19: memref<128x128xbf16, #tpu.memory_space<vmem>>, %arg20: memref<128x2xbf16, #tpu.memory_space<vmem>>, %arg21: memref<128x1xf32, #tpu.memory_space<vmem>>, %arg22: memref<128x128xbf16, #tpu.memory_space<vmem>>, %arg23: memref<128x1xf32, #tpu.memory_space<vmem>>, %arg24: memref<64x128xbf16, #tpu.memory_space<vmem>>, %arg25: memref<64x1xf32, #tpu.memory_space<vmem>>, %arg26: memref<1x64x1xf32, #tpu.memory_space<vmem>>) attributes {dimension_semantics = [#tpu.dimension_semantics<parallel>], iteration_bounds = array<i64: 2>, scalar_prefetch = 0 : i64, scratch_operands = 0 : i64, tpu.core_type = #tpu.core_type<tc>, window_params = [{transform_indices = @transform_0, window_bounds = array<i64: 1, 1, 768>}, {transform_indices = @transform_1, window_bounds = array<i64: 1, 2, 1>}, {pipeline_mode = #tpu.pipeline_mode<synchronous>, transform_indices = @transform_2, window_bounds = array<i64: 768, 768>}, {pipeline_mode = #tpu.pipeline_mode<synchronous>, transform_indices = @transform_3, window_bounds = array<i64: 16, 4>}, {pipeline_mode = #tpu.pipeline_mode<synchronous>, transform_indices = @transform_4, window_bounds = array<i64: 16, 1>}, {pipeline_mode = #tpu.pipeline_mode<synchronous>, transform_indices = @transform_5, window_bounds = array<i64: 16, 1>}, {pipeline_mode = #tpu.pipeline_mode<synchronous>, transform_indices = @transform_6, window_bounds = array<i64: 192, 192>}, {pipeline_mode = #tpu.pipeline_mode<synchronous>, transform_indices = @transform_7, window_bounds = array<i64: 32, 64>}, {pipeline_mode = #tpu.pipeline_mode<synchronous>, transform_indices = @transform_8, window_bounds = array<i64: 32, 1>}, {pipeline_mode = #tpu.pipeline_mode<synchronous>, transform_indices = @transform_9, window_bounds = array<i64: 32, 1>}, {pipeline_mode = #tpu.pipeline_mode<synchronous>, transform_indices = @transform_10, window_bounds = array<i64: 48, 48>}, {pipeline_mode = #tpu.pipeline_mode<synchronous>, transform_indices = @transform_11, window_bounds = array<i64: 64, 128>}, {pipeline_mode = #tpu.pipeline_mode<synchronous>, transform_indices = @transform_12, window_bounds = array<i64: 64, 1>}, {pipeline_mode = #tpu.pipeline_mode<synchronous>, transform_indices = @transform_13, window_bounds = array<i64: 64, 1>}, {pipeline_mode = #tpu.pipeline_mode<synchronous>, transform_indices = @transform_14, window_bounds = array<i64: 12, 12>}, {pipeline_mode = #tpu.pipeline_mode<synchronous>, transform_indices = @transform_15, window_bounds = array<i64: 128, 256>}, {pipeline_mode = #tpu.pipeline_mode<synchronous>, transform_indices = @transform_16, window_bounds = array<i64: 128, 1>}, {pipeline_mode = #tpu.pipeline_mode<synchronous>, transform_indices = @transform_17, window_bounds = array<i64: 128, 1>}, {pipeline_mode = #tpu.pipeline_mode<synchronous>, transform_indices = @transform_18, window_bounds = array<i64: 128, 128>}, {pipeline_mode = #tpu.pipeline_mode<synchronous>, transform_indices = @transform_19, window_bounds = array<i64: 128, 2>}, {pipeline_mode = #tpu.pipeline_mode<synchronous>, transform_indices = @transform_20, window_bounds = array<i64: 128, 1>}, {pipeline_mode = #tpu.pipeline_mode<synchronous>, transform_indices = @transform_21, window_bounds = array<i64: 128, 128>}, {pipeline_mode = #tpu.pipeline_mode<synchronous>, transform_indices = @transform_22, window_bounds = array<i64: 128, 1>}, {pipeline_mode = #tpu.pipeline_mode<synchronous>, transform_indices = @transform_23, window_bounds = array<i64: 64, 128>}, {pipeline_mode = #tpu.pipeline_mode<synchronous>, transform_indices = @transform_24, window_bounds = array<i64: 64, 1>}, {transform_indices = @transform_25, window_bounds = array<i64: 1, 64, 1>}]} {
    %c0 = arith.constant 0 : index
    %c0_0 = arith.constant 0 : index
    %c0_1 = arith.constant 0 : index
    %0 = vector.load %arg1[%c0, %c0_0, %c0_1] : memref<1x1x768xf32, #tpu.memory_space<vmem>>, vector<1x1x768xf32>
    %1 = vector.shape_cast %0 : vector<1x1x768xf32> to vector<1x768xf32>
    %c0_2 = arith.constant 0 : index
    %c0_3 = arith.constant 0 : index
    %2 = vector.load %arg3[%c0_2, %c0_3] : memref<768x768xbf16, #tpu.memory_space<vmem>>, vector<768x768xbf16>
    %c0_4 = arith.constant 0 : index
    %c0_5 = arith.constant 0 : index
    %3 = vector.load %arg4[%c0_4, %c0_5] : memref<16x4xbf16, #tpu.memory_space<vmem>>, vector<16x4xbf16>
    %c0_6 = arith.constant 0 : index
    %c0_7 = arith.constant 0 : index
    %4 = vector.load %arg5[%c0_6, %c0_7] : memref<16x1xf32, #tpu.memory_space<vmem>>, vector<16x1xf32>
    %c0_8 = arith.constant 0 : index
    %c0_9 = arith.constant 0 : index
    %5 = vector.load %arg6[%c0_8, %c0_9] : memref<16x1xf32, #tpu.memory_space<vmem>>, vector<16x1xf32>
    %6 = arith.truncf %1 : vector<1x768xf32> to vector<1x768xbf16>
    %cst = arith.constant dense<0.000000e+00> : vector<1x768xf32>
    %7 = tpu.matmul %6, %2, %cst {dimension_numbers = #tpu.dot_dimension_numbers<[1], [0], [0], [1], [0, 0, 1, 1], [], []>} : vector<1x768xbf16>, vector<768x768xbf16>, vector<1x768xf32> -> vector<1x768xf32>
    %8 = arith.truncf %7 : vector<1x768xf32> to vector<1x768xbf16>
    %cst_10 = arith.constant dense<0.000000e+00> : vector<1x768xf32>
    %9 = tpu.matmul %8, %2, %cst_10 {dimension_numbers = #tpu.dot_dimension_numbers<[1], [0], [0], [1], [0, 0, 1, 1], [], []>} : vector<1x768xbf16>, vector<768x768xbf16>, vector<1x768xf32> -> vector<1x768xf32>
    %cst_11 = arith.constant 2.000000e+00 : f32
    %10 = vector.broadcast %cst_11 : f32 to vector<1x768xf32>
    %11 = arith.mulf %10, %9 : vector<1x768xf32>
    %12 = arith.subf %11, %1 : vector<1x768xf32>
    %13 = arith.truncf %12 : vector<1x768xf32> to vector<1x768xbf16>
    %cst_12 = arith.constant dense<0.000000e+00> : vector<1x768xf32>
    %14 = tpu.matmul %13, %2, %cst_12 {dimension_numbers = #tpu.dot_dimension_numbers<[1], [0], [0], [1], [0, 0, 1, 1], [], []>} : vector<1x768xbf16>, vector<768x768xbf16>, vector<1x768xf32> -> vector<1x768xf32>
    %cst_13 = arith.constant 2.000000e+00 : f32
    %15 = vector.broadcast %cst_13 : f32 to vector<1x768xf32>
    %16 = arith.mulf %15, %14 : vector<1x768xf32>
    %17 = arith.subf %16, %7 : vector<1x768xf32>
    %18 = tpu.concatenate %1, %7, %12, %17 in 0 : vector<1x768xf32>, vector<1x768xf32>, vector<1x768xf32>, vector<1x768xf32> -> vector<4x768xf32>
    %19 = arith.truncf %18 : vector<4x768xf32> to vector<4x768xbf16>
    %cst_14 = arith.constant dense<0.000000e+00> : vector<16x768xf32>
    %20 = tpu.matmul %3, %19, %cst_14 {dimension_numbers = #tpu.dot_dimension_numbers<[1], [0], [0], [1], [0, 0, 1, 1], [], []>} : vector<16x4xbf16>, vector<4x768xbf16>, vector<16x768xf32> -> vector<16x768xf32>
    %21 = vector.broadcast %4 : vector<16x1xf32> to vector<16x768xf32>
    %22 = arith.mulf %20, %21 : vector<16x768xf32>
    %23 = vector.broadcast %5 : vector<16x1xf32> to vector<16x768xf32>
    %24 = arith.addf %22, %23 : vector<16x768xf32>
    %cst_15 = arith.constant 0.000000e+00 : f32
    %25 = vector.broadcast %cst_15 : f32 to vector<16x768xf32>
    %26 = arith.maximumf %24, %25 : vector<16x768xf32>
    %27 = vector.extract_strided_slice %26 {offsets = [0, 0], sizes = [16, 192], strides = [1, 1]} : vector<16x768xf32> to vector<16x192xf32>
    %28 = vector.extract_strided_slice %26 {offsets = [0, 192], sizes = [16, 192], strides = [1, 1]} : vector<16x768xf32> to vector<16x192xf32>
    %29 = arith.maximumf %27, %28 : vector<16x192xf32>
    %30 = vector.extract_strided_slice %26 {offsets = [0, 384], sizes = [16, 192], strides = [1, 1]} : vector<16x768xf32> to vector<16x192xf32>
    %31 = arith.maximumf %29, %30 : vector<16x192xf32>
    %32 = vector.extract_strided_slice %26 {offsets = [0, 576], sizes = [16, 192], strides = [1, 1]} : vector<16x768xf32> to vector<16x192xf32>
    %33 = arith.maximumf %31, %32 : vector<16x192xf32>
    %c0_16 = arith.constant 0 : index
    %c0_17 = arith.constant 0 : index
    %34 = vector.load %arg7[%c0_16, %c0_17] : memref<192x192xbf16, #tpu.memory_space<vmem>>, vector<192x192xbf16>
    %c0_18 = arith.constant 0 : index
    %c0_19 = arith.constant 0 : index
    %35 = vector.load %arg8[%c0_18, %c0_19] : memref<32x64xbf16, #tpu.memory_space<vmem>>, vector<32x64xbf16>
    %c0_20 = arith.constant 0 : index
    %c0_21 = arith.constant 0 : index
    %36 = vector.load %arg9[%c0_20, %c0_21] : memref<32x1xf32, #tpu.memory_space<vmem>>, vector<32x1xf32>
    %c0_22 = arith.constant 0 : index
    %c0_23 = arith.constant 0 : index
    %37 = vector.load %arg10[%c0_22, %c0_23] : memref<32x1xf32, #tpu.memory_space<vmem>>, vector<32x1xf32>
    %38 = arith.truncf %33 : vector<16x192xf32> to vector<16x192xbf16>
    %cst_24 = arith.constant dense<0.000000e+00> : vector<16x192xf32>
    %39 = tpu.matmul %38, %34, %cst_24 {dimension_numbers = #tpu.dot_dimension_numbers<[1], [0], [0], [1], [0, 0, 1, 1], [], []>} : vector<16x192xbf16>, vector<192x192xbf16>, vector<16x192xf32> -> vector<16x192xf32>
    %40 = arith.truncf %39 : vector<16x192xf32> to vector<16x192xbf16>
    %cst_25 = arith.constant dense<0.000000e+00> : vector<16x192xf32>
    %41 = tpu.matmul %40, %34, %cst_25 {dimension_numbers = #tpu.dot_dimension_numbers<[1], [0], [0], [1], [0, 0, 1, 1], [], []>} : vector<16x192xbf16>, vector<192x192xbf16>, vector<16x192xf32> -> vector<16x192xf32>
    %cst_26 = arith.constant 2.000000e+00 : f32
    %42 = vector.broadcast %cst_26 : f32 to vector<16x192xf32>
    %43 = arith.mulf %42, %41 : vector<16x192xf32>
    %44 = arith.subf %43, %33 : vector<16x192xf32>
    %45 = arith.truncf %44 : vector<16x192xf32> to vector<16x192xbf16>
    %cst_27 = arith.constant dense<0.000000e+00> : vector<16x192xf32>
    %46 = tpu.matmul %45, %34, %cst_27 {dimension_numbers = #tpu.dot_dimension_numbers<[1], [0], [0], [1], [0, 0, 1, 1], [], []>} : vector<16x192xbf16>, vector<192x192xbf16>, vector<16x192xf32> -> vector<16x192xf32>
    %cst_28 = arith.constant 2.000000e+00 : f32
    %47 = vector.broadcast %cst_28 : f32 to vector<16x192xf32>
    %48 = arith.mulf %47, %46 : vector<16x192xf32>
    %49 = arith.subf %48, %39 : vector<16x192xf32>
    %50 = tpu.concatenate %33, %39, %44, %49 in 0 : vector<16x192xf32>, vector<16x192xf32>, vector<16x192xf32>, vector<16x192xf32> -> vector<64x192xf32>
    %51 = arith.truncf %50 : vector<64x192xf32> to vector<64x192xbf16>
    %cst_29 = arith.constant dense<0.000000e+00> : vector<32x192xf32>
    %52 = tpu.matmul %35, %51, %cst_29 {dimension_numbers = #tpu.dot_dimension_numbers<[1], [0], [0], [1], [0, 0, 1, 1], [], []>} : vector<32x64xbf16>, vector<64x192xbf16>, vector<32x192xf32> -> vector<32x192xf32>
    %53 = vector.broadcast %36 : vector<32x1xf32> to vector<32x192xf32>
    %54 = arith.mulf %52, %53 : vector<32x192xf32>
    %55 = vector.broadcast %37 : vector<32x1xf32> to vector<32x192xf32>
    %56 = arith.addf %54, %55 : vector<32x192xf32>
    %cst_30 = arith.constant 0.000000e+00 : f32
    %57 = vector.broadcast %cst_30 : f32 to vector<32x192xf32>
    %58 = arith.maximumf %56, %57 : vector<32x192xf32>
    %59 = vector.extract_strided_slice %58 {offsets = [0, 0], sizes = [32, 48], strides = [1, 1]} : vector<32x192xf32> to vector<32x48xf32>
    %60 = vector.extract_strided_slice %58 {offsets = [0, 48], sizes = [32, 48], strides = [1, 1]} : vector<32x192xf32> to vector<32x48xf32>
    %61 = arith.maximumf %59, %60 : vector<32x48xf32>
    %62 = vector.extract_strided_slice %58 {offsets = [0, 96], sizes = [32, 48], strides = [1, 1]} : vector<32x192xf32> to vector<32x48xf32>
    %63 = arith.maximumf %61, %62 : vector<32x48xf32>
    %64 = vector.extract_strided_slice %58 {offsets = [0, 144], sizes = [32, 48], strides = [1, 1]} : vector<32x192xf32> to vector<32x48xf32>
    %65 = arith.maximumf %63, %64 : vector<32x48xf32>
    %c0_31 = arith.constant 0 : index
    %c0_32 = arith.constant 0 : index
    %66 = vector.load %arg11[%c0_31, %c0_32] : memref<48x48xbf16, #tpu.memory_space<vmem>>, vector<48x48xbf16>
    %c0_33 = arith.constant 0 : index
    %c0_34 = arith.constant 0 : index
    %67 = vector.load %arg12[%c0_33, %c0_34] : memref<64x128xbf16, #tpu.memory_space<vmem>>, vector<64x128xbf16>
    %c0_35 = arith.constant 0 : index
    %c0_36 = arith.constant 0 : index
    %68 = vector.load %arg13[%c0_35, %c0_36] : memref<64x1xf32, #tpu.memory_space<vmem>>, vector<64x1xf32>
    %c0_37 = arith.constant 0 : index
    %c0_38 = arith.constant 0 : index
    %69 = vector.load %arg14[%c0_37, %c0_38] : memref<64x1xf32, #tpu.memory_space<vmem>>, vector<64x1xf32>
    %70 = arith.truncf %65 : vector<32x48xf32> to vector<32x48xbf16>
    %cst_39 = arith.constant dense<0.000000e+00> : vector<32x48xf32>
    %71 = tpu.matmul %70, %66, %cst_39 {dimension_numbers = #tpu.dot_dimension_numbers<[1], [0], [0], [1], [0, 0, 1, 1], [], []>} : vector<32x48xbf16>, vector<48x48xbf16>, vector<32x48xf32> -> vector<32x48xf32>
    %72 = arith.truncf %71 : vector<32x48xf32> to vector<32x48xbf16>
    %cst_40 = arith.constant dense<0.000000e+00> : vector<32x48xf32>
    %73 = tpu.matmul %72, %66, %cst_40 {dimension_numbers = #tpu.dot_dimension_numbers<[1], [0], [0], [1], [0, 0, 1, 1], [], []>} : vector<32x48xbf16>, vector<48x48xbf16>, vector<32x48xf32> -> vector<32x48xf32>
    %cst_41 = arith.constant 2.000000e+00 : f32
    %74 = vector.broadcast %cst_41 : f32 to vector<32x48xf32>
    %75 = arith.mulf %74, %73 : vector<32x48xf32>
    %76 = arith.subf %75, %65 : vector<32x48xf32>
    %77 = arith.truncf %76 : vector<32x48xf32> to vector<32x48xbf16>
    %cst_42 = arith.constant dense<0.000000e+00> : vector<32x48xf32>
    %78 = tpu.matmul %77, %66, %cst_42 {dimension_numbers = #tpu.dot_dimension_numbers<[1], [0], [0], [1], [0, 0, 1, 1], [], []>} : vector<32x48xbf16>, vector<48x48xbf16>, vector<32x48xf32> -> vector<32x48xf32>
    %cst_43 = arith.constant 2.000000e+00 : f32
    %79 = vector.broadcast %cst_43 : f32 to vector<32x48xf32>
    %80 = arith.mulf %79, %78 : vector<32x48xf32>
    %81 = arith.subf %80, %71 : vector<32x48xf32>
    %82 = tpu.concatenate %65, %71, %76, %81 in 0 : vector<32x48xf32>, vector<32x48xf32>, vector<32x48xf32>, vector<32x48xf32> -> vector<128x48xf32>
    %83 = arith.truncf %82 : vector<128x48xf32> to vector<128x48xbf16>
    %cst_44 = arith.constant dense<0.000000e+00> : vector<64x48xf32>
    %84 = tpu.matmul %67, %83, %cst_44 {dimension_numbers = #tpu.dot_dimension_numbers<[1], [0], [0], [1], [0, 0, 1, 1], [], []>} : vector<64x128xbf16>, vector<128x48xbf16>, vector<64x48xf32> -> vector<64x48xf32>
    %85 = vector.broadcast %68 : vector<64x1xf32> to vector<64x48xf32>
    %86 = arith.mulf %84, %85 : vector<64x48xf32>
    %87 = vector.broadcast %69 : vector<64x1xf32> to vector<64x48xf32>
    %88 = arith.addf %86, %87 : vector<64x48xf32>
    %cst_45 = arith.constant 0.000000e+00 : f32
    %89 = vector.broadcast %cst_45 : f32 to vector<64x48xf32>
    %90 = arith.maximumf %88, %89 : vector<64x48xf32>
    %91 = vector.extract_strided_slice %90 {offsets = [0, 0], sizes = [64, 12], strides = [1, 1]} : vector<64x48xf32> to vector<64x12xf32>
    %92 = vector.extract_strided_slice %90 {offsets = [0, 12], sizes = [64, 12], strides = [1, 1]} : vector<64x48xf32> to vector<64x12xf32>
    %93 = arith.maximumf %91, %92 : vector<64x12xf32>
    %94 = vector.extract_strided_slice %90 {offsets = [0, 24], sizes = [64, 12], strides = [1, 1]} : vector<64x48xf32> to vector<64x12xf32>
    %95 = arith.maximumf %93, %94 : vector<64x12xf32>
    %96 = vector.extract_strided_slice %90 {offsets = [0, 36], sizes = [64, 12], strides = [1, 1]} : vector<64x48xf32> to vector<64x12xf32>
    %97 = arith.maximumf %95, %96 : vector<64x12xf32>
    %c0_46 = arith.constant 0 : index
    %c0_47 = arith.constant 0 : index
    %98 = vector.load %arg15[%c0_46, %c0_47] : memref<12x12xbf16, #tpu.memory_space<vmem>>, vector<12x12xbf16>
    %c0_48 = arith.constant 0 : index
    %c0_49 = arith.constant 0 : index
    %99 = vector.load %arg16[%c0_48, %c0_49] : memref<128x256xbf16, #tpu.memory_space<vmem>>, vector<128x256xbf16>
    %c0_50 = arith.constant 0 : index
    %c0_51 = arith.constant 0 : index
    %100 = vector.load %arg17[%c0_50, %c0_51] : memref<128x1xf32, #tpu.memory_space<vmem>>, vector<128x1xf32>
    %c0_52 = arith.constant 0 : index
    %c0_53 = arith.constant 0 : index
    %101 = vector.load %arg18[%c0_52, %c0_53] : memref<128x1xf32, #tpu.memory_space<vmem>>, vector<128x1xf32>
    %102 = arith.truncf %97 : vector<64x12xf32> to vector<64x12xbf16>
    %cst_54 = arith.constant dense<0.000000e+00> : vector<64x12xf32>
    %103 = tpu.matmul %102, %98, %cst_54 {dimension_numbers = #tpu.dot_dimension_numbers<[1], [0], [0], [1], [0, 0, 1, 1], [], []>} : vector<64x12xbf16>, vector<12x12xbf16>, vector<64x12xf32> -> vector<64x12xf32>
    %104 = arith.truncf %103 : vector<64x12xf32> to vector<64x12xbf16>
    %cst_55 = arith.constant dense<0.000000e+00> : vector<64x12xf32>
    %105 = tpu.matmul %104, %98, %cst_55 {dimension_numbers = #tpu.dot_dimension_numbers<[1], [0], [0], [1], [0, 0, 1, 1], [], []>} : vector<64x12xbf16>, vector<12x12xbf16>, vector<64x12xf32> -> vector<64x12xf32>
    %cst_56 = arith.constant 2.000000e+00 : f32
    %106 = vector.broadcast %cst_56 : f32 to vector<64x12xf32>
    %107 = arith.mulf %106, %105 : vector<64x12xf32>
    %108 = arith.subf %107, %97 : vector<64x12xf32>
    %109 = arith.truncf %108 : vector<64x12xf32> to vector<64x12xbf16>
    %cst_57 = arith.constant dense<0.000000e+00> : vector<64x12xf32>
    %110 = tpu.matmul %109, %98, %cst_57 {dimension_numbers = #tpu.dot_dimension_numbers<[1], [0], [0], [1], [0, 0, 1, 1], [], []>} : vector<64x12xbf16>, vector<12x12xbf16>, vector<64x12xf32> -> vector<64x12xf32>
    %cst_58 = arith.constant 2.000000e+00 : f32
    %111 = vector.broadcast %cst_58 : f32 to vector<64x12xf32>
    %112 = arith.mulf %111, %110 : vector<64x12xf32>
    %113 = arith.subf %112, %103 : vector<64x12xf32>
    %114 = tpu.concatenate %97, %103, %108, %113 in 0 : vector<64x12xf32>, vector<64x12xf32>, vector<64x12xf32>, vector<64x12xf32> -> vector<256x12xf32>
    %115 = arith.truncf %114 : vector<256x12xf32> to vector<256x12xbf16>
    %cst_59 = arith.constant dense<0.000000e+00> : vector<128x12xf32>
    %116 = tpu.matmul %99, %115, %cst_59 {dimension_numbers = #tpu.dot_dimension_numbers<[1], [0], [0], [1], [0, 0, 1, 1], [], []>} : vector<128x256xbf16>, vector<256x12xbf16>, vector<128x12xf32> -> vector<128x12xf32>
    %117 = vector.broadcast %100 : vector<128x1xf32> to vector<128x12xf32>
    %118 = arith.mulf %116, %117 : vector<128x12xf32>
    %119 = vector.broadcast %101 : vector<128x1xf32> to vector<128x12xf32>
    %120 = arith.addf %118, %119 : vector<128x12xf32>
    %cst_60 = arith.constant 0.000000e+00 : f32
    %121 = vector.broadcast %cst_60 : f32 to vector<128x12xf32>
    %122 = arith.maximumf %120, %121 : vector<128x12xf32>
    %123 = vector.extract_strided_slice %122 {offsets = [0, 0], sizes = [128, 3], strides = [1, 1]} : vector<128x12xf32> to vector<128x3xf32>
    %124 = vector.extract_strided_slice %122 {offsets = [0, 3], sizes = [128, 3], strides = [1, 1]} : vector<128x12xf32> to vector<128x3xf32>
    %125 = arith.maximumf %123, %124 : vector<128x3xf32>
    %126 = vector.extract_strided_slice %122 {offsets = [0, 6], sizes = [128, 3], strides = [1, 1]} : vector<128x12xf32> to vector<128x3xf32>
    %127 = arith.maximumf %125, %126 : vector<128x3xf32>
    %128 = vector.extract_strided_slice %122 {offsets = [0, 9], sizes = [128, 3], strides = [1, 1]} : vector<128x12xf32> to vector<128x3xf32>
    %129 = arith.maximumf %127, %128 : vector<128x3xf32>
    %cst_61 = arith.constant dense<0.000000e+00> : vector<128xf32>
    %130 = vector.multi_reduction <add>, %129, %cst_61 [1] : vector<128x3xf32> to vector<128xf32>
    %131 = vector.shape_cast %130 : vector<128xf32> to vector<128x1xf32>
    %cst_62 = arith.constant 3.000000e+00 : f32
    %132 = vector.broadcast %cst_62 : f32 to vector<128x1xf32>
    %133 = arith.divf %131, %132 : vector<128x1xf32>
    %c0_63 = arith.constant 0 : index
    %c0_64 = arith.constant 0 : index
    %134 = vector.load %arg19[%c0_63, %c0_64] : memref<128x128xbf16, #tpu.memory_space<vmem>>, vector<128x128xbf16>
    %135 = arith.truncf %133 : vector<128x1xf32> to vector<128x1xbf16>
    %cst_65 = arith.constant dense<0.000000e+00> : vector<128x1xf32>
    %136 = tpu.matmul %134, %135, %cst_65 {dimension_numbers = #tpu.dot_dimension_numbers<[1], [0], [0], [1], [0, 0, 1, 1], [], []>} : vector<128x128xbf16>, vector<128x1xbf16>, vector<128x1xf32> -> vector<128x1xf32>
    %c0_66 = arith.constant 0 : index
    %c0_67 = arith.constant 0 : index
    %137 = vector.load %arg20[%c0_66, %c0_67] : memref<128x2xbf16, #tpu.memory_space<vmem>>, vector<128x2xbf16>
    %c0_68 = arith.constant 0 : index
    %c0_69 = arith.constant 0 : index
    %c0_70 = arith.constant 0 : index
    %138 = vector.load %arg2[%c0_68, %c0_69, %c0_70] : memref<1x2x1xf32, #tpu.memory_space<vmem>>, vector<1x2x1xf32>
    %139 = vector.shape_cast %138 : vector<1x2x1xf32> to vector<2x1xf32>
    %140 = arith.truncf %139 : vector<2x1xf32> to vector<2x1xbf16>
    %cst_71 = arith.constant dense<0.000000e+00> : vector<128x1xf32>
    %141 = tpu.matmul %137, %140, %cst_71 {dimension_numbers = #tpu.dot_dimension_numbers<[1], [0], [0], [1], [0, 0, 1, 1], [], []>} : vector<128x2xbf16>, vector<2x1xbf16>, vector<128x1xf32> -> vector<128x1xf32>
    %142 = arith.addf %136, %141 : vector<128x1xf32>
    %c0_72 = arith.constant 0 : index
    %c0_73 = arith.constant 0 : index
    %143 = vector.load %arg21[%c0_72, %c0_73] : memref<128x1xf32, #tpu.memory_space<vmem>>, vector<128x1xf32>
    %144 = arith.addf %142, %143 : vector<128x1xf32>
    %cst_74 = arith.constant 0.000000e+00 : f32
    %145 = vector.broadcast %cst_74 : f32 to vector<128x1xf32>
    %146 = arith.maximumf %144, %145 : vector<128x1xf32>
    %c0_75 = arith.constant 0 : index
    %c0_76 = arith.constant 0 : index
    %147 = vector.load %arg22[%c0_75, %c0_76] : memref<128x128xbf16, #tpu.memory_space<vmem>>, vector<128x128xbf16>
    %148 = arith.truncf %146 : vector<128x1xf32> to vector<128x1xbf16>
    %cst_77 = arith.constant dense<0.000000e+00> : vector<128x1xf32>
    %149 = tpu.matmul %147, %148, %cst_77 {dimension_numbers = #tpu.dot_dimension_numbers<[1], [0], [0], [1], [0, 0, 1, 1], [], []>} : vector<128x128xbf16>, vector<128x1xbf16>, vector<128x1xf32> -> vector<128x1xf32>
    %c0_78 = arith.constant 0 : index
    %c0_79 = arith.constant 0 : index
    %150 = vector.load %arg23[%c0_78, %c0_79] : memref<128x1xf32, #tpu.memory_space<vmem>>, vector<128x1xf32>
    %151 = arith.addf %149, %150 : vector<128x1xf32>
    %cst_80 = arith.constant 0.000000e+00 : f32
    %152 = vector.broadcast %cst_80 : f32 to vector<128x1xf32>
    %153 = arith.maximumf %151, %152 : vector<128x1xf32>
    %c0_81 = arith.constant 0 : index
    %c0_82 = arith.constant 0 : index
    %154 = vector.load %arg24[%c0_81, %c0_82] : memref<64x128xbf16, #tpu.memory_space<vmem>>, vector<64x128xbf16>
    %155 = arith.truncf %153 : vector<128x1xf32> to vector<128x1xbf16>
    %cst_83 = arith.constant dense<0.000000e+00> : vector<64x1xf32>
    %156 = tpu.matmul %154, %155, %cst_83 {dimension_numbers = #tpu.dot_dimension_numbers<[1], [0], [0], [1], [0, 0, 1, 1], [], []>} : vector<64x128xbf16>, vector<128x1xbf16>, vector<64x1xf32> -> vector<64x1xf32>
    %c0_84 = arith.constant 0 : index
    %c0_85 = arith.constant 0 : index
    %157 = vector.load %arg25[%c0_84, %c0_85] : memref<64x1xf32, #tpu.memory_space<vmem>>, vector<64x1xf32>
    %158 = arith.addf %156, %157 : vector<64x1xf32>
    %c0_86 = arith.constant 0 : index
    %c0_87 = arith.constant 0 : index
    %c0_88 = arith.constant 0 : index
    %159 = vector.load %arg26[%c0_86, %c0_87, %c0_88] : memref<1x64x1xf32, #tpu.memory_space<vmem>>, vector<1x64x1xf32>
    %160 = vector.shape_cast %159 : vector<1x64x1xf32> to vector<64x1xf32>
    %161 = vector.shape_cast %158 : vector<64x1xf32> to vector<1x64x1xf32>
    tpu.vector_store %arg26[%c0_86, %c0_87, %c0_88], %161 {strides = array<i32>} : memref<1x64x1xf32, #tpu.memory_space<vmem>>, vector<1x64x1xf32>,
    return
  }
  func.func @transform_0(%arg0: i32) -> (i32, i32, i32) {
    %c0_i32 = arith.constant 0 : i32
    %c0_i32_0 = arith.constant 0 : i32
    %c0_i32_1 = arith.constant 0 : i32
    return %arg0, %c0_i32, %c0_i32_0 : i32, i32, i32
  }
  func.func @transform_1(%arg0: i32) -> (i32, i32, i32) {
    %c0_i32 = arith.constant 0 : i32
    %c0_i32_0 = arith.constant 0 : i32
    %c0_i32_1 = arith.constant 0 : i32
    return %arg0, %c0_i32, %c0_i32_0 : i32, i32, i32
  }
  func.func @transform_2(%arg0: i32) -> (i32, i32) {
    %c0_i32 = arith.constant 0 : i32
    %c0_i32_0 = arith.constant 0 : i32
    %c0_i32_1 = arith.constant 0 : i32
    return %c0_i32, %c0_i32_0 : i32, i32
  }
  func.func @transform_3(%arg0: i32) -> (i32, i32) {
    %c0_i32 = arith.constant 0 : i32
    %c0_i32_0 = arith.constant 0 : i32
    %c0_i32_1 = arith.constant 0 : i32
    return %c0_i32, %c0_i32_0 : i32, i32
  }
  func.func @transform_4(%arg0: i32) -> (i32, i32) {
    %c0_i32 = arith.constant 0 : i32
    %c0_i32_0 = arith.constant 0 : i32
    %c0_i32_1 = arith.constant 0 : i32
    return %c0_i32, %c0_i32_0 : i32, i32
  }
  func.func @transform_5(%arg0: i32) -> (i32, i32) {
    %c0_i32 = arith.constant 0 : i32
    %c0_i32_0 = arith.constant 0 : i32
    %c0_i32_1 = arith.constant 0 : i32
    return %c0_i32, %c0_i32_0 : i32, i32
  }
  func.func @transform_6(%arg0: i32) -> (i32, i32) {
    %c0_i32 = arith.constant 0 : i32
    %c0_i32_0 = arith.constant 0 : i32
    %c0_i32_1 = arith.constant 0 : i32
    return %c0_i32, %c0_i32_0 : i32, i32
  }
  func.func @transform_7(%arg0: i32) -> (i32, i32) {
    %c0_i32 = arith.constant 0 : i32
    %c0_i32_0 = arith.constant 0 : i32
    %c0_i32_1 = arith.constant 0 : i32
    return %c0_i32, %c0_i32_0 : i32, i32
  }
  func.func @transform_8(%arg0: i32) -> (i32, i32) {
    %c0_i32 = arith.constant 0 : i32
    %c0_i32_0 = arith.constant 0 : i32
    %c0_i32_1 = arith.constant 0 : i32
    return %c0_i32, %c0_i32_0 : i32, i32
  }
  func.func @transform_9(%arg0: i32) -> (i32, i32) {
    %c0_i32 = arith.constant 0 : i32
    %c0_i32_0 = arith.constant 0 : i32
    %c0_i32_1 = arith.constant 0 : i32
    return %c0_i32, %c0_i32_0 : i32, i32
  }
  func.func @transform_10(%arg0: i32) -> (i32, i32) {
    %c0_i32 = arith.constant 0 : i32
    %c0_i32_0 = arith.constant 0 : i32
    %c0_i32_1 = arith.constant 0 : i32
    return %c0_i32, %c0_i32_0 : i32, i32
  }
  func.func @transform_11(%arg0: i32) -> (i32, i32) {
    %c0_i32 = arith.constant 0 : i32
    %c0_i32_0 = arith.constant 0 : i32
    %c0_i32_1 = arith.constant 0 : i32
    return %c0_i32, %c0_i32_0 : i32, i32
  }
  func.func @transform_12(%arg0: i32) -> (i32, i32) {
    %c0_i32 = arith.constant 0 : i32
    %c0_i32_0 = arith.constant 0 : i32
    %c0_i32_1 = arith.constant 0 : i32
    return %c0_i32, %c0_i32_0 : i32, i32
  }
  func.func @transform_13(%arg0: i32) -> (i32, i32) {
    %c0_i32 = arith.constant 0 : i32
    %c0_i32_0 = arith.constant 0 : i32
    %c0_i32_1 = arith.constant 0 : i32
    return %c0_i32, %c0_i32_0 : i32, i32
  }
  func.func @transform_14(%arg0: i32) -> (i32, i32) {
    %c0_i32 = arith.constant 0 : i32
    %c0_i32_0 = arith.constant 0 : i32
    %c0_i32_1 = arith.constant 0 : i32
    return %c0_i32, %c0_i32_0 : i32, i32
  }
  func.func @transform_15(%arg0: i32) -> (i32, i32) {
    %c0_i32 = arith.constant 0 : i32
    %c0_i32_0 = arith.constant 0 : i32
    %c0_i32_1 = arith.constant 0 : i32
    return %c0_i32, %c0_i32_0 : i32, i32
  }
  func.func @transform_16(%arg0: i32) -> (i32, i32) {
    %c0_i32 = arith.constant 0 : i32
    %c0_i32_0 = arith.constant 0 : i32
    %c0_i32_1 = arith.constant 0 : i32
    return %c0_i32, %c0_i32_0 : i32, i32
  }
  func.func @transform_17(%arg0: i32) -> (i32, i32) {
    %c0_i32 = arith.constant 0 : i32
    %c0_i32_0 = arith.constant 0 : i32
    %c0_i32_1 = arith.constant 0 : i32
    return %c0_i32, %c0_i32_0 : i32, i32
  }
  func.func @transform_18(%arg0: i32) -> (i32, i32) {
    %c0_i32 = arith.constant 0 : i32
    %c0_i32_0 = arith.constant 0 : i32
    %c0_i32_1 = arith.constant 0 : i32
    return %c0_i32, %c0_i32_0 : i32, i32
  }
  func.func @transform_19(%arg0: i32) -> (i32, i32) {
    %c0_i32 = arith.constant 0 : i32
    %c0_i32_0 = arith.constant 0 : i32
    %c0_i32_1 = arith.constant 0 : i32
    return %c0_i32, %c0_i32_0 : i32, i32
  }
  func.func @transform_20(%arg0: i32) -> (i32, i32) {
    %c0_i32 = arith.constant 0 : i32
    %c0_i32_0 = arith.constant 0 : i32
    %c0_i32_1 = arith.constant 0 : i32
    return %c0_i32, %c0_i32_0 : i32, i32
  }
  func.func @transform_21(%arg0: i32) -> (i32, i32) {
    %c0_i32 = arith.constant 0 : i32
    %c0_i32_0 = arith.constant 0 : i32
    %c0_i32_1 = arith.constant 0 : i32
    return %c0_i32, %c0_i32_0 : i32, i32
  }
  func.func @transform_22(%arg0: i32) -> (i32, i32) {
    %c0_i32 = arith.constant 0 : i32
    %c0_i32_0 = arith.constant 0 : i32
    %c0_i32_1 = arith.constant 0 : i32
    return %c0_i32, %c0_i32_0 : i32, i32
  }
  func.func @transform_23(%arg0: i32) -> (i32, i32) {
    %c0_i32 = arith.constant 0 : i32
    %c0_i32_0 = arith.constant 0 : i32
    %c0_i32_1 = arith.constant 0 : i32
    return %c0_i32, %c0_i32_0 : i32, i32
  }
  func.func @transform_24(%arg0: i32) -> (i32, i32) {
    %c0_i32 = arith.constant 0 : i32
    %c0_i32_0 = arith.constant 0 : i32
    %c0_i32_1 = arith.constant 0 : i32
    return %c0_i32, %c0_i32_0 : i32, i32
  }
  func.func @transform_25(%arg0: i32) -> (i32, i32, i32) {
    %c0_i32 = arith.constant 0 : i32
    %c0_i32_0 = arith.constant 0 : i32
    %c0_i32_1 = arith.constant 0 : i32
    return %arg0, %c0_i32, %c0_i32_0 : i32, i32, i32
  }
}

</mosaic_0001>

<bundles_post_ra>
// kernel: tpu_custom_call.1
= control target key start
LH: loop header
LB: loop body
LE: loop exit
PB: predicated region body
PF: predicated region fallthrough
CT: control target
= control target key end

     0   :  { %s12270_s0 = inlined_call_operand.hbm [shape: f32[2,1,768], index: 0, kind: input, shape index: {}]   ;;  %s12271_s1 = inlined_call_operand.vmem [shape: f32[2,2,1], index: 1, kind: input, shape index: {}]   ;;  %s12272_s2 = inlined_call_operand.hbm [shape: bf16[768,768], index: 2, kind: input, shape index: {}]   ;;  %s12273_s3 = inlined_call_operand.vmem [shape: bf16[16,4], index: 3, kind: input, shape index: {}]   ;;  %s12274_s4 = inlined_call_operand.vmem [shape: f32[16,1], index: 4, kind: input, shape index: {}]   ;;  %s12275_s5 = inlined_call_operand.vmem [shape: f32[16,1], index: 5, kind: input, shape index: {}]   ;;  %s12276_s6 = inlined_call_operand.hbm [shape: bf16[192,192], index: 6, kind: input, shape index: {}]   ;;  %s12277_s7 = inlined_call_operand.hbm [shape: bf16[32,64], index: 7, kind: input, shape index: {}]   ;;  %s12278_s8 = inlined_call_operand.vmem [shape: f32[32,1], index: 8, kind: input, shape index: {}]   ;;  %s12279_s9 = inlined_call_operand.vmem [shape: f32[32,1], index: 9, kind: input, shape index: {}]   ;;  %s12280_s10 = inlined_call_operand.hbm [shape: bf16[48,48], index: 10, kind: input, shape index: {}]   ;;  %s12281_s11 = inlined_call_operand.hbm [shape: bf16[64,128], index: 11, kind: input, shape index: {}]   ;;  %s12282_s12 = inlined_call_operand.vmem [shape: f32[64,1], index: 12, kind: input, shape index: {}]   ;;  %s12283_s13 = inlined_call_operand.vmem [shape: f32[64,1], index: 13, kind: input, shape index: {}]   ;;  %s12284_s14 = inlined_call_operand.hbm [shape: bf16[12,12], index: 14, kind: input, shape index: {}]   ;;  %s12285_s15 = inlined_call_operand.hbm [shape: bf16[128,256], index: 15, kind: input, shape index: {}]   ;;  %s12286_s16 = inlined_call_operand.vmem [shape: f32[128,1], index: 16, kind: input, shape index: {}]   ;;  %s12287_s17 = inlined_call_operand.vmem [shape: f32[128,1], index: 17, kind: input, shape index: {}]   ;;  %s12288_s18 = inlined_call_operand.hbm [shape: bf16[128,128], index: 18, kind: input, shape index: {}]   ;;  %s12289_s19 = inlined_call_operand.vmem [shape: bf16[128,2], index: 19, kind: input, shape index: {}]   ;;  %s12290_s20 = inlined_call_operand.vmem [shape: f32[128,1], index: 20, kind: input, shape index: {}]   ;;  %s12291_s21 = inlined_call_operand.hbm [shape: bf16[128,128], index: 21, kind: input, shape index: {}]   ;;  %s12292_s22 = inlined_call_operand.vmem [shape: f32[128,1], index: 22, kind: input, shape index: {}]   ;;  %s12293_s23 = inlined_call_operand.hbm [shape: bf16[64,128], index: 23, kind: input, shape index: {}]   ;;  %s12294_s24 = inlined_call_operand.vmem [shape: f32[64,1], index: 24, kind: input, shape index: {}]   ;;  %s12295_s25 = inlined_call_operand.vmem [shape: f32[2,64,1], index: 25, kind: output, shape index: {}]  }
   0x1   :  { %12571 = sst [smem:[#allocation266_spill]] %s12270_s0 }
   0x2   :  { %12572 = sst [smem:[#allocation267_spill]] %s12271_s1 }
   0x3   :  { %12573 = sst [smem:[#allocation268_spill]] %s12272_s2 }
   0x4   :  { %12574 = sst [smem:[#allocation269_spill]] %s12273_s3 }
   0x5   :  { %12575 = sst [smem:[#allocation270_spill]] %s12274_s4 }
   0x6   :  { %12576 = sst [smem:[#allocation271_spill]] %s12275_s5 }
   0x7   :  { %12577 = sst [smem:[#allocation272_spill]] %s12276_s6 }
   0x8   :  { %12578 = sst [smem:[#allocation273_spill]] %s12277_s7 }
   0x9   :  { %12579 = sst [smem:[#allocation274_spill]] %s12278_s8 }
   0xa   :  { %12580 = sst [smem:[#allocation275_spill]] %s12279_s9 }
   0xb   :  { %12581 = sst [smem:[#allocation276_spill]] %s12281_s11 }
   0xc   :  { %12582 = sst [smem:[#allocation277_spill]] %s12282_s12 }
   0xd   :  { %12583 = sst [smem:[#allocation278_spill]] %s12283_s13 }
   0xe   :  { %12584 = sst [smem:[#allocation279_spill]] %s12286_s16 }
   0xf   :  { %12585 = sst [smem:[#allocation280_spill]] %s12287_s17 }
  0x10   :  { %12586 = sst [smem:[#allocation281_spill]] %s12289_s19 }
  0x11   :  { %12587 = sst [smem:[#allocation282_spill]] %s12290_s20 }
  0x12   :  { %12588 = sst [smem:[#allocation283_spill]] %s12292_s22 }
  0x13   :  { %12589 = sst [smem:[#allocation284_spill]] %s12294_s24 }
  0x14   :  { %12590 = sst [smem:[#allocation285_spill]] %s12295_s25 }
  0x15   :  { %30 = vsyncpa [#allocation3], 0 }
  0x16   :  { %32 = vsyncpa [#allocation3 + $0x1], 0 }
  0x17   :  { %33 = vsyncpa [#allocation5], 0 }
  0x18   :  { %34 = vsyncpa [#allocation8], 0 }
  0x19   :  { %35 = vsyncpa [#allocation11], 0 }
  0x1a   :  { %36 = vsyncpa [#allocation14], 0 }
  0x1b   :  { %37 = vsyncpa [#allocation17], 0  ;;  %s9534_s29 = smov 0   ;;  %s9536_s2 = smov 0  }
  0x1c   :  { %s9538_s6 = smov 0   ;;  %s9540_s30 = smov 0  }
  0x1d LB: > { %s9376_s7 = smov [#allocation4]   ;;  %s9555_s26 = sadd.s32 4294967295, %s9374_s30   ;;  %s9374_s30 = sphi %s9540_s30, %s13117_s30   ;;  %s9370_s6 = sphi %s9538_s6, %s13116_s6   ;;  %s9366_s2 = sphi %s9536_s2, %s13115_s2   ;;  %s9362_s29 = sphi %s9534_s29, %s13114_s29  }
  0x1e   : > { %s621_s3 = sshll.u32 %s9376_s7, 4  ;;  %p7154_p0 = scmp.ge.s32.totalorder %s9374_s30, 1  ;;  %s9560_s3 = int_to_ptr.vmem [resolvable:$true] %s621_s3 }
  0x1f   : > { %p12312_p1 = scmp.eq.s32.totalorder %s9555_s26, 0  ;;  %p609_p2 = scmp.lt.s32.totalorder %s9374_s30, 3 }
  0x20   : > { %s9377_s8 = smov [#allocation7]   ;;  %s9378_s28 = smov [#allocation10]  }
  0x21   : > { %p9562_p3 = pnand %p7154_p0, %p609_p2  ;;  %s656_s27 = sshll.u32 %s9377_s8, 4  ;;  %s9574_s27 = int_to_ptr.vmem [resolvable:$true] %s656_s27 }
  0x22   : > { %s9576_s9 = sshll.u32 %s9378_s28, 4  ;;  %s12593_s7 = sld [smem:[#allocation268_spill]]  ;;  %s689_s9 = int_to_ptr.vmem [resolvable:$true] %s9576_s9 }
  0x23   : > { %s12591_s1 = scalar_select %p9562_p3, 1, 0 }
  0x24   : > { %p8074_p4 = pneg %p9562_p3 }
  0x26   : > { %p9570_p5 = pnand %p8074_p4, %p12312_p1 }
  0x28   : > { %s9010_s25 = scalar_lea.hbm %s12593_s7, 36864  ;;  %p9586_p7 = pneg %p9570_p5 }
  0x29   : > { %p9011_p6 = scmp.ne.s32.totalorder %s12593_s7, %s9010_s25  ;;  %p9017_p10 = scmp.lt.u32.totalorder %s9010_s25, %s12593_s7 }
  0x2b   : > { %p9013_p8 = pnand %p9586_p7, %p9011_p6 }
  0x2d   : > { %p9014_p9 = pneg %p9013_p8 }
  0x2f   : > { %p9019_p11 = pnand %p9017_p10, %p9014_p9 }
  0x31   : > { %9022 = shalt.err (!%p9019_p11)
}
  0x32   : > { %s9023_s22 = scalar_lea.vmem %s9560_s3, 36864  ;;  %p9031_p2 = scmp.lt.s32.totalorder %s9560_s3, %s9560_s3 }
  0x33   : > { %p9024_p12 = scmp.ne.s32.totalorder %s9560_s3, %s9023_s22  ;;  %p9032_p4 = scmp.lt.s32.totalorder %s9023_s22, %s9023_s22 }
  0x35   : > { %p9026_p13 = pnand %p9024_p12, %p9586_p7  ;;  %p9033_p6 = por %p9032_p4, %p9031_p2 }
  0x37   : > { %p9027_p0 = pneg %p9026_p13 }
  0x39   : > { %p9034_p8 = pnand %p9033_p6, %p9027_p0 }
  0x3b   : > { %9037 = shalt.err (!%p9034_p8)
}
  0x3c   : > { %s9379_s24 = smov 384   ;;  %s9380_s20 = smov 24  }
  0x3d   : > { %8077 = dma.hbm_to_vmem [thread:$0]  (!%p9570_p5), %s12593_s7, 36864, %s9560_s3, [#allocation5], %s9379_s24, %s9379_s24, %s9380_s20  }
  0x3e   : > { %s12595_s19 = sld [smem:[#allocation273_spill]] }
  0x44   : > { %s9038_s17 = scalar_lea.hbm %s12595_s19, 256 }
  0x45   : > { %p9039_p9 = scmp.ne.s32.totalorder %s12595_s19, %s9038_s17  ;;  %p9045_p12 = scmp.lt.u32.totalorder %s9038_s17, %s12595_s19 }
  0x47   : > { %p9041_p10 = pnand %p9039_p9, %p9586_p7 }
  0x49   : > { %p9042_p11 = pneg %p9041_p10 }
  0x4b   : > { %p9047_p13 = pnand %p9045_p12, %p9042_p11 }
  0x4d   : > { %9050 = shalt.err (!%p9047_p13)
}
  0x4e   : > { %s9051_s3 = scalar_lea.vmem %s9574_s27, 256  ;;  %p9059_p6 = scmp.lt.s32.totalorder %s9574_s27, %s9574_s27 }
  0x4f   : > { %p9052_p0 = scmp.ne.s32.totalorder %s9574_s27, %s9051_s3  ;;  %p9060_p8 = scmp.lt.s32.totalorder %s9051_s3, %s9051_s3 }
  0x51   : > { %p9054_p2 = pnand %p9052_p0, %p9586_p7  ;;  %p9061_p9 = por %p9060_p8, %p9059_p6 }
  0x53   : > { %p9055_p4 = pneg %p9054_p2 }
  0x55   : > { %p9062_p10 = pnand %p9061_p9, %p9055_p4 }
  0x57   : > { %9065 = shalt.err (!%p9062_p10)
}
  0x58   : > { %s9381_s13 = smov 64   ;;  %s9382_s12 = smov 4  }
  0x59   : > { %8083 = dma.hbm_to_vmem [thread:$0]  (!%p9570_p5), %s12595_s19, 256, %s9574_s27, [#allocation8], %s9381_s13, %s9381_s13, %s9382_s12  }
  0x5a   : > { %s12596_s11 = sld [smem:[#allocation276_spill]] }
  0x60   : > { %s9066_s25 = scalar_lea.hbm %s12596_s11, 512 }
  0x61   : > { %p9067_p11 = scmp.ne.s32.totalorder %s12596_s11, %s9066_s25  ;;  %p9073_p0 = scmp.lt.u32.totalorder %s9066_s25, %s12596_s11 }
  0x63   : > { %p9069_p12 = pnand %p9067_p11, %p9586_p7 }
  0x65   : > { %p9070_p13 = pneg %p9069_p12 }
  0x67   : > { %p9075_p2 = pnand %p9073_p0, %p9070_p13 }
  0x69   : > { %9078 = shalt.err (!%p9075_p2)
}
  0x6a   : > { %s9079_s3 = scalar_lea.vmem %s689_s9, 512  ;;  %p9087_p9 = scmp.lt.s32.totalorder %s689_s9, %s689_s9 }
  0x6b   : > { %p9080_p4 = scmp.ne.s32.totalorder %s689_s9, %s9079_s3  ;;  %p9088_p10 = scmp.lt.s32.totalorder %s9079_s3, %s9079_s3 }
  0x6d   : > { %p9082_p6 = pnand %p9080_p4, %p9586_p7  ;;  %p9089_p1 = por %p9088_p10, %p9087_p9 }
  0x6f   : > { %p9083_p8 = pneg %p9082_p6 }
  0x71   : > { %p9090_p3 = pnand %p9089_p1, %p9083_p8 }
  0x73   : > { %9093 = shalt.err (!%p9090_p3)
}
  0x74   : > { %8089 = dma.hbm_to_vmem [thread:$0]  (!%p9570_p5), %s12596_s11, 512, %s689_s9, [#allocation11], %s9381_s13, %s9381_s13, %s9382_s12  }
  0x75   : > { %s9383_s17 = smov [#allocation13]   ;;  %s9384_s20 = smov [#allocation16]  }
  0x76   : > { %s720_s24 = sshll.u32 %s9383_s17, 4  ;;  %s758_s25 = sshll.u32 %s9384_s20, 4  ;;  %s721_s24 = int_to_ptr.vmem [resolvable:$true] %s720_s24  ;;  %s759_s25 = int_to_ptr.vmem [resolvable:$true] %s758_s25 }
  0x77   : > { %s9094_s28 = scalar_lea.hbm %s12285_s15, 2048 }
  0x78   : > { %p9095_p1 = scmp.ne.s32.totalorder %s12285_s15, %s9094_s28  ;;  %p9101_p12 = scmp.lt.u32.totalorder %s9094_s28, %s12285_s15 }
  0x7a   : > { %p9097_p3 = pnand %p9095_p1, %p9586_p7 }
  0x7c   : > { %p9098_p11 = pneg %p9097_p3 }
  0x7e   : > { %p9103_p13 = pnand %p9101_p12, %p9098_p11 }
  0x80   : > { %9106 = shalt.err (!%p9103_p13)
}
  0x81   : > { %s9107_s9 = scalar_lea.vmem %s721_s24, 2048  ;;  %p9115_p6 = scmp.lt.s32.totalorder %s721_s24, %s721_s24 }
  0x82   : > { %p9108_p0 = scmp.ne.s32.totalorder %s721_s24, %s9107_s9  ;;  %p9116_p8 = scmp.lt.s32.totalorder %s9107_s9, %s9107_s9 }
  0x84   : > { %p9110_p2 = pnand %p9108_p0, %p9586_p7  ;;  %p9117_p9 = por %p9116_p8, %p9115_p6 }
  0x86   : > { %p9111_p4 = pneg %p9110_p2 }
  0x88   : > { %p9118_p10 = pnand %p9117_p9, %p9111_p4 }
  0x8a   : > { %9121 = shalt.err (!%p9118_p10)
}
  0x8b   : > { %s12315_s16 = smov 128   ;;  %s12316_s17 = smov 8  }
  0x8c   : > { %8095 = dma.hbm_to_vmem [thread:$0]  (!%p9570_p5), %s12285_s15, 2048, %s721_s24, [#allocation14], %s12315_s16, %s12315_s16, %s12316_s17  }
  0x8d   : > { %s9122_s28 = scalar_lea.hbm %s12291_s21, 1024 }
  0x8e   : > { %p9123_p1 = scmp.ne.s32.totalorder %s12291_s21, %s9122_s28  ;;  %p9129_p12 = scmp.lt.u32.totalorder %s9122_s28, %s12291_s21 }
  0x90   : > { %p9125_p3 = pnand %p9123_p1, %p9586_p7 }
  0x92   : > { %p9126_p11 = pneg %p9125_p3 }
  0x94   : > { %p9131_p13 = pnand %p9129_p12, %p9126_p11 }
  0x96   : > { %9134 = shalt.err (!%p9131_p13)
}
  0x97   : > { %s9135_s7 = scalar_lea.vmem %s759_s25, 1024  ;;  %p9143_p6 = scmp.lt.s32.totalorder %s759_s25, %s759_s25 }
  0x98   : > { %p9136_p0 = scmp.ne.s32.totalorder %s759_s25, %s9135_s7  ;;  %p9144_p8 = scmp.lt.s32.totalorder %s9135_s7, %s9135_s7 }
  0x9a   : > { %p9138_p2 = pnand %p9136_p0, %p9586_p7  ;;  %p9145_p9 = por %p9144_p8, %p9143_p6 }
  0x9c   : > { %p9139_p4 = pneg %p9138_p2 }
  0x9e   : > { %p9146_p10 = pnand %p9145_p9, %p9139_p4 }
  0xa0   : > { %9149 = shalt.err (!%p9146_p10)
}
  0xa1   : > { %8101 = dma.hbm_to_vmem [thread:$0]  (!%p9570_p5), %s12291_s21, 1024, %s759_s25, [#allocation17], %s9381_s13, %s9381_s13, %s9382_s12  }
  0xa2   : > { %s9387_s5 = smov [#allocation6]   ;;  %s9388_s28 = smov [#allocation9]  }
  0xa3   : > { %s643_s0 = sshll.u32 %s9387_s5, 4  ;;  %s675_s22 = sshll.u32 %s9388_s28, 4  ;;  %s644_s0 = int_to_ptr.vmem [resolvable:$true] %s643_s0  ;;  %s676_s22 = int_to_ptr.vmem [resolvable:$true] %s675_s22 }
  0xa4   : > { %s12597_s9 = sld [smem:[#allocation272_spill]] }
  0xaa   : > { %s9150_s7 = scalar_lea.hbm %s12597_s9, 3072 }
  0xab   : > { %p9151_p1 = scmp.ne.s32.totalorder %s12597_s9, %s9150_s7  ;;  %p9157_p12 = scmp.lt.u32.totalorder %s9150_s7, %s12597_s9 }
  0xad   : > { %p9153_p3 = pnand %p9151_p1, %p9586_p7 }
  0xaf   : > { %p9154_p11 = pneg %p9153_p3 }
  0xb1   : > { %p9159_p13 = pnand %p9157_p12, %p9154_p11 }
  0xb3   : > { %9162 = shalt.err (!%p9159_p13)
}
  0xb4   : > { %s9163_s25 = scalar_lea.vmem %s644_s0, 3072  ;;  %p9171_p6 = scmp.lt.s32.totalorder %s644_s0, %s644_s0 }
  0xb5   : > { %p9164_p0 = scmp.ne.s32.totalorder %s644_s0, %s9163_s25  ;;  %p9172_p8 = scmp.lt.s32.totalorder %s9163_s25, %s9163_s25 }
  0xb7   : > { %p9166_p2 = pnand %p9164_p0, %p9586_p7  ;;  %p9173_p9 = por %p9172_p8, %p9171_p6 }
  0xb9   : > { %p9167_p4 = pneg %p9166_p2 }
  0xbb   : > { %p9174_p10 = pnand %p9173_p9, %p9167_p4 }
  0xbd   : > { %9177 = shalt.err (!%p9174_p10)
}
  0xbe   : > { %s12598_s16 = smov 8   ;;  %s12599_s17 = smov 128  }
  0xbf   : > { %8080 = dma.hbm_to_vmem [thread:$0]  (!%p9570_p5), %s12597_s9, 3072, %s644_s0, [#allocation5], %s12599_s17, %s12599_s17, %s12598_s16  }
  0xc0   : > { %s9178_s3 = scalar_lea.hbm %s12280_s10, 384 }
  0xc1   : > { %p9179_p1 = scmp.ne.s32.totalorder %s12280_s10, %s9178_s3  ;;  %p9185_p12 = scmp.lt.u32.totalorder %s9178_s3, %s12280_s10 }
  0xc3   : > { %p9181_p3 = pnand %p9179_p1, %p9586_p7 }
  0xc5   : > { %p9182_p11 = pneg %p9181_p3 }
  0xc7   : > { %p9187_p13 = pnand %p9185_p12, %p9182_p11 }
  0xc9   : > { %9190 = shalt.err (!%p9187_p13)
}
  0xca   : > { %s9191_s11 = scalar_lea.vmem %s676_s22, 384  ;;  %p9199_p6 = scmp.lt.s32.totalorder %s676_s22, %s676_s22 }
  0xcb   : > { %p9192_p0 = scmp.ne.s32.totalorder %s676_s22, %s9191_s11  ;;  %p9200_p8 = scmp.lt.s32.totalorder %s9191_s11, %s9191_s11 }
  0xcd   : > { %p9194_p2 = pnand %p9192_p0, %p9586_p7  ;;  %p9201_p9 = por %p9200_p8, %p9199_p6 }
  0xcf   : > { %p9195_p4 = pneg %p9194_p2 }
  0xd1   : > { %p9202_p10 = pnand %p9201_p9, %p9195_p4 }
  0xd3   : > { %9205 = shalt.err (!%p9202_p10)
}
  0xd4   : > { %8086 = dma.hbm_to_vmem [thread:$0]  (!%p9570_p5), %s12280_s10, 384, %s676_s22, [#allocation8], %s9381_s13, %s9381_s13, %s9382_s12  }
  0xd5   : > { %s9389_s17 = smov [#allocation12]   ;;  %s9390_s5 = smov [#allocation15]  }
  0xd6   : > { %s707_s20 = sshll.u32 %s9389_s17, 4  ;;  %s739_s28 = sshll.u32 %s9390_s5, 4  ;;  %s708_s20 = int_to_ptr.vmem [resolvable:$true] %s707_s20  ;;  %s740_s28 = int_to_ptr.vmem [resolvable:$true] %s739_s28 }
  0xd7   : > { %s9206_s7 = scalar_lea.hbm %s12284_s14, 128 }
  0xd8   : > { %p9207_p1 = scmp.ne.s32.totalorder %s12284_s14, %s9206_s7  ;;  %p9213_p12 = scmp.lt.u32.totalorder %s9206_s7, %s12284_s14 }
  0xda   : > { %p9209_p3 = pnand %p9207_p1, %p9586_p7 }
  0xdc   : > { %p9210_p11 = pneg %p9209_p3 }
  0xde   : > { %p9215_p13 = pnand %p9213_p12, %p9210_p11 }
  0xe0   : > { %9218 = shalt.err (!%p9215_p13)
}
  0xe1   : > { %s9219_s22 = scalar_lea.vmem %s708_s20, 128  ;;  %p9227_p6 = scmp.lt.s32.totalorder %s708_s20, %s708_s20 }
  0xe2   : > { %p9220_p0 = scmp.ne.s32.totalorder %s708_s20, %s9219_s22  ;;  %p9228_p8 = scmp.lt.s32.totalorder %s9219_s22, %s9219_s22 }
  0xe4   : > { %p9222_p2 = pnand %p9220_p0, %p9586_p7  ;;  %p9229_p9 = por %p9228_p8, %p9227_p6 }
  0xe6   : > { %p9223_p4 = pneg %p9222_p2 }
  0xe8   : > { %p9230_p10 = pnand %p9229_p9, %p9223_p4 }
  0xea   : > { %9233 = shalt.err (!%p9230_p10)
}
  0xeb   : > { %8092 = dma.hbm_to_vmem [thread:$0]  (!%p9570_p5), %s12284_s14, 128, %s708_s20, [#allocation11], %s9381_s13, %s9381_s13, %s9382_s12  }
  0xec   : > { %s9234_s27 = scalar_lea.hbm %s12288_s18, 1024 }
  0xed   : > { %p9235_p1 = scmp.ne.s32.totalorder %s12288_s18, %s9234_s27  ;;  %p9241_p12 = scmp.lt.u32.totalorder %s9234_s27, %s12288_s18 }
  0xef   : > { %p9237_p3 = pnand %p9235_p1, %p9586_p7 }
  0xf1   : > { %p9238_p11 = pneg %p9237_p3 }
  0xf3   : > { %p9243_p13 = pnand %p9241_p12, %p9238_p11 }
  0xf5   : > { %9246 = shalt.err (!%p9243_p13)
}
  0xf6   : > { %s9247_s0 = scalar_lea.vmem %s740_s28, 1024  ;;  %p9255_p6 = scmp.lt.s32.totalorder %s740_s28, %s740_s28 }
  0xf7   : > { %p9248_p0 = scmp.ne.s32.totalorder %s740_s28, %s9247_s0  ;;  %p9256_p8 = scmp.lt.s32.totalorder %s9247_s0, %s9247_s0 }
  0xf9   : > { %p9250_p2 = pnand %p9248_p0, %p9586_p7  ;;  %p9257_p9 = por %p9256_p8, %p9255_p6 }
  0xfb   : > { %p9251_p4 = pneg %p9250_p2 }
  0xfd   : > { %p9258_p10 = pnand %p9257_p9, %p9251_p4 }
  0xff   : > { %9261 = shalt.err (!%p9258_p10)
}
 0x100   : > { %8098 = dma.hbm_to_vmem [thread:$0]  (!%p9570_p5), %s12288_s18, 1024, %s740_s28, [#allocation14], %s9381_s13, %s9381_s13, %s9382_s12  }
 0x101   : > { %s9391_s16 = smov [#allocation18]   ;;  %s9262_s27 = scalar_lea.hbm %s12293_s23, 512 }
 0x102   : > { %s774_s17 = sshll.u32 %s9391_s16, 4  ;;  %p9263_p1 = scmp.ne.s32.totalorder %s12293_s23, %s9262_s27  ;;  %s775_s17 = int_to_ptr.vmem [resolvable:$true] %s774_s17 }
 0x103   : > { %p9269_p12 = scmp.lt.u32.totalorder %s9262_s27, %s12293_s23 }
 0x104   : > { %p9265_p3 = pnand %p9263_p1, %p9586_p7 }
 0x106   : > { %p9266_p11 = pneg %p9265_p3 }
 0x108   : > { %p9271_p13 = pnand %p9269_p12, %p9266_p11 }
 0x10a   : > { %9274 = shalt.err (!%p9271_p13)
}
 0x10b   : > { %s9275_s28 = scalar_lea.vmem %s775_s17, 512  ;;  %p9283_p6 = scmp.lt.s32.totalorder %s775_s17, %s775_s17 }
 0x10c   : > { %p9276_p0 = scmp.ne.s32.totalorder %s775_s17, %s9275_s28  ;;  %p9284_p8 = scmp.lt.s32.totalorder %s9275_s28, %s9275_s28 }
 0x10e   : > { %p9278_p2 = pnand %p9276_p0, %p9586_p7  ;;  %p9285_p9 = por %p9284_p8, %p9283_p6 }
 0x110   : > { %p9279_p4 = pneg %p9278_p2 }
 0x112   : > { %p9286_p10 = pnand %p9285_p9, %p9279_p4 }
 0x114   : > { %9289 = shalt.err (!%p9286_p10)
}
 0x115   : > { %8104 = dma.hbm_to_vmem [thread:$0]  (!%p9570_p5), %s12293_s23, 512, %s775_s17, [#allocation17], %s9381_s13, %s9381_s13, %s9382_s12  }
 0x116   : > { %s9803_s4 = sadd.s32 1, %s9374_s30   ;;  %s50_s8 = sadd.s32 1, %s9370_s6 }
 0x117   : > { %s47_s22 = ssub.s32 %s9374_s30, %s9803_s4  ;;  %p57_p7 = scmp.ne.s32.totalorder %s9370_s6, %s9366_s2 }
 0x118   : > { %p48_p1 = scmp.eq.s32.totalorder %s47_s22, 0  ;;  %p58_p3 = scmp.eq.s32.totalorder %s9374_s30, 0 }
 0x119   : > { %p63_p11 = scmp.ne.s32.totalorder %s9366_s2, %s9362_s29  ;;  %p8119_p12 = scmp.lt.s32.totalorder %s9374_s30, 2 }
 0x11a   : > { %s9815_s16 = scalar_select %p48_p1, %s9370_s6, %s50_s8  }
 0x11b   : > { %p59_p13 = por %p58_p3, %p57_p7  ;;  %p12600_p0 = scmp.eq.s32.totalorder %s9555_s26, 0 }
 0x11c   : > { %s791_s3 = sand.u32 1, %s9370_s6   ;;  %s8030_s13 = smul.u32 96, %s9374_s30 }
 0x11d   : > { %p9819_p2 = por %p12600_p0, %p63_p11  ;;  %s8029_s12 = smul.u32 6, %s791_s3 }
 0x11e   : > { %p9825_p5 = pnand %p8119_p12, %p59_p13  ;;  %s12603_s24 = sld [smem:[#allocation266_spill]] }
 0x11f   : > { %s795_s25 = scalar_lea.vmem [#allocation2], %s8029_s12  ;;  %s792_s30 = scalar_lea.sflag [#allocation3], %s791_s3 }
 0x120   : > { %s803_s11 = sshll.u32 %s795_s25, 4  ;;  %p9292_p6 = pneg %p9825_p5  ;;  %s9834_s11 = int_to_ptr.vmem [resolvable:$true] %s803_s11 }
 0x124   : > { %s9832_s29 = scalar_lea.hbm %s12603_s24, %s8030_s13  ;;  %s9295_s8 = scalar_lea.hbm %s12603_s24, 192 }
 0x125   : > { %s9290_s28 = scalar_lea.hbm %s9832_s29, 96  ;;  %p9296_p10 = scmp.lt.u32.totalorder %s9832_s29, %s12603_s24 }
 0x126   : > { %p9291_p4 = scmp.ne.s32.totalorder %s9832_s29, %s9290_s28  ;;  %p9297_p7 = scmp.lt.u32.totalorder %s9295_s8, %s9290_s28 }
 0x127   : > { %p9299_p3 = scmp.lt.u32.totalorder %s9290_s28, %s9832_s29 }
 0x128   : > { %p9293_p8 = pnand %p9292_p6, %p9291_p4  ;;  %p9298_p1 = por %p9297_p7, %p9296_p10 }
 0x12a   : > { %p9294_p9 = pneg %p9293_p8  ;;  %p9300_p11 = por %p9299_p3, %p9298_p1 }
 0x12c   : > { %p9301_p12 = pnand %p9300_p11, %p9294_p9 }
 0x12e   : > { %9304 = shalt.err (!%p9301_p12)
}
 0x12f   : > { %s9305_s3 = scalar_lea.vmem %s9834_s11, 96  ;;  %s9392_s12 = smov [#allocation2]  }
 0x130   : > { %p9306_p13 = scmp.ne.s32.totalorder %s9834_s11, %s9305_s3  ;;  %s9310_s27 = sshll.u32 %s9392_s12, 4  ;;  %s9311_s27 = int_to_ptr.vmem [resolvable:$false] %s9310_s27 }
 0x131   : > { %s9312_s7 = scalar_lea.vmem %s9311_s27, 192  ;;  %p9313_p8 = scmp.lt.s32.totalorder %s9834_s11, %s9311_s27 }
 0x132   : > { %p9308_p0 = pnand %p9306_p13, %p9292_p6  ;;  %p9314_p10 = scmp.lt.s32.totalorder %s9312_s7, %s9305_s3 }
 0x134   : > { %p9309_p4 = pneg %p9308_p0  ;;  %p9315_p7 = por %p9314_p10, %p9313_p8 }
 0x136   : > { %p9316_p1 = pnand %p9315_p7, %p9309_p4 }
 0x138   : > { %9319 = shalt.err (!%p9316_p1)
}
 0x139   : > { %8108 = dma.hbm_to_vmem [thread:$0]  (!%p9825_p5), %s9832_s29, 96, %s9834_s11, %s792_s30  }
 0x13a   : > { %p12604_p9 = scmp.ne.s32.totalorder %s12591_s1, 0 }
 0x13c   : > { %819 = sbr.rel (%p12604_p9) target bundleno = 6186 (0x182a), region = 120 }
 0x143   : > { %s821_s25 = sand.u32 1, %s9366_s2  }
 0x144   : > { %s9864_s28 = smul.u32 6, %s821_s25  ;;  %s822_s0 = scalar_lea.sflag [#allocation3], %s821_s25 }
 0x146   : > { %s825_s20 = scalar_lea.vmem [#allocation2], %s9864_s28 }
 0x147   : > { %9337 = dma.done.wait (%p9819_p2), %s822_s0, 96  }
 0x148   : > { %9339 = vsyncadd (%p9819_p2), %s822_s0, 4294967200  ;;  %p12605_p6 = scmp.eq.s32.totalorder %s9555_s26, 0 }
 0x14a   : > { %9341 = dma.done.wait (%p12605_p6), [#allocation5], 39936   ;;  %p12606_p5 = pmov %p12605_p6 }
 0x14c   : > { %9343 = vsyncadd (%p12606_p5), [#allocation5], 4294927360  ;;  %p12607_p3 = pmov %p12606_p5 }
 0x14e   : > { %9345 = dma.done.wait (%p12607_p3), [#allocation8], 640   ;;  %p12608_p11 = pmov %p12607_p3 }
 0x14f   : > { %p12609_p12 = pmov %p12607_p3 }
 0x150   : > { %9347 = vsyncadd (%p12608_p11), [#allocation8], 4294966656 }
 0x151   : > { %9349 = dma.done.wait (%p12609_p12), [#allocation11], 640   ;;  %p12610_p13 = pmov %p12607_p3 }
 0x152   : > { %p12611_p2 = pmov %p12607_p3 }
 0x153   : > { %9351 = vsyncadd (%p12610_p13), [#allocation11], 4294966656 }
 0x154   : > { %9353 = dma.done.wait (%p12611_p2), [#allocation14], 3072   ;;  %p12612_p0 = pmov %p12611_p2 }
 0x156   : > { %9355 = vsyncadd (%p12612_p0), [#allocation14], 4294964224  ;;  %p12613_p4 = pmov %p12612_p0 }
 0x157   : > { %p12614_p8 = pmov %p12612_p0 }
 0x158   : > { %9357 = dma.done.wait (%p12613_p4), [#allocation17], 1536  }
 0x159   : > { %9359 = vsyncadd (%p12614_p8), [#allocation17], 4294965760  ;;  %v8191_v0 = vld [vmem:[#allocation4 + $0x4] ss:$24 sps:$4 sm:$0xff]   ;;  %v8195_v2 = vld [vmem:[#allocation4] ss:$24 sps:$4 sm:$0xff]   ;;  %v1242_v36 = vlaneseq }
 0x15a   : > { %v8193_v1 = vld [vmem:[#allocation4 + $0xc] ss:$24 sps:$4 sm:$0xff]   ;;  %2718 = vmatprep.subr.bf16.mxu0 %v8191_v0  ;;  %v8196_v3 = vld [vmem:[#allocation4 + $0x8] ss:$24 sps:$4 sm:$0xff]   ;;  %v8199_v5 = vld [vmem:[#allocation4 + $0x3c] ss:$24 sps:$4 sm:$0xff]  }
 0x15b   : > { %2841 = vmatprep.subr.bf16.mxu1 %v8193_v1  ;;  %v8197_v4 = vld [vmem:[#allocation4 + $0x34] ss:$24 sps:$4 sm:$0xff]   ;;  %2719 = vmatpush1.bf16.msra.mxu0 %v8195_v2  ;;  %v8201_v6 = vld [vmem:[#allocation4 + $0x30] ss:$24 sps:$4 sm:$0xff]   ;;  %v8203_v8 = vld [vmem:[#allocation4 + $0x64] ss:$24 sps:$4 sm:$0xff]  }
 0x15c   : > { %2842 = vmatpush1.bf16.msra.mxu1 %v8196_v3  ;;  %2720 = vmatprep.subr.bf16.mxu0 %v8197_v4  ;;  %v8202_v7 = vld [vmem:[#allocation4 + $0x38] ss:$24 sps:$4 sm:$0xff]   ;;  %v8205_v9 = vld [vmem:[#allocation4 + $0x6c] ss:$24 sps:$4 sm:$0xff]   ;;  %v8208_v11 = vld [vmem:[#allocation4 + $0x68] ss:$24 sps:$4 sm:$0xff]  }
 0x15d   : > { %2843 = vmatprep.subr.bf16.mxu1 %v8199_v5  ;;  %v8207_v10 = vld [vmem:[#allocation4 + $0x60] ss:$24 sps:$4 sm:$0xff]   ;;  %v8209_v12 = vld [vmem:[#allocation4 + $0x94] ss:$24 sps:$4 sm:$0xff]   ;;  %v8213_v14 = vld [vmem:[#allocation4 + $0x90] ss:$24 sps:$4 sm:$0xff]  }
 0x15e   : > { %v8211_v13 = vld [vmem:[#allocation4 + $0x9c] ss:$24 sps:$4 sm:$0xff]   ;;  %v8214_v15 = vld [vmem:[#allocation4 + $0x98] ss:$24 sps:$4 sm:$0xff]   ;;  %v8217_v17 = vld [vmem:[#allocation4 + $0xcc] ss:$24 sps:$4 sm:$0xff]  }
 0x15f   : > { %2721 = vmatpush1.bf16.msra.mxu0 %v8201_v6  ;;  %v8215_v16 = vld [vmem:[#allocation4 + $0xc4] ss:$24 sps:$4 sm:$0xff]   ;;  %v8219_v18 = vld [vmem:[#allocation4 + $0xc0] ss:$24 sps:$4 sm:$0xff]   ;;  %v8221_v20 = vld [vmem:[#allocation4 + $0xf4] ss:$24 sps:$4 sm:$0xff]  }
 0x160   : > { %2844 = vmatpush1.bf16.msra.mxu1 %v8202_v7  ;;  %2722 = vmatprep.subr.bf16.mxu0 %v8203_v8  ;;  %v8220_v19 = vld [vmem:[#allocation4 + $0xc8] ss:$24 sps:$4 sm:$0xff]   ;;  %v8223_v21 = vld [vmem:[#allocation4 + $0xfc] ss:$24 sps:$4 sm:$0xff]   ;;  %v8226_v23 = vld [vmem:[#allocation4 + $0xf8] ss:$24 sps:$4 sm:$0xff]  }
 0x161   : > { %2845 = vmatprep.subr.bf16.mxu1 %v8205_v9  ;;  %v8225_v22 = vld [vmem:[#allocation4 + $0xf0] ss:$24 sps:$4 sm:$0xff]   ;;  %v8227_v24 = vld [vmem:[#allocation4 + $0x124] ss:$24 sps:$4 sm:$0xff]   ;;  %v8231_v26 = vld [vmem:[#allocation4 + $0x120] ss:$24 sps:$4 sm:$0xff]  }
 0x162   : > { %v8229_v25 = vld [vmem:[#allocation4 + $0x12c] ss:$24 sps:$4 sm:$0xff]   ;;  %v8232_v27 = vld [vmem:[#allocation4 + $0x128] ss:$24 sps:$4 sm:$0xff]   ;;  %v8235_v29 = vld [vmem:[#allocation4 + $0x15c] ss:$24 sps:$4 sm:$0xff]  }
 0x163   : > { %2723 = vmatpush1.bf16.msra.mxu0 %v8207_v10  ;;  %v8233_v28 = vld [vmem:[#allocation4 + $0x154] ss:$24 sps:$4 sm:$0xff]   ;;  %v8237_v30 = vld [vmem:[#allocation4 + $0x150] ss:$24 sps:$4 sm:$0xff]   ;;  %v8239_v32 = vld [vmem:[#allocation4 + $0x184] ss:$24 sps:$4 sm:$0xff]  }
 0x164   : > { %2846 = vmatpush1.bf16.msra.mxu1 %v8208_v11  ;;  %2724 = vmatprep.subr.bf16.mxu0 %v8209_v12  ;;  %v8238_v31 = vld [vmem:[#allocation4 + $0x158] ss:$24 sps:$4 sm:$0xff]   ;;  %v8241_v33 = vld [vmem:[#allocation4 + $0x18c] ss:$24 sps:$4 sm:$0xff]   ;;  %v8244_v35 = vld [vmem:[#allocation4 + $0x188] ss:$24 sps:$4 sm:$0xff]  }
 0x165   : > { %2847 = vmatprep.subr.bf16.mxu1 %v8211_v13  ;;  %v8243_v34 = vld [vmem:[#allocation4 + $0x180] ss:$24 sps:$4 sm:$0xff]   ;;  %v8245_v37 = vld [vmem:[#allocation4 + $0x1b4] ss:$24 sps:$4 sm:$0xff]   ;;  %v8249_v39 = vld [vmem:[#allocation4 + $0x1b0] ss:$24 sps:$4 sm:$0xff]  }
 0x166   : > { %v8247_v38 = vld [vmem:[#allocation4 + $0x1bc] ss:$24 sps:$4 sm:$0xff]   ;;  %v9891_v40 = vshrl.u32 %v1242_v36, 7  ;;  %v8250_v41 = vld [vmem:[#allocation4 + $0x1b8] ss:$24 sps:$4 sm:$0xff]   ;;  %vm3915_vm0 = vcmask 1040384  }
 0x167   : > { %2725 = vmatpush1.bf16.msra.mxu0 %v8213_v14  ;;  %v8251_v42 = vld [vmem:[#allocation4 + $0x1e4] ss:$24 sps:$4 sm:$0xff]   ;;  %v8255_v44 = vld [vmem:[#allocation4 + $0x1e0] ss:$24 sps:$4 sm:$0xff]   ;;  %v8257_v48 = vld [vmem:[#allocation4 + $0x214] ss:$24 sps:$4 sm:$0xff]  }
 0x168   : > { %2848 = vmatpush1.bf16.msra.mxu1 %v8214_v15  ;;  %2726 = vmatprep.subr.bf16.mxu0 %v8215_v16  ;;  %v8253_v43 = vld [vmem:[#allocation4 + $0x1ec] ss:$24 sps:$4 sm:$0xff]   ;;  %v8256_v45 = vld [vmem:[#allocation4 + $0x1e8] ss:$24 sps:$4 sm:$0xff]   ;;  %v1248_v46 = vsub.s32 1, %v9891_v40  ;;  %v1252_v47 = vsub.s32 2, %v9891_v40 }
 0x169   : > { %2849 = vmatprep.subr.bf16.mxu1 %v8217_v17  ;;  %v8259_v49 = vld [vmem:[#allocation4 + $0x21c] ss:$24 sps:$4 sm:$0xff]   ;;  %v8261_v51 = vld [vmem:[#allocation4 + $0x210] ss:$24 sps:$4 sm:$0xff]   ;;  %v8265_v56 = vld [vmem:[#allocation4 + $0x24c] ss:$24 sps:$4 sm:$0xff]  }
 0x16a   : > { %v946_v50 = vld [vmem:[%s825_s20] sm:$0x3f]  ;;  %v8268_v59 = vld [vmem:[#allocation4 + $0x248] ss:$24 sps:$4 sm:$0xff]   ;;  %v8277_v1 = vld [vmem:[#allocation4 + $0x2ac] ss:$24 sps:$4 sm:$0xff]  }
 0x16b   : > { %2727 = vmatpush1.bf16.msra.mxu0 %v8219_v18  ;;  %v9897_v52 = vrot.slane %v946_v50, %v1248_v46  ;;  %v9899_v53 = vrot.slane %v946_v50, %v1252_v47  ;;  %v8262_v54 = vld [vmem:[#allocation4 + $0x218] ss:$24 sps:$4 sm:$0xff]   ;;  %v8263_v55 = vld [vmem:[#allocation4 + $0x244] ss:$24 sps:$4 sm:$0xff]   ;;  %v8269_v60 = vld [vmem:[#allocation4 + $0x274] ss:$24 sps:$4 sm:$0xff]  }
 0x16c   : > { %2850 = vmatpush1.bf16.msra.mxu1 %v8220_v19  ;;  %2728 = vmatprep.subr.bf16.mxu0 %v8221_v20  ;;  %v8267_v58 = vld [vmem:[#allocation4 + $0x240] ss:$24 sps:$4 sm:$0xff]   ;;  %v8271_v61 = vld [vmem:[#allocation4 + $0x27c] ss:$24 sps:$4 sm:$0xff]   ;;  %v8273_v62 = vld [vmem:[#allocation4 + $0x270] ss:$24 sps:$4 sm:$0xff]  }
 0x16d   : > { %2851 = vmatprep.subr.bf16.mxu1 %v8223_v21  ;;  %12615 = vst [vmem:[#allocation25_spill] sm:$0xff] %v9897_v52  ;;  %12616 = vst [vmem:[#allocation26_spill] sm:$0xff] %v9899_v53  ;;  %v9903_v57 = vpack.c.bf16 %v9897_v52, %v9897_v52  ;;  %v8274_v63 = vld [vmem:[#allocation4 + $0x278] ss:$24 sps:$4 sm:$0xff]   ;;  %v8275_v0 = vld [vmem:[#allocation4 + $0x2a4] ss:$24 sps:$4 sm:$0xff]  }
 0x16e   : > { %v8279_v2 = vld [vmem:[#allocation4 + $0x2a0] ss:$24 sps:$4 sm:$0xff]   ;;  %v1244_v3 = vsub.s32 0, %v9891_v40  ;;  %v8281_v5 = vld [vmem:[#allocation4 + $0x2d4] ss:$24 sps:$4 sm:$0xff]   ;;  %v1256_v7 = vsub.s32 3, %v9891_v40 }
 0x16f   : > { %2729 = vmatpush1.bf16.msra.mxu0 %v8225_v22  ;;  %2750 = vmatprep.mubr.bf16.mxu0 %v9903_v57  ;;  %v8280_v4 = vld [vmem:[#allocation4 + $0x2a8] ss:$24 sps:$4 sm:$0xff]   ;;  %v8283_v6 = vld [vmem:[#allocation4 + $0x2dc] ss:$24 sps:$4 sm:$0xff]   ;;  %v8286_v10 = vld [vmem:[#allocation4 + $0x2d8] ss:$24 sps:$4 sm:$0xff]  }
 0x170   : > { %2852 = vmatpush1.bf16.msra.mxu1 %v8226_v23  ;;  %2730 = vmatprep.subr.bf16.mxu0 %v8227_v24  ;;  %v8285_v8 = vld [vmem:[#allocation4 + $0x2d0] ss:$24 sps:$4 sm:$0xff]   ;;  %v9909_v9 = vrot.slane %v946_v50, %v1244_v3  ;;  %v1264_v11 = vsub.s32 5, %v9891_v40  ;;  %v8289_v12 = vld [vmem:[#allocation4 + $0x304] ss:$24 sps:$4 sm:$0xff]   ;;  %v1260_v14 = vsub.s32 4, %v9891_v40  ;;  %v9913_v15 = vrot.slane %v946_v50, %v1256_v7 }
 0x171   : > { %2853 = vmatprep.subr.bf16.mxu1 %v8229_v25  ;;  %2873 = vmatprep.mubr.bf16.mxu1 %v9903_v57  ;;  %v8292_v13 = vld [vmem:[#allocation4 + $0x30c] ss:$24 sps:$4 sm:$0xff]   ;;  %v8287_v17 = vld [vmem:[#allocation4 + $0x300] ss:$24 sps:$4 sm:$0xff]   ;;  %v8298_v22 = vld [vmem:[#allocation4 + $0x33c] ss:$24 sps:$4 sm:$0xff]  }
 0x172   : > { %12617 = vst [vmem:[#allocation27_spill] sm:$0xff] %v9909_v9  ;;  %12618 = vst [vmem:[#allocation28_spill] sm:$0xff] %v9913_v15  ;;  %v9915_v16 = vrot.slane %v946_v50, %v1264_v11  ;;  %v9919_v18 = vpack.c.bf16 %v9909_v9, %v9909_v9  ;;  %v9921_v19 = vrot.slane %v946_v50, %v1260_v14  ;;  %v8290_v20 = vld [vmem:[#allocation4 + $0x308] ss:$24 sps:$4 sm:$0xff]   ;;  %v8295_v21 = vld [vmem:[#allocation4 + $0x334] ss:$24 sps:$4 sm:$0xff]  }
 0x173   : > { %2731 = vmatpush1.bf16.msra.mxu0 %v8231_v26  ;;  %v9925_v23 = vpack.c.bf16 %v9913_v15, %v9913_v15  ;;  %v8293_v24 = vld [vmem:[#allocation4 + $0x330] ss:$24 sps:$4 sm:$0xff]   ;;  %v8301_v26 = vld [vmem:[#allocation4 + $0x364] ss:$24 sps:$4 sm:$0xff]   ;;  %v8311_v36 = vld [vmem:[#allocation4 + $0x3c0] ss:$24 sps:$4 sm:$0xff]  }
 0x174   : > { %2854 = vmatpush1.bf16.msra.mxu1 %v8232_v27  ;;  %2732 = vmatprep.subr.bf16.mxu0 %v8233_v28  ;;  %12619 = vst [vmem:[#allocation29_spill] sm:$0xff] %v9915_v16  ;;  %12620 = vst [vmem:[#allocation30_spill] sm:$0xff] %v9921_v19  ;;  %v8296_v25 = vld [vmem:[#allocation4 + $0x338] ss:$24 sps:$4 sm:$0xff]   ;;  %v8304_v27 = vld [vmem:[#allocation4 + $0x36c] ss:$24 sps:$4 sm:$0xff]  }
 0x175   : > { %2855 = vmatprep.subr.bf16.mxu1 %v8235_v29  ;;  %v8299_v28 = vld [vmem:[#allocation4 + $0x360] ss:$24 sps:$4 sm:$0xff]   ;;  %v8317_v40 = vld [vmem:[#allocation4 + $0x3f0] ss:$24 sps:$4 sm:$0xff]   ;;  %v8331_v46 = vld [vmem:[#allocation4 + $0x454] ss:$24 sps:$4 sm:$0xff]  }
 0x176   : > { %v8302_v29 = vld [vmem:[#allocation4 + $0x368] ss:$24 sps:$4 sm:$0xff]   ;;  %v8334_v47 = vld [vmem:[#allocation4 + $0x45c] ss:$24 sps:$4 sm:$0xff]   ;;  %vm3922_vm1 = vcmask 1041408   ;;  %s13097_s17 = sld [smem:[#allocation270_spill]] }
 0x177   : > { %2733 = vmatpush1.bf16.msra.mxu0 %v8237_v30  ;;  %v8307_v30 = vld [vmem:[#allocation4 + $0x394] ss:$24 sps:$4 sm:$0xff]   ;;  %v8337_v50 = vld [vmem:[#allocation4 + $0x484] ss:$24 sps:$4 sm:$0xff]   ;;  %v8353_v3 = vld [vmem:[#allocation4 + $0x510] ss:$24 sps:$4 sm:$0xff]  }
 0x178   : > { %2856 = vmatpush1.bf16.msra.mxu1 %v8238_v31  ;;  %2734 = vmatprep.subr.bf16.mxu0 %v8239_v32  ;;  %v8310_v31 = vld [vmem:[#allocation4 + $0x39c] ss:$24 sps:$4 sm:$0xff]   ;;  %v8305_v32 = vld [vmem:[#allocation4 + $0x390] ss:$24 sps:$4 sm:$0xff]   ;;  %v8359_v7 = vld [vmem:[#allocation4 + $0x540] ss:$24 sps:$4 sm:$0xff]  }
 0x179   : > { %2857 = vmatprep.subr.bf16.mxu1 %v8241_v33  ;;  %v8308_v33 = vld [vmem:[#allocation4 + $0x398] ss:$24 sps:$4 sm:$0xff]   ;;  %v8370_v11 = vld [vmem:[#allocation4 + $0x57c] ss:$24 sps:$4 sm:$0xff]   ;;  %s13098_s30 = sld [smem:[#allocation271_spill]]  ;;  %vm3929_vm2 = vcmask 1042432  }
 0x17a   : > { %v8373_v14 = vld [vmem:[#allocation4 + $0x5a4] ss:$24 sps:$4 sm:$0xff]   ;;  %v10114_v15 = vld [vmem:[#allocation4 + $0x2b4] ss:$24 sps:$4 sm:$0xff]   ;;  %v10116_v52 = vld [vmem:[#allocation4 + $0x240] ss:$24 sps:$4 sm:$0xff]  }
 0x17b   : > { %2735 = vmatpush1.bf16.msra.mxu0 %v8243_v34  ;;  %v8313_v34 = vld [vmem:[#allocation4 + $0x3c4] ss:$24 sps:$4 sm:$0xff]   ;;  %12625 = vst [vmem:[#allocation35_spill] sm:$0xff] %v10114_v15  ;;  %12626 = vst [vmem:[#allocation36_spill] sm:$0xff] %v10116_v52  ;;  %v10123_v9 = vld [vmem:[#allocation4 + $0x2b0] ss:$24 sps:$4 sm:$0xff]  }
 0x17c   : > { %2858 = vmatpush1.bf16.msra.mxu1 %v8244_v35  ;;  %2736 = vmatprep.subr.bf16.mxu0 %v8245_v37  ;;  %v8316_v35 = vld [vmem:[#allocation4 + $0x3cc] ss:$24 sps:$4 sm:$0xff]   ;;  %v8314_v37 = vld [vmem:[#allocation4 + $0x3c8] ss:$24 sps:$4 sm:$0xff]   ;;  %12628 = vst [vmem:[#allocation38_spill] sm:$0xff] %v10123_v9  ;;  %s13100_s25 = sld [smem:[#allocation269_spill]] }
 0x17d   : > { %2859 = vmatprep.subr.bf16.mxu1 %v8247_v38  ;;  %v8319_v38 = vld [vmem:[#allocation4 + $0x3f4] ss:$24 sps:$4 sm:$0xff]   ;;  %vm3947_vm3 = vcmask 31744   ;;  %s9394_s28 = smov 64   ;;  %vm4166_vm4 = vcmask 523264   ;;  %s13101_s1 = sld [smem:[#allocation274_spill]] }
 0x17e   : > { %s13102_s27 = sld [smem:[#allocation275_spill]]  ;;  %s9395_s29 = smov 80   ;;  %vm4694_vm5 = vcmask 261120   ;;  %vm4773_vm6 = vcmask 392192   ;;  %vm5330_vm7 = vcmask 1045504   ;;  %vm5317_vm8 = vcmask 97280  }
 0x17f   : > { %2737 = vmatpush1.bf16.msra.mxu0 %v8249_v39  ;;  %v8322_v39 = vld [vmem:[#allocation4 + $0x3fc] ss:$24 sps:$4 sm:$0xff]   ;;  %s13099_s8 = smov %s13098_s30  ;;  %s9396_s11 = smov 32   ;;  %vm6190_vm9 = vcmask 23552   ;;  %vm6338_vm10 = vcmask 15360   ;;  %vm6970_vm11 = vcmask 7168  }
 0x180   : > { %2860 = vmatpush1.bf16.msra.mxu1 %v8250_v41  ;;  %2738 = vmatprep.subr.bf16.mxu0 %v8251_v42  ;;  %v8320_v41 = vld [vmem:[#allocation4 + $0x3f8] ss:$24 sps:$4 sm:$0xff]   ;;  %v8325_v42 = vld [vmem:[#allocation4 + $0x424] ss:$24 sps:$4 sm:$0xff]   ;;  %s13103_s3 = sld [smem:[#allocation277_spill]]  ;;  %s9399_s22 = smov 104  }
 0x181   : > { %2861 = vmatprep.subr.bf16.mxu1 %v8253_v43  ;;  %v8328_v43 = vld [vmem:[#allocation4 + $0x42c] ss:$24 sps:$4 sm:$0xff]   ;;  %s9400_s13 = smov 92   ;;  %s9402_s7 = smov 122  }
 0x182   : > { %p936_p10 = scmp.lt.s32.totalorder %s9555_s26, 1  ;;  %s13108_s5 = sld [smem:[#allocation267_spill]] }
 0x183   : > { %2739 = vmatpush1.bf16.msra.mxu0 %v8255_v44  ;;  %v8323_v44 = vld [vmem:[#allocation4 + $0x420] ss:$24 sps:$4 sm:$0xff]   ;;  %s13109_s12 = sld [smem:[#allocation281_spill]]  ;;  %s13112_s0 = sld [smem:[#allocation284_spill]] }
 0x184   : > { %2862 = vmatpush1.bf16.msra.mxu1 %v8256_v45  ;;  %2740 = vmatprep.subr.bf16.mxu0 %v8257_v48  ;;  %v8326_v45 = vld [vmem:[#allocation4 + $0x428] ss:$24 sps:$4 sm:$0xff]   ;;  %s13119_s26 = smov (!%p936_p10, %s9555_s26), 1 }
 0x185   : > { %2863 = vmatprep.subr.bf16.mxu1 %v8259_v49  ;;  %v8329_v48 = vld [vmem:[#allocation4 + $0x450] ss:$24 sps:$4 sm:$0xff]  }
 0x186   : > { %v8332_v49 = vld [vmem:[#allocation4 + $0x458] ss:$24 sps:$4 sm:$0xff]  }
 0x187   : > { %2741 = vmatpush1.bf16.msra.mxu0 %v8261_v51  ;;  %v8340_v51 = vld [vmem:[#allocation4 + $0x48c] ss:$24 sps:$4 sm:$0xff]  }
 0x188   : > { %2864 = vmatpush1.bf16.msra.mxu1 %v8262_v54  ;;  %2742 = vmatprep.subr.bf16.mxu0 %v8263_v55  ;;  %v8335_v54 = vld [vmem:[#allocation4 + $0x480] ss:$24 sps:$4 sm:$0xff]  }
 0x189   : > { %2865 = vmatprep.subr.bf16.mxu1 %v8265_v56  ;;  %v8338_v55 = vld [vmem:[#allocation4 + $0x488] ss:$24 sps:$4 sm:$0xff]   ;;  %v8343_v56 = vld [vmem:[#allocation4 + $0x4b4] ss:$24 sps:$4 sm:$0xff]  }
 0x18b   : > { %2743 = vmatpush1.bf16.msra.mxu0 %v8267_v58  ;;  %v8346_v58 = vld [vmem:[#allocation4 + $0x4bc] ss:$24 sps:$4 sm:$0xff]  }
 0x18c   : > { %2866 = vmatpush1.bf16.msra.mxu1 %v8268_v59  ;;  %2744 = vmatprep.subr.bf16.mxu0 %v8269_v60  ;;  %v8341_v59 = vld [vmem:[#allocation4 + $0x4b0] ss:$24 sps:$4 sm:$0xff]  }
 0x18d   : > { %2867 = vmatprep.subr.bf16.mxu1 %v8271_v61  ;;  %v8344_v60 = vld [vmem:[#allocation4 + $0x4b8] ss:$24 sps:$4 sm:$0xff]   ;;  %v8349_v61 = vld [vmem:[#allocation4 + $0x4e4] ss:$24 sps:$4 sm:$0xff]  }
 0x18f   : > { %2745 = vmatpush1.bf16.msra.mxu0 %v8273_v62  ;;  %v8352_v62 = vld [vmem:[#allocation4 + $0x4ec] ss:$24 sps:$4 sm:$0xff]  }
 0x190   : > { %2868 = vmatpush1.bf16.msra.mxu1 %v8274_v63  ;;  %2746 = vmatprep.subr.bf16.mxu0 %v8275_v0  ;;  %v8347_v63 = vld [vmem:[#allocation4 + $0x4e0] ss:$24 sps:$4 sm:$0xff]  }
 0x191   : > { %2869 = vmatprep.subr.bf16.mxu1 %v8277_v1  ;;  %v8350_v0 = vld [vmem:[#allocation4 + $0x4e8] ss:$24 sps:$4 sm:$0xff]   ;;  %v8355_v1 = vld [vmem:[#allocation4 + $0x514] ss:$24 sps:$4 sm:$0xff]  }
 0x193   : > { %2747 = vmatpush1.bf16.msra.mxu0 %v8279_v2  ;;  %v8358_v2 = vld [vmem:[#allocation4 + $0x51c] ss:$24 sps:$4 sm:$0xff]  }
 0x194   : > { %2870 = vmatpush1.bf16.msra.mxu1 %v8280_v4  ;;  %2748 = vmatprep.subr.bf16.mxu0 %v8281_v5  ;;  %v8356_v4 = vld [vmem:[#allocation4 + $0x518] ss:$24 sps:$4 sm:$0xff]   ;;  %v8361_v5 = vld [vmem:[#allocation4 + $0x544] ss:$24 sps:$4 sm:$0xff]  }
 0x195   : > { %2871 = vmatprep.subr.bf16.mxu1 %v8283_v6  ;;  %v8364_v6 = vld [vmem:[#allocation4 + $0x54c] ss:$24 sps:$4 sm:$0xff]  }
 0x197   : > { %2749 = vmatpush1.bf16.msra.mxu0 %v8285_v8  ;;  %v8362_v8 = vld [vmem:[#allocation4 + $0x548] ss:$24 sps:$4 sm:$0xff]  }
 0x198   : > { %2872 = vmatpush1.bf16.msra.mxu1 %v8286_v10  ;;  %2759 = vmatprep.subr.bf16.mxu0 %v8289_v12  ;;  %v8367_v10 = vld [vmem:[#allocation4 + $0x574] ss:$24 sps:$4 sm:$0xff]   ;;  %v8365_v12 = vld [vmem:[#allocation4 + $0x570] ss:$24 sps:$4 sm:$0xff]  }
 0x199   : > { %2882 = vmatprep.subr.bf16.mxu1 %v8292_v13  ;;  %v8368_v13 = vld [vmem:[#allocation4 + $0x578] ss:$24 sps:$4 sm:$0xff]  }
 0x19a   : > { %2751 = vmatmul.mubr.bf16.vlgmr.msra.gmra.mrb[0].mxu0 %v9919_v18 }
 0x19b   : > { %2874 = vmatmul.mubr.bf16.vlgmr.msra.gmra.mrb[0].mxu1 %v9919_v18  ;;  %2760 = vmatpush1.bf16.msra.mxu0 %v8287_v17  ;;  %v8376_v17 = vld [vmem:[#allocation4 + $0x5ac] ss:$24 sps:$4 sm:$0xff]  }
 0x19c   : > { %2883 = vmatpush1.bf16.msra.mxu1 %v8290_v20  ;;  %2761 = vmatprep.subr.bf16.mxu0 %v8295_v21  ;;  %v8371_v20 = vld [vmem:[#allocation4 + $0x5a0] ss:$24 sps:$4 sm:$0xff]  }
 0x19d   : > { %2884 = vmatprep.subr.bf16.mxu1 %v8298_v22  ;;  %2791 = vmatprep.mubr.bf16.mxu0 %v9925_v23  ;;  %v8374_v21 = vld [vmem:[#allocation4 + $0x5a8] ss:$24 sps:$4 sm:$0xff]   ;;  %v8379_v22 = vld [vmem:[#allocation4 + $0x5d4] ss:$24 sps:$4 sm:$0xff]  }
 0x19e   : > { %2914 = vmatprep.mubr.bf16.mxu1 %v9925_v23 }
 0x19f   : > { %2762 = vmatpush1.bf16.msra.mxu0 %v8293_v24  ;;  %v8382_v24 = vld [vmem:[#allocation4 + $0x5dc] ss:$24 sps:$4 sm:$0xff]  }
 0x1a0   : > { %2885 = vmatpush1.bf16.msra.mxu1 %v8296_v25  ;;  %2763 = vmatprep.subr.bf16.mxu0 %v8301_v26  ;;  %v8377_v25 = vld [vmem:[#allocation4 + $0x5d0] ss:$24 sps:$4 sm:$0xff]  }
 0x1a1   : > { %2886 = vmatprep.subr.bf16.mxu1 %v8304_v27  ;;  %v8380_v26 = vld [vmem:[#allocation4 + $0x5d8] ss:$24 sps:$4 sm:$0xff]   ;;  %v8385_v27 = vld [vmem:[#allocation4 + $0x604] ss:$24 sps:$4 sm:$0xff]  }
 0x1a3   : > { %2764 = vmatpush1.bf16.msra.mxu0 %v8299_v28  ;;  %v8388_v28 = vld [vmem:[#allocation4 + $0x60c] ss:$24 sps:$4 sm:$0xff]  }
 0x1a4   : > { %2887 = vmatpush1.bf16.msra.mxu1 %v8302_v29  ;;  %2765 = vmatprep.subr.bf16.mxu0 %v8307_v30  ;;  %v8383_v29 = vld [vmem:[#allocation4 + $0x600] ss:$24 sps:$4 sm:$0xff]   ;;  %v9933_v30 = vpack.c.bf16 %v9899_v53, %v9899_v53  ;;  %v10119_v53 = vld [vmem:[#allocation4 + $0x274] ss:$24 sps:$4 sm:$0xff]  }
 0x1a5   : > { %2888 = vmatprep.subr.bf16.mxu1 %v8310_v31  ;;  %v8386_v31 = vld [vmem:[#allocation4 + $0x608] ss:$24 sps:$4 sm:$0xff]   ;;  %12627 = vst [vmem:[#allocation37_spill] sm:$0xff] %v10119_v53 }
 0x1a7   : > { %2766 = vmatpush1.bf16.msra.mxu0 %v8305_v32  ;;  %v8391_v32 = vld [vmem:[#allocation4 + $0x634] ss:$24 sps:$4 sm:$0xff]  }
 0x1a8   : > { %2889 = vmatpush1.bf16.msra.mxu1 %v8308_v33  ;;  %2767 = vmatprep.subr.bf16.mxu0 %v8313_v34  ;;  %v8394_v33 = vld [vmem:[#allocation4 + $0x63c] ss:$24 sps:$4 sm:$0xff]   ;;  %v9937_v34 = vpack.c.bf16 %v9915_v16, %v9915_v16 }
 0x1a9   : > { %2890 = vmatprep.subr.bf16.mxu1 %v8316_v35  ;;  %v8389_v35 = vld [vmem:[#allocation4 + $0x630] ss:$24 sps:$4 sm:$0xff]   ;;  %v10107_v16 = vld [vmem:[#allocation4 + $0x244] ss:$24 sps:$4 sm:$0xff]  }
 0x1aa   : > { %12623 = vst [vmem:[#allocation33_spill] sm:$0xff] %v10107_v16 }
 0x1ab   : > { %2768 = vmatpush1.bf16.msra.mxu0 %v8311_v36  ;;  %v8392_v36 = vld [vmem:[#allocation4 + $0x638] ss:$24 sps:$4 sm:$0xff]  }
 0x1ac   : > { %2891 = vmatpush1.bf16.msra.mxu1 %v8314_v37  ;;  %2769 = vmatprep.subr.bf16.mxu0 %v8319_v38  ;;  %v8397_v37 = vld [vmem:[#allocation4 + $0x664] ss:$24 sps:$4 sm:$0xff]  }
 0x1ad   : > { %2892 = vmatprep.subr.bf16.mxu1 %v8322_v39  ;;  %v8400_v38 = vld [vmem:[#allocation4 + $0x66c] ss:$24 sps:$4 sm:$0xff]   ;;  %v8395_v39 = vld [vmem:[#allocation4 + $0x660] ss:$24 sps:$4 sm:$0xff]  }
 0x1af   : > { %2770 = vmatpush1.bf16.msra.mxu0 %v8317_v40  ;;  %v8398_v40 = vld [vmem:[#allocation4 + $0x668] ss:$24 sps:$4 sm:$0xff]  }
 0x1b0   : > { %2893 = vmatpush1.bf16.msra.mxu1 %v8320_v41  ;;  %2771 = vmatprep.subr.bf16.mxu0 %v8325_v42  ;;  %v8403_v41 = vld [vmem:[#allocation4 + $0x694] ss:$24 sps:$4 sm:$0xff]  }
 0x1b1   : > { %2894 = vmatprep.subr.bf16.mxu1 %v8328_v43  ;;  %v8406_v42 = vld [vmem:[#allocation4 + $0x69c] ss:$24 sps:$4 sm:$0xff]   ;;  %v8401_v43 = vld [vmem:[#allocation4 + $0x690] ss:$24 sps:$4 sm:$0xff]  }
 0x1b3   : > { %2772 = vmatpush1.bf16.msra.mxu0 %v8323_v44  ;;  %v8404_v44 = vld [vmem:[#allocation4 + $0x698] ss:$24 sps:$4 sm:$0xff]  }
 0x1b4   : > { %2895 = vmatpush1.bf16.msra.mxu1 %v8326_v45  ;;  %2773 = vmatprep.subr.bf16.mxu0 %v8331_v46  ;;  %v8409_v45 = vld [vmem:[#allocation4 + $0x6c4] ss:$24 sps:$4 sm:$0xff]  }
 0x1b5   : > { %2896 = vmatprep.subr.bf16.mxu1 %v8334_v47  ;;  %v8412_v46 = vld [vmem:[#allocation4 + $0x6cc] ss:$24 sps:$4 sm:$0xff]   ;;  %v8407_v47 = vld [vmem:[#allocation4 + $0x6c0] ss:$24 sps:$4 sm:$0xff]  }
 0x1b7   : > { %2774 = vmatpush1.bf16.msra.mxu0 %v8329_v48  ;;  %v8410_v48 = vld [vmem:[#allocation4 + $0x6c8] ss:$24 sps:$4 sm:$0xff]  }
 0x1b8   : > { %2897 = vmatpush1.bf16.msra.mxu1 %v8332_v49  ;;  %2775 = vmatprep.subr.bf16.mxu0 %v8337_v50  ;;  %v8415_v49 = vld [vmem:[#allocation4 + $0x6f4] ss:$24 sps:$4 sm:$0xff]  }
 0x1b9   : > { %2898 = vmatprep.subr.bf16.mxu1 %v8340_v51  ;;  %v8418_v50 = vld [vmem:[#allocation4 + $0x6fc] ss:$24 sps:$4 sm:$0xff]   ;;  %v8413_v51 = vld [vmem:[#allocation4 + $0x6f0] ss:$24 sps:$4 sm:$0xff]  }
 0x1bb   : > { %2776 = vmatpush1.bf16.msra.mxu0 %v8335_v54  ;;  %v8416_v54 = vld [vmem:[#allocation4 + $0x6f8] ss:$24 sps:$4 sm:$0xff]  }
 0x1bc   : > { %2899 = vmatpush1.bf16.msra.mxu1 %v8338_v55  ;;  %2777 = vmatprep.subr.bf16.mxu0 %v8343_v56  ;;  %v8421_v55 = vld [vmem:[#allocation4 + $0x724] ss:$24 sps:$4 sm:$0xff]  }
 0x1bd   : > { %2900 = vmatprep.subr.bf16.mxu1 %v8346_v58  ;;  %v8424_v56 = vld [vmem:[#allocation4 + $0x72c] ss:$24 sps:$4 sm:$0xff]   ;;  %v8419_v58 = vld [vmem:[#allocation4 + $0x720] ss:$24 sps:$4 sm:$0xff]  }
 0x1bf   : > { %2778 = vmatpush1.bf16.msra.mxu0 %v8341_v59  ;;  %v8422_v59 = vld [vmem:[#allocation4 + $0x728] ss:$24 sps:$4 sm:$0xff]  }
 0x1c0   : > { %2901 = vmatpush1.bf16.msra.mxu1 %v8344_v60  ;;  %2779 = vmatprep.subr.bf16.mxu0 %v8349_v61  ;;  %v8427_v60 = vld [vmem:[#allocation4 + $0x754] ss:$24 sps:$4 sm:$0xff]  }
 0x1c1   : > { %2902 = vmatprep.subr.bf16.mxu1 %v8352_v62  ;;  %v8430_v61 = vld [vmem:[#allocation4 + $0x75c] ss:$24 sps:$4 sm:$0xff]   ;;  %v8425_v62 = vld [vmem:[#allocation4 + $0x750] ss:$24 sps:$4 sm:$0xff]  }
 0x1c3   : > { %2780 = vmatpush1.bf16.msra.mxu0 %v8347_v63  ;;  %v8428_v63 = vld [vmem:[#allocation4 + $0x758] ss:$24 sps:$4 sm:$0xff]  }
 0x1c4   : > { %2903 = vmatpush1.bf16.msra.mxu1 %v8350_v0  ;;  %2781 = vmatprep.subr.bf16.mxu0 %v8355_v1  ;;  %v8433_v0 = vld [vmem:[#allocation4 + $0x784] ss:$24 sps:$4 sm:$0xff]  }
 0x1c5   : > { %2904 = vmatprep.subr.bf16.mxu1 %v8358_v2  ;;  %v8436_v1 = vld [vmem:[#allocation4 + $0x78c] ss:$24 sps:$4 sm:$0xff]   ;;  %v8431_v2 = vld [vmem:[#allocation4 + $0x780] ss:$24 sps:$4 sm:$0xff]  }
 0x1c7   : > { %2782 = vmatpush1.bf16.msra.mxu0 %v8353_v3  ;;  %v8434_v3 = vld [vmem:[#allocation4 + $0x788] ss:$24 sps:$4 sm:$0xff]  }
 0x1c8   : > { %2905 = vmatpush1.bf16.msra.mxu1 %v8356_v4  ;;  %2783 = vmatprep.subr.bf16.mxu0 %v8361_v5  ;;  %v8439_v4 = vld [vmem:[#allocation4 + $0x7b4] ss:$24 sps:$4 sm:$0xff]  }
 0x1c9   : > { %2906 = vmatprep.subr.bf16.mxu1 %v8364_v6  ;;  %v8442_v5 = vld [vmem:[#allocation4 + $0x7bc] ss:$24 sps:$4 sm:$0xff]   ;;  %v8437_v6 = vld [vmem:[#allocation4 + $0x7b0] ss:$24 sps:$4 sm:$0xff]  }
 0x1cb   : > { %2784 = vmatpush1.bf16.msra.mxu0 %v8359_v7  ;;  %v8440_v7 = vld [vmem:[#allocation4 + $0x7b8] ss:$24 sps:$4 sm:$0xff]  }
 0x1cc   : > { %2907 = vmatpush1.bf16.msra.mxu1 %v8362_v8  ;;  %2785 = vmatprep.subr.bf16.mxu0 %v8367_v10  ;;  %v8445_v8 = vld [vmem:[#allocation4 + $0x7e4] ss:$24 sps:$4 sm:$0xff]  }
 0x1cd   : > { %2908 = vmatprep.subr.bf16.mxu1 %v8370_v11  ;;  %v8448_v10 = vld [vmem:[#allocation4 + $0x7ec] ss:$24 sps:$4 sm:$0xff]   ;;  %v8443_v11 = vld [vmem:[#allocation4 + $0x7e0] ss:$24 sps:$4 sm:$0xff]  }
 0x1cf   : > { %2786 = vmatpush1.bf16.msra.mxu0 %v8365_v12  ;;  %v8446_v12 = vld [vmem:[#allocation4 + $0x7e8] ss:$24 sps:$4 sm:$0xff]  }
 0x1d0   : > { %2909 = vmatpush1.bf16.msra.mxu1 %v8368_v13  ;;  %2787 = vmatprep.subr.bf16.mxu0 %v8373_v14  ;;  %v8451_v13 = vld [vmem:[#allocation4 + $0x814] ss:$24 sps:$4 sm:$0xff]  }
 0x1d1   : > { %2910 = vmatprep.subr.bf16.mxu1 %v8376_v17  ;;  %v8454_v14 = vld [vmem:[#allocation4 + $0x81c] ss:$24 sps:$4 sm:$0xff]   ;;  %v8449_v17 = vld [vmem:[#allocation4 + $0x810] ss:$24 sps:$4 sm:$0xff]  }
 0x1d3   : > { %2788 = vmatpush1.bf16.msra.mxu0 %v8371_v20  ;;  %v8452_v20 = vld [vmem:[#allocation4 + $0x818] ss:$24 sps:$4 sm:$0xff]  }
 0x1d4   : > { %2911 = vmatpush1.bf16.msra.mxu1 %v8374_v21  ;;  %2789 = vmatprep.subr.bf16.mxu0 %v8379_v22  ;;  %v8457_v21 = vld [vmem:[#allocation4 + $0x844] ss:$24 sps:$4 sm:$0xff]  }
 0x1d5   : > { %2912 = vmatprep.subr.bf16.mxu1 %v8382_v24  ;;  %v8460_v22 = vld [vmem:[#allocation4 + $0x84c] ss:$24 sps:$4 sm:$0xff]   ;;  %v8455_v24 = vld [vmem:[#allocation4 + $0x840] ss:$24 sps:$4 sm:$0xff]  }
 0x1d7   : > { %2790 = vmatpush1.bf16.msra.mxu0 %v8377_v25  ;;  %v8458_v25 = vld [vmem:[#allocation4 + $0x848] ss:$24 sps:$4 sm:$0xff]  }
 0x1d8   : > { %2913 = vmatpush1.bf16.msra.mxu1 %v8380_v26  ;;  %2800 = vmatprep.subr.bf16.mxu0 %v8385_v27  ;;  %v8463_v26 = vld [vmem:[#allocation4 + $0x874] ss:$24 sps:$4 sm:$0xff]  }
 0x1d9   : > { %2923 = vmatprep.subr.bf16.mxu1 %v8388_v28  ;;  %v8466_v27 = vld [vmem:[#allocation4 + $0x87c] ss:$24 sps:$4 sm:$0xff]   ;;  %v8461_v28 = vld [vmem:[#allocation4 + $0x870] ss:$24 sps:$4 sm:$0xff]  }
 0x1da   : > { %2792 = vmatmul.mubr.bf16.vlgmr.msra.gmra.mrb[0].mxu0 %v9933_v30 }
 0x1db   : > { %2915 = vmatmul.mubr.bf16.vlgmr.msra.gmra.mrb[0].mxu1 %v9933_v30  ;;  %2801 = vmatpush1.bf16.msra.mxu0 %v8383_v29  ;;  %v8464_v29 = vld [vmem:[#allocation4 + $0x878] ss:$24 sps:$4 sm:$0xff]  }
 0x1dc   : > { %2924 = vmatpush1.bf16.msra.mxu1 %v8386_v31  ;;  %2802 = vmatprep.subr.bf16.mxu0 %v8391_v32  ;;  %v8469_v31 = vld [vmem:[#allocation4 + $0x8a4] ss:$24 sps:$4 sm:$0xff]  }
 0x1dd   : > { %2925 = vmatprep.subr.bf16.mxu1 %v8394_v33  ;;  %2832 = vmatprep.mubr.bf16.mxu0 %v9937_v34  ;;  %v8472_v32 = vld [vmem:[#allocation4 + $0x8ac] ss:$24 sps:$4 sm:$0xff]   ;;  %v8467_v33 = vld [vmem:[#allocation4 + $0x8a0] ss:$24 sps:$4 sm:$0xff]  }
 0x1de   : > { %2955 = vmatprep.mubr.bf16.mxu1 %v9937_v34 }
 0x1df   : > { %2803 = vmatpush1.bf16.msra.mxu0 %v8389_v35  ;;  %v8470_v35 = vld [vmem:[#allocation4 + $0x8a8] ss:$24 sps:$4 sm:$0xff]  }
 0x1e0   : > { %2926 = vmatpush1.bf16.msra.mxu1 %v8392_v36  ;;  %2804 = vmatprep.subr.bf16.mxu0 %v8397_v37  ;;  %v9943_v36 = vld [vmem:[#allocation4 + $0x8d4] ss:$24 sps:$4 sm:$0xff]  }
 0x1e1   : > { %2927 = vmatprep.subr.bf16.mxu1 %v8400_v38  ;;  %v8478_v37 = vld [vmem:[#allocation4 + $0x8dc] ss:$24 sps:$4 sm:$0xff]   ;;  %v9945_v38 = vld [vmem:[#allocation4 + $0x8d0] ss:$24 sps:$4 sm:$0xff]  }
 0x1e3   : > { %2805 = vmatpush1.bf16.msra.mxu0 %v8395_v39  ;;  %v8476_v39 = vld [vmem:[#allocation4 + $0x8d8] ss:$24 sps:$4 sm:$0xff]  }
 0x1e4   : > { %2928 = vmatpush1.bf16.msra.mxu1 %v8398_v40  ;;  %2806 = vmatprep.subr.bf16.mxu0 %v8403_v41  ;;  %v9947_v40 = vld [vmem:[#allocation4 + $0x14] ss:$24 sps:$4 sm:$0xff]   ;;  %v9952_v41 = vpack.c.bf16 %v9921_v19, %v9921_v19  ;;  %v10111_v19 = vld [vmem:[#allocation4 + $0x280] ss:$24 sps:$4 sm:$0xff]  }
 0x1e5   : > { %2929 = vmatprep.subr.bf16.mxu1 %v8406_v42  ;;  %v9955_v42 = vld [vmem:[#allocation4 + $0x10] ss:$24 sps:$4 sm:$0xff]   ;;  %12624 = vst [vmem:[#allocation34_spill] sm:$0xff] %v10111_v19 }
 0x1e7   : > { %2807 = vmatpush1.bf16.msra.mxu0 %v8401_v43  ;;  %v9957_v43 = vld [vmem:[#allocation4 + $0x44] ss:$24 sps:$4 sm:$0xff]  }
 0x1e8   : > { %2930 = vmatpush1.bf16.msra.mxu1 %v8404_v44  ;;  %2808 = vmatprep.subr.bf16.mxu0 %v8409_v45  ;;  %v9960_v44 = vld [vmem:[#allocation4 + $0x4] ss:$24 sps:$4 sm:$0xff]   ;;  %v9966_v45 = vld [vmem:[#allocation4 + $0x40] ss:$24 sps:$4 sm:$0xff]  }
 0x1e9   : > { %2931 = vmatprep.subr.bf16.mxu1 %v8412_v46  ;;  %v9968_v46 = vld [vmem:[#allocation4 + $0x74] ss:$24 sps:$4 sm:$0xff]  }
 0x1eb   : > { %2809 = vmatpush1.bf16.msra.mxu0 %v8407_v47  ;;  %v9972_v47 = vld [vmem:[#allocation4] ss:$24 sps:$4 sm:$0xff]  }
 0x1ec   : > { %2932 = vmatpush1.bf16.msra.mxu1 %v8410_v48  ;;  %2810 = vmatprep.subr.bf16.mxu0 %v8415_v49  ;;  %v9975_v48 = vld [vmem:[#allocation4 + $0x34] ss:$24 sps:$4 sm:$0xff]   ;;  %v9979_v49 = vld [vmem:[#allocation4 + $0x70] ss:$24 sps:$4 sm:$0xff]  }
 0x1ed   : > { %2933 = vmatprep.subr.bf16.mxu1 %v8418_v50  ;;  %v9981_v50 = vld [vmem:[#allocation4 + $0xa4] ss:$24 sps:$4 sm:$0xff]  }
 0x1ef   : > { %2811 = vmatpush1.bf16.msra.mxu0 %v8413_v51  ;;  %v9984_v51 = vld [vmem:[#allocation4 + $0x30] ss:$24 sps:$4 sm:$0xff]  }
 0x1f0   : > { %2934 = vmatpush1.bf16.msra.mxu1 %v8416_v54  ;;  %2812 = vmatprep.subr.bf16.mxu0 %v8421_v55  ;;  %v9991_v54 = vld [vmem:[#allocation4 + $0xa0] ss:$24 sps:$4 sm:$0xff]   ;;  %v9993_v55 = vld [vmem:[#allocation4 + $0xd4] ss:$24 sps:$4 sm:$0xff]  }
 0x1f1   : > { %2935 = vmatprep.subr.bf16.mxu1 %v8424_v56  ;;  %v9996_v56 = vld [vmem:[#allocation4 + $0x60] ss:$24 sps:$4 sm:$0xff]  }
 0x1f3   : > { %2813 = vmatpush1.bf16.msra.mxu0 %v8419_v58  ;;  %v9999_v58 = vld [vmem:[#allocation4 + $0x94] ss:$24 sps:$4 sm:$0xff]  }
 0x1f4   : > { %2936 = vmatpush1.bf16.msra.mxu1 %v8422_v59  ;;  %2814 = vmatprep.subr.bf16.mxu0 %v8427_v60  ;;  %v10003_v59 = vld [vmem:[#allocation4 + $0xd0] ss:$24 sps:$4 sm:$0xff]   ;;  %v10005_v60 = vld [vmem:[#allocation4 + $0x104] ss:$24 sps:$4 sm:$0xff]  }
 0x1f5   : > { %2937 = vmatprep.subr.bf16.mxu1 %v8430_v61  ;;  %v10008_v61 = vld [vmem:[#allocation4 + $0x90] ss:$24 sps:$4 sm:$0xff]  }
 0x1f7   : > { %2815 = vmatpush1.bf16.msra.mxu0 %v8425_v62  ;;  %v10011_v62 = vld [vmem:[#allocation4 + $0xc4] ss:$24 sps:$4 sm:$0xff]  }
 0x1f8   : > { %2938 = vmatpush1.bf16.msra.mxu1 %v8428_v63  ;;  %2816 = vmatprep.subr.bf16.mxu0 %v8433_v0  ;;  %v10015_v63 = vld [vmem:[#allocation4 + $0x100] ss:$24 sps:$4 sm:$0xff]   ;;  %v10017_v0 = vld [vmem:[#allocation4 + $0x134] ss:$24 sps:$4 sm:$0xff]  }
 0x1f9   : > { %2939 = vmatprep.subr.bf16.mxu1 %v8436_v1  ;;  %v10020_v1 = vld [vmem:[#allocation4 + $0xc0] ss:$24 sps:$4 sm:$0xff]  }
 0x1fb   : > { %2817 = vmatpush1.bf16.msra.mxu0 %v8431_v2  ;;  %v10023_v2 = vld [vmem:[#allocation4 + $0xf4] ss:$24 sps:$4 sm:$0xff]  }
 0x1fc   : > { %2940 = vmatpush1.bf16.msra.mxu1 %v8434_v3  ;;  %2818 = vmatprep.subr.bf16.mxu0 %v8439_v4  ;;  %v10027_v3 = vld [vmem:[#allocation4 + $0x130] ss:$24 sps:$4 sm:$0xff]   ;;  %v10029_v4 = vld [vmem:[#allocation4 + $0x164] ss:$24 sps:$4 sm:$0xff]  }
 0x1fd   : > { %2941 = vmatprep.subr.bf16.mxu1 %v8442_v5  ;;  %v10032_v5 = vld [vmem:[#allocation4 + $0xf0] ss:$24 sps:$4 sm:$0xff]  }
 0x1ff   : > { %2819 = vmatpush1.bf16.msra.mxu0 %v8437_v6  ;;  %v10035_v6 = vld [vmem:[#allocation4 + $0x124] ss:$24 sps:$4 sm:$0xff]  }
 0x200   : > { %2942 = vmatpush1.bf16.msra.mxu1 %v8440_v7  ;;  %2820 = vmatprep.subr.bf16.mxu0 %v8445_v8  ;;  %v10039_v7 = vld [vmem:[#allocation4 + $0x160] ss:$24 sps:$4 sm:$0xff]   ;;  %v10041_v8 = vld [vmem:[#allocation4 + $0x194] ss:$24 sps:$4 sm:$0xff]  }
 0x201   : > { %2943 = vmatprep.subr.bf16.mxu1 %v8448_v10  ;;  %v10044_v10 = vld [vmem:[#allocation4 + $0x120] ss:$24 sps:$4 sm:$0xff]  }
 0x203   : > { %2821 = vmatpush1.bf16.msra.mxu0 %v8443_v11  ;;  %v10047_v11 = vld [vmem:[#allocation4 + $0x154] ss:$24 sps:$4 sm:$0xff]  }
 0x204   : > { %2944 = vmatpush1.bf16.msra.mxu1 %v8446_v12  ;;  %2822 = vmatprep.subr.bf16.mxu0 %v8451_v13  ;;  %v10051_v12 = vld [vmem:[#allocation4 + $0x190] ss:$24 sps:$4 sm:$0xff]   ;;  %v10053_v13 = vld [vmem:[#allocation4 + $0x1c4] ss:$24 sps:$4 sm:$0xff]  }
 0x205   : > { %2945 = vmatprep.subr.bf16.mxu1 %v8454_v14  ;;  %v10056_v14 = vld [vmem:[#allocation4 + $0x150] ss:$24 sps:$4 sm:$0xff]  }
 0x207   : > { %2823 = vmatpush1.bf16.msra.mxu0 %v8449_v17  ;;  %v10059_v17 = vld [vmem:[#allocation4 + $0x184] ss:$24 sps:$4 sm:$0xff]  }
 0x208   : > { %2946 = vmatpush1.bf16.msra.mxu1 %v8452_v20  ;;  %2824 = vmatprep.subr.bf16.mxu0 %v8457_v21  ;;  %v10063_v20 = vld [vmem:[#allocation4 + $0x1c0] ss:$24 sps:$4 sm:$0xff]   ;;  %v10066_v21 = vld [vmem:[#allocation4 + $0x1f4] ss:$24 sps:$4 sm:$0xff]  }
 0x209   : > { %2947 = vmatprep.subr.bf16.mxu1 %v8460_v22  ;;  %v10068_v22 = vld [vmem:[#allocation4 + $0x180] ss:$24 sps:$4 sm:$0xff]  }
 0x20b   : > { %2825 = vmatpush1.bf16.msra.mxu0 %v8455_v24  ;;  %v10071_v24 = vld [vmem:[#allocation4 + $0x1b4] ss:$24 sps:$4 sm:$0xff]  }
 0x20c   : > { %2948 = vmatpush1.bf16.msra.mxu1 %v8458_v25  ;;  %2826 = vmatprep.subr.bf16.mxu0 %v8463_v26  ;;  %v10075_v25 = vld [vmem:[#allocation4 + $0x1f0] ss:$24 sps:$4 sm:$0xff]   ;;  %v10078_v26 = vld [vmem:[#allocation4 + $0x224] ss:$24 sps:$4 sm:$0xff]  }
 0x20d   : > { %2949 = vmatprep.subr.bf16.mxu1 %v8466_v27  ;;  %v10080_v27 = vld [vmem:[#allocation4 + $0x1b0] ss:$24 sps:$4 sm:$0xff]  }
 0x20f   : > { %2827 = vmatpush1.bf16.msra.mxu0 %v8461_v28  ;;  %v10083_v28 = vld [vmem:[#allocation4 + $0x1e4] ss:$24 sps:$4 sm:$0xff]  }
 0x210   : > { %2950 = vmatpush1.bf16.msra.mxu1 %v8464_v29  ;;  %2828 = vmatprep.subr.bf16.mxu0 %v8469_v31  ;;  %v10087_v29 = vld [vmem:[#allocation4 + $0x220] ss:$24 sps:$4 sm:$0xff]   ;;  %v10090_v31 = vld [vmem:[#allocation4 + $0x254] ss:$24 sps:$4 sm:$0xff]  }
 0x211   : > { %2951 = vmatprep.subr.bf16.mxu1 %v8472_v32  ;;  %v10092_v32 = vld [vmem:[#allocation4 + $0x1e0] ss:$24 sps:$4 sm:$0xff]  }
 0x213   : > { %2829 = vmatpush1.bf16.msra.mxu0 %v8467_v33  ;;  %v10095_v33 = vld [vmem:[#allocation4 + $0x214] ss:$24 sps:$4 sm:$0xff]  }
 0x214   : > { %2952 = vmatpush1.bf16.msra.mxu1 %v8470_v35  ;;  %2830 = vmatprep.subr.bf16.mxu0 %v9943_v36  ;;  %v10099_v35 = vld [vmem:[#allocation4 + $0x250] ss:$24 sps:$4 sm:$0xff]  }
 0x215   : > { %2953 = vmatprep.subr.bf16.mxu1 %v8478_v37  ;;  %12621 = vst [vmem:[#allocation31_spill] sm:$0xff] %v10099_v35  ;;  %v10102_v37 = vld [vmem:[#allocation4 + $0x284] ss:$24 sps:$4 sm:$0xff]  }
 0x216   : > { %12622 = vst [vmem:[#allocation32_spill] sm:$0xff] %v10102_v37 }
 0x217   : > { %2831 = vmatpush1.bf16.msra.mxu0 %v9945_v38 }
 0x218   : > { %2954 = vmatpush1.bf16.msra.mxu1 %v8476_v39  ;;  %2964 = vmatprep.subr.bf16.mxu0 %v9947_v40  ;;  %v10104_v39 = vld [vmem:[#allocation4 + $0x210] ss:$24 sps:$4 sm:$0xff]  }
 0x219   : > { %3093 = vmatprep.subr.bf16.mxu1 %v9960_v44 }
 0x21a   : > { %2833 = vmatmul.mubr.bf16.vlgmr.msra.gmra.mrb[0].mxu0 %v9952_v41 }
 0x21b   : > { %2956 = vmatmul.mubr.bf16.vlgmr.msra.gmra.mrb[0].mxu1 %v9952_v41  ;;  %2965 = vmatpush1.bf16.msra.mxu0 %v9955_v42 }
 0x21c   : > { %2996 = vmatprep.mubr.bf16.mxu0 %v9903_v57  ;;  %2966 = vmatprep.subr.bf16.mxu0 %v9957_v43  ;;  %v9987_v57 = vld [vmem:[#allocation4 + $0x64] ss:$24 sps:$4 sm:$0xff]  }
 0x21d   : > { %3094 = vmatpush1.bf16.msra.mxu1 %v9972_v47 }
 0x21e   : > { %3095 = vmatprep.subr.bf16.mxu1 %v9975_v48 }
 0x21f   : > { %2967 = vmatpush1.bf16.msra.mxu0 %v9966_v45 }
 0x220   : > { %2968 = vmatprep.subr.bf16.mxu0 %v9968_v46 }
 0x221   : > { %3096 = vmatpush1.bf16.msra.mxu1 %v9984_v51 }
 0x222   : > { %3097 = vmatprep.subr.bf16.mxu1 %v9987_v57 }
 0x223   : > { %2969 = vmatpush1.bf16.msra.mxu0 %v9979_v49 }
 0x224   : > { %2970 = vmatprep.subr.bf16.mxu0 %v9981_v50 }
 0x225   : > { %3098 = vmatpush1.bf16.msra.mxu1 %v9996_v56 }
 0x226   : > { %3099 = vmatprep.subr.bf16.mxu1 %v9999_v58 }
 0x227   : > { %2971 = vmatpush1.bf16.msra.mxu0 %v9991_v54 }
 0x228   : > { %2972 = vmatprep.subr.bf16.mxu0 %v9993_v55 }
 0x229   : > { %3100 = vmatpush1.bf16.msra.mxu1 %v10008_v61 }
 0x22a   : > { %3101 = vmatprep.subr.bf16.mxu1 %v10011_v62 }
 0x22b   : > { %2973 = vmatpush1.bf16.msra.mxu0 %v10003_v59 }
 0x22c   : > { %2974 = vmatprep.subr.bf16.mxu0 %v10005_v60 }
 0x22d   : > { %3102 = vmatpush1.bf16.msra.mxu1 %v10020_v1 }
 0x22e   : > { %3103 = vmatprep.subr.bf16.mxu1 %v10023_v2 }
 0x22f   : > { %2975 = vmatpush1.bf16.msra.mxu0 %v10015_v63 }
 0x230   : > { %2976 = vmatprep.subr.bf16.mxu0 %v10017_v0 }
 0x231   : > { %3104 = vmatpush1.bf16.msra.mxu1 %v10032_v5 }
 0x232   : > { %3105 = vmatprep.subr.bf16.mxu1 %v10035_v6 }
 0x233   : > { %2977 = vmatpush1.bf16.msra.mxu0 %v10027_v3 }
 0x234   : > { %2978 = vmatprep.subr.bf16.mxu0 %v10029_v4 }
 0x235   : > { %3106 = vmatpush1.bf16.msra.mxu1 %v10044_v10 }
 0x236   : > { %3107 = vmatprep.subr.bf16.mxu1 %v10047_v11 }
 0x237   : > { %2979 = vmatpush1.bf16.msra.mxu0 %v10039_v7 }
 0x238   : > { %2980 = vmatprep.subr.bf16.mxu0 %v10041_v8 }
 0x239   : > { %3108 = vmatpush1.bf16.msra.mxu1 %v10056_v14 }
 0x23a   : > { %3109 = vmatprep.subr.bf16.mxu1 %v10059_v17 }
 0x23b   : > { %2981 = vmatpush1.bf16.msra.mxu0 %v10051_v12 }
 0x23c   : > { %2982 = vmatprep.subr.bf16.mxu0 %v10053_v13 }
 0x23d   : > { %3110 = vmatpush1.bf16.msra.mxu1 %v10068_v22 }
 0x23e   : > { %3111 = vmatprep.subr.bf16.mxu1 %v10071_v24 }
 0x23f   : > { %2983 = vmatpush1.bf16.msra.mxu0 %v10063_v20 }
 0x240   : > { %2984 = vmatprep.subr.bf16.mxu0 %v10066_v21 }
 0x241   : > { %3112 = vmatpush1.bf16.msra.mxu1 %v10080_v27 }
 0x242   : > { %3113 = vmatprep.subr.bf16.mxu1 %v10083_v28 }
 0x243   : > { %2985 = vmatpush1.bf16.msra.mxu0 %v10075_v25 }
 0x244   : > { %2986 = vmatprep.subr.bf16.mxu0 %v10078_v26 }
 0x245   : > { %3114 = vmatpush1.bf16.msra.mxu1 %v10092_v32 }
 0x246   : > { %3115 = vmatprep.subr.bf16.mxu1 %v10095_v33 }
 0x247   : > { %2987 = vmatpush1.bf16.msra.mxu0 %v10087_v29 }
 0x248   : > { %2988 = vmatprep.subr.bf16.mxu0 %v10090_v31 }
 0x249   : > { %3116 = vmatpush1.bf16.msra.mxu1 %v10104_v39 }
 0x24a   : > { %3117 = vmatprep.subr.bf16.mxu1 %v10107_v16  ;;  %v10128_v16 = vld [vmem:[#allocation4 + $0x270] ss:$24 sps:$4 sm:$0xff]  }
 0x24b   : > { %2989 = vmatpush1.bf16.msra.mxu0 %v10099_v35  ;;  %v10126_v35 = vld [vmem:[#allocation4 + $0x2e4] ss:$24 sps:$4 sm:$0xff]   ;;  %12630 = vst [vmem:[#allocation40_spill] sm:$0xff] %v10128_v16 }
 0x24c   : > { %2990 = vmatprep.subr.bf16.mxu0 %v10102_v37  ;;  %12629 = vst [vmem:[#allocation39_spill] sm:$0xff] %v10126_v35  ;;  %v10131_v37 = vld [vmem:[#allocation4 + $0x2a4] ss:$24 sps:$4 sm:$0xff]  }
 0x24d   : > { %3118 = vmatpush1.bf16.msra.mxu1 %v10116_v52  ;;  %12631 = vst [vmem:[#allocation41_spill] sm:$0xff] %v10131_v37  ;;  %v10135_v52 = vld [vmem:[#allocation4 + $0x2e0] ss:$24 sps:$4 sm:$0xff]  }
 0x24e   : > { %3119 = vmatprep.subr.bf16.mxu1 %v10119_v53  ;;  %12632 = vst [vmem:[#allocation42_spill] sm:$0xff] %v10135_v52  ;;  %v10140_v53 = vld [vmem:[#allocation4 + $0x2a0] ss:$24 sps:$4 sm:$0xff]  }
 0x24f   : > { %2991 = vmatpush1.bf16.msra.mxu0 %v10111_v19  ;;  %v10138_v19 = vld [vmem:[#allocation4 + $0x314] ss:$24 sps:$4 sm:$0xff]  }
 0x250   : > { %2992 = vmatprep.subr.bf16.mxu0 %v10114_v15  ;;  %12633 = vst [vmem:[#allocation43_spill] sm:$0xff] %v10138_v19  ;;  %v10143_v15 = vld [vmem:[#allocation4 + $0x2d4] ss:$24 sps:$4 sm:$0xff]  }
 0x251   : > { %3120 = vmatpush1.bf16.msra.mxu1 %v10128_v16  ;;  %12634 = vst [vmem:[#allocation44_spill] sm:$0xff] %v10143_v15  ;;  %v10147_v16 = vld [vmem:[#allocation4 + $0x310] ss:$24 sps:$4 sm:$0xff]  }
 0x252   : > { %3121 = vmatprep.subr.bf16.mxu1 %v10131_v37  ;;  %12635 = vst [vmem:[#allocation45_spill] sm:$0xff] %v10147_v16  ;;  %v10152_v37 = vld [vmem:[#allocation4 + $0x2d0] ss:$24 sps:$4 sm:$0xff]  }
 0x253   : > { %2993 = vmatpush1.bf16.msra.mxu0 %v10123_v9  ;;  %v10150_v9 = vld [vmem:[#allocation4 + $0x344] ss:$24 sps:$4 sm:$0xff]   ;;  %12637 = vst [vmem:[#allocation47_spill] sm:$0xff] %v10152_v37 }
 0x254   : > { %2994 = vmatprep.subr.bf16.mxu0 %v10126_v35  ;;  %12636 = vst [vmem:[#allocation46_spill] sm:$0xff] %v10150_v9  ;;  %v10155_v35 = vld [vmem:[#allocation4 + $0x304] ss:$24 sps:$4 sm:$0xff]  }
 0x255   : > { %3122 = vmatpush1.bf16.msra.mxu1 %v10140_v53  ;;  %12638 = vst [vmem:[#allocation48_spill] sm:$0xff] %v10155_v35 }
 0x256   : > { %3123 = vmatprep.subr.bf16.mxu1 %v10143_v15  ;;  %v10160_v15 = vld [vmem:[#allocation4 + $0x340] ss:$24 sps:$4 sm:$0xff]  }
 0x257   : > { %2995 = vmatpush1.bf16.msra.mxu0 %v10135_v52  ;;  %12639 = vst [vmem:[#allocation49_spill] sm:$0xff] %v10160_v15  ;;  %v10167_v52 = vld [vmem:[#allocation4 + $0x370] ss:$24 sps:$4 sm:$0xff]  }
 0x258   : > { %3005 = vmatprep.subr.bf16.mxu0 %v10138_v19  ;;  %v10164_v19 = vld [vmem:[#allocation4 + $0x374] ss:$24 sps:$4 sm:$0xff]   ;;  %12641 = vst [vmem:[#allocation51_spill] sm:$0xff] %v10167_v52 }
 0x259   : > { %3124 = vmatpush1.bf16.msra.mxu1 %v10152_v37  ;;  %12640 = vst [vmem:[#allocation50_spill] sm:$0xff] %v10164_v19  ;;  %v10170_v37 = vld [vmem:[#allocation4 + $0x3a4] ss:$24 sps:$4 sm:$0xff]  }
 0x25a   : > { %3134 = vmatprep.subr.bf16.mxu1 %v10155_v35  ;;  %2997 = vmatmul.mubr.bf16.vlgmr.msra.gmra.mrb[4].mxu0 %v9919_v18  ;;  %12642 = vst [vmem:[#allocation52_spill] sm:$0xff] %v10170_v37  ;;  %v10173_v18 = vld [vmem:[#allocation4 + $0x3a0] ss:$24 sps:$4 sm:$0xff]   ;;  %v10400_v35 = vld [vmem:[#allocation4 + $0x12c] ss:$24 sps:$4 sm:$0xff]  }
 0x25b   : > { %3006 = vmatpush1.bf16.msra.mxu0 %v10147_v16  ;;  %3037 = vmatprep.mubr.bf16.mxu0 %v9925_v23  ;;  %12643 = vst [vmem:[#allocation53_spill] sm:$0xff] %v10173_v18  ;;  %v10176_v16 = vld [vmem:[#allocation4 + $0x3d4] ss:$24 sps:$4 sm:$0xff]   ;;  %v10179_v23 = vld [vmem:[#allocation4 + $0x3d0] ss:$24 sps:$4 sm:$0xff]   ;;  %12714 = vst [vmem:[#allocation124_spill] sm:$0xff] %v10400_v35 }
 0x25c   : > { %3007 = vmatprep.subr.bf16.mxu0 %v10150_v9  ;;  %12644 = vst [vmem:[#allocation54_spill] sm:$0xff] %v10176_v16  ;;  %12645 = vst [vmem:[#allocation55_spill] sm:$0xff] %v10179_v23 }
 0x25f   : > { %3008 = vmatpush1.bf16.msra.mxu0 %v10160_v15  ;;  %v10182_v15 = vld [vmem:[#allocation4 + $0x404] ss:$24 sps:$4 sm:$0xff]  }
 0x260   : > { %3009 = vmatprep.subr.bf16.mxu0 %v10164_v19  ;;  %12646 = vst [vmem:[#allocation56_spill] sm:$0xff] %v10182_v15  ;;  %v10185_v19 = vld [vmem:[#allocation4 + $0x400] ss:$24 sps:$4 sm:$0xff]  }
 0x261   : > { %12647 = vst [vmem:[#allocation57_spill] sm:$0xff] %v10185_v19 }
 0x263   : > { %3010 = vmatpush1.bf16.msra.mxu0 %v10167_v52  ;;  %v10188_v52 = vld [vmem:[#allocation4 + $0x434] ss:$24 sps:$4 sm:$0xff]  }
 0x264   : > { %3011 = vmatprep.subr.bf16.mxu0 %v10170_v37  ;;  %12648 = vst [vmem:[#allocation58_spill] sm:$0xff] %v10188_v52  ;;  %v10191_v37 = vld [vmem:[#allocation4 + $0x430] ss:$24 sps:$4 sm:$0xff]  }
 0x265   : > { %12649 = vst [vmem:[#allocation59_spill] sm:$0xff] %v10191_v37 }
 0x267   : > { %3012 = vmatpush1.bf16.msra.mxu0 %v10173_v18  ;;  %v10194_v18 = vld [vmem:[#allocation4 + $0x464] ss:$24 sps:$4 sm:$0xff]  }
 0x268   : > { %3013 = vmatprep.subr.bf16.mxu0 %v10176_v16  ;;  %12650 = vst [vmem:[#allocation60_spill] sm:$0xff] %v10194_v18  ;;  %v10197_v16 = vld [vmem:[#allocation4 + $0x460] ss:$24 sps:$4 sm:$0xff]  }
 0x269   : > { %12651 = vst [vmem:[#allocation61_spill] sm:$0xff] %v10197_v16 }
 0x26b   : > { %3014 = vmatpush1.bf16.msra.mxu0 %v10179_v23  ;;  %v10200_v23 = vld [vmem:[#allocation4 + $0x494] ss:$24 sps:$4 sm:$0xff]  }
 0x26c   : > { %3015 = vmatprep.subr.bf16.mxu0 %v10182_v15  ;;  %12652 = vst [vmem:[#allocation62_spill] sm:$0xff] %v10200_v23  ;;  %v10203_v15 = vld [vmem:[#allocation4 + $0x490] ss:$24 sps:$4 sm:$0xff]  }
 0x26d   : > { %12653 = vst [vmem:[#allocation63_spill] sm:$0xff] %v10203_v15 }
 0x26f   : > { %3016 = vmatpush1.bf16.msra.mxu0 %v10185_v19  ;;  %v10206_v19 = vld [vmem:[#allocation4 + $0x4c4] ss:$24 sps:$4 sm:$0xff]  }
 0x270   : > { %3017 = vmatprep.subr.bf16.mxu0 %v10188_v52  ;;  %12654 = vst [vmem:[#allocation64_spill] sm:$0xff] %v10206_v19  ;;  %v10209_v52 = vld [vmem:[#allocation4 + $0x4c0] ss:$24 sps:$4 sm:$0xff]  }
 0x271   : > { %12655 = vst [vmem:[#allocation65_spill] sm:$0xff] %v10209_v52 }
 0x273   : > { %3018 = vmatpush1.bf16.msra.mxu0 %v10191_v37  ;;  %v10212_v37 = vld [vmem:[#allocation4 + $0x4f4] ss:$24 sps:$4 sm:$0xff]  }
 0x274   : > { %3019 = vmatprep.subr.bf16.mxu0 %v10194_v18  ;;  %12656 = vst [vmem:[#allocation66_spill] sm:$0xff] %v10212_v37  ;;  %v10215_v18 = vld [vmem:[#allocation4 + $0x4f0] ss:$24 sps:$4 sm:$0xff]  }
 0x275   : > { %12657 = vst [vmem:[#allocation67_spill] sm:$0xff] %v10215_v18 }
 0x277   : > { %3020 = vmatpush1.bf16.msra.mxu0 %v10197_v16  ;;  %v10218_v16 = vld [vmem:[#allocation4 + $0x524] ss:$24 sps:$4 sm:$0xff]  }
 0x278   : > { %3021 = vmatprep.subr.bf16.mxu0 %v10200_v23  ;;  %12658 = vst [vmem:[#allocation68_spill] sm:$0xff] %v10218_v16  ;;  %v10221_v23 = vld [vmem:[#allocation4 + $0x520] ss:$24 sps:$4 sm:$0xff]  }
 0x279   : > { %12659 = vst [vmem:[#allocation69_spill] sm:$0xff] %v10221_v23 }
 0x27b   : > { %3022 = vmatpush1.bf16.msra.mxu0 %v10203_v15  ;;  %v10224_v15 = vld [vmem:[#allocation4 + $0x554] ss:$24 sps:$4 sm:$0xff]  }
 0x27c   : > { %3023 = vmatprep.subr.bf16.mxu0 %v10206_v19  ;;  %12660 = vst [vmem:[#allocation70_spill] sm:$0xff] %v10224_v15  ;;  %v10227_v19 = vld [vmem:[#allocation4 + $0x550] ss:$24 sps:$4 sm:$0xff]  }
 0x27d   : > { %12661 = vst [vmem:[#allocation71_spill] sm:$0xff] %v10227_v19 }
 0x27f   : > { %3024 = vmatpush1.bf16.msra.mxu0 %v10209_v52  ;;  %v10230_v52 = vld [vmem:[#allocation4 + $0x584] ss:$24 sps:$4 sm:$0xff]  }
 0x280   : > { %3025 = vmatprep.subr.bf16.mxu0 %v10212_v37  ;;  %12662 = vst [vmem:[#allocation72_spill] sm:$0xff] %v10230_v52  ;;  %v10233_v37 = vld [vmem:[#allocation4 + $0x580] ss:$24 sps:$4 sm:$0xff]  }
 0x281   : > { %12663 = vst [vmem:[#allocation73_spill] sm:$0xff] %v10233_v37 }
 0x283   : > { %3026 = vmatpush1.bf16.msra.mxu0 %v10215_v18  ;;  %v10236_v18 = vld [vmem:[#allocation4 + $0x5b4] ss:$24 sps:$4 sm:$0xff]  }
 0x284   : > { %3027 = vmatprep.subr.bf16.mxu0 %v10218_v16  ;;  %12664 = vst [vmem:[#allocation74_spill] sm:$0xff] %v10236_v18  ;;  %v10239_v16 = vld [vmem:[#allocation4 + $0x5b0] ss:$24 sps:$4 sm:$0xff]  }
 0x285   : > { %12665 = vst [vmem:[#allocation75_spill] sm:$0xff] %v10239_v16 }
 0x287   : > { %3028 = vmatpush1.bf16.msra.mxu0 %v10221_v23  ;;  %v10242_v23 = vld [vmem:[#allocation4 + $0x5e4] ss:$24 sps:$4 sm:$0xff]  }
 0x288   : > { %3029 = vmatprep.subr.bf16.mxu0 %v10224_v15  ;;  %12666 = vst [vmem:[#allocation76_spill] sm:$0xff] %v10242_v23  ;;  %v10245_v15 = vld [vmem:[#allocation4 + $0x5e0] ss:$24 sps:$4 sm:$0xff]  }
 0x289   : > { %12667 = vst [vmem:[#allocation77_spill] sm:$0xff] %v10245_v15 }
 0x28b   : > { %3030 = vmatpush1.bf16.msra.mxu0 %v10227_v19  ;;  %v10248_v19 = vld [vmem:[#allocation4 + $0x614] ss:$24 sps:$4 sm:$0xff]  }
 0x28c   : > { %3031 = vmatprep.subr.bf16.mxu0 %v10230_v52  ;;  %12668 = vst [vmem:[#allocation78_spill] sm:$0xff] %v10248_v19  ;;  %v10251_v52 = vld [vmem:[#allocation4 + $0x610] ss:$24 sps:$4 sm:$0xff]  }
 0x28d   : > { %12669 = vst [vmem:[#allocation79_spill] sm:$0xff] %v10251_v52 }
 0x28f   : > { %3032 = vmatpush1.bf16.msra.mxu0 %v10233_v37  ;;  %v10254_v37 = vld [vmem:[#allocation4 + $0x644] ss:$24 sps:$4 sm:$0xff]  }
 0x290   : > { %3033 = vmatprep.subr.bf16.mxu0 %v10236_v18  ;;  %12670 = vst [vmem:[#allocation80_spill] sm:$0xff] %v10254_v37  ;;  %v10258_v18 = vld [vmem:[#allocation4 + $0x640] ss:$24 sps:$4 sm:$0xff]  }
 0x291   : > { %12671 = vst [vmem:[#allocation81_spill] sm:$0xff] %v10258_v18 }
 0x293   : > { %3034 = vmatpush1.bf16.msra.mxu0 %v10239_v16  ;;  %v10393_v16 = vld [vmem:[#allocation4 + $0xf8] ss:$24 sps:$4 sm:$0xff]  }
 0x294   : > { %3035 = vmatprep.subr.bf16.mxu0 %v10242_v23  ;;  %v10262_v23 = vld [vmem:[#allocation4 + $0x674] ss:$24 sps:$4 sm:$0xff]   ;;  %12713 = vst [vmem:[#allocation123_spill] sm:$0xff] %v10393_v16 }
 0x295   : > { %12672 = vst [vmem:[#allocation82_spill] sm:$0xff] %v10262_v23 }
 0x297   : > { %3036 = vmatpush1.bf16.msra.mxu0 %v10245_v15  ;;  %v10265_v15 = vld [vmem:[#allocation4 + $0x670] ss:$24 sps:$4 sm:$0xff]  }
 0x298   : > { %3046 = vmatprep.subr.bf16.mxu0 %v10248_v19  ;;  %12673 = vst [vmem:[#allocation83_spill] sm:$0xff] %v10265_v15  ;;  %v10268_v19 = vld [vmem:[#allocation4 + $0x6a4] ss:$24 sps:$4 sm:$0xff]  }
 0x299   : > { %12674 = vst [vmem:[#allocation84_spill] sm:$0xff] %v10268_v19 }
 0x29a   : > { %3038 = vmatmul.mubr.bf16.vlgmr.msra.gmra.mrb[4].mxu0 %v9933_v30  ;;  %v10271_v30 = vld [vmem:[#allocation4 + $0x6a0] ss:$24 sps:$4 sm:$0xff]  }
 0x29b   : > { %3047 = vmatpush1.bf16.msra.mxu0 %v10251_v52  ;;  %3078 = vmatprep.mubr.bf16.mxu0 %v9937_v34  ;;  %12675 = vst [vmem:[#allocation85_spill] sm:$0xff] %v10271_v30  ;;  %v10274_v52 = vld [vmem:[#allocation4 + $0x6d4] ss:$24 sps:$4 sm:$0xff]   ;;  %v10277_v34 = vld [vmem:[#allocation4 + $0x6d0] ss:$24 sps:$4 sm:$0xff]  }
 0x29c   : > { %3048 = vmatprep.subr.bf16.mxu0 %v10254_v37  ;;  %12676 = vst [vmem:[#allocation86_spill] sm:$0xff] %v10274_v52  ;;  %12677 = vst [vmem:[#allocation87_spill] sm:$0xff] %v10277_v34 }
 0x29f   : > { %3049 = vmatpush1.bf16.msra.mxu0 %v10258_v18  ;;  %v10280_v18 = vld [vmem:[#allocation4 + $0x704] ss:$24 sps:$4 sm:$0xff]  }
 0x2a0   : > { %3050 = vmatprep.subr.bf16.mxu0 %v10262_v23  ;;  %12678 = vst [vmem:[#allocation88_spill] sm:$0xff] %v10280_v18  ;;  %v10283_v23 = vld [vmem:[#allocation4 + $0x700] ss:$24 sps:$4 sm:$0xff]  }
 0x2a1   : > { %12679 = vst [vmem:[#allocation89_spill] sm:$0xff] %v10283_v23 }
 0x2a3   : > { %3051 = vmatpush1.bf16.msra.mxu0 %v10265_v15  ;;  %v10286_v15 = vld [vmem:[#allocation4 + $0x734] ss:$24 sps:$4 sm:$0xff]  }
 0x2a4   : > { %3052 = vmatprep.subr.bf16.mxu0 %v10268_v19  ;;  %12680 = vst [vmem:[#allocation90_spill] sm:$0xff] %v10286_v15  ;;  %v10289_v19 = vld [vmem:[#allocation4 + $0x730] ss:$24 sps:$4 sm:$0xff]  }
 0x2a5   : > { %12681 = vst [vmem:[#allocation91_spill] sm:$0xff] %v10289_v19 }
 0x2a7   : > { %3053 = vmatpush1.bf16.msra.mxu0 %v10271_v30  ;;  %v10292_v30 = vld [vmem:[#allocation4 + $0x764] ss:$24 sps:$4 sm:$0xff]  }
 0x2a8   : > { %3054 = vmatprep.subr.bf16.mxu0 %v10274_v52  ;;  %12682 = vst [vmem:[#allocation92_spill] sm:$0xff] %v10292_v30  ;;  %v10295_v52 = vld [vmem:[#allocation4 + $0x760] ss:$24 sps:$4 sm:$0xff]  }
 0x2a9   : > { %12683 = vst [vmem:[#allocation93_spill] sm:$0xff] %v10295_v52 }
 0x2ab   : > { %3055 = vmatpush1.bf16.msra.mxu0 %v10277_v34  ;;  %v10298_v34 = vld [vmem:[#allocation4 + $0x794] ss:$24 sps:$4 sm:$0xff]  }
 0x2ac   : > { %3056 = vmatprep.subr.bf16.mxu0 %v10280_v18  ;;  %12684 = vst [vmem:[#allocation94_spill] sm:$0xff] %v10298_v34  ;;  %v10301_v18 = vld [vmem:[#allocation4 + $0x790] ss:$24 sps:$4 sm:$0xff]  }
 0x2ad   : > { %12685 = vst [vmem:[#allocation95_spill] sm:$0xff] %v10301_v18 }
 0x2af   : > { %3057 = vmatpush1.bf16.msra.mxu0 %v10283_v23  ;;  %v10304_v23 = vld [vmem:[#allocation4 + $0x7c4] ss:$24 sps:$4 sm:$0xff]  }
 0x2b0   : > { %3058 = vmatprep.subr.bf16.mxu0 %v10286_v15  ;;  %12686 = vst [vmem:[#allocation96_spill] sm:$0xff] %v10304_v23  ;;  %v10307_v15 = vld [vmem:[#allocation4 + $0x7c0] ss:$24 sps:$4 sm:$0xff]  }
 0x2b1   : > { %12687 = vst [vmem:[#allocation97_spill] sm:$0xff] %v10307_v15 }
 0x2b3   : > { %3059 = vmatpush1.bf16.msra.mxu0 %v10289_v19  ;;  %v10310_v19 = vld [vmem:[#allocation4 + $0x7f4] ss:$24 sps:$4 sm:$0xff]  }
 0x2b4   : > { %3060 = vmatprep.subr.bf16.mxu0 %v10292_v30  ;;  %12688 = vst [vmem:[#allocation98_spill] sm:$0xff] %v10310_v19  ;;  %v10313_v30 = vld [vmem:[#allocation4 + $0x7f0] ss:$24 sps:$4 sm:$0xff]  }
 0x2b5   : > { %12689 = vst [vmem:[#allocation99_spill] sm:$0xff] %v10313_v30 }
 0x2b7   : > { %3061 = vmatpush1.bf16.msra.mxu0 %v10295_v52  ;;  %v10316_v52 = vld [vmem:[#allocation4 + $0x824] ss:$24 sps:$4 sm:$0xff]  }
 0x2b8   : > { %3062 = vmatprep.subr.bf16.mxu0 %v10298_v34  ;;  %12690 = vst [vmem:[#allocation100_spill] sm:$0xff] %v10316_v52  ;;  %v10319_v34 = vld [vmem:[#allocation4 + $0x820] ss:$24 sps:$4 sm:$0xff]  }
 0x2b9   : > { %12691 = vst [vmem:[#allocation101_spill] sm:$0xff] %v10319_v34 }
 0x2bb   : > { %3063 = vmatpush1.bf16.msra.mxu0 %v10301_v18  ;;  %v10322_v18 = vld [vmem:[#allocation4 + $0x854] ss:$24 sps:$4 sm:$0xff]  }
 0x2bc   : > { %3064 = vmatprep.subr.bf16.mxu0 %v10304_v23  ;;  %12692 = vst [vmem:[#allocation102_spill] sm:$0xff] %v10322_v18  ;;  %v10325_v23 = vld [vmem:[#allocation4 + $0x850] ss:$24 sps:$4 sm:$0xff]  }
 0x2bd   : > { %12693 = vst [vmem:[#allocation103_spill] sm:$0xff] %v10325_v23 }
 0x2bf   : > { %3065 = vmatpush1.bf16.msra.mxu0 %v10307_v15  ;;  %v10328_v15 = vld [vmem:[#allocation4 + $0x884] ss:$24 sps:$4 sm:$0xff]  }
 0x2c0   : > { %3066 = vmatprep.subr.bf16.mxu0 %v10310_v19  ;;  %12694 = vst [vmem:[#allocation104_spill] sm:$0xff] %v10328_v15  ;;  %v10331_v19 = vld [vmem:[#allocation4 + $0x880] ss:$24 sps:$4 sm:$0xff]  }
 0x2c1   : > { %12695 = vst [vmem:[#allocation105_spill] sm:$0xff] %v10331_v19 }
 0x2c3   : > { %3067 = vmatpush1.bf16.msra.mxu0 %v10313_v30  ;;  %v10334_v30 = vld [vmem:[#allocation4 + $0x8b4] ss:$24 sps:$4 sm:$0xff]  }
 0x2c4   : > { %3068 = vmatprep.subr.bf16.mxu0 %v10316_v52  ;;  %12696 = vst [vmem:[#allocation106_spill] sm:$0xff] %v10334_v30  ;;  %v10337_v52 = vld [vmem:[#allocation4 + $0x8b0] ss:$24 sps:$4 sm:$0xff]  }
 0x2c5   : > { %12697 = vst [vmem:[#allocation107_spill] sm:$0xff] %v10337_v52 }
 0x2c7   : > { %3069 = vmatpush1.bf16.msra.mxu0 %v10319_v34  ;;  %v10340_v34 = vld [vmem:[#allocation4 + $0x8e4] ss:$24 sps:$4 sm:$0xff]  }
 0x2c8   : > { %3070 = vmatprep.subr.bf16.mxu0 %v10322_v18  ;;  %12698 = vst [vmem:[#allocation108_spill] sm:$0xff] %v10340_v34  ;;  %v10343_v18 = vld [vmem:[#allocation4 + $0x8e0] ss:$24 sps:$4 sm:$0xff]  }
 0x2c9   : > { %12699 = vst [vmem:[#allocation109_spill] sm:$0xff] %v10343_v18 }
 0x2cb   : > { %3071 = vmatpush1.bf16.msra.mxu0 %v10325_v23  ;;  %v10347_v23 = vld [vmem:[#allocation4 + $0xc] ss:$24 sps:$4 sm:$0xff]  }
 0x2cc   : > { %3072 = vmatprep.subr.bf16.mxu0 %v10328_v15  ;;  %12700 = vst [vmem:[#allocation110_spill] sm:$0xff] %v10347_v23 }
 0x2cf   : > { %3073 = vmatpush1.bf16.msra.mxu0 %v10331_v19  ;;  %v10351_v19 = vld [vmem:[#allocation4 + $0x8] ss:$24 sps:$4 sm:$0xff]  }
 0x2d0   : > { %3074 = vmatprep.subr.bf16.mxu0 %v10334_v30  ;;  %12701 = vst [vmem:[#allocation111_spill] sm:$0xff] %v10351_v19  ;;  %v10354_v30 = vld [vmem:[#allocation4 + $0x3c] ss:$24 sps:$4 sm:$0xff]  }
 0x2d1   : > { %12702 = vst [vmem:[#allocation112_spill] sm:$0xff] %v10354_v30 }
 0x2d3   : > { %3075 = vmatpush1.bf16.msra.mxu0 %v10337_v52  ;;  %v10357_v52 = vld [vmem:[#allocation4 + $0x38] ss:$24 sps:$4 sm:$0xff]  }
 0x2d4   : > { %3076 = vmatprep.subr.bf16.mxu0 %v10340_v34  ;;  %12703 = vst [vmem:[#allocation113_spill] sm:$0xff] %v10357_v52  ;;  %v10360_v34 = vld [vmem:[#allocation4 + $0x6c] ss:$24 sps:$4 sm:$0xff]  }
 0x2d5   : > { %12704 = vst [vmem:[#allocation114_spill] sm:$0xff] %v10360_v34 }
 0x2d7   : > { %3077 = vmatpush1.bf16.msra.mxu0 %v10343_v18  ;;  %v10363_v18 = vld [vmem:[#allocation4 + $0x68] ss:$24 sps:$4 sm:$0xff]  }
 0x2d8   : > { %3216 = vmatprep.subr.bf16.mxu0 %v10347_v23  ;;  %12705 = vst [vmem:[#allocation115_spill] sm:$0xff] %v10363_v18 }
 0x2da   : > { %3079 = vmatmul.mubr.bf16.vlgmr.msra.gmra.mrb[4].mxu0 %v9952_v41  ;;  %v10366_v41 = vld [vmem:[#allocation4 + $0x9c] ss:$24 sps:$4 sm:$0xff]  }
 0x2db   : > { %3217 = vmatpush1.bf16.msra.mxu0 %v10351_v19  ;;  %12706 = vst [vmem:[#allocation116_spill] sm:$0xff] %v10366_v41  ;;  %v10369_v19 = vld [vmem:[#allocation4 + $0x98] ss:$24 sps:$4 sm:$0xff]  }
 0x2dc   : > { %3218 = vmatprep.subr.bf16.mxu0 %v10354_v30  ;;  %12707 = vst [vmem:[#allocation117_spill] sm:$0xff] %v10369_v19  ;;  %v10372_v30 = vld [vmem:[#allocation4 + $0xcc] ss:$24 sps:$4 sm:$0xff]  }
 0x2dd   : > { %12708 = vst [vmem:[#allocation118_spill] sm:$0xff] %v10372_v30 }
 0x2df   : > { %3219 = vmatpush1.bf16.msra.mxu0 %v10357_v52  ;;  %v10375_v52 = vld [vmem:[#allocation4 + $0xc8] ss:$24 sps:$4 sm:$0xff]  }
 0x2e0   : > { %3220 = vmatprep.subr.bf16.mxu0 %v10360_v34  ;;  %12709 = vst [vmem:[#allocation119_spill] sm:$0xff] %v10375_v52  ;;  %v10378_v34 = vld [vmem:[#allocation4 + $0xfc] ss:$24 sps:$4 sm:$0xff]  }
 0x2e1   : > { %12710 = vst [vmem:[#allocation120_spill] sm:$0xff] %v10378_v34 }
 0x2e3   : > { %3221 = vmatpush1.bf16.msra.mxu0 %v10363_v18 }
 0x2e4   : > { %3222 = vmatprep.subr.bf16.mxu0 %v10366_v41 }
 0x2e7   : > { %3223 = vmatpush1.bf16.msra.mxu0 %v10369_v19 }
 0x2e8   : > { %3224 = vmatprep.subr.bf16.mxu0 %v10372_v30 }
 0x2eb   : > { %3225 = vmatpush1.bf16.msra.mxu0 %v10375_v52 }
 0x2ec   : > { %3226 = vmatprep.subr.bf16.mxu0 %v10378_v34 }
 0x2ed   : > { %v10381_v18 = vpop.f32.mrb[0].mxu0 }
 0x2ee   : > { %v10383_v23 = vpop.f32.mrb[0].mxu1  ;;  %v10385_v41 = vpop.f32.mrb[1].mxu0  ;;  %v10398_v34 = vpack.c.bf16 %v10381_v18, %v10381_v18 }
 0x2ef   : > { %12711 = vst [vmem:[#allocation121_spill] sm:$0xff] %v10385_v41  ;;  %v10387_v15 = vpop.f32.mrb[1].mxu1  ;;  %v10391_v19 = vpack.c.bf16 %v10385_v41, %v10385_v41  ;;  %v2838_v30 = vpop.f32.mrb[2].mxu0  ;;  %3227 = vmatpush1.bf16.msra.mxu0 %v10393_v16  ;;  %v10616_v16 = vld [vmem:[#allocation4 + $0x634] ss:$24 sps:$4 sm:$0xff]  }
 0x2f0   : > { %12712 = vst [vmem:[#allocation122_spill] sm:$0xff] %v10387_v15  ;;  %v2961_v37 = vpop.f32.mrb[2].mxu1  ;;  %v2839_v52 = vpop.f32.mrb[3].mxu0  ;;  %3228 = vmatprep.subr.bf16.mxu0 %v10400_v35  ;;  %v10405_v41 = vpack.c.bf16 %v10387_v15, %v10387_v15  ;;  %v10420_v30 = vld [vmem:[#allocation4 + $0x15c] ss:$24 sps:$4 sm:$0xff]   ;;  %12781 = vst [vmem:[#allocation191_spill] sm:$0xff] %v10616_v16 }
 0x2f1   : > { %v2962_v9 = vpop.f32.mrb[3].mxu1  ;;  %3125 = vmatprep.mubr.bf16.mxu1 %v10391_v19  ;;  %3248 = vmatprep.mubr.bf16.mxu0 %v10391_v19  ;;  %v10410_v37 = vld [vmem:[#allocation4 + $0x300] ss:$24 sps:$4 sm:$0xff]   ;;  %12718 = vst [vmem:[#allocation128_spill] sm:$0xff] %v10420_v30  ;;  %v10423_v35 = vld [vmem:[#allocation4 + $0x330] ss:$24 sps:$4 sm:$0xff]  }
 0x2f2   : > { %3126 = vmatmul.mubr.bf16.vlgmr.msra.gmra.mrb[4].mxu1 %v10398_v34  ;;  %12715 = vst [vmem:[#allocation125_spill] sm:$0xff] %v10410_v37  ;;  %v10414_v52 = vld [vmem:[#allocation4 + $0x128] ss:$24 sps:$4 sm:$0xff]   ;;  %v10417_v9 = vld [vmem:[#allocation4 + $0x334] ss:$24 sps:$4 sm:$0xff]   ;;  %12719 = vst [vmem:[#allocation129_spill] sm:$0xff] %v10423_v35 }
 0x2f3   : > { %3135 = vmatpush1.bf16.msra.mxu1 %v10410_v37  ;;  %3166 = vmatprep.mubr.bf16.mxu1 %v10405_v41  ;;  %12716 = vst [vmem:[#allocation126_spill] sm:$0xff] %v10414_v52  ;;  %12717 = vst [vmem:[#allocation127_spill] sm:$0xff] %v10417_v9  ;;  %v10426_v15 = vld [vmem:[#allocation4 + $0x158] ss:$24 sps:$4 sm:$0xff]   ;;  %v10429_v37 = vld [vmem:[#allocation4 + $0x364] ss:$24 sps:$4 sm:$0xff]  }
 0x2f4   : > { %3229 = vmatpush1.bf16.msra.mxu0 %v10414_v52  ;;  %3136 = vmatprep.subr.bf16.mxu1 %v10417_v9  ;;  %12720 = vst [vmem:[#allocation130_spill] sm:$0xff] %v10426_v15  ;;  %12721 = vst [vmem:[#allocation131_spill] sm:$0xff] %v10429_v37  ;;  %v10432_v52 = vld [vmem:[#allocation4 + $0x18c] ss:$24 sps:$4 sm:$0xff]   ;;  %v10435_v9 = vld [vmem:[#allocation4 + $0x360] ss:$24 sps:$4 sm:$0xff]  }
 0x2f5   : > { %3230 = vmatprep.subr.bf16.mxu0 %v10420_v30  ;;  %12722 = vst [vmem:[#allocation132_spill] sm:$0xff] %v10432_v52  ;;  %12723 = vst [vmem:[#allocation133_spill] sm:$0xff] %v10435_v9  ;;  %v10438_v30 = vld [vmem:[#allocation4 + $0x188] ss:$24 sps:$4 sm:$0xff]  }
 0x2f6   : > { %12724 = vst [vmem:[#allocation134_spill] sm:$0xff] %v10438_v30 }
 0x2f7   : > { %3137 = vmatpush1.bf16.msra.mxu1 %v10423_v35  ;;  %v10441_v35 = vld [vmem:[#allocation4 + $0x394] ss:$24 sps:$4 sm:$0xff]  }
 0x2f8   : > { %3231 = vmatpush1.bf16.msra.mxu0 %v10426_v15  ;;  %3138 = vmatprep.subr.bf16.mxu1 %v10429_v37  ;;  %12725 = vst [vmem:[#allocation135_spill] sm:$0xff] %v10441_v35  ;;  %v10444_v15 = vld [vmem:[#allocation4 + $0x1bc] ss:$24 sps:$4 sm:$0xff]   ;;  %v10447_v37 = vld [vmem:[#allocation4 + $0x390] ss:$24 sps:$4 sm:$0xff]  }
 0x2f9   : > { %3232 = vmatprep.subr.bf16.mxu0 %v10432_v52  ;;  %12726 = vst [vmem:[#allocation136_spill] sm:$0xff] %v10444_v15  ;;  %12727 = vst [vmem:[#allocation137_spill] sm:$0xff] %v10447_v37  ;;  %v10450_v52 = vld [vmem:[#allocation4 + $0x1b8] ss:$24 sps:$4 sm:$0xff]  }
 0x2fa   : > { %12728 = vst [vmem:[#allocation138_spill] sm:$0xff] %v10450_v52 }
 0x2fb   : > { %3139 = vmatpush1.bf16.msra.mxu1 %v10435_v9  ;;  %v10453_v9 = vld [vmem:[#allocation4 + $0x3c4] ss:$24 sps:$4 sm:$0xff]  }
 0x2fc   : > { %3233 = vmatpush1.bf16.msra.mxu0 %v10438_v30  ;;  %3140 = vmatprep.subr.bf16.mxu1 %v10441_v35  ;;  %12729 = vst [vmem:[#allocation139_spill] sm:$0xff] %v10453_v9  ;;  %v10456_v30 = vld [vmem:[#allocation4 + $0x1ec] ss:$24 sps:$4 sm:$0xff]   ;;  %v10459_v35 = vld [vmem:[#allocation4 + $0x3c0] ss:$24 sps:$4 sm:$0xff]  }
 0x2fd   : > { %3234 = vmatprep.subr.bf16.mxu0 %v10444_v15  ;;  %12730 = vst [vmem:[#allocation140_spill] sm:$0xff] %v10456_v30  ;;  %12731 = vst [vmem:[#allocation141_spill] sm:$0xff] %v10459_v35  ;;  %v10462_v15 = vld [vmem:[#allocation4 + $0x1e8] ss:$24 sps:$4 sm:$0xff]  }
 0x2fe   : > { %12732 = vst [vmem:[#allocation142_spill] sm:$0xff] %v10462_v15 }
 0x2ff   : > { %3141 = vmatpush1.bf16.msra.mxu1 %v10447_v37  ;;  %v10465_v37 = vld [vmem:[#allocation4 + $0x3f4] ss:$24 sps:$4 sm:$0xff]  }
 0x300   : > { %3235 = vmatpush1.bf16.msra.mxu0 %v10450_v52  ;;  %3142 = vmatprep.subr.bf16.mxu1 %v10453_v9  ;;  %12733 = vst [vmem:[#allocation143_spill] sm:$0xff] %v10465_v37  ;;  %v10468_v52 = vld [vmem:[#allocation4 + $0x21c] ss:$24 sps:$4 sm:$0xff]   ;;  %v10471_v9 = vld [vmem:[#allocation4 + $0x3f0] ss:$24 sps:$4 sm:$0xff]  }
 0x301   : > { %3236 = vmatprep.subr.bf16.mxu0 %v10456_v30  ;;  %12734 = vst [vmem:[#allocation144_spill] sm:$0xff] %v10468_v52  ;;  %12735 = vst [vmem:[#allocation145_spill] sm:$0xff] %v10471_v9  ;;  %v10474_v30 = vld [vmem:[#allocation4 + $0x218] ss:$24 sps:$4 sm:$0xff]  }
 0x302   : > { %12736 = vst [vmem:[#allocation146_spill] sm:$0xff] %v10474_v30 }
 0x303   : > { %3143 = vmatpush1.bf16.msra.mxu1 %v10459_v35  ;;  %v10477_v35 = vld [vmem:[#allocation4 + $0x424] ss:$24 sps:$4 sm:$0xff]  }
 0x304   : > { %3237 = vmatpush1.bf16.msra.mxu0 %v10462_v15  ;;  %3144 = vmatprep.subr.bf16.mxu1 %v10465_v37  ;;  %12737 = vst [vmem:[#allocation147_spill] sm:$0xff] %v10477_v35  ;;  %v10480_v15 = vld [vmem:[#allocation4 + $0x24c] ss:$24 sps:$4 sm:$0xff]   ;;  %v10483_v37 = vld [vmem:[#allocation4 + $0x420] ss:$24 sps:$4 sm:$0xff]  }
 0x305   : > { %3238 = vmatprep.subr.bf16.mxu0 %v10468_v52  ;;  %12738 = vst [vmem:[#allocation148_spill] sm:$0xff] %v10480_v15  ;;  %12739 = vst [vmem:[#allocation149_spill] sm:$0xff] %v10483_v37  ;;  %v10486_v52 = vld [vmem:[#allocation4 + $0x248] ss:$24 sps:$4 sm:$0xff]  }
 0x306   : > { %12740 = vst [vmem:[#allocation150_spill] sm:$0xff] %v10486_v52 }
 0x307   : > { %3145 = vmatpush1.bf16.msra.mxu1 %v10471_v9  ;;  %v10489_v9 = vld [vmem:[#allocation4 + $0x454] ss:$24 sps:$4 sm:$0xff]  }
 0x308   : > { %3239 = vmatpush1.bf16.msra.mxu0 %v10474_v30  ;;  %3146 = vmatprep.subr.bf16.mxu1 %v10477_v35  ;;  %12741 = vst [vmem:[#allocation151_spill] sm:$0xff] %v10489_v9  ;;  %v10492_v30 = vld [vmem:[#allocation4 + $0x27c] ss:$24 sps:$4 sm:$0xff]   ;;  %v10495_v35 = vld [vmem:[#allocation4 + $0x450] ss:$24 sps:$4 sm:$0xff]  }
 0x309   : > { %3240 = vmatprep.subr.bf16.mxu0 %v10480_v15  ;;  %12742 = vst [vmem:[#allocation152_spill] sm:$0xff] %v10492_v30  ;;  %12743 = vst [vmem:[#allocation153_spill] sm:$0xff] %v10495_v35  ;;  %v10498_v15 = vld [vmem:[#allocation4 + $0x278] ss:$24 sps:$4 sm:$0xff]  }
 0x30a   : > { %12744 = vst [vmem:[#allocation154_spill] sm:$0xff] %v10498_v15 }
 0x30b   : > { %3147 = vmatpush1.bf16.msra.mxu1 %v10483_v37  ;;  %v10501_v37 = vld [vmem:[#allocation4 + $0x484] ss:$24 sps:$4 sm:$0xff]  }
 0x30c   : > { %3241 = vmatpush1.bf16.msra.mxu0 %v10486_v52  ;;  %3148 = vmatprep.subr.bf16.mxu1 %v10489_v9  ;;  %12745 = vst [vmem:[#allocation155_spill] sm:$0xff] %v10501_v37  ;;  %v10504_v52 = vld [vmem:[#allocation4 + $0x2ac] ss:$24 sps:$4 sm:$0xff]   ;;  %v10507_v9 = vld [vmem:[#allocation4 + $0x480] ss:$24 sps:$4 sm:$0xff]  }
 0x30d   : > { %3242 = vmatprep.subr.bf16.mxu0 %v10492_v30  ;;  %12746 = vst [vmem:[#allocation156_spill] sm:$0xff] %v10504_v52  ;;  %12747 = vst [vmem:[#allocation157_spill] sm:$0xff] %v10507_v9  ;;  %v10510_v30 = vld [vmem:[#allocation4 + $0x2a8] ss:$24 sps:$4 sm:$0xff]  }
 0x30e   : > { %12748 = vst [vmem:[#allocation158_spill] sm:$0xff] %v10510_v30 }
 0x30f   : > { %3149 = vmatpush1.bf16.msra.mxu1 %v10495_v35  ;;  %v10513_v35 = vld [vmem:[#allocation4 + $0x4b4] ss:$24 sps:$4 sm:$0xff]  }
 0x310   : > { %3243 = vmatpush1.bf16.msra.mxu0 %v10498_v15  ;;  %3150 = vmatprep.subr.bf16.mxu1 %v10501_v37  ;;  %12749 = vst [vmem:[#allocation159_spill] sm:$0xff] %v10513_v35  ;;  %v10516_v15 = vld [vmem:[#allocation4 + $0x2dc] ss:$24 sps:$4 sm:$0xff]   ;;  %v10519_v37 = vld [vmem:[#allocation4 + $0x4b0] ss:$24 sps:$4 sm:$0xff]  }
 0x311   : > { %3244 = vmatprep.subr.bf16.mxu0 %v10504_v52  ;;  %12750 = vst [vmem:[#allocation160_spill] sm:$0xff] %v10516_v15  ;;  %12751 = vst [vmem:[#allocation161_spill] sm:$0xff] %v10519_v37  ;;  %v10522_v52 = vld [vmem:[#allocation4 + $0x2d8] ss:$24 sps:$4 sm:$0xff]  }
 0x312   : > { %12752 = vst [vmem:[#allocation162_spill] sm:$0xff] %v10522_v52 }
 0x313   : > { %3151 = vmatpush1.bf16.msra.mxu1 %v10507_v9  ;;  %v10525_v9 = vld [vmem:[#allocation4 + $0x4e4] ss:$24 sps:$4 sm:$0xff]  }
 0x314   : > { %3245 = vmatpush1.bf16.msra.mxu0 %v10510_v30  ;;  %3152 = vmatprep.subr.bf16.mxu1 %v10513_v35  ;;  %12753 = vst [vmem:[#allocation163_spill] sm:$0xff] %v10525_v9  ;;  %v10528_v30 = vld [vmem:[#allocation4 + $0x30c] ss:$24 sps:$4 sm:$0xff]   ;;  %v10531_v35 = vld [vmem:[#allocation4 + $0x4e0] ss:$24 sps:$4 sm:$0xff]  }
 0x315   : > { %3246 = vmatprep.subr.bf16.mxu0 %v10516_v15  ;;  %12754 = vst [vmem:[#allocation164_spill] sm:$0xff] %v10528_v30  ;;  %12755 = vst [vmem:[#allocation165_spill] sm:$0xff] %v10531_v35  ;;  %v10535_v15 = vld [vmem:[#allocation4 + $0x308] ss:$24 sps:$4 sm:$0xff]  }
 0x316   : > { %12756 = vst [vmem:[#allocation166_spill] sm:$0xff] %v10535_v15 }
 0x317   : > { %3153 = vmatpush1.bf16.msra.mxu1 %v10519_v37  ;;  %v10539_v37 = vld [vmem:[#allocation4 + $0x514] ss:$24 sps:$4 sm:$0xff]  }
 0x318   : > { %3247 = vmatpush1.bf16.msra.mxu0 %v10522_v52  ;;  %3154 = vmatprep.subr.bf16.mxu1 %v10525_v9  ;;  %12757 = vst [vmem:[#allocation167_spill] sm:$0xff] %v10539_v37  ;;  %v10542_v9 = vld [vmem:[#allocation4 + $0x33c] ss:$24 sps:$4 sm:$0xff]  }
 0x319   : > { %3257 = vmatprep.subr.bf16.mxu0 %v10528_v30  ;;  %12758 = vst [vmem:[#allocation168_spill] sm:$0xff] %v10542_v9  ;;  %v10545_v30 = vld [vmem:[#allocation4 + $0x510] ss:$24 sps:$4 sm:$0xff]   ;;  %v10551_v52 = vld [vmem:[#allocation4 + $0x544] ss:$24 sps:$4 sm:$0xff]  }
 0x31a   : > { %12759 = vst [vmem:[#allocation169_spill] sm:$0xff] %v10545_v30  ;;  %12761 = vst [vmem:[#allocation171_spill] sm:$0xff] %v10551_v52 }
 0x31b   : > { %3155 = vmatpush1.bf16.msra.mxu1 %v10531_v35  ;;  %3249 = vmatmul.mubr.bf16.vlgmr.msra.gmra.mrb[8].mxu0 %v10398_v34  ;;  %v10548_v35 = vld [vmem:[#allocation4 + $0x338] ss:$24 sps:$4 sm:$0xff]  }
 0x31c   : > { %3258 = vmatpush1.bf16.msra.mxu0 %v10535_v15  ;;  %3289 = vmatprep.mubr.bf16.mxu0 %v10405_v41  ;;  %12760 = vst [vmem:[#allocation170_spill] sm:$0xff] %v10548_v35  ;;  %v10554_v15 = vld [vmem:[#allocation4 + $0x36c] ss:$24 sps:$4 sm:$0xff]  }
 0x31d   : > { %3156 = vmatprep.subr.bf16.mxu1 %v10539_v37  ;;  %3259 = vmatprep.subr.bf16.mxu0 %v10542_v9  ;;  %12762 = vst [vmem:[#allocation172_spill] sm:$0xff] %v10554_v15  ;;  %v10557_v37 = vld [vmem:[#allocation4 + $0x540] ss:$24 sps:$4 sm:$0xff]  }
 0x31e   : > { %12763 = vst [vmem:[#allocation173_spill] sm:$0xff] %v10557_v37  ;;  %v10560_v9 = vld [vmem:[#allocation4 + $0x368] ss:$24 sps:$4 sm:$0xff]  }
 0x31f   : > { %3157 = vmatpush1.bf16.msra.mxu1 %v10545_v30  ;;  %12764 = vst [vmem:[#allocation174_spill] sm:$0xff] %v10560_v9  ;;  %v10563_v30 = vld [vmem:[#allocation4 + $0x574] ss:$24 sps:$4 sm:$0xff]  }
 0x320   : > { %3260 = vmatpush1.bf16.msra.mxu0 %v10548_v35  ;;  %3158 = vmatprep.subr.bf16.mxu1 %v10551_v52  ;;  %12765 = vst [vmem:[#allocation175_spill] sm:$0xff] %v10563_v30  ;;  %v10566_v35 = vld [vmem:[#allocation4 + $0x39c] ss:$24 sps:$4 sm:$0xff]   ;;  %v10569_v52 = vld [vmem:[#allocation4 + $0x570] ss:$24 sps:$4 sm:$0xff]  }
 0x321   : > { %3261 = vmatprep.subr.bf16.mxu0 %v10554_v15  ;;  %12766 = vst [vmem:[#allocation176_spill] sm:$0xff] %v10566_v35  ;;  %12767 = vst [vmem:[#allocation177_spill] sm:$0xff] %v10569_v52  ;;  %v10572_v15 = vld [vmem:[#allocation4 + $0x398] ss:$24 sps:$4 sm:$0xff]  }
 0x322   : > { %12768 = vst [vmem:[#allocation178_spill] sm:$0xff] %v10572_v15 }
 0x323   : > { %3159 = vmatpush1.bf16.msra.mxu1 %v10557_v37  ;;  %v10575_v37 = vld [vmem:[#allocation4 + $0x5a4] ss:$24 sps:$4 sm:$0xff]  }
 0x324   : > { %3262 = vmatpush1.bf16.msra.mxu0 %v10560_v9  ;;  %3160 = vmatprep.subr.bf16.mxu1 %v10563_v30  ;;  %12769 = vst [vmem:[#allocation179_spill] sm:$0xff] %v10575_v37  ;;  %v10578_v9 = vld [vmem:[#allocation4 + $0x3cc] ss:$24 sps:$4 sm:$0xff]   ;;  %v10581_v30 = vld [vmem:[#allocation4 + $0x5a0] ss:$24 sps:$4 sm:$0xff]  }
 0x325   : > { %3263 = vmatprep.subr.bf16.mxu0 %v10566_v35  ;;  %12770 = vst [vmem:[#allocation180_spill] sm:$0xff] %v10578_v9  ;;  %12771 = vst [vmem:[#allocation181_spill] sm:$0xff] %v10581_v30  ;;  %v10584_v35 = vld [vmem:[#allocation4 + $0x3c8] ss:$24 sps:$4 sm:$0xff]  }
 0x326   : > { %12772 = vst [vmem:[#allocation182_spill] sm:$0xff] %v10584_v35 }
 0x327   : > { %3161 = vmatpush1.bf16.msra.mxu1 %v10569_v52  ;;  %v10587_v52 = vld [vmem:[#allocation4 + $0x5d4] ss:$24 sps:$4 sm:$0xff]  }
 0x328   : > { %3264 = vmatpush1.bf16.msra.mxu0 %v10572_v15  ;;  %3162 = vmatprep.subr.bf16.mxu1 %v10575_v37  ;;  %12773 = vst [vmem:[#allocation183_spill] sm:$0xff] %v10587_v52  ;;  %v10590_v15 = vld [vmem:[#allocation4 + $0x3fc] ss:$24 sps:$4 sm:$0xff]   ;;  %v10593_v37 = vld [vmem:[#allocation4 + $0x5d0] ss:$24 sps:$4 sm:$0xff]  }
 0x329   : > { %3265 = vmatprep.subr.bf16.mxu0 %v10578_v9  ;;  %12774 = vst [vmem:[#allocation184_spill] sm:$0xff] %v10590_v15  ;;  %12775 = vst [vmem:[#allocation185_spill] sm:$0xff] %v10593_v37  ;;  %v10598_v9 = vpack.c.bf16 %v10383_v23, %v10383_v23 }
 0x32b   : > { %3163 = vmatpush1.bf16.msra.mxu1 %v10581_v30  ;;  %v10600_v30 = vld [vmem:[#allocation4 + $0x3f8] ss:$24 sps:$4 sm:$0xff]  }
 0x32c   : > { %3266 = vmatpush1.bf16.msra.mxu0 %v10584_v35  ;;  %3164 = vmatprep.subr.bf16.mxu1 %v10587_v52  ;;  %12776 = vst [vmem:[#allocation186_spill] sm:$0xff] %v10600_v30  ;;  %v10603_v35 = vld [vmem:[#allocation4 + $0x604] ss:$24 sps:$4 sm:$0xff]  }
 0x32d   : > { %3267 = vmatprep.subr.bf16.mxu0 %v10590_v15  ;;  %12777 = vst [vmem:[#allocation187_spill] sm:$0xff] %v10603_v35  ;;  %v10606_v52 = vld [vmem:[#allocation4 + $0x42c] ss:$24 sps:$4 sm:$0xff]   ;;  %v10610_v15 = vld [vmem:[#allocation4 + $0x600] ss:$24 sps:$4 sm:$0xff]  }
 0x32e   : > { %12778 = vst [vmem:[#allocation188_spill] sm:$0xff] %v10606_v52  ;;  %12779 = vst [vmem:[#allocation189_spill] sm:$0xff] %v10610_v15 }
 0x32f   : > { %3165 = vmatpush1.bf16.msra.mxu1 %v10593_v37  ;;  %v10613_v37 = vld [vmem:[#allocation4 + $0x428] ss:$24 sps:$4 sm:$0xff]  }
 0x330   : > { %3268 = vmatpush1.bf16.msra.mxu0 %v10600_v30  ;;  %3175 = vmatprep.subr.bf16.mxu1 %v10603_v35  ;;  %12780 = vst [vmem:[#allocation190_spill] sm:$0xff] %v10613_v37  ;;  %v10619_v30 = vld [vmem:[#allocation4 + $0x45c] ss:$24 sps:$4 sm:$0xff]   ;;  %v10622_v35 = vld [vmem:[#allocation4 + $0x630] ss:$24 sps:$4 sm:$0xff]  }
 0x331   : > { %3269 = vmatprep.subr.bf16.mxu0 %v10606_v52  ;;  %12782 = vst [vmem:[#allocation192_spill] sm:$0xff] %v10619_v30  ;;  %12783 = vst [vmem:[#allocation193_spill] sm:$0xff] %v10622_v35  ;;  %v10625_v52 = vld [vmem:[#allocation4 + $0x458] ss:$24 sps:$4 sm:$0xff]  }
 0x332   : > { %3167 = vmatmul.mubr.bf16.vlgmr.msra.gmra.mrb[4].mxu1 %v10598_v9  ;;  %12784 = vst [vmem:[#allocation194_spill] sm:$0xff] %v10625_v52 }
 0x333   : > { %3176 = vmatpush1.bf16.msra.mxu1 %v10610_v15  ;;  %v10628_v15 = vld [vmem:[#allocation4 + $0x664] ss:$24 sps:$4 sm:$0xff]  }
 0x334   : > { %3270 = vmatpush1.bf16.msra.mxu0 %v10613_v37  ;;  %3177 = vmatprep.subr.bf16.mxu1 %v10616_v16  ;;  %12785 = vst [vmem:[#allocation195_spill] sm:$0xff] %v10628_v15  ;;  %v10631_v37 = vld [vmem:[#allocation4 + $0x48c] ss:$24 sps:$4 sm:$0xff]   ;;  %v10634_v16 = vld [vmem:[#allocation4 + $0x660] ss:$24 sps:$4 sm:$0xff]  }
 0x335   : > { %3271 = vmatprep.subr.bf16.mxu0 %v10619_v30  ;;  %12786 = vst [vmem:[#allocation196_spill] sm:$0xff] %v10631_v37  ;;  %12787 = vst [vmem:[#allocation197_spill] sm:$0xff] %v10634_v16  ;;  %v10637_v30 = vld [vmem:[#allocation4 + $0x488] ss:$24 sps:$4 sm:$0xff]  }
 0x336   : > { %12788 = vst [vmem:[#allocation198_spill] sm:$0xff] %v10637_v30 }
 0x337   : > { %3178 = vmatpush1.bf16.msra.mxu1 %v10622_v35  ;;  %v10640_v35 = vld [vmem:[#allocation4 + $0x694] ss:$24 sps:$4 sm:$0xff]  }
 0x338   : > { %3272 = vmatpush1.bf16.msra.mxu0 %v10625_v52  ;;  %3179 = vmatprep.subr.bf16.mxu1 %v10628_v15  ;;  %12789 = vst [vmem:[#allocation199_spill] sm:$0xff] %v10640_v35  ;;  %v10643_v52 = vld [vmem:[#allocation4 + $0x4bc] ss:$24 sps:$4 sm:$0xff]   ;;  %v10646_v15 = vld [vmem:[#allocation4 + $0x690] ss:$24 sps:$4 sm:$0xff]  }
 0x339   : > { %3273 = vmatprep.subr.bf16.mxu0 %v10631_v37  ;;  %12790 = vst [vmem:[#allocation200_spill] sm:$0xff] %v10643_v52  ;;  %12791 = vst [vmem:[#allocation201_spill] sm:$0xff] %v10646_v15  ;;  %v10649_v37 = vld [vmem:[#allocation4 + $0x4b8] ss:$24 sps:$4 sm:$0xff]  }
 0x33a   : > { %12792 = vst [vmem:[#allocation202_spill] sm:$0xff] %v10649_v37 }
 0x33b   : > { %3180 = vmatpush1.bf16.msra.mxu1 %v10634_v16  ;;  %v10652_v16 = vld [vmem:[#allocation4 + $0x6c4] ss:$24 sps:$4 sm:$0xff]  }
 0x33c   : > { %3274 = vmatpush1.bf16.msra.mxu0 %v10637_v30  ;;  %3181 = vmatprep.subr.bf16.mxu1 %v10640_v35  ;;  %12793 = vst [vmem:[#allocation203_spill] sm:$0xff] %v10652_v16  ;;  %v10655_v30 = vld [vmem:[#allocation4 + $0x4ec] ss:$24 sps:$4 sm:$0xff]   ;;  %v10658_v35 = vld [vmem:[#allocation4 + $0x6c0] ss:$24 sps:$4 sm:$0xff]  }
 0x33d   : > { %3275 = vmatprep.subr.bf16.mxu0 %v10643_v52  ;;  %12794 = vst [vmem:[#allocation204_spill] sm:$0xff] %v10655_v30  ;;  %12795 = vst [vmem:[#allocation205_spill] sm:$0xff] %v10658_v35  ;;  %v10661_v52 = vld [vmem:[#allocation4 + $0x4e8] ss:$24 sps:$4 sm:$0xff]  }
 0x33e   : > { %12796 = vst [vmem:[#allocation206_spill] sm:$0xff] %v10661_v52 }
 0x33f   : > { %3182 = vmatpush1.bf16.msra.mxu1 %v10646_v15  ;;  %v10664_v15 = vld [vmem:[#allocation4 + $0x6f4] ss:$24 sps:$4 sm:$0xff]  }
 0x340   : > { %3276 = vmatpush1.bf16.msra.mxu0 %v10649_v37  ;;  %3183 = vmatprep.subr.bf16.mxu1 %v10652_v16  ;;  %12797 = vst [vmem:[#allocation207_spill] sm:$0xff] %v10664_v15  ;;  %v10667_v37 = vld [vmem:[#allocation4 + $0x51c] ss:$24 sps:$4 sm:$0xff]   ;;  %v10670_v16 = vld [vmem:[#allocation4 + $0x6f0] ss:$24 sps:$4 sm:$0xff]  }
 0x341   : > { %3277 = vmatprep.subr.bf16.mxu0 %v10655_v30  ;;  %12798 = vst [vmem:[#allocation208_spill] sm:$0xff] %v10667_v37  ;;  %12799 = vst [vmem:[#allocation209_spill] sm:$0xff] %v10670_v16  ;;  %v10673_v30 = vld [vmem:[#allocation4 + $0x518] ss:$24 sps:$4 sm:$0xff]  }
 0x342   : > { %12800 = vst [vmem:[#allocation210_spill] sm:$0xff] %v10673_v30 }
 0x343   : > { %3184 = vmatpush1.bf16.msra.mxu1 %v10658_v35  ;;  %v10676_v35 = vld [vmem:[#allocation4 + $0x724] ss:$24 sps:$4 sm:$0xff]  }
 0x344   : > { %3278 = vmatpush1.bf16.msra.mxu0 %v10661_v52  ;;  %3185 = vmatprep.subr.bf16.mxu1 %v10664_v15  ;;  %12801 = vst [vmem:[#allocation211_spill] sm:$0xff] %v10676_v35  ;;  %v10679_v52 = vld [vmem:[#allocation4 + $0x54c] ss:$24 sps:$4 sm:$0xff]   ;;  %v10682_v15 = vld [vmem:[#allocation4 + $0x720] ss:$24 sps:$4 sm:$0xff]  }
 0x345   : > { %3279 = vmatprep.subr.bf16.mxu0 %v10667_v37  ;;  %12802 = vst [vmem:[#allocation212_spill] sm:$0xff] %v10679_v52  ;;  %12803 = vst [vmem:[#allocation213_spill] sm:$0xff] %v10682_v15  ;;  %v10685_v37 = vld [vmem:[#allocation4 + $0x548] ss:$24 sps:$4 sm:$0xff]  }
 0x346   : > { %12804 = vst [vmem:[#allocation214_spill] sm:$0xff] %v10685_v37 }
 0x347   : > { %3186 = vmatpush1.bf16.msra.mxu1 %v10670_v16  ;;  %v10688_v16 = vld [vmem:[#allocation4 + $0x754] ss:$24 sps:$4 sm:$0xff]  }
 0x348   : > { %3280 = vmatpush1.bf16.msra.mxu0 %v10673_v30  ;;  %3187 = vmatprep.subr.bf16.mxu1 %v10676_v35  ;;  %12805 = vst [vmem:[#allocation215_spill] sm:$0xff] %v10688_v16  ;;  %v10691_v30 = vld [vmem:[#allocation4 + $0x57c] ss:$24 sps:$4 sm:$0xff]   ;;  %v10694_v35 = vld [vmem:[#allocation4 + $0x750] ss:$24 sps:$4 sm:$0xff]  }
 0x349   : > { %3281 = vmatprep.subr.bf16.mxu0 %v10679_v52  ;;  %12806 = vst [vmem:[#allocation216_spill] sm:$0xff] %v10691_v30  ;;  %12807 = vst [vmem:[#allocation217_spill] sm:$0xff] %v10694_v35  ;;  %v10697_v52 = vld [vmem:[#allocation4 + $0x578] ss:$24 sps:$4 sm:$0xff]  }
 0x34a   : > { %12808 = vst [vmem:[#allocation218_spill] sm:$0xff] %v10697_v52 }
 0x34b   : > { %3188 = vmatpush1.bf16.msra.mxu1 %v10682_v15  ;;  %v10700_v15 = vld [vmem:[#allocation4 + $0x784] ss:$24 sps:$4 sm:$0xff]  }
 0x34c   : > { %3282 = vmatpush1.bf16.msra.mxu0 %v10685_v37  ;;  %3189 = vmatprep.subr.bf16.mxu1 %v10688_v16  ;;  %12809 = vst [vmem:[#allocation219_spill] sm:$0xff] %v10700_v15  ;;  %v10703_v37 = vld [vmem:[#allocation4 + $0x5ac] ss:$24 sps:$4 sm:$0xff]   ;;  %v10706_v16 = vld [vmem:[#allocation4 + $0x780] ss:$24 sps:$4 sm:$0xff]  }
 0x34d   : > { %3283 = vmatprep.subr.bf16.mxu0 %v10691_v30  ;;  %12810 = vst [vmem:[#allocation220_spill] sm:$0xff] %v10703_v37  ;;  %12811 = vst [vmem:[#allocation221_spill] sm:$0xff] %v10706_v16  ;;  %v10709_v30 = vld [vmem:[#allocation4 + $0x5a8] ss:$24 sps:$4 sm:$0xff]  }
 0x34e   : > { %12812 = vst [vmem:[#allocation222_spill] sm:$0xff] %v10709_v30 }
 0x34f   : > { %3190 = vmatpush1.bf16.msra.mxu1 %v10694_v35  ;;  %v10712_v35 = vld [vmem:[#allocation4 + $0x7b4] ss:$24 sps:$4 sm:$0xff]  }
 0x350   : > { %3284 = vmatpush1.bf16.msra.mxu0 %v10697_v52  ;;  %3191 = vmatprep.subr.bf16.mxu1 %v10700_v15  ;;  %12813 = vst [vmem:[#allocation223_spill] sm:$0xff] %v10712_v35  ;;  %v10715_v52 = vld [vmem:[#allocation4 + $0x5dc] ss:$24 sps:$4 sm:$0xff]   ;;  %v10718_v15 = vld [vmem:[#allocation4 + $0x7b0] ss:$24 sps:$4 sm:$0xff]  }
 0x351   : > { %3285 = vmatprep.subr.bf16.mxu0 %v10703_v37  ;;  %12814 = vst [vmem:[#allocation224_spill] sm:$0xff] %v10715_v52  ;;  %12815 = vst [vmem:[#allocation225_spill] sm:$0xff] %v10718_v15  ;;  %v10721_v37 = vld [vmem:[#allocation4 + $0x5d8] ss:$24 sps:$4 sm:$0xff]  }
 0x352   : > { %12816 = vst [vmem:[#allocation226_spill] sm:$0xff] %v10721_v37 }
 0x353   : > { %3192 = vmatpush1.bf16.msra.mxu1 %v10706_v16  ;;  %v10724_v16 = vld [vmem:[#allocation4 + $0x7e4] ss:$24 sps:$4 sm:$0xff]  }
 0x354   : > { %3286 = vmatpush1.bf16.msra.mxu0 %v10709_v30  ;;  %3193 = vmatprep.subr.bf16.mxu1 %v10712_v35  ;;  %12817 = vst [vmem:[#allocation227_spill] sm:$0xff] %v10724_v16  ;;  %v10727_v30 = vld [vmem:[#allocation4 + $0x60c] ss:$24 sps:$4 sm:$0xff]   ;;  %v10731_v35 = vld [vmem:[#allocation4 + $0x7e0] ss:$24 sps:$4 sm:$0xff]  }
 0x355   : > { %3287 = vmatprep.subr.bf16.mxu0 %v10715_v52  ;;  %12818 = vst [vmem:[#allocation228_spill] sm:$0xff] %v10727_v30  ;;  %12819 = vst [vmem:[#allocation229_spill] sm:$0xff] %v10731_v35  ;;  %v10734_v52 = vld [vmem:[#allocation4 + $0x608] ss:$24 sps:$4 sm:$0xff]  }
 0x356   : > { %12820 = vst [vmem:[#allocation230_spill] sm:$0xff] %v10734_v52 }
 0x357   : > { %3194 = vmatpush1.bf16.msra.mxu1 %v10718_v15  ;;  %v10737_v15 = vld [vmem:[#allocation4 + $0x814] ss:$24 sps:$4 sm:$0xff]  }
 0x358   : > { %3288 = vmatpush1.bf16.msra.mxu0 %v10721_v37  ;;  %3195 = vmatprep.subr.bf16.mxu1 %v10724_v16  ;;  %12821 = vst [vmem:[#allocation231_spill] sm:$0xff] %v10737_v15  ;;  %v10740_v37 = vld [vmem:[#allocation4 + $0x63c] ss:$24 sps:$4 sm:$0xff]   ;;  %v10743_v16 = vld [vmem:[#allocation4 + $0x810] ss:$24 sps:$4 sm:$0xff]  }
 0x359   : > { %3298 = vmatprep.subr.bf16.mxu0 %v10727_v30  ;;  %12822 = vst [vmem:[#allocation232_spill] sm:$0xff] %v10740_v37  ;;  %12823 = vst [vmem:[#allocation233_spill] sm:$0xff] %v10743_v16  ;;  %v10746_v30 = vld [vmem:[#allocation4 + $0x638] ss:$24 sps:$4 sm:$0xff]  }
 0x35a   : > { %12824 = vst [vmem:[#allocation234_spill] sm:$0xff] %v10746_v30 }
 0x35b   : > { %3290 = vmatmul.mubr.bf16.vlgmr.msra.gmra.mrb[8].mxu0 %v10598_v9  ;;  %3196 = vmatpush1.bf16.msra.mxu1 %v10731_v35  ;;  %v10749_v35 = vld [vmem:[#allocation4 + $0x844] ss:$24 sps:$4 sm:$0xff]  }
 0x35c   : > { %3299 = vmatpush1.bf16.msra.mxu0 %v10734_v52  ;;  %3197 = vmatprep.subr.bf16.mxu1 %v10737_v15  ;;  %12825 = vst [vmem:[#allocation235_spill] sm:$0xff] %v10749_v35  ;;  %v10752_v52 = vld [vmem:[#allocation4 + $0x66c] ss:$24 sps:$4 sm:$0xff]   ;;  %v10755_v15 = vld [vmem:[#allocation4 + $0x840] ss:$24 sps:$4 sm:$0xff]  }
 0x35d   : > { %3300 = vmatprep.subr.bf16.mxu0 %v10740_v37  ;;  %12826 = vst [vmem:[#allocation236_spill] sm:$0xff] %v10752_v52  ;;  %12827 = vst [vmem:[#allocation237_spill] sm:$0xff] %v10755_v15  ;;  %v10758_v37 = vld [vmem:[#allocation4 + $0x668] ss:$24 sps:$4 sm:$0xff]  }
 0x35e   : > { %12828 = vst [vmem:[#allocation238_spill] sm:$0xff] %v10758_v37 }
 0x35f   : > { %3198 = vmatpush1.bf16.msra.mxu1 %v10743_v16  ;;  %v10761_v16 = vld [vmem:[#allocation4 + $0x874] ss:$24 sps:$4 sm:$0xff]  }
 0x360   : > { %3301 = vmatpush1.bf16.msra.mxu0 %v10746_v30  ;;  %3199 = vmatprep.subr.bf16.mxu1 %v10749_v35  ;;  %12829 = vst [vmem:[#allocation239_spill] sm:$0xff] %v10761_v16  ;;  %v10764_v30 = vld [vmem:[#allocation4 + $0x69c] ss:$24 sps:$4 sm:$0xff]   ;;  %v10767_v35 = vld [vmem:[#allocation4 + $0x870] ss:$24 sps:$4 sm:$0xff]  }
 0x361   : > { %3302 = vmatprep.subr.bf16.mxu0 %v10752_v52  ;;  %12830 = vst [vmem:[#allocation240_spill] sm:$0xff] %v10764_v30  ;;  %12831 = vst [vmem:[#allocation241_spill] sm:$0xff] %v10767_v35  ;;  %v10770_v52 = vld [vmem:[#allocation4 + $0x698] ss:$24 sps:$4 sm:$0xff]  }
 0x363   : > { %3200 = vmatpush1.bf16.msra.mxu1 %v10755_v15  ;;  %v10773_v15 = vld [vmem:[#allocation4 + $0x8a4] ss:$24 sps:$4 sm:$0xff]  }
 0x364   : > { %3303 = vmatpush1.bf16.msra.mxu0 %v10758_v37  ;;  %3201 = vmatprep.subr.bf16.mxu1 %v10761_v16  ;;  %12832 = vst [vmem:[#allocation242_spill] sm:$0xff] %v10773_v15  ;;  %v10776_v37 = vld [vmem:[#allocation4 + $0x6cc] ss:$24 sps:$4 sm:$0xff]   ;;  %v10779_v16 = vld [vmem:[#allocation4 + $0x8a0] ss:$24 sps:$4 sm:$0xff]  }
 0x365   : > { %3304 = vmatprep.subr.bf16.mxu0 %v10764_v30  ;;  %12833 = vst [vmem:[#allocation243_spill] sm:$0xff] %v10776_v37  ;;  %12834 = vst [vmem:[#allocation244_spill] sm:$0xff] %v10779_v16  ;;  %v10782_v30 = vld [vmem:[#allocation4 + $0x6c8] ss:$24 sps:$4 sm:$0xff]  }
 0x367   : > { %3202 = vmatpush1.bf16.msra.mxu1 %v10767_v35  ;;  %v10786_v35 = vld [vmem:[#allocation4 + $0x6fc] ss:$24 sps:$4 sm:$0xff]  }
 0x368   : > { %3305 = vmatpush1.bf16.msra.mxu0 %v10770_v52  ;;  %3203 = vmatprep.subr.bf16.mxu1 %v10773_v15  ;;  %12835 = vst [vmem:[#allocation245_spill] sm:$0xff] %v10786_v35  ;;  %v10790_v15 = vld [vmem:[#allocation4 + $0x6f8] ss:$24 sps:$4 sm:$0xff]  }
 0x369   : > { %3306 = vmatprep.subr.bf16.mxu0 %v10776_v37  ;;  %12836 = vst [vmem:[#allocation246_spill] sm:$0xff] %v10790_v15  ;;  %v10794_v37 = vld [vmem:[#allocation4 + $0x72c] ss:$24 sps:$4 sm:$0xff]  }
 0x36a   : > { %12837 = vst [vmem:[#allocation247_spill] sm:$0xff] %v10794_v37 }
 0x36b   : > { %3204 = vmatpush1.bf16.msra.mxu1 %v10779_v16  ;;  %v10797_v16 = vld [vmem:[#allocation4 + $0x728] ss:$24 sps:$4 sm:$0xff]  }
 0x36c   : > { %3307 = vmatpush1.bf16.msra.mxu0 %v10782_v30  ;;  %3205 = vmatprep.subr.bf16.mxu1 %v9943_v36  ;;  %12838 = vst [vmem:[#allocation248_spill] sm:$0xff] %v10797_v16  ;;  %v10800_v36 = vld [vmem:[#allocation4 + $0x75c] ss:$24 sps:$4 sm:$0xff]  }
 0x36d   : > { %3308 = vmatprep.subr.bf16.mxu0 %v10786_v35  ;;  %12839 = vst [vmem:[#allocation249_spill] sm:$0xff] %v10800_v36  ;;  %v10803_v35 = vld [vmem:[#allocation4 + $0x758] ss:$24 sps:$4 sm:$0xff]  }
 0x36e   : > { %12840 = vst [vmem:[#allocation250_spill] sm:$0xff] %v10803_v35 }
 0x36f   : > { %3206 = vmatpush1.bf16.msra.mxu1 %v9945_v38  ;;  %v10806_v38 = vld [vmem:[#allocation4 + $0x78c] ss:$24 sps:$4 sm:$0xff]  }
 0x370   : > { %3309 = vmatpush1.bf16.msra.mxu0 %v10790_v15  ;;  %3339 = vmatprep.subr.bf16.mxu1 %v9947_v40  ;;  %12841 = vst [vmem:[#allocation251_spill] sm:$0xff] %v10806_v38  ;;  %v10809_v40 = vld [vmem:[#allocation4 + $0x788] ss:$24 sps:$4 sm:$0xff]  }
 0x371   : > { %3310 = vmatprep.subr.bf16.mxu0 %v10794_v37  ;;  %12842 = vst [vmem:[#allocation252_spill] sm:$0xff] %v10809_v40  ;;  %v10812_v37 = vld [vmem:[#allocation4 + $0x7bc] ss:$24 sps:$4 sm:$0xff]  }
 0x372   : > { %12843 = vst [vmem:[#allocation253_spill] sm:$0xff] %v10812_v37 }
 0x374   : > { %3311 = vmatpush1.bf16.msra.mxu0 %v10797_v16  ;;  %v10815_v16 = vld [vmem:[#allocation4 + $0x7b8] ss:$24 sps:$4 sm:$0xff]  }
 0x375   : > { %3312 = vmatprep.subr.bf16.mxu0 %v10800_v36  ;;  %12844 = vst [vmem:[#allocation254_spill] sm:$0xff] %v10815_v16  ;;  %v10818_v36 = vld [vmem:[#allocation4 + $0x7ec] ss:$24 sps:$4 sm:$0xff]  }
 0x376   : > { %12845 = vst [vmem:[#allocation255_spill] sm:$0xff] %v10818_v36 }
 0x378   : > { %3313 = vmatpush1.bf16.msra.mxu0 %v10803_v35  ;;  %v10821_v35 = vld [vmem:[#allocation4 + $0x7e8] ss:$24 sps:$4 sm:$0xff]  }
 0x379   : > { %3314 = vmatprep.subr.bf16.mxu0 %v10806_v38  ;;  %12846 = vst [vmem:[#allocation256_spill] sm:$0xff] %v10821_v35  ;;  %v10824_v38 = vld [vmem:[#allocation4 + $0x81c] ss:$24 sps:$4 sm:$0xff]  }
 0x37a   : > { %12847 = vst [vmem:[#allocation257_spill] sm:$0xff] %v10824_v38 }
 0x37c   : > { %3315 = vmatpush1.bf16.msra.mxu0 %v10809_v40  ;;  %v10827_v40 = vld [vmem:[#allocation4 + $0x818] ss:$24 sps:$4 sm:$0xff]  }
 0x37d   : > { %3316 = vmatprep.subr.bf16.mxu0 %v10812_v37  ;;  %12848 = vst [vmem:[#allocation258_spill] sm:$0xff] %v10827_v40  ;;  %v10830_v37 = vld [vmem:[#allocation4 + $0x84c] ss:$24 sps:$4 sm:$0xff]  }
 0x37e   : > { %12849 = vst [vmem:[#allocation259_spill] sm:$0xff] %v10830_v37 }
 0x380   : > { %3317 = vmatpush1.bf16.msra.mxu0 %v10815_v16  ;;  %v10833_v16 = vld [vmem:[#allocation4 + $0x848] ss:$24 sps:$4 sm:$0xff]  }
 0x381   : > { %3318 = vmatprep.subr.bf16.mxu0 %v10818_v36  ;;  %12850 = vst [vmem:[#allocation260_spill] sm:$0xff] %v10833_v16  ;;  %v10836_v36 = vld [vmem:[#allocation4 + $0x87c] ss:$24 sps:$4 sm:$0xff]  }
 0x382   : > { %12851 = vst [vmem:[#allocation261_spill] sm:$0xff] %v10836_v36 }
 0x384   : > { %3319 = vmatpush1.bf16.msra.mxu0 %v10821_v35  ;;  %v10839_v35 = vld [vmem:[#allocation4 + $0x878] ss:$24 sps:$4 sm:$0xff]  }
 0x385   : > { %3320 = vmatprep.subr.bf16.mxu0 %v10824_v38  ;;  %12852 = vst [vmem:[#allocation262_spill] sm:$0xff] %v10839_v35  ;;  %v10842_v38 = vld [vmem:[#allocation4 + $0x8ac] ss:$24 sps:$4 sm:$0xff]  }
 0x386   : > { %12853 = vst [vmem:[#allocation263_spill] sm:$0xff] %v10842_v38 }
 0x388   : > { %3321 = vmatpush1.bf16.msra.mxu0 %v10827_v40  ;;  %v10845_v40 = vld [vmem:[#allocation4 + $0x8a8] ss:$24 sps:$4 sm:$0xff]  }
 0x389   : > { %3322 = vmatprep.subr.bf16.mxu0 %v10830_v37  ;;  %12854 = vst [vmem:[#allocation264_spill] sm:$0xff] %v10845_v40  ;;  %v10848_v37 = vld [vmem:[#allocation4 + $0x8dc] ss:$24 sps:$4 sm:$0xff]  }
 0x38a   : > { %12855 = vst [vmem:[#allocation265_spill] sm:$0xff] %v10848_v37 }
 0x38c   : > { %3323 = vmatpush1.bf16.msra.mxu0 %v10833_v16  ;;  %v10851_v16 = vld [vmem:[#allocation4 + $0x8d8] ss:$24 sps:$4 sm:$0xff]  }
 0x38d   : > { %3324 = vmatprep.subr.bf16.mxu0 %v10836_v36 }
 0x390   : > { %3325 = vmatpush1.bf16.msra.mxu0 %v10839_v35 }
 0x391   : > { %3326 = vmatprep.subr.bf16.mxu0 %v10842_v38 }
 0x394   : > { %3327 = vmatpush1.bf16.msra.mxu0 %v10845_v40 }
 0x395   : > { %3328 = vmatprep.subr.bf16.mxu0 %v10848_v37 }
 0x398   : > { %3329 = vmatpush1.bf16.msra.mxu0 %v10851_v16 }
 0x399   : > { %3480 = vmatprep.subr.bf16.mxu0 %v9960_v44  ;;  %v12860_v44 = vld [vmem:[#allocation37_spill] sm:$0xff] }
 0x3ad   : > { %v10855_v36 = vpop.f32.mrb[4].mxu0 }
 0x3ae   : > { %v10857_v35 = vpop.f32.mrb[5].mxu0  ;;  %v10865_v40 = vpack.c.bf16 %v10855_v36, %v10855_v36 }
 0x3af   : > { %v10861_v38 = vpack.c.bf16 %v10857_v35, %v10857_v35  ;;  %v3084_v15 = vpop.f32.mrb[6].mxu0 }
 0x3b0   : > { %v3085_v37 = vpop.f32.mrb[7].mxu0  ;;  %v12856_v15 = vld [vmem:[#allocation33_spill] sm:$0xff] }
 0x3b1   : > { %3207 = vmatprep.mubr.bf16.mxu1 %v10861_v38  ;;  %3330 = vmatprep.mubr.bf16.mxu0 %v10861_v38  ;;  %v12909_v37 = vld [vmem:[#allocation84_spill] sm:$0xff] }
 0x3b2   : > { %3208 = vmatmul.mubr.bf16.vlgmr.msra.gmra.mrb[4].mxu1 %v10865_v40  ;;  %3331 = vmatmul.mubr.bf16.vlgmr.msra.gmra.mrb[8].mxu0 %v10865_v40 }
 0x3b3   : > { %3340 = vmatpush1.bf16.msra.mxu1 %v9955_v42  ;;  %3371 = vmatprep.mubr.bf16.mxu1 %v10391_v19  ;;  %v12857_v19 = vld [vmem:[#allocation31_spill] sm:$0xff]  ;;  %v12858_v42 = vld [vmem:[#allocation32_spill] sm:$0xff] }
 0x3b4   : > { %3341 = vmatprep.subr.bf16.mxu1 %v9957_v43  ;;  %3481 = vmatpush1.bf16.msra.mxu0 %v9972_v47  ;;  %v12859_v43 = vld [vmem:[#allocation36_spill] sm:$0xff] }
 0x3b5   : > { %3482 = vmatprep.subr.bf16.mxu0 %v9975_v48  ;;  %v12863_v47 = vld [vmem:[#allocation40_spill] sm:$0xff]  ;;  %v12864_v48 = vld [vmem:[#allocation41_spill] sm:$0xff] }
 0x3b7   : > { %3342 = vmatpush1.bf16.msra.mxu1 %v9966_v45  ;;  %v12861_v45 = vld [vmem:[#allocation34_spill] sm:$0xff] }
 0x3b8   : > { %3343 = vmatprep.subr.bf16.mxu1 %v9968_v46  ;;  %3483 = vmatpush1.bf16.msra.mxu0 %v9984_v51  ;;  %v12862_v46 = vld [vmem:[#allocation35_spill] sm:$0xff]  ;;  %v12867_v51 = vld [vmem:[#allocation44_spill] sm:$0xff] }
 0x3b9   : > { %3484 = vmatprep.subr.bf16.mxu0 %v9987_v57  ;;  %v12868_v57 = vld [vmem:[#allocation42_spill] sm:$0xff] }
 0x3bb   : > { %3344 = vmatpush1.bf16.msra.mxu1 %v9979_v49  ;;  %v12865_v49 = vld [vmem:[#allocation38_spill] sm:$0xff] }
 0x3bc   : > { %3345 = vmatprep.subr.bf16.mxu1 %v9981_v50  ;;  %3485 = vmatpush1.bf16.msra.mxu0 %v9996_v56  ;;  %v12866_v50 = vld [vmem:[#allocation39_spill] sm:$0xff]  ;;  %v12871_v56 = vld [vmem:[#allocation48_spill] sm:$0xff] }
 0x3bd   : > { %3486 = vmatprep.subr.bf16.mxu0 %v9999_v58  ;;  %v12872_v58 = vld [vmem:[#allocation45_spill] sm:$0xff] }
 0x3bf   : > { %3346 = vmatpush1.bf16.msra.mxu1 %v9991_v54  ;;  %v12869_v54 = vld [vmem:[#allocation43_spill] sm:$0xff] }
 0x3c0   : > { %3347 = vmatprep.subr.bf16.mxu1 %v9993_v55  ;;  %3487 = vmatpush1.bf16.msra.mxu0 %v10008_v61  ;;  %v12870_v55 = vld [vmem:[#allocation47_spill] sm:$0xff] }
 0x3c1   : > { %3488 = vmatprep.subr.bf16.mxu0 %v10011_v62  ;;  %v12876_v61 = vld [vmem:[#allocation51_spill] sm:$0xff]  ;;  %v12877_v62 = vld [vmem:[#allocation52_spill] sm:$0xff] }
 0x3c3   : > { %3348 = vmatpush1.bf16.msra.mxu1 %v10003_v59  ;;  %v12873_v59 = vld [vmem:[#allocation46_spill] sm:$0xff] }
 0x3c4   : > { %3349 = vmatprep.subr.bf16.mxu1 %v10005_v60  ;;  %3489 = vmatpush1.bf16.msra.mxu0 %v10020_v1  ;;  %v12874_v60 = vld [vmem:[#allocation49_spill] sm:$0xff]  ;;  %v12880_v1 = vld [vmem:[#allocation55_spill] sm:$0xff] }
 0x3c5   : > { %3490 = vmatprep.subr.bf16.mxu0 %v10023_v2  ;;  %v12881_v2 = vld [vmem:[#allocation56_spill] sm:$0xff] }
 0x3c7   : > { %3350 = vmatpush1.bf16.msra.mxu1 %v10015_v63  ;;  %v12878_v63 = vld [vmem:[#allocation53_spill] sm:$0xff] }
 0x3c8   : > { %3351 = vmatprep.subr.bf16.mxu1 %v10017_v0  ;;  %3491 = vmatpush1.bf16.msra.mxu0 %v10032_v5  ;;  %v12879_v0 = vld [vmem:[#allocation54_spill] sm:$0xff]  ;;  %v12884_v5 = vld [vmem:[#allocation59_spill] sm:$0xff] }
 0x3c9   : > { %3492 = vmatprep.subr.bf16.mxu0 %v10035_v6  ;;  %v12885_v6 = vld [vmem:[#allocation60_spill] sm:$0xff] }
 0x3cb   : > { %3352 = vmatpush1.bf16.msra.mxu1 %v10027_v3  ;;  %v12882_v3 = vld [vmem:[#allocation57_spill] sm:$0xff] }
 0x3cc   : > { %3353 = vmatprep.subr.bf16.mxu1 %v10029_v4  ;;  %3493 = vmatpush1.bf16.msra.mxu0 %v10044_v10  ;;  %v12883_v4 = vld [vmem:[#allocation58_spill] sm:$0xff]  ;;  %v12888_v10 = vld [vmem:[#allocation63_spill] sm:$0xff] }
 0x3cd   : > { %3494 = vmatprep.subr.bf16.mxu0 %v10047_v11  ;;  %v12889_v11 = vld [vmem:[#allocation64_spill] sm:$0xff] }
 0x3cf   : > { %3354 = vmatpush1.bf16.msra.mxu1 %v10039_v7  ;;  %v12886_v7 = vld [vmem:[#allocation61_spill] sm:$0xff] }
 0x3d0   : > { %3355 = vmatprep.subr.bf16.mxu1 %v10041_v8  ;;  %3495 = vmatpush1.bf16.msra.mxu0 %v10056_v14  ;;  %v12887_v8 = vld [vmem:[#allocation62_spill] sm:$0xff]  ;;  %v12892_v14 = vld [vmem:[#allocation67_spill] sm:$0xff] }
 0x3d1   : > { %3496 = vmatprep.subr.bf16.mxu0 %v10059_v17  ;;  %v12893_v17 = vld [vmem:[#allocation68_spill] sm:$0xff] }
 0x3d3   : > { %3356 = vmatpush1.bf16.msra.mxu1 %v10051_v12  ;;  %v12890_v12 = vld [vmem:[#allocation65_spill] sm:$0xff] }
 0x3d4   : > { %3357 = vmatprep.subr.bf16.mxu1 %v10053_v13  ;;  %3497 = vmatpush1.bf16.msra.mxu0 %v10068_v22  ;;  %v12891_v13 = vld [vmem:[#allocation66_spill] sm:$0xff]  ;;  %v12896_v22 = vld [vmem:[#allocation71_spill] sm:$0xff] }
 0x3d5   : > { %3498 = vmatprep.subr.bf16.mxu0 %v10071_v24  ;;  %v12897_v24 = vld [vmem:[#allocation72_spill] sm:$0xff] }
 0x3d7   : > { %3358 = vmatpush1.bf16.msra.mxu1 %v10063_v20  ;;  %v12894_v20 = vld [vmem:[#allocation69_spill] sm:$0xff] }
 0x3d8   : > { %3359 = vmatprep.subr.bf16.mxu1 %v10066_v21  ;;  %3499 = vmatpush1.bf16.msra.mxu0 %v10080_v27  ;;  %v12895_v21 = vld [vmem:[#allocation70_spill] sm:$0xff]  ;;  %v12900_v27 = vld [vmem:[#allocation75_spill] sm:$0xff] }
 0x3d9   : > { %3500 = vmatprep.subr.bf16.mxu0 %v10083_v28  ;;  %v12901_v28 = vld [vmem:[#allocation76_spill] sm:$0xff] }
 0x3db   : > { %3360 = vmatpush1.bf16.msra.mxu1 %v10075_v25  ;;  %v12898_v25 = vld [vmem:[#allocation73_spill] sm:$0xff] }
 0x3dc   : > { %3361 = vmatprep.subr.bf16.mxu1 %v10078_v26  ;;  %3501 = vmatpush1.bf16.msra.mxu0 %v10092_v32  ;;  %v12899_v26 = vld [vmem:[#allocation74_spill] sm:$0xff]  ;;  %v12904_v32 = vld [vmem:[#allocation79_spill] sm:$0xff] }
 0x3dd   : > { %3502 = vmatprep.subr.bf16.mxu0 %v10095_v33  ;;  %v12905_v33 = vld [vmem:[#allocation80_spill] sm:$0xff] }
 0x3df   : > { %3362 = vmatpush1.bf16.msra.mxu1 %v10087_v29  ;;  %v12902_v29 = vld [vmem:[#allocation77_spill] sm:$0xff] }
 0x3e0   : > { %3363 = vmatprep.subr.bf16.mxu1 %v10090_v31  ;;  %3503 = vmatpush1.bf16.msra.mxu0 %v10104_v39  ;;  %v12903_v31 = vld [vmem:[#allocation78_spill] sm:$0xff]  ;;  %v12906_v39 = vld [vmem:[#allocation81_spill] sm:$0xff] }
 0x3e1   : > { %3504 = vmatprep.subr.bf16.mxu0 %v12856_v15  ;;  %v12910_v15 = vld [vmem:[#allocation85_spill] sm:$0xff] }
 0x3e3   : > { %3364 = vmatpush1.bf16.msra.mxu1 %v12857_v19  ;;  %v12911_v19 = vld [vmem:[#allocation86_spill] sm:$0xff] }
 0x3e4   : > { %3365 = vmatprep.subr.bf16.mxu1 %v12858_v42  ;;  %3505 = vmatpush1.bf16.msra.mxu0 %v12859_v43  ;;  %v12912_v42 = vld [vmem:[#allocation87_spill] sm:$0xff]  ;;  %v12914_v43 = vld [vmem:[#allocation89_spill] sm:$0xff] }
 0x3e5   : > { %3506 = vmatprep.subr.bf16.mxu0 %v12860_v44  ;;  %v12916_v44 = vld [vmem:[#allocation91_spill] sm:$0xff] }
 0x3e7   : > { %3366 = vmatpush1.bf16.msra.mxu1 %v12861_v45  ;;  %v12917_v45 = vld [vmem:[#allocation92_spill] sm:$0xff] }
 0x3e8   : > { %3367 = vmatprep.subr.bf16.mxu1 %v12862_v46  ;;  %3507 = vmatpush1.bf16.msra.mxu0 %v12863_v47  ;;  %v12918_v46 = vld [vmem:[#allocation93_spill] sm:$0xff]  ;;  %v12919_v47 = vld [vmem:[#allocation94_spill] sm:$0xff] }
 0x3e9   : > { %3508 = vmatprep.subr.bf16.mxu0 %v12864_v48  ;;  %v12920_v48 = vld [vmem:[#allocation95_spill] sm:$0xff] }
 0x3eb   : > { %3368 = vmatpush1.bf16.msra.mxu1 %v12865_v49  ;;  %v12921_v49 = vld [vmem:[#allocation96_spill] sm:$0xff] }
 0x3ec   : > { %3369 = vmatprep.subr.bf16.mxu1 %v12866_v50  ;;  %3509 = vmatpush1.bf16.msra.mxu0 %v10140_v53  ;;  %v12875_v53 = vld [vmem:[#allocation50_spill] sm:$0xff]  ;;  %v12922_v50 = vld [vmem:[#allocation97_spill] sm:$0xff] }
 0x3ed   : > { %3510 = vmatprep.subr.bf16.mxu0 %v12867_v51  ;;  %v12923_v51 = vld [vmem:[#allocation98_spill] sm:$0xff] }
 0x3ef   : > { %3370 = vmatpush1.bf16.msra.mxu1 %v12868_v57  ;;  %v12924_v57 = vld [vmem:[#allocation99_spill] sm:$0xff] }
 0x3f0   : > { %3380 = vmatprep.subr.bf16.mxu1 %v12869_v54  ;;  %3511 = vmatpush1.bf16.msra.mxu0 %v12870_v55  ;;  %v12925_v54 = vld [vmem:[#allocation100_spill] sm:$0xff]  ;;  %v12926_v55 = vld [vmem:[#allocation101_spill] sm:$0xff] }
 0x3f1   : > { %3521 = vmatprep.subr.bf16.mxu0 %v12871_v56  ;;  %v12927_v56 = vld [vmem:[#allocation102_spill] sm:$0xff] }
 0x3f2   : > { %3372 = vmatmul.mubr.bf16.vlgmr.msra.gmra.mrb[8].mxu1 %v10398_v34  ;;  %v12907_v34 = vld [vmem:[#allocation82_spill] sm:$0xff] }
 0x3f3   : > { %3381 = vmatpush1.bf16.msra.mxu1 %v12872_v58  ;;  %3412 = vmatprep.mubr.bf16.mxu1 %v10405_v41  ;;  %v12908_v41 = vld [vmem:[#allocation83_spill] sm:$0xff] }
 0x3f4   : > { %3382 = vmatprep.subr.bf16.mxu1 %v12873_v59  ;;  %v12928_v58 = vld [vmem:[#allocation103_spill] sm:$0xff]  ;;  %v12929_v59 = vld [vmem:[#allocation104_spill] sm:$0xff] }
 0x3f7   : > { %3383 = vmatpush1.bf16.msra.mxu1 %v12874_v60  ;;  %v12930_v60 = vld [vmem:[#allocation105_spill] sm:$0xff] }
 0x3f8   : > { %3384 = vmatprep.subr.bf16.mxu1 %v12875_v53  ;;  %v12931_v53 = vld [vmem:[#allocation106_spill] sm:$0xff] }
 0x3fb   : > { %3385 = vmatpush1.bf16.msra.mxu1 %v12876_v61  ;;  %v12932_v61 = vld [vmem:[#allocation107_spill] sm:$0xff] }
 0x3fc   : > { %3386 = vmatprep.subr.bf16.mxu1 %v12877_v62  ;;  %v12933_v62 = vld [vmem:[#allocation108_spill] sm:$0xff] }
 0x3ff   : > { %3387 = vmatpush1.bf16.msra.mxu1 %v12878_v63  ;;  %v12934_v63 = vld [vmem:[#allocation109_spill] sm:$0xff] }
 0x400   : > { %3388 = vmatprep.subr.bf16.mxu1 %v12879_v0  ;;  %v12935_v0 = vld [vmem:[#allocation110_spill] sm:$0xff] }
 0x403   : > { %3389 = vmatpush1.bf16.msra.mxu1 %v12880_v1  ;;  %v12936_v1 = vld [vmem:[#allocation111_spill] sm:$0xff] }
 0x404   : > { %3390 = vmatprep.subr.bf16.mxu1 %v12881_v2  ;;  %v12937_v2 = vld [vmem:[#allocation112_spill] sm:$0xff] }
 0x407   : > { %3391 = vmatpush1.bf16.msra.mxu1 %v12882_v3  ;;  %v12938_v3 = vld [vmem:[#allocation113_spill] sm:$0xff] }
 0x408   : > { %3392 = vmatprep.subr.bf16.mxu1 %v12883_v4  ;;  %v12939_v4 = vld [vmem:[#allocation114_spill] sm:$0xff] }
 0x40b   : > { %3393 = vmatpush1.bf16.msra.mxu1 %v12884_v5  ;;  %v12940_v5 = vld [vmem:[#allocation115_spill] sm:$0xff] }
 0x40c   : > { %3394 = vmatprep.subr.bf16.mxu1 %v12885_v6  ;;  %v12941_v6 = vld [vmem:[#allocation116_spill] sm:$0xff] }
 0x40f   : > { %3395 = vmatpush1.bf16.msra.mxu1 %v12886_v7  ;;  %v12942_v7 = vld [vmem:[#allocation117_spill] sm:$0xff] }
 0x410   : > { %3396 = vmatprep.subr.bf16.mxu1 %v12887_v8  ;;  %v12943_v8 = vld [vmem:[#allocation118_spill] sm:$0xff] }
 0x413   : > { %3397 = vmatpush1.bf16.msra.mxu1 %v12888_v10  ;;  %v12944_v10 = vld [vmem:[#allocation119_spill] sm:$0xff] }
 0x414   : > { %3398 = vmatprep.subr.bf16.mxu1 %v12889_v11  ;;  %v12945_v11 = vld [vmem:[#allocation120_spill] sm:$0xff] }
 0x417   : > { %3399 = vmatpush1.bf16.msra.mxu1 %v12890_v12 }
 0x418   : > { %3400 = vmatprep.subr.bf16.mxu1 %v12891_v13  ;;  %v3867_v13 = vrot.slane %v10381_v18, 7 }
 0x41b   : > { %3401 = vmatpush1.bf16.msra.mxu1 %v12892_v14  ;;  %v3869_v14 = vrot.slane %v10383_v23, 7 }
 0x41c   : > { %3402 = vmatprep.subr.bf16.mxu1 %v12893_v17 }
 0x41f   : > { %3403 = vmatpush1.bf16.msra.mxu1 %v12894_v20 }
 0x420   : > { %3404 = vmatprep.subr.bf16.mxu1 %v12895_v21 }
 0x423   : > { %3405 = vmatpush1.bf16.msra.mxu1 %v12896_v22 }
 0x424   : > { %3406 = vmatprep.subr.bf16.mxu1 %v12897_v24  ;;  %v12946_v24 = vld [vmem:[#allocation121_spill] sm:$0xff] }
 0x427   : > { %3407 = vmatpush1.bf16.msra.mxu1 %v12898_v25  ;;  %v3868_v25 = vrot.slane %v12946_v24, 7 }
 0x428   : > { %3408 = vmatprep.subr.bf16.mxu1 %v12899_v26 }
 0x42b   : > { %3409 = vmatpush1.bf16.msra.mxu1 %v12900_v27 }
 0x42c   : > { %3410 = vmatprep.subr.bf16.mxu1 %v12901_v28  ;;  %v12947_v28 = vld [vmem:[#allocation123_spill] sm:$0xff] }
 0x42f   : > { %3411 = vmatpush1.bf16.msra.mxu1 %v12902_v29 }
 0x430   : > { %3421 = vmatprep.subr.bf16.mxu1 %v12903_v31 }
 0x432   : > { %3413 = vmatmul.mubr.bf16.vlgmr.msra.gmra.mrb[8].mxu1 %v10598_v9  ;;  %v12913_v9 = vld [vmem:[#allocation88_spill] sm:$0xff] }
 0x433   : > { %3422 = vmatpush1.bf16.msra.mxu1 %v12904_v32  ;;  %3453 = vmatprep.mubr.bf16.mxu1 %v10861_v38  ;;  %v12915_v38 = vld [vmem:[#allocation90_spill] sm:$0xff] }
 0x434   : > { %3423 = vmatprep.subr.bf16.mxu1 %v12905_v33  ;;  %v12948_v32 = vld [vmem:[#allocation122_spill] sm:$0xff] }
 0x435   : > { %v3870_v33 = vrot.slane %v12948_v32, 7 }
 0x437   : > { %3424 = vmatpush1.bf16.msra.mxu1 %v12906_v39  ;;  %v12949_v39 = vld [vmem:[#allocation27_spill] sm:$0xff] }
 0x438   : > { %3425 = vmatprep.subr.bf16.mxu1 %v12907_v34 }
 0x43b   : > { %3426 = vmatpush1.bf16.msra.mxu1 %v12908_v41  ;;  %v12950_v41 = vld [vmem:[#allocation26_spill] sm:$0xff] }
 0x43c   : > { %3427 = vmatprep.subr.bf16.mxu1 %v12909_v37 }
 0x43f   : > { %3428 = vmatpush1.bf16.msra.mxu1 %v12910_v15 }
 0x440   : > { %3429 = vmatprep.subr.bf16.mxu1 %v12911_v19 }
 0x443   : > { %3430 = vmatpush1.bf16.msra.mxu1 %v12912_v42  ;;  %v12951_v42 = vld [vmem:[#allocation124_spill] sm:$0xff] }
 0x444   : > { %3431 = vmatprep.subr.bf16.mxu1 %v12913_v9  ;;  %v12952_v9 = vld [vmem:[#allocation25_spill] sm:$0xff] }
 0x447   : > { %3432 = vmatpush1.bf16.msra.mxu1 %v12914_v43 }
 0x448   : > { %3433 = vmatprep.subr.bf16.mxu1 %v12915_v38  ;;  %v12953_v38 = vld [vmem:[#allocation28_spill] sm:$0xff] }
 0x44b   : > { %3434 = vmatpush1.bf16.msra.mxu1 %v12916_v44 }
 0x44c   : > { %3435 = vmatprep.subr.bf16.mxu1 %v12917_v45  ;;  %v3916_v45 = vsel %vm3915_vm0, %v12949_v39, %v3867_v13  ;;  %v12970_v13 = vld [vmem:[#allocation139_spill] sm:$0xff] }
 0x44f   : > { %3436 = vmatpush1.bf16.msra.mxu1 %v12918_v46  ;;  %v3918_v46 = vsel %vm3915_vm0, %v12950_v41, %v3869_v14  ;;  %v12971_v14 = vld [vmem:[#allocation144_spill] sm:$0xff] }
 0x450   : > { %3437 = vmatprep.subr.bf16.mxu1 %v12919_v47 }
 0x453   : > { %3438 = vmatpush1.bf16.msra.mxu1 %v12920_v48 }
 0x454   : > { %3439 = vmatprep.subr.bf16.mxu1 %v12921_v49  ;;  %v3917_v49 = vsel %vm3915_vm0, %v12952_v9, %v3868_v25  ;;  %v12976_v25 = vld [vmem:[#allocation145_spill] sm:$0xff] }
 0x457   : > { %3440 = vmatpush1.bf16.msra.mxu1 %v12922_v50 }
 0x458   : > { %3441 = vmatprep.subr.bf16.mxu1 %v12923_v51 }
 0x45b   : > { %3442 = vmatpush1.bf16.msra.mxu1 %v12924_v57  ;;  %v12954_v57 = vld [vmem:[#allocation126_spill] sm:$0xff] }
 0x45c   : > { %3443 = vmatprep.subr.bf16.mxu1 %v12925_v54 }
 0x45f   : > { %3444 = vmatpush1.bf16.msra.mxu1 %v12926_v55  ;;  %v3919_v55 = vsel %vm3915_vm0, %v12953_v38, %v3870_v33  ;;  %v12982_v33 = vld [vmem:[#allocation151_spill] sm:$0xff] }
 0x460   : > { %3445 = vmatprep.subr.bf16.mxu1 %v12927_v56 }
 0x463   : > { %3446 = vmatpush1.bf16.msra.mxu1 %v12928_v58  ;;  %v12955_v58 = vld [vmem:[#allocation128_spill] sm:$0xff] }
 0x464   : > { %3447 = vmatprep.subr.bf16.mxu1 %v12929_v59 }
 0x467   : > { %3448 = vmatpush1.bf16.msra.mxu1 %v12930_v60 }
 0x468   : > { %3449 = vmatprep.subr.bf16.mxu1 %v12931_v53 }
 0x46b   : > { %3450 = vmatpush1.bf16.msra.mxu1 %v12932_v61 }
 0x46c   : > { %3451 = vmatprep.subr.bf16.mxu1 %v12933_v62 }
 0x46f   : > { %3452 = vmatpush1.bf16.msra.mxu1 %v12934_v63  ;;  %v12956_v63 = vld [vmem:[#allocation125_spill] sm:$0xff] }
 0x470   : > { %3603 = vmatprep.subr.bf16.mxu1 %v12935_v0  ;;  %v12957_v0 = vld [vmem:[#allocation130_spill] sm:$0xff] }
 0x472   : > { %3454 = vmatmul.mubr.bf16.vlgmr.msra.gmra.mrb[8].mxu1 %v10865_v40 }
 0x473   : > { %3604 = vmatpush1.bf16.msra.mxu1 %v12936_v1  ;;  %v12958_v1 = vld [vmem:[#allocation127_spill] sm:$0xff] }
 0x474   : > { %3605 = vmatprep.subr.bf16.mxu1 %v12937_v2  ;;  %v12959_v2 = vld [vmem:[#allocation132_spill] sm:$0xff] }
 0x477   : > { %3606 = vmatpush1.bf16.msra.mxu1 %v12938_v3  ;;  %v12960_v3 = vld [vmem:[#allocation129_spill] sm:$0xff] }
 0x478   : > { %3607 = vmatprep.subr.bf16.mxu1 %v12939_v4  ;;  %v12961_v4 = vld [vmem:[#allocation134_spill] sm:$0xff] }
 0x47b   : > { %3608 = vmatpush1.bf16.msra.mxu1 %v12940_v5  ;;  %v12962_v5 = vld [vmem:[#allocation131_spill] sm:$0xff] }
 0x47c   : > { %3609 = vmatprep.subr.bf16.mxu1 %v12941_v6  ;;  %v12963_v6 = vld [vmem:[#allocation136_spill] sm:$0xff] }
 0x47f   : > { %3610 = vmatpush1.bf16.msra.mxu1 %v12942_v7  ;;  %v12964_v7 = vld [vmem:[#allocation133_spill] sm:$0xff] }
 0x480   : > { %3611 = vmatprep.subr.bf16.mxu1 %v12943_v8  ;;  %v12965_v8 = vld [vmem:[#allocation138_spill] sm:$0xff] }
 0x483   : > { %3612 = vmatpush1.bf16.msra.mxu1 %v12944_v10  ;;  %v12966_v10 = vld [vmem:[#allocation135_spill] sm:$0xff] }
 0x484   : > { %3613 = vmatprep.subr.bf16.mxu1 %v12945_v11  ;;  %v12967_v11 = vld [vmem:[#allocation140_spill] sm:$0xff] }
 0x485   : > { %v3209_v40 = vpop.f32.mrb[4].mxu1  ;;  %v3332_v12 = vpop.f32.mrb[8].mxu0 }
 0x486   : > { %v3462_v17 = vmul.f32 2.0, %v3209_v40  ;;  %v3464_v20 = vmul.f32 2.0, %v3332_v12  ;;  %v3211_v21 = vpop.f32.mrb[5].mxu1  ;;  %v3334_v22 = vpop.f32.mrb[9].mxu0  ;;  %v12968_v40 = vld [vmem:[#allocation137_spill] sm:$0xff]  ;;  %v12969_v12 = vld [vmem:[#allocation142_spill] sm:$0xff] }
 0x487   : > { %v3463_v26 = vmul.f32 2.0, %v3211_v21  ;;  %v3465_v27 = vmul.f32 2.0, %v3334_v22  ;;  %3614 = vmatpush1.bf16.msra.mxu1 %v12947_v28  ;;  %v3213_v29 = vpop.f32.mrb[6].mxu1  ;;  %v3336_v31 = vpop.f32.mrb[10].mxu0  ;;  %v12974_v21 = vld [vmem:[#allocation143_spill] sm:$0xff]  ;;  %v12975_v22 = vld [vmem:[#allocation148_spill] sm:$0xff] }
 0x488   : > { %v3468_v34 = vsub.f32 %v3462_v17, %v12949_v39  ;;  %v11022_v37 = vsub.f32 %v3464_v20, %v12950_v41  ;;  %v3214_v15 = vpop.f32.mrb[7].mxu1  ;;  %v3337_v19 = vpop.f32.mrb[11].mxu0  ;;  %3615 = vmatprep.subr.bf16.mxu1 %v12951_v42  ;;  %v12972_v17 = vld [vmem:[#allocation141_spill] sm:$0xff]  ;;  %v12973_v20 = vld [vmem:[#allocation146_spill] sm:$0xff]  ;;  %v12979_v28 = vld [vmem:[#allocation152_spill] sm:$0xff] }
 0x489   : > { %v3469_v43 = vsub.f32 %v3463_v26, %v12952_v9  ;;  %v3471_v44 = vsub.f32 %v3465_v27, %v12953_v38  ;;  %v12977_v26 = vld [vmem:[#allocation150_spill] sm:$0xff]  ;;  %v12978_v27 = vld [vmem:[#allocation147_spill] sm:$0xff]  ;;  %v12980_v29 = vld [vmem:[#allocation149_spill] sm:$0xff] }
 0x48a   : > { %v3885_v47 = vrot.slane %v3468_v34, 6  ;;  %v3887_v48 = vrot.slane %v11022_v37, 6  ;;  %v11039_v56 = vpack.c.bf16 %v3468_v34, %v3468_v34  ;;  %v12981_v31 = vld [vmem:[#allocation154_spill] sm:$0xff]  ;;  %v12983_v39 = vld [vmem:[#allocation156_spill] sm:$0xff]  ;;  %v12984_v34 = vld [vmem:[#allocation153_spill] sm:$0xff] }
 0x48b   : > { %v3886_v50 = vrot.slane %v3469_v43, 6  ;;  %v3888_v51 = vrot.slane %v3471_v44, 6  ;;  %3616 = vmatpush1.bf16.msra.mxu1 %v12954_v57  ;;  %v11035_v54 = vpack.c.bf16 %v3469_v43, %v3469_v43  ;;  %v11057_v62 = vpack.c.bf16 %v3471_v44, %v3471_v44  ;;  %v12985_v41 = vld [vmem:[#allocation158_spill] sm:$0xff]  ;;  %v12986_v15 = vld [vmem:[#allocation155_spill] sm:$0xff]  ;;  %v12987_v19 = vld [vmem:[#allocation160_spill] sm:$0xff] }
 0x48c   : > { %3617 = vmatprep.subr.bf16.mxu1 %v12955_v58  ;;  %v11043_v59 = vsel %vm3922_vm1, %v3916_v45, %v3885_v47  ;;  %v11046_v60 = vsel %vm3922_vm1, %v3918_v46, %v3887_v48  ;;  %v12988_v42 = vld [vmem:[#allocation157_spill] sm:$0xff]  ;;  %v12989_v9 = vld [vmem:[#allocation162_spill] sm:$0xff]  ;;  %v12990_v43 = vld [vmem:[#allocation159_spill] sm:$0xff] }
 0x48d   : > { %v11049_v53 = vsel %vm3922_vm1, %v3917_v49, %v3886_v50  ;;  %v11052_v61 = vsel %vm3922_vm1, %v3919_v55, %v3888_v51  ;;  %3512 = vmatprep.mubr.bf16.mxu0 %v11035_v54  ;;  %3635 = vmatprep.mubr.bf16.mxu1 %v11035_v54  ;;  %v12991_v38 = vld [vmem:[#allocation164_spill] sm:$0xff]  ;;  %v12992_v44 = vld [vmem:[#allocation161_spill] sm:$0xff]  ;;  %v12993_v45 = vld [vmem:[#allocation166_spill] sm:$0xff] }
 0x48e   : > { %3513 = vmatmul.mubr.bf16.vlgmr.msra.gmra.mrb[12].mxu0 %v11039_v56  ;;  %v12994_v46 = vld [vmem:[#allocation163_spill] sm:$0xff]  ;;  %v12995_v47 = vld [vmem:[#allocation168_spill] sm:$0xff]  ;;  %v12996_v48 = vld [vmem:[#allocation165_spill] sm:$0xff] }
 0x48f   : > { %3522 = vmatpush1.bf16.msra.mxu0 %v12956_v63  ;;  %3618 = vmatpush1.bf16.msra.mxu1 %v12957_v0  ;;  %v12997_v49 = vld [vmem:[#allocation170_spill] sm:$0xff]  ;;  %v12998_v50 = vld [vmem:[#allocation167_spill] sm:$0xff]  ;;  %v12999_v51 = vld [vmem:[#allocation172_spill] sm:$0xff] }
 0x490   : > { %3553 = vmatprep.mubr.bf16.mxu0 %v11057_v62  ;;  %3523 = vmatprep.subr.bf16.mxu0 %v12958_v1  ;;  %v13000_v57 = vld [vmem:[#allocation169_spill] sm:$0xff]  ;;  %v13001_v55 = vld [vmem:[#allocation174_spill] sm:$0xff]  ;;  %v13002_v58 = vld [vmem:[#allocation171_spill] sm:$0xff] }
 0x491   : > { %3619 = vmatprep.subr.bf16.mxu1 %v12959_v2  ;;  %v13003_v63 = vld [vmem:[#allocation176_spill] sm:$0xff]  ;;  %v13004_v0 = vld [vmem:[#allocation173_spill] sm:$0xff]  ;;  %v13005_v1 = vld [vmem:[#allocation178_spill] sm:$0xff] }
 0x492   : > { %v13006_v2 = vld [vmem:[#allocation175_spill] sm:$0xff] }
 0x493   : > { %3524 = vmatpush1.bf16.msra.mxu0 %v12960_v3  ;;  %3620 = vmatpush1.bf16.msra.mxu1 %v12961_v4  ;;  %v13007_v3 = vld [vmem:[#allocation180_spill] sm:$0xff]  ;;  %v13008_v4 = vld [vmem:[#allocation177_spill] sm:$0xff] }
 0x494   : > { %3525 = vmatprep.subr.bf16.mxu0 %v12962_v5  ;;  %3621 = vmatprep.subr.bf16.mxu1 %v12963_v6  ;;  %v13009_v5 = vld [vmem:[#allocation182_spill] sm:$0xff]  ;;  %v13010_v6 = vld [vmem:[#allocation179_spill] sm:$0xff] }
 0x497   : > { %3526 = vmatpush1.bf16.msra.mxu0 %v12964_v7  ;;  %3622 = vmatpush1.bf16.msra.mxu1 %v12965_v8  ;;  %v13011_v7 = vld [vmem:[#allocation184_spill] sm:$0xff]  ;;  %v13012_v8 = vld [vmem:[#allocation181_spill] sm:$0xff] }
 0x498   : > { %3527 = vmatprep.subr.bf16.mxu0 %v12966_v10  ;;  %3623 = vmatprep.subr.bf16.mxu1 %v12967_v11  ;;  %v13013_v10 = vld [vmem:[#allocation186_spill] sm:$0xff]  ;;  %v13014_v11 = vld [vmem:[#allocation183_spill] sm:$0xff] }
 0x49b   : > { %3528 = vmatpush1.bf16.msra.mxu0 %v12968_v40  ;;  %3624 = vmatpush1.bf16.msra.mxu1 %v12969_v12  ;;  %v13015_v40 = vld [vmem:[#allocation188_spill] sm:$0xff]  ;;  %v13016_v12 = vld [vmem:[#allocation185_spill] sm:$0xff] }
 0x49c   : > { %3529 = vmatprep.subr.bf16.mxu0 %v12970_v13  ;;  %3625 = vmatprep.subr.bf16.mxu1 %v12971_v14  ;;  %v13017_v13 = vld [vmem:[#allocation190_spill] sm:$0xff]  ;;  %v11126_v14 = vpack.c.bf16 %v11022_v37, %v11022_v37  ;;  %v13026_v37 = vld [vmem:[#allocation200_spill] sm:$0xff] }
 0x49f   : > { %3530 = vmatpush1.bf16.msra.mxu0 %v12972_v17  ;;  %3626 = vmatpush1.bf16.msra.mxu1 %v12973_v20  ;;  %v13018_v17 = vld [vmem:[#allocation192_spill] sm:$0xff]  ;;  %v13019_v20 = vld [vmem:[#allocation187_spill] sm:$0xff] }
 0x4a0   : > { %3531 = vmatprep.subr.bf16.mxu0 %v12974_v21  ;;  %3627 = vmatprep.subr.bf16.mxu1 %v12975_v22  ;;  %v13020_v21 = vld [vmem:[#allocation194_spill] sm:$0xff]  ;;  %v13021_v22 = vld [vmem:[#allocation189_spill] sm:$0xff] }
 0x4a3   : > { %3532 = vmatpush1.bf16.msra.mxu0 %v12976_v25  ;;  %3628 = vmatpush1.bf16.msra.mxu1 %v12977_v26  ;;  %v13022_v25 = vld [vmem:[#allocation196_spill] sm:$0xff]  ;;  %v13023_v26 = vld [vmem:[#allocation191_spill] sm:$0xff] }
 0x4a4   : > { %3533 = vmatprep.subr.bf16.mxu0 %v12978_v27  ;;  %3629 = vmatprep.subr.bf16.mxu1 %v12979_v28  ;;  %v13024_v27 = vld [vmem:[#allocation198_spill] sm:$0xff]  ;;  %v13025_v28 = vld [vmem:[#allocation193_spill] sm:$0xff] }
 0x4a7   : > { %3534 = vmatpush1.bf16.msra.mxu0 %v12980_v29  ;;  %3630 = vmatpush1.bf16.msra.mxu1 %v12981_v31  ;;  %v13027_v29 = vld [vmem:[#allocation195_spill] sm:$0xff]  ;;  %v13028_v31 = vld [vmem:[#allocation202_spill] sm:$0xff] }
 0x4a8   : > { %3535 = vmatprep.subr.bf16.mxu0 %v12982_v33  ;;  %3631 = vmatprep.subr.bf16.mxu1 %v12983_v39  ;;  %v13029_v33 = vld [vmem:[#allocation197_spill] sm:$0xff]  ;;  %v13030_v39 = vld [vmem:[#allocation204_spill] sm:$0xff] }
 0x4ab   : > { %3536 = vmatpush1.bf16.msra.mxu0 %v12984_v34  ;;  %3632 = vmatpush1.bf16.msra.mxu1 %v12985_v41  ;;  %v13031_v34 = vld [vmem:[#allocation199_spill] sm:$0xff]  ;;  %v13032_v41 = vld [vmem:[#allocation206_spill] sm:$0xff] }
 0x4ac   : > { %3537 = vmatprep.subr.bf16.mxu0 %v12986_v15  ;;  %3633 = vmatprep.subr.bf16.mxu1 %v12987_v19  ;;  %v13033_v15 = vld [vmem:[#allocation201_spill] sm:$0xff]  ;;  %v13034_v19 = vld [vmem:[#allocation208_spill] sm:$0xff] }
 0x4af   : > { %3538 = vmatpush1.bf16.msra.mxu0 %v12988_v42  ;;  %3634 = vmatpush1.bf16.msra.mxu1 %v12989_v9  ;;  %v13035_v42 = vld [vmem:[#allocation203_spill] sm:$0xff]  ;;  %v13036_v9 = vld [vmem:[#allocation210_spill] sm:$0xff] }
 0x4b0   : > { %3539 = vmatprep.subr.bf16.mxu0 %v12990_v43  ;;  %3644 = vmatprep.subr.bf16.mxu1 %v12991_v38  ;;  %v13037_v43 = vld [vmem:[#allocation205_spill] sm:$0xff]  ;;  %v13038_v38 = vld [vmem:[#allocation212_spill] sm:$0xff] }
 0x4b2   : > { %3636 = vmatmul.mubr.bf16.vlgmr.msra.gmra.mrb[12].mxu1 %v11039_v56 }
 0x4b3   : > { %3540 = vmatpush1.bf16.msra.mxu0 %v12992_v44  ;;  %3645 = vmatpush1.bf16.msra.mxu1 %v12993_v45  ;;  %v13039_v44 = vld [vmem:[#allocation207_spill] sm:$0xff]  ;;  %v13040_v45 = vld [vmem:[#allocation214_spill] sm:$0xff] }
 0x4b4   : > { %3676 = vmatprep.mubr.bf16.mxu1 %v11057_v62  ;;  %3541 = vmatprep.subr.bf16.mxu0 %v12994_v46  ;;  %v13041_v46 = vld [vmem:[#allocation209_spill] sm:$0xff] }
 0x4b5   : > { %3646 = vmatprep.subr.bf16.mxu1 %v12995_v47  ;;  %v13042_v47 = vld [vmem:[#allocation216_spill] sm:$0xff] }
 0x4b7   : > { %3542 = vmatpush1.bf16.msra.mxu0 %v12996_v48  ;;  %3647 = vmatpush1.bf16.msra.mxu1 %v12997_v49  ;;  %v13043_v48 = vld [vmem:[#allocation211_spill] sm:$0xff]  ;;  %v13044_v49 = vld [vmem:[#allocation218_spill] sm:$0xff] }
 0x4b8   : > { %3543 = vmatprep.subr.bf16.mxu0 %v12998_v50  ;;  %3648 = vmatprep.subr.bf16.mxu1 %v12999_v51  ;;  %v13045_v50 = vld [vmem:[#allocation213_spill] sm:$0xff]  ;;  %v13046_v51 = vld [vmem:[#allocation220_spill] sm:$0xff] }
 0x4bb   : > { %3544 = vmatpush1.bf16.msra.mxu0 %v13000_v57  ;;  %3649 = vmatpush1.bf16.msra.mxu1 %v13001_v55  ;;  %v13047_v57 = vld [vmem:[#allocation215_spill] sm:$0xff]  ;;  %v13048_v55 = vld [vmem:[#allocation222_spill] sm:$0xff] }
 0x4bc   : > { %3545 = vmatprep.subr.bf16.mxu0 %v13002_v58  ;;  %3650 = vmatprep.subr.bf16.mxu1 %v13003_v63  ;;  %v13049_v58 = vld [vmem:[#allocation217_spill] sm:$0xff]  ;;  %v13050_v63 = vld [vmem:[#allocation224_spill] sm:$0xff] }
 0x4bf   : > { %3546 = vmatpush1.bf16.msra.mxu0 %v13004_v0  ;;  %3651 = vmatpush1.bf16.msra.mxu1 %v13005_v1  ;;  %v13051_v0 = vld [vmem:[#allocation219_spill] sm:$0xff]  ;;  %v13052_v1 = vld [vmem:[#allocation226_spill] sm:$0xff] }
 0x4c0   : > { %3547 = vmatprep.subr.bf16.mxu0 %v13006_v2  ;;  %3652 = vmatprep.subr.bf16.mxu1 %v13007_v3  ;;  %v13053_v2 = vld [vmem:[#allocation221_spill] sm:$0xff]  ;;  %v13054_v3 = vld [vmem:[#allocation228_spill] sm:$0xff] }
 0x4c3   : > { %3548 = vmatpush1.bf16.msra.mxu0 %v13008_v4  ;;  %3653 = vmatpush1.bf16.msra.mxu1 %v13009_v5  ;;  %v13055_v4 = vld [vmem:[#allocation223_spill] sm:$0xff]  ;;  %v13056_v5 = vld [vmem:[#allocation230_spill] sm:$0xff] }
 0x4c4   : > { %3549 = vmatprep.subr.bf16.mxu0 %v13010_v6  ;;  %3654 = vmatprep.subr.bf16.mxu1 %v13011_v7  ;;  %v13057_v6 = vld [vmem:[#allocation225_spill] sm:$0xff]  ;;  %v13058_v7 = vld [vmem:[#allocation232_spill] sm:$0xff] }
 0x4c7   : > { %3550 = vmatpush1.bf16.msra.mxu0 %v13012_v8  ;;  %3655 = vmatpush1.bf16.msra.mxu1 %v13013_v10  ;;  %v13059_v8 = vld [vmem:[#allocation227_spill] sm:$0xff]  ;;  %v13060_v10 = vld [vmem:[#allocation234_spill] sm:$0xff] }
 0x4c8   : > { %3551 = vmatprep.subr.bf16.mxu0 %v13014_v11  ;;  %3656 = vmatprep.subr.bf16.mxu1 %v13015_v40  ;;  %v13061_v11 = vld [vmem:[#allocation229_spill] sm:$0xff]  ;;  %v13062_v40 = vld [vmem:[#allocation236_spill] sm:$0xff] }
 0x4cb   : > { %3552 = vmatpush1.bf16.msra.mxu0 %v13016_v12  ;;  %3657 = vmatpush1.bf16.msra.mxu1 %v13017_v13  ;;  %v13063_v12 = vld [vmem:[#allocation231_spill] sm:$0xff]  ;;  %v13064_v13 = vld [vmem:[#allocation238_spill] sm:$0xff] }
 0x4cc   : > { %3658 = vmatprep.subr.bf16.mxu1 %v13018_v17  ;;  %3562 = vmatprep.subr.bf16.mxu0 %v13019_v20  ;;  %v13065_v17 = vld [vmem:[#allocation233_spill] sm:$0xff]  ;;  %v13066_v20 = vld [vmem:[#allocation240_spill] sm:$0xff] }
 0x4ce   : > { %3554 = vmatmul.mubr.bf16.vlgmr.msra.gmra.mrb[12].mxu0 %v11126_v14 }
 0x4cf   : > { %3659 = vmatpush1.bf16.msra.mxu1 %v13020_v21  ;;  %3563 = vmatpush1.bf16.msra.mxu0 %v13021_v22  ;;  %v13067_v21 = vld [vmem:[#allocation235_spill] sm:$0xff]  ;;  %v13068_v22 = vld [vmem:[#allocation237_spill] sm:$0xff] }
 0x4d0   : > { %3660 = vmatprep.subr.bf16.mxu1 %v13022_v25  ;;  %3564 = vmatprep.subr.bf16.mxu0 %v13023_v26  ;;  %v13069_v25 = vld [vmem:[#allocation243_spill] sm:$0xff] }
 0x4d1   : > { %v13070_v26 = vld [vmem:[#allocation239_spill] sm:$0xff] }
 0x4d3   : > { %3661 = vmatpush1.bf16.msra.mxu1 %v13024_v27  ;;  %3565 = vmatpush1.bf16.msra.mxu0 %v13025_v28  ;;  %v13071_v27 = vld [vmem:[#allocation241_spill] sm:$0xff] }
 0x4d4   : > { %3662 = vmatprep.subr.bf16.mxu1 %v13026_v37  ;;  %3566 = vmatprep.subr.bf16.mxu0 %v13027_v29  ;;  %v13072_v28 = vld [vmem:[#allocation245_spill] sm:$0xff]  ;;  %v13073_v37 = vld [vmem:[#allocation242_spill] sm:$0xff] }
 0x4d5   : > { %v13074_v29 = vld [vmem:[#allocation246_spill] sm:$0xff] }
 0x4d7   : > { %3663 = vmatpush1.bf16.msra.mxu1 %v13028_v31  ;;  %3567 = vmatpush1.bf16.msra.mxu0 %v13029_v33  ;;  %v13075_v31 = vld [vmem:[#allocation244_spill] sm:$0xff]  ;;  %v13076_v33 = vld [vmem:[#allocation247_spill] sm:$0xff] }
 0x4d8   : > { %3664 = vmatprep.subr.bf16.mxu1 %v13030_v39  ;;  %3568 = vmatprep.subr.bf16.mxu0 %v13031_v34  ;;  %v13077_v39 = vld [vmem:[#allocation248_spill] sm:$0xff] }
 0x4d9   : > { %v8913_v34 = vld [vmem:[#allocation4 + $0x8d0] ss:$24 sps:$4 sm:$0xff]  }
 0x4db   : > { %3665 = vmatpush1.bf16.msra.mxu1 %v13032_v41  ;;  %3569 = vmatpush1.bf16.msra.mxu0 %v13033_v15  ;;  %v13078_v41 = vld [vmem:[#allocation249_spill] sm:$0xff]  ;;  %v13079_v15 = vld [vmem:[#allocation250_spill] sm:$0xff] }
 0x4dc   : > { %3666 = vmatprep.subr.bf16.mxu1 %v13034_v19  ;;  %3570 = vmatprep.subr.bf16.mxu0 %v13035_v42  ;;  %v13080_v19 = vld [vmem:[#allocation251_spill] sm:$0xff]  ;;  %v13081_v42 = vld [vmem:[#allocation252_spill] sm:$0xff] }
 0x4df   : > { %3667 = vmatpush1.bf16.msra.mxu1 %v13036_v9  ;;  %3571 = vmatpush1.bf16.msra.mxu0 %v13037_v43  ;;  %v13082_v9 = vld [vmem:[#allocation253_spill] sm:$0xff]  ;;  %v13083_v43 = vld [vmem:[#allocation254_spill] sm:$0xff] }
 0x4e0   : > { %3668 = vmatprep.subr.bf16.mxu1 %v13038_v38  ;;  %3572 = vmatprep.subr.bf16.mxu0 %v13039_v44  ;;  %v13084_v38 = vld [vmem:[#allocation255_spill] sm:$0xff]  ;;  %v13085_v44 = vld [vmem:[#allocation256_spill] sm:$0xff] }
 0x4e3   : > { %3669 = vmatpush1.bf16.msra.mxu1 %v13040_v45  ;;  %3573 = vmatpush1.bf16.msra.mxu0 %v13041_v46  ;;  %v13086_v45 = vld [vmem:[#allocation257_spill] sm:$0xff]  ;;  %v13087_v46 = vld [vmem:[#allocation258_spill] sm:$0xff] }
 0x4e4   : > { %3670 = vmatprep.subr.bf16.mxu1 %v13042_v47  ;;  %3574 = vmatprep.subr.bf16.mxu0 %v13043_v48  ;;  %v13088_v47 = vld [vmem:[#allocation259_spill] sm:$0xff]  ;;  %v13089_v48 = vld [vmem:[#allocation260_spill] sm:$0xff] }
 0x4e7   : > { %3671 = vmatpush1.bf16.msra.mxu1 %v13044_v49  ;;  %3575 = vmatpush1.bf16.msra.mxu0 %v13045_v50  ;;  %v13090_v49 = vld [vmem:[#allocation261_spill] sm:$0xff]  ;;  %v13091_v50 = vld [vmem:[#allocation262_spill] sm:$0xff] }
 0x4e8   : > { %3672 = vmatprep.subr.bf16.mxu1 %v13046_v51  ;;  %3576 = vmatprep.subr.bf16.mxu0 %v13047_v57  ;;  %v13092_v51 = vld [vmem:[#allocation263_spill] sm:$0xff]  ;;  %v13093_v57 = vld [vmem:[#allocation264_spill] sm:$0xff] }
 0x4eb   : > { %3673 = vmatpush1.bf16.msra.mxu1 %v13048_v55  ;;  %3577 = vmatpush1.bf16.msra.mxu0 %v13049_v58  ;;  %v13094_v55 = vld [vmem:[#allocation265_spill] sm:$0xff] }
 0x4ec   : > { %3674 = vmatprep.subr.bf16.mxu1 %v13050_v63  ;;  %3578 = vmatprep.subr.bf16.mxu0 %v13051_v0 }
 0x4ef   : > { %3675 = vmatpush1.bf16.msra.mxu1 %v13052_v1  ;;  %3579 = vmatpush1.bf16.msra.mxu0 %v13053_v2  ;;  %v3871_v1 = vrot.slane %v10855_v36, 7 }
 0x4f0   : > { %3685 = vmatprep.subr.bf16.mxu1 %v13054_v3  ;;  %3580 = vmatprep.subr.bf16.mxu0 %v13055_v4  ;;  %v3872_v4 = vrot.slane %v10857_v35, 7 }
 0x4f2   : > { %3677 = vmatmul.mubr.bf16.vlgmr.msra.gmra.mrb[12].mxu1 %v11126_v14 }
 0x4f3   : > { %3686 = vmatpush1.bf16.msra.mxu1 %v13056_v5  ;;  %3581 = vmatpush1.bf16.msra.mxu0 %v13057_v6  ;;  %v13095_v5 = vld [vmem:[#allocation30_spill] sm:$0xff] }
 0x4f4   : > { %3687 = vmatprep.subr.bf16.mxu1 %v13058_v7  ;;  %3582 = vmatprep.subr.bf16.mxu0 %v13059_v8  ;;  %v13096_v8 = vld [vmem:[#allocation29_spill] sm:$0xff] }
 0x4f7   : > { %3688 = vmatpush1.bf16.msra.mxu1 %v13060_v10  ;;  %3583 = vmatpush1.bf16.msra.mxu0 %v13061_v11 }
 0x4f8   : > { %3689 = vmatprep.subr.bf16.mxu1 %v13062_v40  ;;  %3584 = vmatprep.subr.bf16.mxu0 %v13063_v12  ;;  %v3920_v40 = vsel %vm3915_vm0, %v13095_v5, %v3871_v1  ;;  %v8949_v1 = vld [vmem:[#allocation4 + $0x340] ss:$24 sps:$4 sm:$0xff]  }
 0x4fb   : > { %3690 = vmatpush1.bf16.msra.mxu1 %v13064_v13  ;;  %3585 = vmatpush1.bf16.msra.mxu0 %v13065_v17  ;;  %v3921_v13 = vsel %vm3915_vm0, %v13096_v8, %v3872_v4  ;;  %v8952_v4 = vld [vmem:[#allocation4 + $0x3a4] ss:$24 sps:$4 sm:$0xff]  }
 0x4fc   : > { %3691 = vmatprep.subr.bf16.mxu1 %v13066_v20  ;;  %3586 = vmatprep.subr.bf16.mxu0 %v13067_v21 }
 0x4ff   : > { %3692 = vmatpush1.bf16.msra.mxu1 %v10770_v52  ;;  %3587 = vmatpush1.bf16.msra.mxu0 %v13068_v22  ;;  %v8912_v52 = vld [vmem:[#allocation4 + $0x8d4] ss:$24 sps:$4 sm:$0xff]   ;;  %v8915_v22 = vld [vmem:[#allocation4 + $0x10] ss:$24 sps:$4 sm:$0xff]  }
 0x500   : > { %3693 = vmatprep.subr.bf16.mxu1 %v13069_v25  ;;  %3588 = vmatprep.subr.bf16.mxu0 %v13070_v26  ;;  %v8916_v25 = vld [vmem:[#allocation4 + $0x44] ss:$24 sps:$4 sm:$0xff]   ;;  %v8917_v26 = vld [vmem:[#allocation4 + $0x40] ss:$24 sps:$4 sm:$0xff]  }
 0x503   : > { %3694 = vmatpush1.bf16.msra.mxu1 %v10782_v30  ;;  %3589 = vmatpush1.bf16.msra.mxu0 %v13071_v27  ;;  %v8914_v30 = vld [vmem:[#allocation4 + $0x14] ss:$24 sps:$4 sm:$0xff]  }
 0x504   : > { %3695 = vmatprep.subr.bf16.mxu1 %v13072_v28  ;;  %3590 = vmatprep.subr.bf16.mxu0 %v13073_v37  ;;  %v8918_v27 = vld [vmem:[#allocation4 + $0x74] ss:$24 sps:$4 sm:$0xff]   ;;  %v8919_v28 = vld [vmem:[#allocation4 + $0x70] ss:$24 sps:$4 sm:$0xff]   ;;  %v8920_v37 = vld [vmem:[#allocation4 + $0xa4] ss:$24 sps:$4 sm:$0xff]  }
 0x507   : > { %3696 = vmatpush1.bf16.msra.mxu1 %v13074_v29  ;;  %3591 = vmatpush1.bf16.msra.mxu0 %v13075_v31  ;;  %v8921_v29 = vld [vmem:[#allocation4 + $0xa0] ss:$24 sps:$4 sm:$0xff]   ;;  %v8922_v31 = vld [vmem:[#allocation4 + $0xd4] ss:$24 sps:$4 sm:$0xff]  }
 0x508   : > { %3697 = vmatprep.subr.bf16.mxu1 %v13076_v33  ;;  %3592 = vmatprep.subr.bf16.mxu0 %v8912_v52  ;;  %v8923_v33 = vld [vmem:[#allocation4 + $0xd0] ss:$24 sps:$4 sm:$0xff]   ;;  %v8924_v52 = vld [vmem:[#allocation4 + $0x104] ss:$24 sps:$4 sm:$0xff]  }
 0x50b   : > { %3698 = vmatpush1.bf16.msra.mxu1 %v13077_v39  ;;  %3593 = vmatpush1.bf16.msra.mxu0 %v8913_v34  ;;  %v8925_v39 = vld [vmem:[#allocation4 + $0x100] ss:$24 sps:$4 sm:$0xff]   ;;  %v8927_v34 = vld [vmem:[#allocation4 + $0x130] ss:$24 sps:$4 sm:$0xff]  }
 0x50c   : > { %3699 = vmatprep.subr.bf16.mxu1 %v13078_v41  ;;  %3726 = vmatprep.subr.bf16.mxu0 %v8914_v30  ;;  %v8928_v41 = vld [vmem:[#allocation4 + $0x164] ss:$24 sps:$4 sm:$0xff]   ;;  %v8929_v30 = vld [vmem:[#allocation4 + $0x160] ss:$24 sps:$4 sm:$0xff]  }
 0x50f   : > { %3700 = vmatpush1.bf16.msra.mxu1 %v13079_v15  ;;  %v8930_v15 = vld [vmem:[#allocation4 + $0x194] ss:$24 sps:$4 sm:$0xff]  }
 0x510   : > { %3701 = vmatprep.subr.bf16.mxu1 %v13080_v19  ;;  %v8931_v19 = vld [vmem:[#allocation4 + $0x190] ss:$24 sps:$4 sm:$0xff]  }
 0x513   : > { %3702 = vmatpush1.bf16.msra.mxu1 %v13081_v42  ;;  %v8932_v42 = vld [vmem:[#allocation4 + $0x1c4] ss:$24 sps:$4 sm:$0xff]  }
 0x514   : > { %3703 = vmatprep.subr.bf16.mxu1 %v13082_v9  ;;  %v8933_v9 = vld [vmem:[#allocation4 + $0x1c0] ss:$24 sps:$4 sm:$0xff]  }
 0x517   : > { %3704 = vmatpush1.bf16.msra.mxu1 %v13083_v43  ;;  %v8934_v43 = vld [vmem:[#allocation4 + $0x1f4] ss:$24 sps:$4 sm:$0xff]  }
 0x518   : > { %3705 = vmatprep.subr.bf16.mxu1 %v13084_v38  ;;  %v8935_v38 = vld [vmem:[#allocation4 + $0x1f0] ss:$24 sps:$4 sm:$0xff]  }
 0x51b   : > { %3706 = vmatpush1.bf16.msra.mxu1 %v13085_v44  ;;  %v8936_v44 = vld [vmem:[#allocation4 + $0x224] ss:$24 sps:$4 sm:$0xff]  }
 0x51c   : > { %3707 = vmatprep.subr.bf16.mxu1 %v13086_v45  ;;  %v8937_v45 = vld [vmem:[#allocation4 + $0x220] ss:$24 sps:$4 sm:$0xff]  }
 0x51f   : > { %3708 = vmatpush1.bf16.msra.mxu1 %v13087_v46  ;;  %v8938_v46 = vld [vmem:[#allocation4 + $0x254] ss:$24 sps:$4 sm:$0xff]  }
 0x520   : > { %3709 = vmatprep.subr.bf16.mxu1 %v13088_v47  ;;  %v8939_v47 = vld [vmem:[#allocation4 + $0x250] ss:$24 sps:$4 sm:$0xff]  }
 0x523   : > { %3710 = vmatpush1.bf16.msra.mxu1 %v13089_v48  ;;  %v8940_v48 = vld [vmem:[#allocation4 + $0x284] ss:$24 sps:$4 sm:$0xff]  }
 0x524   : > { %3711 = vmatprep.subr.bf16.mxu1 %v13090_v49  ;;  %v8941_v49 = vld [vmem:[#allocation4 + $0x280] ss:$24 sps:$4 sm:$0xff]  }
 0x527   : > { %3712 = vmatpush1.bf16.msra.mxu1 %v13091_v50  ;;  %v8942_v50 = vld [vmem:[#allocation4 + $0x2b4] ss:$24 sps:$4 sm:$0xff]  }
 0x528   : > { %3713 = vmatprep.subr.bf16.mxu1 %v13092_v51  ;;  %v8943_v51 = vld [vmem:[#allocation4 + $0x2b0] ss:$24 sps:$4 sm:$0xff]  }
 0x52b   : > { %3714 = vmatpush1.bf16.msra.mxu1 %v13093_v57  ;;  %v8944_v57 = vld [vmem:[#allocation4 + $0x2e4] ss:$24 sps:$4 sm:$0xff]  }
 0x52c   : > { %3715 = vmatprep.subr.bf16.mxu1 %v13094_v55  ;;  %v8945_v55 = vld [vmem:[#allocation4 + $0x2e0] ss:$24 sps:$4 sm:$0xff]  }
 0x52f   : > { %3716 = vmatpush1.bf16.msra.mxu1 %v10851_v16 }
 0x545   : > { %v3455_v58 = vpop.f32.mrb[8].mxu1 }
 0x546   : > { %v3466_v63 = vmul.f32 2.0, %v3455_v58  ;;  %v3457_v0 = vpop.f32.mrb[9].mxu1  ;;  %v8946_v58 = vld [vmem:[#allocation4 + $0x314] ss:$24 sps:$4 sm:$0xff]  }
 0x547   : > { %v3467_v2 = vmul.f32 2.0, %v3457_v0  ;;  %v3459_v3 = vpop.f32.mrb[10].mxu1  ;;  %v8948_v0 = vld [vmem:[#allocation4 + $0x344] ss:$24 sps:$4 sm:$0xff]  }
 0x548   : > { %v3472_v6 = vsub.f32 %v3466_v63, %v13095_v5  ;;  %v3460_v7 = vpop.f32.mrb[11].mxu1  ;;  %v8947_v63 = vld [vmem:[#allocation4 + $0x310] ss:$24 sps:$4 sm:$0xff]   ;;  %v8953_v5 = vld [vmem:[#allocation4 + $0x3a0] ss:$24 sps:$4 sm:$0xff]  }
 0x549   : > { %v3473_v10 = vsub.f32 %v3467_v2, %v13096_v8  ;;  %v8950_v2 = vld [vmem:[#allocation4 + $0x374] ss:$24 sps:$4 sm:$0xff]   ;;  %v8951_v3 = vld [vmem:[#allocation4 + $0x370] ss:$24 sps:$4 sm:$0xff]   ;;  %v8957_v8 = vld [vmem:[#allocation4 + $0x400] ss:$24 sps:$4 sm:$0xff]  }
 0x54a   : > { %v3889_v11 = vrot.slane %v3472_v6, 6  ;;  %v11220_v17 = vpack.c.bf16 %v3472_v6, %v3472_v6  ;;  %v8954_v6 = vld [vmem:[#allocation4 + $0x3d4] ss:$24 sps:$4 sm:$0xff]   ;;  %v8955_v7 = vld [vmem:[#allocation4 + $0x3d0] ss:$24 sps:$4 sm:$0xff]  }
 0x54b   : > { %v3890_v12 = vrot.slane %v3473_v10, 6  ;;  %v11216_v16 = vpack.c.bf16 %v3473_v10, %v3473_v10  ;;  %v8959_v10 = vld [vmem:[#allocation4 + $0x430] ss:$24 sps:$4 sm:$0xff]  }
 0x54c   : > { %v11223_v20 = vsel %vm3922_vm1, %v3920_v40, %v3889_v11  ;;  %v8960_v11 = vld [vmem:[#allocation4 + $0x464] ss:$24 sps:$4 sm:$0xff]   ;;  %v8961_v40 = vld [vmem:[#allocation4 + $0x460] ss:$24 sps:$4 sm:$0xff]  }
 0x54d   : > { %v11226_v21 = vsel %vm3922_vm1, %v3921_v13, %v3890_v12  ;;  %3594 = vmatprep.mubr.bf16.mxu0 %v11216_v16  ;;  %3717 = vmatprep.mubr.bf16.mxu1 %v11216_v16  ;;  %v8962_v12 = vld [vmem:[#allocation4 + $0x494] ss:$24 sps:$4 sm:$0xff]   ;;  %v8963_v13 = vld [vmem:[#allocation4 + $0x490] ss:$24 sps:$4 sm:$0xff]  }
 0x54e   : > { %3595 = vmatmul.mubr.bf16.vlgmr.msra.gmra.mrb[12].mxu0 %v11220_v17  ;;  %3718 = vmatmul.mubr.bf16.vlgmr.msra.gmra.mrb[12].mxu1 %v11220_v17 }
 0x54f   : > { %3727 = vmatpush1.bf16.msra.mxu0 %v8915_v22  ;;  %3758 = vmatprep.mubr.bf16.mxu0 %v11035_v54  ;;  %v8926_v54 = vld [vmem:[#allocation4 + $0x134] ss:$24 sps:$4 sm:$0xff]   ;;  %v9393_v22 = vmov 0  }
 0x550   : > { %3728 = vmatprep.subr.bf16.mxu0 %v8916_v25  ;;  %4001 = vmatprep.mubr.bf16.mxu1 %v9393_v22  ;;  %v8964_v25 = vld [vmem:[#allocation4 + $0x4c4] ss:$24 sps:$4 sm:$0xff]  }
 0x551   : > { %8189 = vset.pattern.permute.xlu0 %v9393_v22  ;;  %8190 = vset.pattern.permute.xlu1 %v9393_v22 }
 0x553   : > { %3729 = vmatpush1.bf16.msra.mxu0 %v8917_v26  ;;  %v8965_v26 = vld [vmem:[#allocation4 + $0x4c0] ss:$24 sps:$4 sm:$0xff]  }
 0x554   : > { %3730 = vmatprep.subr.bf16.mxu0 %v8918_v27  ;;  %v8966_v27 = vld [vmem:[#allocation4 + $0x4f4] ss:$24 sps:$4 sm:$0xff]  }
 0x557   : > { %3731 = vmatpush1.bf16.msra.mxu0 %v8919_v28  ;;  %v8967_v28 = vld [vmem:[#allocation4 + $0x4f0] ss:$24 sps:$4 sm:$0xff]  }
 0x558   : > { %3732 = vmatprep.subr.bf16.mxu0 %v8920_v37  ;;  %v8968_v37 = vld [vmem:[#allocation4 + $0x524] ss:$24 sps:$4 sm:$0xff]  }
 0x55b   : > { %3733 = vmatpush1.bf16.msra.mxu0 %v8921_v29  ;;  %v1237_v29 = vld [vmem:[%s13097_s17] sm:$0xff] }
 0x55c   : > { %3734 = vmatprep.subr.bf16.mxu0 %v8922_v31  ;;  %v1239_v31 = vld [vmem:[%s13098_s30] sm:$0xff]  ;;  %4100 = vperm.xlu0 %8189, %v1237_v29   ;;  %s9397_s30 = smov 112  }
 0x55d   : > { %4122 = vperm.xlu1 %8190, %v1239_v31  }
 0x55f   : > { %3735 = vmatpush1.bf16.msra.mxu0 %v8923_v33  ;;  %v1238_v33 = vld [vmem:[%s13097_s17 + $0x8] sm:$0xff] }
 0x560   : > { %3736 = vmatprep.subr.bf16.mxu0 %v8924_v52  ;;  %v1240_v52 = vld [vmem:[%s13099_s8 + $0x8] sm:$0xff]  ;;  %4105 = vperm.xlu0 %8189, %v1238_v33  }
 0x561   : > { %4127 = vperm.xlu1 %8190, %v1240_v52  }
 0x563   : > { %3737 = vmatpush1.bf16.msra.mxu0 %v8925_v39  ;;  %v8969_v39 = vld [vmem:[#allocation4 + $0x520] ss:$24 sps:$4 sm:$0xff]  }
 0x564   : > { %3738 = vmatprep.subr.bf16.mxu0 %v8926_v54  ;;  %v8970_v54 = vld [vmem:[#allocation4 + $0x554] ss:$24 sps:$4 sm:$0xff]  }
 0x567   : > { %3739 = vmatpush1.bf16.msra.mxu0 %v8927_v34  ;;  %v8971_v34 = vld [vmem:[#allocation4 + $0x550] ss:$24 sps:$4 sm:$0xff]  }
 0x568   : > { %3740 = vmatprep.subr.bf16.mxu0 %v8928_v41  ;;  %v8972_v41 = vld [vmem:[#allocation4 + $0x584] ss:$24 sps:$4 sm:$0xff]  }
 0x56b   : > { %3741 = vmatpush1.bf16.msra.mxu0 %v8929_v30  ;;  %v8973_v30 = vld [vmem:[#allocation4 + $0x580] ss:$24 sps:$4 sm:$0xff]  }
 0x56c   : > { %3742 = vmatprep.subr.bf16.mxu0 %v8930_v15  ;;  %v8974_v15 = vld [vmem:[#allocation4 + $0x5b4] ss:$24 sps:$4 sm:$0xff]  }
 0x56f   : > { %3743 = vmatpush1.bf16.msra.mxu0 %v8931_v19  ;;  %v8975_v19 = vld [vmem:[#allocation4 + $0x5b0] ss:$24 sps:$4 sm:$0xff]  }
 0x570   : > { %3744 = vmatprep.subr.bf16.mxu0 %v8932_v42  ;;  %v8976_v42 = vld [vmem:[#allocation4 + $0x5e4] ss:$24 sps:$4 sm:$0xff]  }
 0x573   : > { %3745 = vmatpush1.bf16.msra.mxu0 %v8933_v9  ;;  %v8977_v9 = vld [vmem:[#allocation4 + $0x5e0] ss:$24 sps:$4 sm:$0xff]  }
 0x574   : > { %3746 = vmatprep.subr.bf16.mxu0 %v8934_v43  ;;  %v8978_v43 = vld [vmem:[#allocation4 + $0x614] ss:$24 sps:$4 sm:$0xff]  }
 0x577   : > { %3747 = vmatpush1.bf16.msra.mxu0 %v8935_v38  ;;  %v8979_v38 = vld [vmem:[#allocation4 + $0x610] ss:$24 sps:$4 sm:$0xff]  }
 0x578   : > { %3748 = vmatprep.subr.bf16.mxu0 %v8936_v44  ;;  %v8980_v44 = vld [vmem:[#allocation4 + $0x644] ss:$24 sps:$4 sm:$0xff]  }
 0x57b   : > { %3749 = vmatpush1.bf16.msra.mxu0 %v8937_v45  ;;  %v8981_v45 = vld [vmem:[#allocation4 + $0x640] ss:$24 sps:$4 sm:$0xff]  }
 0x57c   : > { %3750 = vmatprep.subr.bf16.mxu0 %v8938_v46  ;;  %v8982_v46 = vld [vmem:[#allocation4 + $0x674] ss:$24 sps:$4 sm:$0xff]  }
 0x57f   : > { %3751 = vmatpush1.bf16.msra.mxu0 %v8939_v47  ;;  %v8983_v47 = vld [vmem:[#allocation4 + $0x670] ss:$24 sps:$4 sm:$0xff]  }
 0x580   : > { %3752 = vmatprep.subr.bf16.mxu0 %v8940_v48  ;;  %v8984_v48 = vld [vmem:[#allocation4 + $0x6a4] ss:$24 sps:$4 sm:$0xff]  }
 0x583   : > { %3753 = vmatpush1.bf16.msra.mxu0 %v8941_v49  ;;  %v8985_v49 = vld [vmem:[#allocation4 + $0x6a0] ss:$24 sps:$4 sm:$0xff]  }
 0x584   : > { %3754 = vmatprep.subr.bf16.mxu0 %v8942_v50  ;;  %v8986_v50 = vld [vmem:[#allocation4 + $0x6d4] ss:$24 sps:$4 sm:$0xff]  }
 0x587   : > { %3755 = vmatpush1.bf16.msra.mxu0 %v8943_v51  ;;  %v8987_v51 = vld [vmem:[#allocation4 + $0x6d0] ss:$24 sps:$4 sm:$0xff]  }
 0x588   : > { %3756 = vmatprep.subr.bf16.mxu0 %v8944_v57  ;;  %v8989_v57 = vld [vmem:[#allocation4 + $0x700] ss:$24 sps:$4 sm:$0xff]  }
 0x58b   : > { %3757 = vmatpush1.bf16.msra.mxu0 %v8945_v55  ;;  %v8991_v55 = vld [vmem:[#allocation4 + $0x730] ss:$24 sps:$4 sm:$0xff]  }
 0x58c   : > { %3767 = vmatprep.subr.bf16.mxu0 %v8946_v58  ;;  %v8992_v58 = vld [vmem:[#allocation4 + $0x764] ss:$24 sps:$4 sm:$0xff]  }
 0x58e   : > { %3759 = vmatmul.mubr.bf16.vlgmr.msra.gmra.mrb[16].mxu0 %v11039_v56  ;;  %v8956_v56 = vld [vmem:[#allocation4 + $0x404] ss:$24 sps:$4 sm:$0xff]  }
 0x58f   : > { %3768 = vmatpush1.bf16.msra.mxu0 %v8947_v63  ;;  %3799 = vmatprep.mubr.bf16.mxu0 %v11057_v62  ;;  %v8958_v62 = vld [vmem:[#allocation4 + $0x434] ss:$24 sps:$4 sm:$0xff]   ;;  %v8993_v63 = vld [vmem:[#allocation4 + $0x760] ss:$24 sps:$4 sm:$0xff]  }
 0x590   : > { %3769 = vmatprep.subr.bf16.mxu0 %v8948_v0  ;;  %v8994_v0 = vld [vmem:[#allocation4 + $0x794] ss:$24 sps:$4 sm:$0xff]  }
 0x593   : > { %3770 = vmatpush1.bf16.msra.mxu0 %v8949_v1  ;;  %v8995_v1 = vld [vmem:[#allocation4 + $0x790] ss:$24 sps:$4 sm:$0xff]  }
 0x594   : > { %3771 = vmatprep.subr.bf16.mxu0 %v8950_v2  ;;  %v8996_v2 = vld [vmem:[#allocation4 + $0x7c4] ss:$24 sps:$4 sm:$0xff]  }
 0x597   : > { %3772 = vmatpush1.bf16.msra.mxu0 %v8951_v3  ;;  %v8997_v3 = vld [vmem:[#allocation4 + $0x7c0] ss:$24 sps:$4 sm:$0xff]  }
 0x598   : > { %3773 = vmatprep.subr.bf16.mxu0 %v8952_v4  ;;  %v8998_v4 = vld [vmem:[#allocation4 + $0x7f4] ss:$24 sps:$4 sm:$0xff]  }
 0x59b   : > { %3774 = vmatpush1.bf16.msra.mxu0 %v8953_v5  ;;  %v8999_v5 = vld [vmem:[#allocation4 + $0x7f0] ss:$24 sps:$4 sm:$0xff]  }
 0x59c   : > { %3775 = vmatprep.subr.bf16.mxu0 %v8954_v6  ;;  %v9000_v6 = vld [vmem:[#allocation4 + $0x824] ss:$24 sps:$4 sm:$0xff]  }
 0x59f   : > { %3776 = vmatpush1.bf16.msra.mxu0 %v8955_v7  ;;  %v9001_v7 = vld [vmem:[#allocation4 + $0x820] ss:$24 sps:$4 sm:$0xff]  }
 0x5a0   : > { %3777 = vmatprep.subr.bf16.mxu0 %v8956_v56  ;;  %v9002_v56 = vld [vmem:[#allocation4 + $0x854] ss:$24 sps:$4 sm:$0xff]  }
 0x5a3   : > { %3778 = vmatpush1.bf16.msra.mxu0 %v8957_v8  ;;  %v9003_v8 = vld [vmem:[#allocation4 + $0x850] ss:$24 sps:$4 sm:$0xff]  }
 0x5a4   : > { %3779 = vmatprep.subr.bf16.mxu0 %v8958_v62  ;;  %v9004_v62 = vld [vmem:[#allocation4 + $0x884] ss:$24 sps:$4 sm:$0xff]  }
 0x5a7   : > { %3780 = vmatpush1.bf16.msra.mxu0 %v8959_v10  ;;  %v9005_v10 = vld [vmem:[#allocation4 + $0x880] ss:$24 sps:$4 sm:$0xff]  }
 0x5a8   : > { %3781 = vmatprep.subr.bf16.mxu0 %v8960_v11  ;;  %v9006_v11 = vld [vmem:[#allocation4 + $0x8b4] ss:$24 sps:$4 sm:$0xff]  }
 0x5ab   : > { %3782 = vmatpush1.bf16.msra.mxu0 %v8961_v40  ;;  %v9007_v40 = vld [vmem:[#allocation4 + $0x8b0] ss:$24 sps:$4 sm:$0xff]  }
 0x5ac   : > { %3783 = vmatprep.subr.bf16.mxu0 %v8962_v12  ;;  %v9008_v12 = vld [vmem:[#allocation4 + $0x8e4] ss:$24 sps:$4 sm:$0xff]  }
 0x5af   : > { %3784 = vmatpush1.bf16.msra.mxu0 %v8963_v13  ;;  %v9009_v13 = vld [vmem:[#allocation4 + $0x8e0] ss:$24 sps:$4 sm:$0xff]  }
 0x5b0   : > { %3785 = vmatprep.subr.bf16.mxu0 %v8964_v25 }
 0x5b3   : > { %3786 = vmatpush1.bf16.msra.mxu0 %v8965_v26 }
 0x5b4   : > { %3787 = vmatprep.subr.bf16.mxu0 %v8966_v27 }
 0x5b7   : > { %3788 = vmatpush1.bf16.msra.mxu0 %v8967_v28 }
 0x5b8   : > { %3789 = vmatprep.subr.bf16.mxu0 %v8968_v37 }
 0x5bb   : > { %3790 = vmatpush1.bf16.msra.mxu0 %v8969_v39 }
 0x5bc   : > { %3791 = vmatprep.subr.bf16.mxu0 %v8970_v54 }
 0x5bf   : > { %3792 = vmatpush1.bf16.msra.mxu0 %v8971_v34 }
 0x5c0   : > { %3793 = vmatprep.subr.bf16.mxu0 %v8972_v41 }
 0x5c3   : > { %3794 = vmatpush1.bf16.msra.mxu0 %v8973_v30 }
 0x5c4   : > { %3795 = vmatprep.subr.bf16.mxu0 %v8974_v15 }
 0x5c7   : > { %3796 = vmatpush1.bf16.msra.mxu0 %v8975_v19 }
 0x5c8   : > { %3797 = vmatprep.subr.bf16.mxu0 %v8976_v42 }
 0x5cb   : > { %3798 = vmatpush1.bf16.msra.mxu0 %v8977_v9 }
 0x5cc   : > { %3808 = vmatprep.subr.bf16.mxu0 %v8978_v43 }
 0x5ce   : > { %3800 = vmatmul.mubr.bf16.vlgmr.msra.gmra.mrb[16].mxu0 %v11126_v14  ;;  %v8988_v14 = vld [vmem:[#allocation4 + $0x704] ss:$24 sps:$4 sm:$0xff]  }
 0x5cf   : > { %3809 = vmatpush1.bf16.msra.mxu0 %v8979_v38  ;;  %3840 = vmatprep.mubr.bf16.mxu0 %v11216_v16  ;;  %v8990_v16 = vld [vmem:[#allocation4 + $0x734] ss:$24 sps:$4 sm:$0xff]  }
 0x5d0   : > { %3810 = vmatprep.subr.bf16.mxu0 %v8980_v44 }
 0x5d3   : > { %3811 = vmatpush1.bf16.msra.mxu0 %v8981_v45 }
 0x5d4   : > { %3812 = vmatprep.subr.bf16.mxu0 %v8982_v46 }
 0x5d7   : > { %3813 = vmatpush1.bf16.msra.mxu0 %v8983_v47 }
 0x5d8   : > { %3814 = vmatprep.subr.bf16.mxu0 %v8984_v48 }
 0x5db   : > { %3815 = vmatpush1.bf16.msra.mxu0 %v8985_v49 }
 0x5dc   : > { %3816 = vmatprep.subr.bf16.mxu0 %v8986_v50 }
 0x5df   : > { %3817 = vmatpush1.bf16.msra.mxu0 %v8987_v51 }
 0x5e0   : > { %3818 = vmatprep.subr.bf16.mxu0 %v8988_v14 }
 0x5e3   : > { %3819 = vmatpush1.bf16.msra.mxu0 %v8989_v57 }
 0x5e4   : > { %3820 = vmatprep.subr.bf16.mxu0 %v8990_v16 }
 0x5e7   : > { %3821 = vmatpush1.bf16.msra.mxu0 %v8991_v55 }
 0x5e8   : > { %3822 = vmatprep.subr.bf16.mxu0 %v8992_v58 }
 0x5eb   : > { %3823 = vmatpush1.bf16.msra.mxu0 %v8993_v63 }
 0x5ec   : > { %3824 = vmatprep.subr.bf16.mxu0 %v8994_v0 }
 0x5ef   : > { %3825 = vmatpush1.bf16.msra.mxu0 %v8995_v1 }
 0x5f0   : > { %3826 = vmatprep.subr.bf16.mxu0 %v8996_v2 }
 0x5f3   : > { %3827 = vmatpush1.bf16.msra.mxu0 %v8997_v3 }
 0x5f4   : > { %3828 = vmatprep.subr.bf16.mxu0 %v8998_v4 }
 0x5f7   : > { %3829 = vmatpush1.bf16.msra.mxu0 %v8999_v5 }
 0x5f8   : > { %3830 = vmatprep.subr.bf16.mxu0 %v9000_v6 }
 0x5fb   : > { %3831 = vmatpush1.bf16.msra.mxu0 %v9001_v7 }
 0x5fc   : > { %3832 = vmatprep.subr.bf16.mxu0 %v9002_v56 }
 0x5ff   : > { %3833 = vmatpush1.bf16.msra.mxu0 %v9003_v8 }
 0x600   : > { %3834 = vmatprep.subr.bf16.mxu0 %v9004_v62 }
 0x603   : > { %3835 = vmatpush1.bf16.msra.mxu0 %v9005_v10 }
 0x604   : > { %3836 = vmatprep.subr.bf16.mxu0 %v9006_v11 }
 0x607   : > { %3837 = vmatpush1.bf16.msra.mxu0 %v9007_v40 }
 0x608   : > { %3838 = vmatprep.subr.bf16.mxu0 %v9008_v12 }
 0x60b   : > { %3839 = vmatpush1.bf16.msra.mxu0 %v9009_v13 }
 0x60e   : > { %3841 = vmatmul.mubr.bf16.vlgmr.msra.gmra.mrb[16].mxu0 %v11220_v17 }
 0x621   : > { %v3596_v25 = vpop.f32.mrb[12].mxu0  ;;  %v3719_v26 = vpop.f32.mrb[12].mxu1 }
 0x622   : > { %v3849_v27 = vmul.f32 2.0, %v3596_v25  ;;  %v3851_v28 = vmul.f32 2.0, %v3719_v26  ;;  %v3598_v37 = vpop.f32.mrb[13].mxu0  ;;  %v3721_v29 = vpop.f32.mrb[13].mxu1 }
 0x623   : > { %v3850_v31 = vmul.f32 2.0, %v3598_v37  ;;  %v3852_v33 = vmul.f32 2.0, %v3721_v29  ;;  %v3600_v52 = vpop.f32.mrb[14].mxu0  ;;  %v3723_v39 = vpop.f32.mrb[14].mxu1 }
 0x624   : > { %v3855_v54 = vsub.f32 %v3849_v27, %v10381_v18  ;;  %v3857_v34 = vsub.f32 %v3851_v28, %v10383_v23  ;;  %v3601_v41 = vpop.f32.mrb[15].mxu0  ;;  %v3724_v30 = vpop.f32.mrb[15].mxu1  ;;  %v11317_v52 = vld [vmem:[#allocation6 + $0x4] ss:$8 sps:$4 sm:$0xff]   ;;  %v11319_v39 = vld [vmem:[#allocation6 + $0x14] ss:$8 sps:$4 sm:$0xff]  }
 0x625   : > { %v3856_v15 = vsub.f32 %v3850_v31, %v12946_v24  ;;  %v3858_v17 = vsub.f32 %v3852_v33, %v12948_v32  ;;  %v11315_v33 = vld [vmem:[#allocation6] ss:$8 sps:$4 sm:$0xff]   ;;  %v11332_v30 = vld [vmem:[#allocation6 + $0x34] ss:$8 sps:$4 sm:$0xff]  }
 0x626   : > { %v3903_v19 = vrot.slane %v3855_v54, 5  ;;  %v3905_v42 = vrot.slane %v3857_v34, 5  ;;  %v11323_v54 = vld [vmem:[#allocation6 + $0x10] ss:$8 sps:$4 sm:$0xff]   ;;  %v11326_v34 = vld [vmem:[#allocation6 + $0x24] ss:$8 sps:$4 sm:$0xff]  }
 0x627   : > { %v3904_v9 = vrot.slane %v3856_v15, 5  ;;  %v3906_v43 = vrot.slane %v3858_v17, 5  ;;  %v11329_v41 = vld [vmem:[#allocation6 + $0x20] ss:$8 sps:$4 sm:$0xff]   ;;  %v11335_v15 = vld [vmem:[#allocation6 + $0x30] ss:$8 sps:$4 sm:$0xff]  }
 0x628   : > { %v3930_v38 = vsel %vm3929_vm2, %v11043_v59, %v3903_v19  ;;  %v3932_v44 = vsel %vm3929_vm2, %v11046_v60, %v3905_v42  ;;  %v8623_v59 = vld [vmem:[%s13100_s25] sm:$0xff]   ;;  %v11338_v17 = vld [vmem:[#allocation6 + $0x44] ss:$8 sps:$4 sm:$0xff]   ;;  %v11341_v19 = vld [vmem:[#allocation6 + $0x40] ss:$8 sps:$4 sm:$0xff]   ;;  %s13105_s25 = sld [smem:[#allocation279_spill]] }
 0x629   : > { %v3931_v18 = vsel %vm3929_vm2, %v11049_v53, %v3904_v9  ;;  %v3933_v23 = vsel %vm3929_vm2, %v11052_v61, %v3906_v43  ;;  %v3936_v24 = vpack.c.bf16 %v3930_v38, %v3930_v38  ;;  %v3938_v47 = vpack.c.bf16 %v3932_v44, %v3932_v44  ;;  %v11344_v42 = vld [vmem:[#allocation6 + $0x54] ss:$8 sps:$4 sm:$0xff]   ;;  %v11347_v9 = vld [vmem:[#allocation6 + $0x50] ss:$8 sps:$4 sm:$0xff]   ;;  %v11350_v43 = vld [vmem:[#allocation6 + $0x64] ss:$8 sps:$4 sm:$0xff]  }
 0x62a   : > { %v3937_v45 = vpack.c.bf16 %v3931_v18, %v3931_v18  ;;  %v3939_v46 = vpack.c.bf16 %v3933_v23, %v3933_v23  ;;  %v11353_v38 = vld [vmem:[#allocation6 + $0x60] ss:$8 sps:$4 sm:$0xff]   ;;  %v11356_v44 = vld [vmem:[#allocation6 + $0x74] ss:$8 sps:$4 sm:$0xff]   ;;  %v11360_v23 = vld [vmem:[#allocation6 + $0x70] ss:$8 sps:$4 sm:$0xff]  }
 0x62b   : > { %v3952_v32 = vsel %vm3922_vm1, %v3936_v24, 0  ;;  %v3958_v60 = vsel %vm3922_vm1, %v3938_v47, 0  ;;  %v11363_v24 = vld [vmem:[#allocation6 + $0x84] ss:$8 sps:$4 sm:$0xff]   ;;  %v11372_v47 = vld [vmem:[#allocation6 + $0x94] ss:$8 sps:$4 sm:$0xff]  }
 0x62c   : > { %7470 = vmatprep.subr.msk.bf16.mxu1 %vm3922_vm1, %v3937_v45 }
 0x62d   : > { %3970 = vmatpush1.bf16.msra.mxu1 %v3952_v32 }
 0x62e   : > { %7472 = vmatprep.subr.msk.bf16.mxu1 %vm3922_vm1, %v3939_v46 }
 0x630   : > { %7471 = vmatmul.mubr.msk.bf16.vlgmr.msra.gmra.mrb[16].mxu1 %vm3947_vm3, %v8623_v59 }
 0x631   : > { %4013 = vmatpush1.bf16.msra.mxu1 %v3958_v60  ;;  %4044 = vmatprep.mubr.bf16.mxu1 %v9393_v22 }
 0x638   : > { %7473 = vmatmul.mubr.msk.bf16.vlgmr.msra.gmra.mrb[20].mxu1 %vm3947_vm3, %v8623_v59 }
 0x639   : > { %4087 = vmatprep.mubr.bf16.mxu1 %v9393_v22 }
 0x6e1   : > { %v3842_v53 = vpop.f32.mrb[16].mxu0 }
 0x6e2   : > { %v3853_v61 = vmul.f32 2.0, %v3842_v53  ;;  %v3844_v48 = vpop.f32.mrb[17].mxu0 }
 0x6e3   : > { %v3854_v49 = vmul.f32 2.0, %v3844_v48  ;;  %v3846_v50 = vpop.f32.mrb[18].mxu0 }
 0x6e4   : > { %v3859_v51 = vsub.f32 %v3853_v61, %v10855_v36  ;;  %v3847_v14 = vpop.f32.mrb[19].mxu0  ;;  %v11285_v36 = vpop.permute.xlu0 %4100  ;;  %v11378_v50 = vld [vmem:[#allocation6 + $0x90] ss:$8 sps:$4 sm:$0xff]  }
 0x6e5   : > { %v3860_v57 = vsub.f32 %v3854_v49, %v10857_v35  ;;  %v11287_v35 = vpop.permute.xlu1 %4122 }
 0x6e6   : > { %v3907_v16 = vrot.slane %v3859_v51, 5 }
 0x6e7   : > { %v3908_v55 = vrot.slane %v3860_v57, 5 }
 0x6e8   : > { %v3934_v58 = vsel %vm3929_vm2, %v11223_v20, %v3907_v16  ;;  %v11289_v5 = vpop.permute.xlu0 %4105 }
 0x6e9   : > { %v3935_v63 = vsel %vm3929_vm2, %v11226_v21, %v3908_v55  ;;  %v3940_v0 = vpack.c.bf16 %v3934_v58, %v3934_v58  ;;  %v11292_v7 = vpop.permute.xlu1 %4127 }
 0x6ea   : > { %v3941_v1 = vpack.c.bf16 %v3935_v63, %v3935_v63 }
 0x6eb   : > { %v3964_v2 = vsel %vm3922_vm1, %v3940_v0, 0 }
 0x6ec   : > { %7474 = vmatprep.subr.msk.bf16.mxu1 %vm3922_vm1, %v3941_v1 }
 0x6ed   : > { %4056 = vmatpush1.bf16.msra.mxu1 %v3964_v2 }
 0x6ee   : > { %4364 = vmatprep.subr.bf16.mxu1 %v11317_v52 }
 0x6f0   : > { %7475 = vmatmul.mubr.msk.bf16.vlgmr.msra.gmra.mrb[24].mxu1 %vm3947_vm3, %v8623_v59  ;;  %v11369_v59 = vld [vmem:[#allocation6 + $0x80] ss:$8 sps:$4 sm:$0xff]  }
 0x6f1   : > { %4365 = vmatpush1.bf16.msra.mxu1 %v11315_v33 }
 0x6f2   : > { %4366 = vmatprep.subr.bf16.mxu1 %v11319_v39 }
 0x6f5   : > { %4367 = vmatpush1.bf16.msra.mxu1 %v11323_v54 }
 0x6f6   : > { %4368 = vmatprep.subr.bf16.mxu1 %v11326_v34 }
 0x6f9   : > { %4369 = vmatpush1.bf16.msra.mxu1 %v11329_v41 }
 0x6fa   : > { %4370 = vmatprep.subr.bf16.mxu1 %v11332_v30 }
 0x6fd   : > { %4371 = vmatpush1.bf16.msra.mxu1 %v11335_v15 }
 0x6fe   : > { %4372 = vmatprep.subr.bf16.mxu1 %v11338_v17 }
 0x701   : > { %4373 = vmatpush1.bf16.msra.mxu1 %v11341_v19 }
 0x702   : > { %4374 = vmatprep.subr.bf16.mxu1 %v11344_v42 }
 0x703   : > { %v4003_v3 = vpop.f32.mrb[16].mxu1 }
 0x704   : > { %v4005_v4 = vpop.f32.mrb[17].mxu1  ;;  %v4108_v18 = vmul.f32 %v11285_v36, %v4003_v3 }
 0x705   : > { %v4007_v20 = vpop.f32.mrb[18].mxu1  ;;  %v4109_v21 = vmul.f32 %v11285_v36, %v4005_v4  ;;  %4375 = vmatpush1.bf16.msra.mxu1 %v11347_v9 }
 0x706   : > { %v4009_v6 = vpop.f32.mrb[19].mxu1  ;;  %4376 = vmatprep.subr.bf16.mxu1 %v11350_v43  ;;  %v4130_v32 = vadd.f32 %v11287_v35, %v4108_v18  ;;  %v4114_v46 = vmul.f32 %v11289_v5, %v4007_v20 }
 0x707   : > { %v11295_v56 = vadd.f32 %v11287_v35, %v4109_v21  ;;  %v4115_v8 = vmul.f32 %v11289_v5, %v4009_v6  ;;  %v11385_v21 = vld [vmem:[#allocation6 + $0xa4] ss:$8 sps:$4 sm:$0xff]   ;;  %v11387_v6 = vld [vmem:[#allocation6 + $0xa0] ss:$8 sps:$4 sm:$0xff]  }
 0x708   : > { %v4142_v48 = vmax.f32 %v4130_v32, 0.0  ;;  %v4136_v49 = vadd.f32 %v11292_v7, %v4114_v46 }
 0x709   : > { %v4143_v62 = vmax.f32 %v11295_v56, 0.0  ;;  %v11300_v10 = vadd.f32 %v11292_v7, %v4115_v8  ;;  %4377 = vmatpush1.bf16.msra.mxu1 %v11353_v38  ;;  %v11391_v8 = vld [vmem:[#allocation6 + $0xb4] ss:$8 sps:$4 sm:$0xff]  }
 0x70a   : > { %4378 = vmatprep.subr.bf16.mxu1 %v11356_v44  ;;  %v4148_v63 = vmax.f32 %v4136_v49, 0.0  ;;  %v4236_v49 = vld [vmem:[%s13102_s27 + $0x8] sm:$0xff] }
 0x70b   : > { %v4046_v11 = vpop.f32.mrb[20].mxu1  ;;  %4158 = vrot.lane.b32.xlu0 %v4143_v62, %s9394_s28  ;;  %v4149_v40 = vmax.f32 %v11300_v10, 0.0 }
 0x70c   : > { %v4110_v12 = vmul.f32 %v11285_v36, %v4046_v11  ;;  %v4048_v13 = vpop.f32.mrb[21].mxu1  ;;  %v11393_v11 = vld [vmem:[#allocation6 + $0xb0] ss:$8 sps:$4 sm:$0xff]  }
 0x70d   : > { %v4050_v25 = vpop.f32.mrb[22].mxu1  ;;  %v4111_v45 = vmul.f32 %v11285_v36, %v4048_v13  ;;  %4379 = vmatpush1.bf16.msra.mxu1 %v11360_v23 }
 0x70e   : > { %v4116_v26 = vmul.f32 %v11289_v5, %v4050_v25  ;;  %v4132_v27 = vadd.f32 %v11287_v35, %v4110_v12  ;;  %v4052_v28 = vpop.f32.mrb[23].mxu1  ;;  %4380 = vmatprep.subr.bf16.mxu1 %v11363_v24 }
 0x70f   : > { %4162 = vrot.lane.b32.xlu0 %v4149_v40, %s9394_s28  ;;  %v4133_v60 = vadd.f32 %v11287_v35, %v4111_v45  ;;  %v4117_v61 = vmul.f32 %v11289_v5, %v4052_v28 }
 0x710   : > { %v4144_v37 = vmax.f32 %v4132_v27, 0.0  ;;  %v4138_v29 = vadd.f32 %v11292_v7, %v4116_v26 }
 0x711   : > { %4381 = vmatpush1.bf16.msra.mxu1 %v11369_v59  ;;  %v4145_v51 = vmax.f32 %v4133_v60, 0.0  ;;  %v4139_v57 = vadd.f32 %v11292_v7, %v4117_v61  ;;  %v4234_v61 = vld [vmem:[%s13101_s1 + $0x18] sm:$0xff] }
 0x712   : > { %4160 = vrot.lane.b32.xlu1 %v4144_v37, %s9394_s28  ;;  %v4150_v31 = vmax.f32 %v4138_v29, 0.0  ;;  %4382 = vmatprep.subr.bf16.mxu1 %v11372_v47 }
 0x713   : > { %v4151_v0 = vmax.f32 %v4139_v57, 0.0  ;;  %v4238_v57 = vld [vmem:[%s13102_s27 + $0x18] sm:$0xff] }
 0x715   : > { %4383 = vmatpush1.bf16.msra.mxu1 %v11378_v50 }
 0x716   : > { %4164 = vrot.lane.b32.xlu1 %v4150_v31, %s9394_s28  ;;  %4384 = vmatprep.subr.bf16.mxu1 %v11385_v21 }
 0x719   : > { %4385 = vmatpush1.bf16.msra.mxu1 %v11387_v6 }
 0x71a   : > { %4386 = vmatprep.subr.bf16.mxu1 %v11391_v8 }
 0x71d   : > { %4387 = vmatpush1.bf16.msra.mxu1 %v11393_v11 }
 0x71e   : > { %4412 = vmatprep.subr.bf16.mxu1 %v11317_v52 }
 0x77d   : > { %v4159_v53 = vpop.permute.xlu0 %4158 }
 0x781   : > { %v4163_v58 = vpop.permute.xlu0 %4162 }
 0x784   : > { %v4161_v14 = vpop.permute.xlu1 %4160 }
 0x785   : > { %v4167_v16 = vsel %vm4166_vm4, %v4159_v53, %v4161_v14 }
 0x786   : > { %v4173_v55 = vmax.f32 %v4142_v48, %v4167_v16  ;;  %v4235_v48 = vld [vmem:[%s13102_s27] sm:$0xff] }
 0x788   : > { %v4165_v1 = vpop.permute.xlu1 %4164  ;;  %v4177_v2 = vmax.f32 %v4173_v55, %v4145_v51  ;;  %v4237_v51 = vld [vmem:[%s13102_s27 + $0x10] sm:$0xff] }
 0x789   : > { %v4168_v3 = vsel %vm4166_vm4, %v4163_v58, %v4165_v1  ;;  %v4174_v58 = vmax.f32 %v4143_v62, %v4161_v14 }
 0x78a   : > { %v4175_v4 = vmax.f32 %v4148_v63, %v4168_v3  ;;  %v4176_v63 = vmax.f32 %v4149_v40, %v4165_v1 }
 0x78c   : > { %v4179_v20 = vmax.f32 %v4175_v4, %v4151_v0 }
 0x7c3   : > { %v4089_v12 = vpop.f32.mrb[24].mxu1 }
 0x7c4   : > { %v4112_v13 = vmul.f32 %v11285_v36, %v4089_v12  ;;  %v4091_v25 = vpop.f32.mrb[25].mxu1 }
 0x7c5   : > { %v4113_v26 = vmul.f32 %v11285_v36, %v4091_v25  ;;  %v4093_v27 = vpop.f32.mrb[26].mxu1 }
 0x7c6   : > { %v4134_v28 = vadd.f32 %v11287_v35, %v4112_v13  ;;  %v4118_v37 = vmul.f32 %v11289_v5, %v4093_v27  ;;  %v4095_v29 = vpop.f32.mrb[27].mxu1 }
 0x7c7   : > { %v4135_v31 = vadd.f32 %v11287_v35, %v4113_v26  ;;  %v4119_v18 = vmul.f32 %v11289_v5, %v4095_v29  ;;  %v4231_v35 = vld [vmem:[%s13101_s1] sm:$0xff]  ;;  %v4232_v5 = vld [vmem:[%s13101_s1 + $0x8] sm:$0xff] }
 0x7c8   : > { %v4146_v45 = vmax.f32 %v4134_v28, 0.0  ;;  %v4140_v32 = vadd.f32 %v11292_v7, %v4118_v37 }
 0x7c9   : > { %v4147_v46 = vmax.f32 %v4135_v31, 0.0  ;;  %v4141_v60 = vadd.f32 %v11292_v7, %v4119_v18  ;;  %v4233_v7 = vld [vmem:[%s13101_s1 + $0x10] sm:$0xff] }
 0x7ca   : > { %4185 = vrot.lane.b32.xlu0 %v4146_v45, %s9394_s28  ;;  %v4152_v36 = vmax.f32 %v4140_v32, 0.0  ;;  %v4178_v0 = vmax.f32 %v4174_v58, %v4146_v45  ;;  %v8660_v32 = vld [vmem:[#allocation7] sm:$0xff]  }
 0x7cb   : > { %4187 = vrot.lane.b32.xlu1 %v4147_v46, %s9394_s28  ;;  %v4153_v53 = vmax.f32 %v4141_v60, 0.0  ;;  %v8661_v46 = vld [vmem:[#allocation7 + $0x8] sm:$0xff]  }
 0x7cc   : > { %v4180_v3 = vmax.f32 %v4176_v63, %v4152_v36 }
 0x7ce   : > { %4189 = vrot.lane.b32.xlu0 %v4152_v36, %s9394_s28 }
 0x7cf   : > { %4191 = vrot.lane.b32.xlu1 %v4153_v53, %s9394_s28  ;;  %s7178_s28 = sshll.u32 %s13119_s26, 1 }
 0x7d0   : > { %s939_s1 = scalar_lea.vmem %s13108_s5, %s7178_s28  ;;  %s13110_s5 = sld [smem:[#allocation282_spill]] }
 0x7d2   : > { %4592 = vperm.xlu0 %8189, %v4231_v35  }
 0x7d3   : > { %4597 = vperm.xlu1 %8190, %v4232_v5  }
 0x7d6   : > { %4602 = vperm.xlu0 %8189, %v4233_v7  }
 0x7d7   : > { %4607 = vperm.xlu1 %8190, %v4234_v61  }
 0x7da   : > { %4620 = vperm.xlu0 %8189, %v4235_v48  }
 0x7db   : > { %4625 = vperm.xlu1 %8190, %v4236_v49  }
 0x7de   : > { %4630 = vperm.xlu0 %8189, %v4237_v51  }
 0x7df   : > { %4635 = vperm.xlu1 %8190, %v4238_v57  }
 0x83c   : > { %v4186_v16 = vpop.permute.xlu0 %4185 }
 0x83d   : > { %v4188_v55 = vpop.permute.xlu1 %4187 }
 0x83e   : > { %v4193_v4 = vsel %vm4166_vm4, %v4186_v16, %v4188_v55  ;;  %v11439_v25 = vmax.f32 %v4178_v0, %v4188_v55 }
 0x83f   : > { %v11444_v28 = vmax.f32 %v4177_v2, %v4193_v4 }
 0x840   : > { %v4190_v12 = vpop.permute.xlu0 %4189 }
 0x841   : > { %v4192_v13 = vpop.permute.xlu1 %4191 }
 0x842   : > { %v4194_v26 = vsel %vm4166_vm4, %v4190_v12, %v4192_v13  ;;  %v11442_v27 = vmax.f32 %v4180_v3, %v4192_v13 }
 0x843   : > { %v11446_v37 = vmax.f32 %v4179_v20, %v4194_v26 }
 0x844   : > { %v4240_v56 = vpack.c.bf16 %v11442_v27, %v11439_v25 }
 0x845   : > { %v11452_v62 = vpack.c.bf16 %v11446_v37, %v11444_v28 }
 0x846   : > { %7500 = vmatprep.mubr.msk.bf16.mxu1 %vm4166_vm4, %v4240_v56 }
 0x847   : > { %4397 = vmatmul.mubr.bf16.vlgmr.msra.gmra.mrb[28].mxu1 %v11452_v62 }
 0x848   : > { %4413 = vmatpush1.bf16.msra.mxu1 %v11315_v33 }
 0x849   : > { %4414 = vmatprep.subr.bf16.mxu1 %v11319_v39 }
 0x84c   : > { %4415 = vmatpush1.bf16.msra.mxu1 %v11323_v54 }
 0x84d   : > { %4416 = vmatprep.subr.bf16.mxu1 %v11326_v34 }
 0x850   : > { %4417 = vmatpush1.bf16.msra.mxu1 %v11329_v41 }
 0x851   : > { %4418 = vmatprep.subr.bf16.mxu1 %v11332_v30  ;;  %v4593_v60 = vpop.permute.xlu0 %4592 }
 0x852   : > { %v4598_v36 = vpop.permute.xlu1 %4597 }
 0x854   : > { %4419 = vmatpush1.bf16.msra.mxu1 %v11335_v15 }
 0x855   : > { %4420 = vmatprep.subr.bf16.mxu1 %v11338_v17  ;;  %v4603_v53 = vpop.permute.xlu0 %4602 }
 0x856   : > { %v4608_v35 = vpop.permute.xlu1 %4607 }
 0x858   : > { %4421 = vmatpush1.bf16.msra.mxu1 %v11341_v19 }
 0x859   : > { %4422 = vmatprep.subr.bf16.mxu1 %v11344_v42  ;;  %v4621_v48 = vpop.permute.xlu0 %4620 }
 0x85a   : > { %v4626_v63 = vpop.permute.xlu1 %4625 }
 0x85c   : > { %4423 = vmatpush1.bf16.msra.mxu1 %v11347_v9 }
 0x85d   : > { %4424 = vmatprep.subr.bf16.mxu1 %v11350_v43 }
 0x860   : > { %4425 = vmatpush1.bf16.msra.mxu1 %v11353_v38 }
 0x861   : > { %4426 = vmatprep.subr.bf16.mxu1 %v11356_v44 }
 0x864   : > { %4427 = vmatpush1.bf16.msra.mxu1 %v11360_v23 }
 0x865   : > { %4428 = vmatprep.subr.bf16.mxu1 %v11363_v24 }
 0x868   : > { %4429 = vmatpush1.bf16.msra.mxu1 %v11369_v59 }
 0x869   : > { %4430 = vmatprep.subr.bf16.mxu1 %v11372_v47 }
 0x86c   : > { %4431 = vmatpush1.bf16.msra.mxu1 %v11378_v50 }
 0x86d   : > { %4432 = vmatprep.subr.bf16.mxu1 %v11385_v21 }
 0x870   : > { %4433 = vmatpush1.bf16.msra.mxu1 %v11387_v6 }
 0x871   : > { %4434 = vmatprep.subr.bf16.mxu1 %v11391_v8 }
 0x874   : > { %4435 = vmatpush1.bf16.msra.mxu1 %v11393_v11 }
 0x875   : > { %4468 = vmatprep.subr.bf16.mxu1 %v11317_v52 }
 0x91a   : > { %v11480_v10 = vpop.f32.mrb[28].mxu1 }
 0x91b   : > { %v11482_v40 = vpop.f32.mrb[29].mxu1 }
 0x91c   : > { %v11484_v14 = vpop.f32.mrb[30].mxu1 }
 0x91d   : > { %v4407_v1 = vpack.c.bf16 %v11484_v14, %v11480_v10  ;;  %v11488_v2 = vpop.f32.mrb[31].mxu1 }
 0x91e   : > { %v4408_v20 = vpack.c.bf16 %v11488_v2, %v11482_v40 }
 0x920   : > { %7501 = vmatprep.mubr.msk.bf16.mxu1 %vm4166_vm4, %v4408_v20 }
 0x921   : > { %4445 = vmatmul.mubr.bf16.vlgmr.msra.gmra.mrb[32].mxu1 %v4407_v1 }
 0x922   : > { %4469 = vmatpush1.bf16.msra.mxu1 %v11315_v33 }
 0x923   : > { %4470 = vmatprep.subr.bf16.mxu1 %v11319_v39 }
 0x926   : > { %4471 = vmatpush1.bf16.msra.mxu1 %v11323_v54 }
 0x927   : > { %4472 = vmatprep.subr.bf16.mxu1 %v11326_v34 }
 0x92a   : > { %4473 = vmatpush1.bf16.msra.mxu1 %v11329_v41 }
 0x92b   : > { %4474 = vmatprep.subr.bf16.mxu1 %v11332_v30 }
 0x92e   : > { %4475 = vmatpush1.bf16.msra.mxu1 %v11335_v15 }
 0x92f   : > { %4476 = vmatprep.subr.bf16.mxu1 %v11338_v17 }
 0x932   : > { %4477 = vmatpush1.bf16.msra.mxu1 %v11341_v19 }
 0x933   : > { %4478 = vmatprep.subr.bf16.mxu1 %v11344_v42 }
 0x936   : > { %4479 = vmatpush1.bf16.msra.mxu1 %v11347_v9 }
 0x937   : > { %4480 = vmatprep.subr.bf16.mxu1 %v11350_v43 }
 0x93a   : > { %4481 = vmatpush1.bf16.msra.mxu1 %v11353_v38 }
 0x93b   : > { %4482 = vmatprep.subr.bf16.mxu1 %v11356_v44 }
 0x93e   : > { %4483 = vmatpush1.bf16.msra.mxu1 %v11360_v23 }
 0x93f   : > { %4484 = vmatprep.subr.bf16.mxu1 %v11363_v24 }
 0x942   : > { %4485 = vmatpush1.bf16.msra.mxu1 %v11369_v59 }
 0x943   : > { %4486 = vmatprep.subr.bf16.mxu1 %v11372_v47 }
 0x946   : > { %4487 = vmatpush1.bf16.msra.mxu1 %v11378_v50 }
 0x947   : > { %4488 = vmatprep.subr.bf16.mxu1 %v11385_v21 }
 0x94a   : > { %4489 = vmatpush1.bf16.msra.mxu1 %v11387_v6 }
 0x94b   : > { %4490 = vmatprep.subr.bf16.mxu1 %v11391_v8 }
 0x94e   : > { %4491 = vmatpush1.bf16.msra.mxu1 %v11393_v11 }
 0x94f   : > { %4537 = vmatprep.subr.bf16.mxu1 %v4240_v56 }
 0x9f4   : > { %v4446_v33 = vpop.f32.mrb[32].mxu1 }
 0x9f5   : > { %v4455_v52 = vmul.f32 2.0, %v4446_v33  ;;  %v4448_v39 = vpop.f32.mrb[33].mxu1  ;;  %v4636_v33 = vpop.permute.xlu1 %4635 }
 0x9f6   : > { %v4456_v54 = vmul.f32 2.0, %v4448_v39  ;;  %v4450_v34 = vpop.f32.mrb[34].mxu1 }
 0x9f7   : > { %v4457_v41 = vmul.f32 2.0, %v4450_v34  ;;  %v4452_v30 = vpop.f32.mrb[35].mxu1  ;;  %v4459_v17 = vsub.f32 %v4455_v52, %v11444_v28 }
 0x9f8   : > { %v4458_v15 = vmul.f32 2.0, %v4452_v30  ;;  %v4460_v42 = vsub.f32 %v4456_v54, %v11439_v25 }
 0x9f9   : > { %v4461_v19 = vsub.f32 %v4457_v41, %v11446_v37  ;;  %v11556_v41 = vld [vmem:[#allocation9 + $0x10] sm:$0xff]  }
 0x9fa   : > { %v4462_v9 = vsub.f32 %v4458_v15, %v11442_v27 }
 0x9fb   : > { %v4463_v43 = vpack.c.bf16 %v4461_v19, %v4459_v17  ;;  %v4737_v19 = vld [vmem:[%s13103_s3] sm:$0xff] }
 0x9fc   : > { %v4464_v38 = vpack.c.bf16 %v4462_v9, %v4460_v42  ;;  %v4738_v42 = vld [vmem:[%s13103_s3 + $0x8] sm:$0xff]  ;;  %v4739_v9 = vld [vmem:[%s13103_s3 + $0x10] sm:$0xff] }
 0x9fe   : > { %7502 = vmatprep.mubr.msk.bf16.mxu1 %vm4166_vm4, %v4464_v38 }
 0x9ff   : > { %4501 = vmatmul.mubr.bf16.vlgmr.msra.gmra.mrb[36].mxu1 %v4463_v43 }
 0xa00   : > { %4538 = vmatpush1.bf16.msra.mxu1 %v11452_v62  ;;  %4569 = vmatprep.mubr.bf16.mxu1 %v9393_v22 }
 0xa01   : > { %4539 = vmatprep.subr.bf16.mxu1 %v4408_v20  ;;  %v11547_v20 = vld [vmem:[#allocation9 + $0x8] sm:$0xff]  }
 0xa04   : > { %4540 = vmatpush1.bf16.msra.mxu1 %v4407_v1 }
 0xa05   : > { %4541 = vmatprep.subr.bf16.mxu1 %v4464_v38 }
 0xa08   : > { %4542 = vmatpush1.bf16.msra.mxu1 %v4463_v43  ;;  %v4740_v43 = vld [vmem:[%s13103_s3 + $0x18] sm:$0xff] }
 0xad2   : > { %v4502_v44 = vpop.f32.mrb[36].mxu1 }
 0xad3   : > { %v4511_v23 = vmul.f32 2.0, %v4502_v44  ;;  %v4504_v24 = vpop.f32.mrb[37].mxu1 }
 0xad4   : > { %v4512_v59 = vmul.f32 2.0, %v4504_v24  ;;  %v4506_v47 = vpop.f32.mrb[38].mxu1 }
 0xad5   : > { %v4515_v50 = vsub.f32 %v4511_v23, %v11480_v10  ;;  %v4513_v21 = vmul.f32 2.0, %v4506_v47  ;;  %v4508_v6 = vpop.f32.mrb[39].mxu1  ;;  %v11541_v10 = vld [vmem:[#allocation9] sm:$0xff]   ;;  %v4742_v47 = vld [vmem:[%s13103_s3 + $0x28] sm:$0xff] }
 0xad6   : > { %v4516_v8 = vsub.f32 %v4512_v59, %v11482_v40  ;;  %v4514_v11 = vmul.f32 2.0, %v4508_v6  ;;  %v4631_v40 = vpop.permute.xlu0 %4630  ;;  %v4741_v59 = vld [vmem:[%s13103_s3 + $0x20] sm:$0xff] }
 0xad7   : > { %v4517_v29 = vsub.f32 %v4513_v21, %v11484_v14  ;;  %v4744_v21 = vld [vmem:[%s13103_s3 + $0x38] sm:$0xff] }
 0xad8   : > { %v4518_v31 = vsub.f32 %v4514_v11, %v11488_v2 }
 0xad9   : > { %v4519_v18 = vpack.c.bf16 %v4517_v29, %v4515_v50  ;;  %v4743_v50 = vld [vmem:[%s13103_s3 + $0x30] sm:$0xff]  ;;  %s9401_s3 = smov 125  }
 0xada   : > { %v4520_v45 = vpack.c.bf16 %v4518_v31, %v4516_v8 }
 0xadc   : > { %4543 = vmatprep.subr.bf16.mxu1 %v4520_v45 }
 0xadd   : > { %4544 = vmatpush1.bf16.msra.mxu1 %v4519_v18 }
 0xade   : > { %7747 = vmatprep.subr.bf16.mxu1 %v11541_v10 }
 0xae0   : > { %7505 = vmatmul.mubr.msk.bf16.vlgmr.msra.gmra.mrb[40].mxu1 %vm4166_vm4, %v8660_v32 }
 0xae1   : > { %4579 = vmatprep.mubr.bf16.mxu1 %v9393_v22  ;;  %7748 = vmatpush3.bf16.msra.mxu1 %v11541_v10 }
 0xae2   : > { %7749 = vmatprep.subr.bf16.mxu1 %v11547_v20 }
 0xae5   : > { %7750 = vmatpush3.bf16.msra.mxu1 %v11547_v20 }
 0xae6   : > { %7751 = vmatprep.subr.bf16.mxu1 %v11556_v41 }
 0xae8   : > { %7506 = vmatmul.mubr.msk.bf16.gmra.mrb[44].mxu1 %vm4166_vm4, %v8661_v46 }
 0xae9   : > { %7752 = vmatpush3.bf16.msra.mxu1 %v11556_v41 }
 0xaea   : > { %7757 = vmatprep.subr.bf16.mxu1 %v11541_v10 }
 0xbb3   : > { %v4571_v5 = vpop.f32.mrb[40].mxu1 }
 0xbb4   : > { %v4610_v7 = vmul.f32 %v4593_v60, %v4571_v5  ;;  %v4573_v61 = vpop.f32.mrb[41].mxu1 }
 0xbb5   : > { %v4611_v49 = vmul.f32 %v4593_v60, %v4573_v61  ;;  %v4575_v51 = vpop.f32.mrb[42].mxu1 }
 0xbb6   : > { %v4638_v57 = vadd.f32 %v4621_v48, %v4610_v7  ;;  %v4612_v16 = vmul.f32 %v4598_v36, %v4575_v51  ;;  %v4577_v55 = vpop.f32.mrb[43].mxu1 }
 0xbb7   : > { %v4639_v58 = vadd.f32 %v4621_v48, %v4611_v49  ;;  %v4613_v4 = vmul.f32 %v4598_v36, %v4577_v55 }
 0xbb8   : > { %v11530_v0 = vmax.f32 %v4638_v57, 0.0  ;;  %v4640_v3 = vadd.f32 %v4626_v63, %v4612_v16 }
 0xbb9   : > { %v4647_v22 = vmax.f32 %v4639_v58, 0.0  ;;  %v4641_v26 = vadd.f32 %v4626_v63, %v4613_v4 }
 0xbba   : > { %4658 = vrot.lane.b32.xlu0 %v11530_v0, %s9395_s29  ;;  %v11535_v25 = vmax.f32 %v4640_v3, 0.0 }
 0xbbb   : > { %4680 = vrot.lane.b32.xlu1 %v4647_v22, %s9396_s11  ;;  %v4581_v12 = vpop.f32.mrb[44].mxu1  ;;  %v4649_v56 = vmax.f32 %v4641_v26, 0.0 }
 0xbbc   : > { %v4583_v13 = vpop.f32.mrb[45].mxu1  ;;  %v4614_v37 = vmul.f32 %v4603_v53, %v4581_v12 }
 0xbbd   : > { %v4585_v27 = vpop.f32.mrb[46].mxu1  ;;  %v4615_v62 = vmul.f32 %v4603_v53, %v4583_v13 }
 0xbbe   : > { %4678 = vrot.lane.b32.xlu0 %v11530_v0, %s9396_s11  ;;  %v4587_v28 = vpop.f32.mrb[47].mxu1  ;;  %v4642_v14 = vadd.f32 %v4631_v40, %v4614_v37  ;;  %v4616_v2 = vmul.f32 %v4608_v35, %v4585_v27 }
 0xbbf   : > { %4660 = vrot.lane.b32.xlu1 %v11535_v25, %s9395_s29  ;;  %v4643_v1 = vadd.f32 %v4631_v40, %v4615_v62  ;;  %v4617_v34 = vmul.f32 %v4608_v35, %v4587_v28 }
 0xbc0   : > { %v11553_v52 = vmax.f32 %v4642_v14, 0.0  ;;  %v4644_v54 = vadd.f32 %v4636_v33, %v4616_v2 }
 0xbc1   : > { %v4651_v39 = vmax.f32 %v4643_v1, 0.0  ;;  %v4645_v15 = vadd.f32 %v4636_v33, %v4617_v34 }
 0xbc2   : > { %4707 = vrot.lane.b32.xlu0 %v4647_v22, %s9397_s30  ;;  %v11563_v30 = vmax.f32 %v4644_v54, 0.0 }
 0xbc3   : > { %4684 = vrot.lane.b32.xlu1 %v4649_v56, %s9396_s11  ;;  %v4653_v17 = vmax.f32 %v4645_v15, 0.0 }
 0xbc6   : > { %4682 = vrot.lane.b32.xlu0 %v11535_v25, %s9396_s11 }
 0xbc7   : > { %4709 = vrot.lane.b32.xlu1 %v4649_v56, %s9397_s30 }
 0xbca   : > { %4662 = vrot.lane.b32.xlu0 %v11553_v52, %s9395_s29 }
 0xbcb   : > { %4688 = vrot.lane.b32.xlu1 %v4651_v39, %s9396_s11 }
 0xbce   : > { %4686 = vrot.lane.b32.xlu0 %v11553_v52, %s9396_s11 }
 0xbcf   : > { %4664 = vrot.lane.b32.xlu1 %v11563_v30, %s9395_s29  ;;  %s13106_s29 = sld [smem:[#allocation280_spill]] }
 0xbd2   : > { %4690 = vrot.lane.b32.xlu0 %v11563_v30, %s9396_s11 }
 0xbd3   : > { %4692 = vrot.lane.b32.xlu1 %v4653_v17, %s9396_s11  ;;  %s13104_s11 = sld [smem:[#allocation278_spill]] }
 0xbd6   : > { %4711 = vrot.lane.b32.xlu0 %v4651_v39, %s9397_s30 }
 0xbd7   : > { %4713 = vrot.lane.b32.xlu1 %v4653_v17, %s9397_s30  ;;  %s9398_s30 = smov 116  }
 0xbd9   : > { %v4745_v38 = vld [vmem:[%s13104_s11] sm:$0xff]  ;;  %v4746_v44 = vld [vmem:[%s13104_s11 + $0x8] sm:$0xff]  ;;  %v4747_v23 = vld [vmem:[%s13104_s11 + $0x10] sm:$0xff] }
 0xbda   : > { %5052 = vperm.xlu0 %8189, %v4737_v19   ;;  %v4748_v24 = vld [vmem:[%s13104_s11 + $0x18] sm:$0xff]  ;;  %v4749_v6 = vld [vmem:[%s13104_s11 + $0x20] sm:$0xff]  ;;  %v4750_v8 = vld [vmem:[%s13104_s11 + $0x28] sm:$0xff] }
 0xbdb   : > { %5057 = vperm.xlu1 %8190, %v4738_v42   ;;  %v4751_v11 = vld [vmem:[%s13104_s11 + $0x30] sm:$0xff]  ;;  %v4752_v29 = vld [vmem:[%s13104_s11 + $0x38] sm:$0xff] }
 0xbde   : > { %5062 = vperm.xlu0 %8189, %v4739_v9  }
 0xbdf   : > { %5067 = vperm.xlu1 %8190, %v4740_v43  }
 0xbe2   : > { %5100 = vperm.xlu0 %8189, %v4745_v38  }
 0xbe3   : > { %5105 = vperm.xlu1 %8190, %v4746_v44  }
 0xbe6   : > { %5110 = vperm.xlu0 %8189, %v4747_v23  }
 0xbe7   : > { %5115 = vperm.xlu1 %8190, %v4748_v24  }
 0xbea   : > { %5072 = vperm.xlu0 %8189, %v4741_v59  }
 0xbeb   : > { %5077 = vperm.xlu1 %8190, %v4742_v47  }
 0xbee   : > { %5082 = vperm.xlu0 %8189, %v4743_v50  }
 0xbef   : > { %5087 = vperm.xlu1 %8190, %v4744_v21  }
 0xbf2   : > { %5120 = vperm.xlu0 %8189, %v4749_v6  }
 0xbf3   : > { %5125 = vperm.xlu1 %8190, %v4750_v8  }
 0xbf6   : > { %5130 = vperm.xlu0 %8189, %v4751_v11  }
 0xbf7   : > { %5135 = vperm.xlu1 %8190, %v4752_v29  }
 0xc2c   : > { %v4659_v31 = vpop.permute.xlu0 %4658 }
 0xc2d   : > { %v4681_v18 = vpop.permute.xlu1 %4680  ;;  %v4670_v53 = vmax.f32 %v11530_v0, %v4659_v31 }
 0xc30   : > { %v4679_v45 = vpop.permute.xlu0 %4678 }
 0xc31   : > { %v4661_v32 = vpop.permute.xlu1 %4660  ;;  %v4695_v60 = vsel %vm4694_vm5, %v4679_v45, %v4681_v18 }
 0xc32   : > { %v4703_v35 = vmax.f32 %v4670_v53, %v4695_v60  ;;  %v4671_v5 = vmax.f32 %v11535_v25, %v4661_v32  ;;  %v8666_v60 = vld [vmem:[#allocation10 + $0x8] sm:$0xff]   ;;  %v8668_v53 = vld [vmem:[#allocation10 + $0x18] sm:$0xff]  }
 0xc34   : > { %v4708_v46 = vpop.permute.xlu0 %4707 }
 0xc35   : > { %v4685_v36 = vpop.permute.xlu1 %4684  ;;  %v11627_v51 = vmax.f32 %v4703_v35, %v4708_v46 }
 0xc38   : > { %v4683_v7 = vpop.permute.xlu0 %4682 }
 0xc39   : > { %v4696_v61 = vsel %vm4694_vm5, %v4683_v7, %v4685_v36  ;;  %v4710_v48 = vpop.permute.xlu1 %4709  ;;  %v8667_v36 = vld [vmem:[#allocation10 + $0x10] sm:$0xff]  }
 0xc3a   : > { %v4704_v49 = vmax.f32 %v4671_v5, %v4696_v61 }
 0xc3c   : > { %v11629_v57 = vmax.f32 %v4704_v49, %v4710_v48  ;;  %v4663_v16 = vpop.permute.xlu0 %4662 }
 0xc3d   : > { %v4689_v55 = vpop.permute.xlu1 %4688  ;;  %v4672_v4 = vmax.f32 %v11553_v52, %v4663_v16 }
 0xc3e   : > { %v4753_v58 = vpack.c.bf16 %v11629_v57, %v11627_v51 }
 0xc40   : > { %v4687_v63 = vpop.permute.xlu0 %4686  ;;  %7753 = vmatprep.mubr.msk.bf16.mxu1 %vm4773_vm6, %v4753_v58  ;;  %7777 = vmatprep.subr.bf16.mxu0 %v4753_v58 }
 0xc41   : > { %7778 = vmatpush3.bf16.msra.mxu0 %v4753_v58  ;;  %v4665_v0 = vpop.permute.xlu1 %4664  ;;  %v4697_v22 = vsel %vm4694_vm5, %v4687_v63, %v4689_v55 }
 0xc42   : > { %v4673_v12 = vmax.f32 %v11563_v30, %v4665_v0  ;;  %v4705_v26 = vmax.f32 %v4672_v4, %v4697_v22 }
 0xc44   : > { %v4691_v3 = vpop.permute.xlu0 %4690 }
 0xc45   : > { %v4693_v13 = vpop.permute.xlu1 %4692 }
 0xc46   : > { %v4698_v25 = vsel %vm4694_vm5, %v4691_v3, %v4693_v13 }
 0xc47   : > { %v4706_v27 = vmax.f32 %v4673_v12, %v4698_v25 }
 0xc48   : > { %v4712_v28 = vpop.permute.xlu0 %4711 }
 0xc49   : > { %v4721_v37 = vmax.f32 %v4705_v26, %v4712_v28  ;;  %v4714_v56 = vpop.permute.xlu1 %4713 }
 0xc4a   : > { %v4722_v62 = vmax.f32 %v4706_v27, %v4714_v56 }
 0xc4c   : > { %v4754_v40 = vpack.c.bf16 %v4722_v62, %v4721_v37 }
 0xc4e   : > { %7754 = vmatmul.mubr.msk.bf16.vlgmr.msra.gmra.mrb[48].mxu1 %vm4773_vm6, %v4754_v40  ;;  %7779 = vmatprep.subr.bf16.mxu0 %v4754_v40 }
 0xc4f   : > { %7780 = vmatpush3.bf16.msra.mxu0 %v4754_v40  ;;  %7758 = vmatpush3.bf16.msra.mxu1 %v11541_v10 }
 0xc50   : > { %7759 = vmatprep.subr.bf16.mxu1 %v11547_v20 }
 0xc53   : > { %7760 = vmatpush3.bf16.msra.mxu1 %v11547_v20 }
 0xc54   : > { %7761 = vmatprep.subr.bf16.mxu1 %v11556_v41 }
 0xc57   : > { %7762 = vmatpush3.bf16.msra.mxu1 %v11556_v41 }
 0xc58   : > { %7767 = vmatprep.subr.bf16.mxu1 %v11541_v10 }
 0xc59   : > { %v5053_v35 = vpop.permute.xlu0 %5052 }
 0xc5a   : > { %v5058_v5 = vpop.permute.xlu1 %5057 }
 0xc5d   : > { %v5063_v7 = vpop.permute.xlu0 %5062 }
 0xc5e   : > { %v5068_v61 = vpop.permute.xlu1 %5067 }
 0xc61   : > { %v5101_v48 = vpop.permute.xlu0 %5100 }
 0xc62   : > { %v5106_v49 = vpop.permute.xlu1 %5105 }
 0xc66   : > { %v5116_v58 = vpop.permute.xlu1 %5115 }
 0xc6a   : > { %v5078_v26 = vpop.permute.xlu1 %5077 }
 0xd21   : > { %v7755_v14 = vpop.f32.mrb[48].mxu1 }
 0xd22   : > { %v4814_v1 = vpop.f32.mrb[49].mxu1 }
 0xd23   : > { %v7756_v2 = vpop.f32.mrb[50].mxu1 }
 0xd24   : > { %v4830_v33 = vpack.c.bf16 %v7756_v2, %v7755_v14  ;;  %v4817_v52 = vpop.f32.mrb[51].mxu1 }
 0xd25   : > { %v4829_v39 = vpack.c.bf16 %v4817_v52, %v4814_v1 }
 0xd27   : > { %7763 = vmatprep.mubr.msk.bf16.mxu1 %vm4773_vm6, %v4829_v39  ;;  %7781 = vmatprep.subr.bf16.mxu0 %v4829_v39 }
 0xd28   : > { %7764 = vmatmul.mubr.msk.bf16.vlgmr.msra.gmra.mrb[52].mxu1 %vm4773_vm6, %v4830_v33  ;;  %7782 = vmatpush3.bf16.msra.mxu0 %v4829_v39 }
 0xd29   : > { %7783 = vmatprep.subr.bf16.mxu0 %v4830_v33  ;;  %7768 = vmatpush3.bf16.msra.mxu1 %v11541_v10 }
 0xd2a   : > { %7769 = vmatprep.subr.bf16.mxu1 %v11547_v20 }
 0xd2c   : > { %7784 = vmatpush3.bf16.msra.mxu0 %v4830_v33 }
 0xd2d   : > { %7770 = vmatpush3.bf16.msra.mxu1 %v11547_v20 }
 0xd2e   : > { %7771 = vmatprep.subr.bf16.mxu1 %v11556_v41 }
 0xd31   : > { %7772 = vmatpush3.bf16.msra.mxu1 %v11556_v41  ;;  %v8665_v41 = vld [vmem:[#allocation10] sm:$0xff]  }
 0xd32   : > { %7793 = vmatprep.mubr.bf16.mxu0 %v8665_v41 }
 0xdfb   : > { %v7765_v54 = vpop.f32.mrb[52].mxu1 }
 0xdfc   : > { %v4888_v34 = vmul.f32 2.0, %v7765_v54  ;;  %v4871_v30 = vpop.f32.mrb[53].mxu1 }
 0xdfd   : > { %v4886_v15 = vmul.f32 2.0, %v4871_v30  ;;  %v7766_v17 = vpop.f32.mrb[54].mxu1 }
 0xdfe   : > { %v4889_v19 = vmul.f32 2.0, %v7766_v17  ;;  %v4874_v42 = vpop.f32.mrb[55].mxu1  ;;  %v4892_v43 = vsub.f32 %v4888_v34, %v4721_v37 }
 0xdff   : > { %v4887_v9 = vmul.f32 2.0, %v4874_v42  ;;  %v4890_v10 = vsub.f32 %v4886_v15, %v11627_v51  ;;  %v5111_v51 = vpop.permute.xlu0 %5110 }
 0xe00   : > { %v4893_v38 = vsub.f32 %v4889_v19, %v4722_v62 }
 0xe01   : > { %v4891_v44 = vsub.f32 %v4887_v9, %v11629_v57 }
 0xe02   : > { %v4895_v23 = vpack.c.bf16 %v4893_v38, %v4892_v43 }
 0xe03   : > { %v4894_v20 = vpack.c.bf16 %v4891_v44, %v4890_v10  ;;  %v5073_v13 = vpop.permute.xlu0 %5072 }
 0xe05   : > { %7773 = vmatprep.mubr.msk.bf16.mxu1 %vm4773_vm6, %v4894_v20  ;;  %7785 = vmatprep.subr.bf16.mxu0 %v4894_v20 }
 0xe06   : > { %7774 = vmatmul.mubr.msk.bf16.vlgmr.msra.gmra.mrb[56].mxu1 %vm4773_vm6, %v4895_v23  ;;  %7786 = vmatpush3.bf16.msra.mxu0 %v4894_v20 }
 0xe07   : > { %7787 = vmatprep.subr.bf16.mxu0 %v4895_v23 }
 0xe0a   : > { %7788 = vmatpush3.bf16.msra.mxu0 %v4895_v23 }
 0xed9   : > { %v7775_v24 = vpop.f32.mrb[56].mxu1 }
 0xeda   : > { %v4953_v59 = vmul.f32 2.0, %v7775_v24  ;;  %v4936_v47 = vpop.f32.mrb[57].mxu1 }
 0xedb   : > { %v4951_v50 = vmul.f32 2.0, %v4936_v47  ;;  %v7776_v21 = vpop.f32.mrb[58].mxu1 }
 0xedc   : > { %v4957_v6 = vsub.f32 %v4953_v59, %v7755_v14  ;;  %v4954_v8 = vmul.f32 2.0, %v7776_v21  ;;  %v4939_v11 = vpop.f32.mrb[59].mxu1  ;;  %v5083_v14 = vpop.permute.xlu0 %5082  ;;  %v5277_v21 = vld [vmem:[%s13105_s25 + $0x8] sm:$0xff] }
 0xedd   : > { %v4955_v29 = vsub.f32 %v4951_v50, %v4814_v1  ;;  %v4952_v31 = vmul.f32 2.0, %v4939_v11  ;;  %v5276_v50 = vld [vmem:[%s13105_s25] sm:$0xff]  ;;  %v5278_v11 = vld [vmem:[%s13105_s25 + $0x10] sm:$0xff] }
 0xede   : > { %v4958_v18 = vsub.f32 %v4954_v8, %v7756_v2  ;;  %v5088_v2 = vpop.permute.xlu1 %5087 }
 0xedf   : > { %v4956_v45 = vsub.f32 %v4952_v31, %v4817_v52  ;;  %v8669_v52 = vld [vmem:[#allocation12] sm:$0x3f]  }
 0xee0   : > { %v4960_v32 = vpack.c.bf16 %v4958_v18, %v4957_v6  ;;  %v5121_v54 = vpop.permute.xlu0 %5120  ;;  %8025 = vmatprep.subr.msk.bf16.mxu1 %vm5330_vm7, %v8669_v52  ;;  %v11674_v34 = vsel %vm5330_vm7, %v8669_v52, 0  ;;  %v5292_v6 = vld [vmem:[%s13106_s29] sm:$0xff] }
 0xee1   : > { %v4959_v46 = vpack.c.bf16 %v4956_v45, %v4955_v29  ;;  %7802 = vmatpush3.bf16.msra.mxu1 %v11674_v34  ;;  %v5279_v29 = vld [vmem:[%s13105_s25 + $0x18] sm:$0xff]  ;;  %v5280_v45 = vld [vmem:[%s13105_s25 + $0x20] sm:$0xff] }
 0xee2   : > { %v5126_v15 = vpop.permute.xlu1 %5125  ;;  %8026 = vmatprep.subr.msk.bf16.mxu1 %vm5330_vm7, %v8669_v52 }
 0xee3   : > { %7789 = vmatprep.subr.bf16.mxu0 %v4959_v46 }
 0xee4   : > { %7790 = vmatpush3.bf16.msra.mxu0 %v4959_v46  ;;  %v5131_v42 = vpop.permute.xlu0 %5130 }
 0xee5   : > { %7791 = vmatprep.subr.bf16.mxu0 %v4960_v32 }
 0xee6   : > { %v5136_v43 = vpop.permute.xlu1 %5135 }
 0xee8   : > { %7792 = vmatpush3.bf16.msra.mxu0 %v4960_v32  ;;  %v5281_v32 = vld [vmem:[%s13105_s25 + $0x28] sm:$0xff] }
 0xee9   : > { %8027 = vmatprep.subr.msk.bf16.mxu0 %vm5330_vm7, %v8669_v52 }
 0xeeb   : > { %7794 = vmatmul.mubr.bf16.vlgmr.msra.gmra.mrb[20].mxu0 %v8666_v60 }
 0xeec   : > { %7797 = vmatprep.mubr.bf16.mxu0 %v8667_v36  ;;  %7822 = vmatpush3.bf16.msra.mxu0 %v11674_v34  ;;  %v5282_v36 = vld [vmem:[%s13105_s25 + $0x30] sm:$0xff] }
 0xef3   : > { %7798 = vmatmul.mubr.bf16.gmra.mrb[24].mxu0 %v8668_v53  ;;  %v5283_v53 = vld [vmem:[%s13105_s25 + $0x38] sm:$0xff] }
 0xfbe   : > { %v7795_v57 = vpop.f32.mrb[20].mxu0 }
 0xfbf   : > { %v5092_v16 = vmul.f32 %v7795_v57, %v5063_v7  ;;  %v5019_v55 = vpop.f32.mrb[21].mxu0  ;;  %v5284_v7 = vld [vmem:[%s13105_s25 + $0x40] sm:$0xff]  ;;  %v5287_v57 = vld [vmem:[%s13105_s25 + $0x58] sm:$0xff] }
 0xfc0   : > { %v7796_v63 = vpop.f32.mrb[22].mxu0  ;;  %v5090_v28 = vmul.f32 %v5053_v35, %v5019_v55 }
 0xfc1   : > { %v5140_v0 = vadd.f32 %v5111_v51, %v5092_v16  ;;  %v5093_v22 = vmul.f32 %v7796_v63, %v5068_v61  ;;  %v5022_v3 = vpop.f32.mrb[23].mxu0  ;;  %v5285_v61 = vld [vmem:[%s13105_s25 + $0x48] sm:$0xff]  ;;  %v5286_v51 = vld [vmem:[%s13105_s25 + $0x50] sm:$0xff] }
 0xfc2   : > { %v5091_v62 = vmul.f32 %v5058_v5, %v5022_v3  ;;  %v5138_v1 = vadd.f32 %v5101_v48, %v5090_v28  ;;  %v5289_v63 = vld [vmem:[%s13105_s25 + $0x68] sm:$0xff]  ;;  %v5290_v3 = vld [vmem:[%s13105_s25 + $0x70] sm:$0xff] }
 0xfc3   : > { %v11656_v4 = vmax.f32 %v5140_v0, 0.0  ;;  %v5141_v12 = vadd.f32 %v5116_v58, %v5093_v22  ;;  %v5288_v58 = vld [vmem:[%s13105_s25 + $0x60] sm:$0xff] }
 0xfc4   : > { %v5139_v33 = vadd.f32 %v5106_v49, %v5091_v62  ;;  %v11670_v39 = vmax.f32 %v5138_v1, 0.0 }
 0xfc5   : > { %v11658_v25 = vmax.f32 %v5141_v12, 0.0  ;;  %5166 = vrot.lane.b32.xlu0 %v11656_v4, %s9398_s30  ;;  %v5291_v12 = vld [vmem:[%s13105_s25 + $0x78] sm:$0xff] }
 0xfc6   : > { %v7799_v27 = vpop.f32.mrb[24].mxu0  ;;  %v11676_v30 = vmax.f32 %v5139_v33, 0.0 }
 0xfc7   : > { %5168 = vrot.lane.b32.xlu1 %v11658_v25, %s9398_s30  ;;  %v5035_v37 = vpop.f32.mrb[25].mxu0  ;;  %v5096_v17 = vmul.f32 %v7799_v27, %v5083_v14 }
 0xfc8   : > { %v7800_v56 = vpop.f32.mrb[26].mxu0  ;;  %v5094_v44 = vmul.f32 %v5073_v13, %v5035_v37 }
 0xfc9   : > { %5198 = vrot.lane.b32.xlu0 %v11656_v4, %s9399_s22  ;;  %v5038_v40 = vpop.f32.mrb[27].mxu0  ;;  %v5097_v19 = vmul.f32 %v7800_v56, %v5088_v2  ;;  %v5144_v9 = vadd.f32 %v5131_v42, %v5096_v17 }
 0xfca   : > { %v5095_v20 = vmul.f32 %v5078_v26, %v5038_v40  ;;  %v5142_v41 = vadd.f32 %v5121_v54, %v5094_v44 }
 0xfcb   : > { %5200 = vrot.lane.b32.xlu1 %v11658_v25, %s9399_s22  ;;  %v5145_v38 = vadd.f32 %v5136_v43, %v5097_v19  ;;  %v11690_v10 = vmax.f32 %v5144_v9, 0.0 }
 0xfcc   : > { %v5143_v24 = vadd.f32 %v5126_v15, %v5095_v20  ;;  %v11702_v59 = vmax.f32 %v5142_v41, 0.0 }
 0xfcd   : > { %5230 = vrot.lane.b32.xlu0 %v11656_v4, %s9400_s13  ;;  %v11694_v23 = vmax.f32 %v5145_v38, 0.0 }
 0xfce   : > { %v11706_v47 = vmax.f32 %v5143_v24, 0.0 }
 0xfcf   : > { %5232 = vrot.lane.b32.xlu1 %v11658_v25, %s9400_s13 }
 0xfd1   : > { %5162 = vrot.lane.b32.xlu0 %v11670_v39, %s9398_s30 }
 0xfd3   : > { %5164 = vrot.lane.b32.xlu1 %v11676_v30, %s9398_s30 }
 0xfd5   : > { %5194 = vrot.lane.b32.xlu0 %v11670_v39, %s9399_s22 }
 0xfd7   : > { %5196 = vrot.lane.b32.xlu1 %v11676_v30, %s9399_s22 }
 0xfd9   : > { %5226 = vrot.lane.b32.xlu0 %v11670_v39, %s9400_s13 }
 0xfdb   : > { %5228 = vrot.lane.b32.xlu1 %v11676_v30, %s9400_s13 }
 0xfdd   : > { %5174 = vrot.lane.b32.xlu0 %v11690_v10, %s9398_s30 }
 0xfdf   : > { %5176 = vrot.lane.b32.xlu1 %v11694_v23, %s9398_s30 }
 0xfe1   : > { %5206 = vrot.lane.b32.xlu0 %v11690_v10, %s9399_s22 }
 0xfe3   : > { %5208 = vrot.lane.b32.xlu1 %v11694_v23, %s9399_s22 }
 0xfe5   : > { %5170 = vrot.lane.b32.xlu0 %v11702_v59, %s9398_s30 }
 0xfe7   : > { %5172 = vrot.lane.b32.xlu1 %v11706_v47, %s9398_s30 }
 0xfe9   : > { %5202 = vrot.lane.b32.xlu0 %v11702_v59, %s9399_s22 }
 0xfeb   : > { %5204 = vrot.lane.b32.xlu1 %v11706_v47, %s9399_s22  ;;  %s13107_s22 = smov %s13106_s29 }
 0xfec   : > { %v5293_v8 = vld [vmem:[%s13107_s22 + $0x8] sm:$0xff]  ;;  %v5294_v31 = vld [vmem:[%s13107_s22 + $0x10] sm:$0xff]  ;;  %v5295_v18 = vld [vmem:[%s13107_s22 + $0x18] sm:$0xff] }
 0xfed   : > { %5234 = vrot.lane.b32.xlu0 %v11702_v59, %s9400_s13  ;;  %v5296_v46 = vld [vmem:[%s13107_s22 + $0x20] sm:$0xff]  ;;  %v5297_v60 = vld [vmem:[%s13107_s22 + $0x28] sm:$0xff]  ;;  %v5298_v35 = vld [vmem:[%s13107_s22 + $0x30] sm:$0xff] }
 0xfee   : > { %v5299_v5 = vld [vmem:[%s13107_s22 + $0x38] sm:$0xff]  ;;  %v5300_v48 = vld [vmem:[%s13107_s22 + $0x40] sm:$0xff]  ;;  %v5301_v49 = vld [vmem:[%s13107_s22 + $0x48] sm:$0xff] }
 0xfef   : > { %5236 = vrot.lane.b32.xlu1 %v11706_v47, %s9400_s13  ;;  %v5302_v16 = vld [vmem:[%s13107_s22 + $0x50] sm:$0xff]  ;;  %v5303_v55 = vld [vmem:[%s13107_s22 + $0x58] sm:$0xff]  ;;  %v5304_v0 = vld [vmem:[%s13107_s22 + $0x60] sm:$0xff] }
 0xff0   : > { %v5305_v22 = vld [vmem:[%s13107_s22 + $0x68] sm:$0xff]  ;;  %v5306_v13 = vld [vmem:[%s13107_s22 + $0x70] sm:$0xff]  ;;  %v5307_v26 = vld [vmem:[%s13107_s22 + $0x78] sm:$0xff] }
 0xff1   : > { %5238 = vrot.lane.b32.xlu0 %v11690_v10, %s9400_s13 }
 0xff3   : > { %5240 = vrot.lane.b32.xlu1 %v11694_v23, %s9400_s13  ;;  %s9403_s13 = smov 119  }
 0xff5   : > { %5776 = vperm.xlu0 %8189, %v5276_v50  }
 0xff7   : > { %5781 = vperm.xlu1 %8190, %v5277_v21  }
 0xff9   : > { %5872 = vperm.xlu0 %8189, %v5292_v6  }
 0xffb   : > { %5877 = vperm.xlu1 %8190, %v5293_v8  }
 0xffd   : > { %5786 = vperm.xlu0 %8189, %v5278_v11  }
 0xfff   : > { %5791 = vperm.xlu1 %8190, %v5279_v29  }
0x1001   : > { %5882 = vperm.xlu0 %8189, %v5294_v31  }
0x1003   : > { %5887 = vperm.xlu1 %8190, %v5295_v18  }
0x1005   : > { %5796 = vperm.xlu0 %8189, %v5280_v45  }
0x1007   : > { %5801 = vperm.xlu1 %8190, %v5281_v32  }
0x1009   : > { %5892 = vperm.xlu0 %8189, %v5296_v46  }
0x100b   : > { %5897 = vperm.xlu1 %8190, %v5297_v60  }
0x100d   : > { %5806 = vperm.xlu0 %8189, %v5282_v36  }
0x100f   : > { %5811 = vperm.xlu1 %8190, %v5283_v53  }
0x1011   : > { %5902 = vperm.xlu0 %8189, %v5298_v35  }
0x1013   : > { %5907 = vperm.xlu1 %8190, %v5299_v5  }
0x1015   : > { %5816 = vperm.xlu0 %8189, %v5284_v7  }
0x1017   : > { %5821 = vperm.xlu1 %8190, %v5285_v61  }
0x1019   : > { %5912 = vperm.xlu0 %8189, %v5300_v48  }
0x101b   : > { %5917 = vperm.xlu1 %8190, %v5301_v49  }
0x101d   : > { %5826 = vperm.xlu0 %8189, %v5286_v51  }
0x101f   : > { %5831 = vperm.xlu1 %8190, %v5287_v57  }
0x1021   : > { %5922 = vperm.xlu0 %8189, %v5302_v16  }
0x1023   : > { %5927 = vperm.xlu1 %8190, %v5303_v55  }
0x1025   : > { %5836 = vperm.xlu0 %8189, %v5288_v58  }
0x1027   : > { %5841 = vperm.xlu1 %8190, %v5289_v63  }
0x1029   : > { %5932 = vperm.xlu0 %8189, %v5304_v0  }
0x102b   : > { %5937 = vperm.xlu1 %8190, %v5305_v22  }
0x102d   : > { %5846 = vperm.xlu0 %8189, %v5290_v3  }
0x102f   : > { %5851 = vperm.xlu1 %8190, %v5291_v12  }
0x1031   : > { %5942 = vperm.xlu0 %8189, %v5306_v13  }
0x1033   : > { %5947 = vperm.xlu1 %8190, %v5307_v26  }
0x1037   : > { %v5167_v27 = vpop.permute.xlu0 %5166 }
0x1038   : > { %v5188_v17 = vmax.f32 %v11656_v4, %v5167_v27 }
0x1039   : > { %v5169_v28 = vpop.permute.xlu1 %5168 }
0x103a   : > { %v5189_v33 = vmax.f32 %v11658_v25, %v5169_v28 }
0x103b   : > { %v5199_v37 = vpop.permute.xlu0 %5198 }
0x103c   : > { %v5220_v38 = vmax.f32 %v5188_v17, %v5199_v37 }
0x103d   : > { %v5201_v56 = vpop.permute.xlu1 %5200 }
0x103e   : > { %v5221_v19 = vmax.f32 %v5189_v33, %v5201_v56 }
0x103f   : > { %v5231_v62 = vpop.permute.xlu0 %5230 }
0x1040   : > { %v11830_v25 = vmax.f32 %v5220_v38, %v5231_v62 }
0x1041   : > { %v5233_v40 = vpop.permute.xlu1 %5232 }
0x1042   : > { %v11824_v44 = vmax.f32 %v5221_v19, %v5233_v40 }
0x1043   : > { %v5163_v14 = vpop.permute.xlu0 %5162 }
0x1044   : > { %v5186_v54 = vmax.f32 %v11670_v39, %v5163_v14  ;;  %v11838_v4 = vpack.c.bf16 %v11824_v44, %v11830_v25 }
0x1045   : > { %v5165_v1 = vpop.permute.xlu1 %5164 }
0x1046   : > { %v5187_v15 = vmax.f32 %v11676_v30, %v5165_v1 }
0x1047   : > { %v5195_v2 = vpop.permute.xlu0 %5194 }
0x1048   : > { %v5218_v9 = vmax.f32 %v5186_v54, %v5195_v2 }
0x1049   : > { %v5197_v52 = vpop.permute.xlu1 %5196 }
0x104a   : > { %v5219_v43 = vmax.f32 %v5187_v15, %v5197_v52 }
0x104b   : > { %v5227_v42 = vpop.permute.xlu0 %5226 }
0x104c   : > { %v11826_v41 = vmax.f32 %v5218_v9, %v5227_v42 }
0x104d   : > { %v5229_v20 = vpop.permute.xlu1 %5228 }
0x104e   : > { %v11828_v24 = vmax.f32 %v5219_v43, %v5229_v20 }
0x104f   : > { %v5175_v50 = vpop.permute.xlu0 %5174 }
0x1050   : > { %v11834_v39 = vpack.c.bf16 %v11828_v24, %v11826_v41  ;;  %v5192_v53 = vmax.f32 %v11690_v10, %v5175_v50 }
0x1051   : > { %v5177_v30 = vpop.permute.xlu1 %5176 }
0x1052   : > { %7803 = vmatprep.mubr.msk.bf16.mxu1 %vm5317_vm8, %v11834_v39  ;;  %v5193_v35 = vmax.f32 %v11694_v23, %v5177_v30 }
0x1053   : > { %7804 = vmatmul.mubr.msk.bf16.vlgmr.msra.gmra.mrb[60].mxu1 %vm5317_vm8, %v11838_v4  ;;  %v5207_v21 = vpop.permute.xlu0 %5206 }
0x1054   : > { %7812 = vmatpush3.bf16.msra.mxu1 %v11674_v34  ;;  %v5224_v61 = vmax.f32 %v5192_v53, %v5207_v21 }
0x1055   : > { %v5209_v6 = vpop.permute.xlu1 %5208 }
0x1056   : > { %v5225_v48 = vmax.f32 %v5193_v35, %v5209_v6 }
0x1057   : > { %v5171_v8 = vpop.permute.xlu0 %5170 }
0x1058   : > { %v5190_v18 = vmax.f32 %v11702_v59, %v5171_v8 }
0x1059   : > { %v5173_v11 = vpop.permute.xlu1 %5172 }
0x105a   : > { %v5191_v45 = vmax.f32 %v11706_v47, %v5173_v11 }
0x105b   : > { %v5203_v29 = vpop.permute.xlu0 %5202 }
0x105c   : > { %v5222_v46 = vmax.f32 %v5190_v18, %v5203_v29 }
0x105d   : > { %v5205_v31 = vpop.permute.xlu1 %5204 }
0x105e   : > { %v5223_v60 = vmax.f32 %v5191_v45, %v5205_v31 }
0x105f   : > { %v5235_v32 = vpop.permute.xlu0 %5234 }
0x1060   : > { %v5254_v5 = vmax.f32 %v5222_v46, %v5235_v32 }
0x1061   : > { %v5237_v36 = vpop.permute.xlu1 %5236 }
0x1062   : > { %v5255_v7 = vmax.f32 %v5223_v60, %v5237_v36 }
0x1063   : > { %v5239_v34 = vpop.permute.xlu0 %5238 }
0x1064   : > { %v5310_v49 = vpack.c.bf16 %v5255_v7, %v5254_v5  ;;  %v5256_v57 = vmax.f32 %v5224_v61, %v5239_v34 }
0x1065   : > { %v5241_v51 = vpop.permute.xlu1 %5240 }
0x1066   : > { %v5257_v16 = vmax.f32 %v5225_v48, %v5241_v51  ;;  %7807 = vmatprep.mubr.msk.bf16.mxu1 %vm5317_vm8, %v5310_v49 }
0x1068   : > { %v5311_v59 = vpack.c.bf16 %v5257_v16, %v5256_v57 }
0x106a   : > { %7808 = vmatmul.mubr.msk.bf16.gmra.mrb[64].mxu1 %vm5317_vm8, %v5311_v59 }
0x1126   : > { %v11851_v47 = vpop.f32.mrb[60].mxu1 }
0x1127   : > { %v11853_v55 = vpop.f32.mrb[61].mxu1 }
0x1128   : > { %v11855_v10 = vpop.f32.mrb[62].mxu1 }
0x1129   : > { %v11859_v23 = vpack.c.bf16 %v11855_v10, %v11851_v47  ;;  %v11861_v58 = vpop.f32.mrb[63].mxu1 }
0x112a   : > { %v11865_v63 = vpack.c.bf16 %v11861_v58, %v11853_v55 }
0x112c   : > { %7813 = vmatprep.mubr.msk.bf16.mxu1 %vm5317_vm8, %v11865_v63 }
0x112d   : > { %7814 = vmatmul.mubr.msk.bf16.vlgmr.msra.gmra.mrb[68].mxu1 %vm5317_vm8, %v11859_v23 }
0x113d   : > { %v11871_v0 = vpop.f32.mrb[64].mxu1 }
0x113e   : > { %v11873_v22 = vpop.f32.mrb[65].mxu1 }
0x113f   : > { %v11875_v3 = vpop.f32.mrb[66].mxu1 }
0x1140   : > { %v11879_v12 = vpack.c.bf16 %v11875_v3, %v11871_v0  ;;  %v11881_v13 = vpop.f32.mrb[67].mxu1 }
0x1141   : > { %v11885_v26 = vpack.c.bf16 %v11881_v13, %v11873_v22 }
0x1143   : > { %7817 = vmatprep.mubr.msk.bf16.mxu1 %vm5317_vm8, %v11885_v26 }
0x1144   : > { %7818 = vmatmul.mubr.msk.bf16.gmra.mrb[72].mxu1 %vm5317_vm8, %v11879_v12 }
0x1200   : > { %v7815_v27 = vpop.f32.mrb[68].mxu1 }
0x1201   : > { %v5482_v28 = vmul.f32 2.0, %v7815_v27  ;;  %v5449_v37 = vpop.f32.mrb[69].mxu1  ;;  %v8673_v27 = vld [vmem:[#allocation13 + $0x14] ss:$8 sps:$4 sm:$0xff]  }
0x1202   : > { %v5480_v56 = vmul.f32 2.0, %v5449_v37  ;;  %v7816_v62 = vpop.f32.mrb[70].mxu1  ;;  %v8682_v37 = vld [vmem:[#allocation13 + $0x44] ss:$8 sps:$4 sm:$0xff]  }
0x1203   : > { %v5483_v40 = vmul.f32 2.0, %v7816_v62  ;;  %v5452_v14 = vpop.f32.mrb[71].mxu1  ;;  %v5490_v2 = vsub.f32 %v5482_v28, %v11830_v25  ;;  %v8676_v28 = vld [vmem:[#allocation13 + $0x24] ss:$8 sps:$4 sm:$0xff]  }
0x1204   : > { %v5481_v1 = vmul.f32 2.0, %v5452_v14  ;;  %v5488_v52 = vsub.f32 %v5480_v56, %v11826_v41  ;;  %v8685_v56 = vld [vmem:[#allocation13 + $0x54] ss:$8 sps:$4 sm:$0xff]   ;;  %v8688_v62 = vld [vmem:[#allocation13 + $0x64] ss:$8 sps:$4 sm:$0xff]  }
0x1205   : > { %v5491_v33 = vsub.f32 %v5483_v40, %v11824_v44  ;;  %v8690_v40 = vld [vmem:[#allocation13 + $0x60] ss:$8 sps:$4 sm:$0xff]   ;;  %v8691_v14 = vld [vmem:[#allocation13 + $0x74] ss:$8 sps:$4 sm:$0xff]  }
0x1206   : > { %v5489_v54 = vsub.f32 %v5481_v1, %v11828_v24  ;;  %v8693_v1 = vld [vmem:[#allocation13 + $0x70] ss:$8 sps:$4 sm:$0xff]  }
0x1207   : > { %v5497_v15 = vpack.c.bf16 %v5491_v33, %v5490_v2  ;;  %v5777_v2 = vpop.permute.xlu0 %5776  ;;  %v5782_v33 = vpop.permute.xlu1 %5781 }
0x1208   : > { %v5496_v17 = vpack.c.bf16 %v5489_v54, %v5488_v52 }
0x120a   : > { %7823 = vmatprep.mubr.msk.bf16.mxu0 %vm5317_vm8, %v5496_v17  ;;  %7630 = vmatprep.subr.bf16.mxu1 %v5496_v17 }
0x120b   : > { %7824 = vmatmul.mubr.msk.bf16.vlgmr.msra.gmra.mrb[28].mxu0 %vm5317_vm8, %v5497_v15  ;;  %7631 = vmatpush3.bf16.msra.mxu1 %v11834_v39  ;;  %v8672_v39 = vld [vmem:[#allocation13 + $0x4] ss:$8 sps:$4 sm:$0xff]  }
0x120c   : > { %7632 = vmatprep.subr.bf16.mxu1 %v5497_v15  ;;  %5709 = vmatprep.mubr.bf16.mxu1 %v8672_v39 }
0x120f   : > { %7633 = vmatpush3.bf16.msra.mxu1 %v11838_v4 }
0x1217   : > { %v7819_v19 = vpop.f32.mrb[72].mxu1 }
0x1218   : > { %v5486_v42 = vmul.f32 2.0, %v7819_v19  ;;  %v5465_v9 = vpop.f32.mrb[73].mxu1  ;;  %v5873_v19 = vpop.permute.xlu0 %5872 }
0x1219   : > { %v5484_v43 = vmul.f32 2.0, %v5465_v9  ;;  %v7820_v38 = vpop.f32.mrb[74].mxu1 }
0x121a   : > { %v5487_v44 = vmul.f32 2.0, %v7820_v38  ;;  %v5468_v20 = vpop.f32.mrb[75].mxu1  ;;  %v5494_v24 = vsub.f32 %v5486_v42, %v5256_v57  ;;  %v5878_v38 = vpop.permute.xlu1 %5877 }
0x121b   : > { %v5485_v41 = vmul.f32 2.0, %v5468_v20  ;;  %v5492_v50 = vsub.f32 %v5484_v43, %v5254_v5 }
0x121c   : > { %v5495_v25 = vsub.f32 %v5487_v44, %v5257_v16 }
0x121d   : > { %v5493_v30 = vsub.f32 %v5485_v41, %v5255_v7 }
0x121e   : > { %v5499_v21 = vpack.c.bf16 %v5495_v25, %v5494_v24 }
0x121f   : > { %v5498_v6 = vpack.c.bf16 %v5493_v30, %v5492_v50  ;;  %v5787_v50 = vpop.permute.xlu0 %5786 }
0x1221   : > { %7827 = vmatprep.mubr.msk.bf16.mxu0 %vm5317_vm8, %v5498_v6  ;;  %7634 = vmatprep.subr.bf16.mxu1 %v5498_v6 }
0x1222   : > { %7828 = vmatmul.mubr.msk.bf16.gmra.mrb[32].mxu0 %vm5317_vm8, %v5499_v21  ;;  %7635 = vmatpush3.bf16.msra.mxu1 %v5310_v49 }
0x1223   : > { %7636 = vmatprep.subr.bf16.mxu1 %v5499_v21 }
0x1226   : > { %7637 = vmatpush3.bf16.msra.mxu1 %v5311_v59 }
0x12de   : > { %v7825_v4 = vpop.f32.mrb[28].mxu0 }
0x12df   : > { %v5579_v8 = vmul.f32 2.0, %v7825_v4  ;;  %v5546_v11 = vpop.f32.mrb[29].mxu0  ;;  %v5792_v4 = vpop.permute.xlu1 %5791 }
0x12e0   : > { %v5577_v29 = vmul.f32 2.0, %v5546_v11  ;;  %v7826_v31 = vpop.f32.mrb[30].mxu0 }
0x12e1   : > { %v5587_v18 = vsub.f32 %v5579_v8, %v11851_v47  ;;  %v5580_v45 = vmul.f32 2.0, %v7826_v31  ;;  %v5549_v32 = vpop.f32.mrb[31].mxu0 }
0x12e2   : > { %v5585_v46 = vsub.f32 %v5577_v29, %v11853_v55  ;;  %v5578_v60 = vmul.f32 2.0, %v5549_v32 }
0x12e3   : > { %v5588_v36 = vsub.f32 %v5580_v45, %v11855_v10 }
0x12e4   : > { %v5586_v53 = vsub.f32 %v5578_v60, %v11861_v58 }
0x12e5   : > { %v5594_v35 = vpack.c.bf16 %v5588_v36, %v5587_v18  ;;  %v5883_v18 = vpop.permute.xlu0 %5882 }
0x12e6   : > { %v5593_v5 = vpack.c.bf16 %v5586_v53, %v5585_v46  ;;  %v5888_v46 = vpop.permute.xlu1 %5887 }
0x12e8   : > { %7638 = vmatprep.subr.bf16.mxu1 %v5593_v5 }
0x12e9   : > { %7639 = vmatpush3.bf16.msra.mxu1 %v11865_v63 }
0x12ea   : > { %7640 = vmatprep.subr.bf16.mxu1 %v5594_v35 }
0x12ed   : > { %7641 = vmatpush3.bf16.msra.mxu1 %v11859_v23  ;;  %v8670_v23 = vld [vmem:[#allocation13] ss:$8 sps:$4 sm:$0xff]  }
0x12f5   : > { %v7829_v7 = vpop.f32.mrb[32].mxu0 }
0x12f6   : > { %v5583_v34 = vmul.f32 2.0, %v7829_v7  ;;  %v5562_v61 = vpop.f32.mrb[33].mxu0 }
0x12f7   : > { %v5581_v48 = vmul.f32 2.0, %v5562_v61  ;;  %v7830_v49 = vpop.f32.mrb[34].mxu0  ;;  %v5797_v61 = vpop.permute.xlu0 %5796 }
0x12f8   : > { %v5591_v51 = vsub.f32 %v5583_v34, %v11871_v0  ;;  %v5584_v57 = vmul.f32 2.0, %v7830_v49  ;;  %v5565_v16 = vpop.f32.mrb[35].mxu0  ;;  %v8675_v0 = vld [vmem:[#allocation13 + $0x10] ss:$8 sps:$4 sm:$0xff]   ;;  %v5802_v49 = vpop.permute.xlu1 %5801 }
0x12f9   : > { %v5589_v59 = vsub.f32 %v5581_v48, %v11873_v22  ;;  %v5582_v47 = vmul.f32 2.0, %v5565_v16  ;;  %v8678_v22 = vld [vmem:[#allocation13 + $0x20] ss:$8 sps:$4 sm:$0xff]  }
0x12fa   : > { %v5592_v55 = vsub.f32 %v5584_v57, %v11875_v3  ;;  %v8679_v3 = vld [vmem:[#allocation13 + $0x34] ss:$8 sps:$4 sm:$0xff]  }
0x12fb   : > { %v5590_v10 = vsub.f32 %v5582_v47, %v11881_v13  ;;  %v8681_v13 = vld [vmem:[#allocation13 + $0x30] ss:$8 sps:$4 sm:$0xff]  }
0x12fc   : > { %v5596_v58 = vpack.c.bf16 %v5592_v55, %v5591_v51 }
0x12fd   : > { %v5595_v63 = vpack.c.bf16 %v5590_v10, %v5589_v59  ;;  %v5893_v10 = vpop.permute.xlu0 %5892 }
0x12ff   : > { %7642 = vmatprep.subr.bf16.mxu1 %v5595_v63 }
0x1300   : > { %7643 = vmatpush3.bf16.msra.mxu1 %v11885_v26  ;;  %v8684_v26 = vld [vmem:[#allocation13 + $0x40] ss:$8 sps:$4 sm:$0xff]  }
0x1301   : > { %7644 = vmatprep.subr.bf16.mxu1 %v5596_v58 }
0x1304   : > { %7645 = vmatpush3.bf16.msra.mxu1 %v11879_v12  ;;  %v8687_v12 = vld [vmem:[#allocation13 + $0x50] ss:$8 sps:$4 sm:$0xff]  }
0x1307   : > { %5710 = vmatmul.mubr.bf16.vlgmr.msra.gmra.mrb[76].mxu1 %v8670_v23 }
0x1308   : > { %5717 = vmatprep.mubr.bf16.mxu1 %v8673_v27  ;;  %v5898_v27 = vpop.permute.xlu1 %5897 }
0x130f   : > { %5718 = vmatmul.mubr.bf16.gmra.mrb[80].mxu1 %v8675_v0 }
0x1310   : > { %5725 = vmatprep.mubr.bf16.mxu1 %v8676_v28 }
0x1317   : > { %5726 = vmatmul.mubr.bf16.gmra.mrb[84].mxu1 %v8678_v22 }
0x1318   : > { %5733 = vmatprep.mubr.bf16.mxu1 %v8679_v3  ;;  %v5807_v3 = vpop.permute.xlu0 %5806 }
0x131f   : > { %5734 = vmatmul.mubr.bf16.gmra.mrb[88].mxu1 %v8681_v13 }
0x1320   : > { %5741 = vmatprep.mubr.bf16.mxu1 %v8682_v37 }
0x1327   : > { %5742 = vmatmul.mubr.bf16.gmra.mrb[92].mxu1 %v8684_v26 }
0x1328   : > { %5749 = vmatprep.mubr.bf16.mxu1 %v8685_v56 }
0x132f   : > { %5750 = vmatmul.mubr.bf16.gmra.mrb[96].mxu1 %v8687_v12  ;;  %v5812_v12 = vpop.permute.xlu1 %5811 }
0x1330   : > { %5757 = vmatprep.mubr.bf16.mxu1 %v8688_v62 }
0x1337   : > { %5758 = vmatmul.mubr.bf16.gmra.mrb[100].mxu1 %v8690_v40 }
0x1338   : > { %5765 = vmatprep.mubr.bf16.mxu1 %v8691_v14 }
0x133f   : > { %5766 = vmatmul.mubr.bf16.gmra.mrb[104].mxu1 %v8693_v1 }
0x13da   : > { %v7646_v52 = vpop.f32.mrb[76].mxu1 }
0x13db   : > { %v7647_v54 = vpop.f32.mrb[77].mxu1 }
0x13dc   : > { %v7648_v15 = vadd.f32 %v7647_v54, %v7646_v52  ;;  %v7649_v17 = vpop.f32.mrb[78].mxu1  ;;  %v5908_v54 = vpop.permute.xlu1 %5907 }
0x13dd   : > { %v7650_v42 = vpop.f32.mrb[79].mxu1 }
0x13de   : > { %v5854_v9 = vmul.f32 %v7648_v15, %v5777_v2  ;;  %v7651_v43 = vadd.f32 %v7650_v42, %v7649_v17  ;;  %v5903_v2 = vpop.permute.xlu0 %5902 }
0x13e0   : > { %v5950_v44 = vadd.f32 %v5873_v19, %v5854_v9  ;;  %v5855_v20 = vmul.f32 %v7651_v43, %v5782_v33 }
0x13e2   : > { %v11913_v41 = vmax.f32 %v5950_v44, 0.0  ;;  %v5951_v24 = vadd.f32 %v5878_v38, %v5855_v20  ;;  %v7652_v25 = vpop.f32.mrb[80].mxu1  ;;  %v5817_v44 = vpop.permute.xlu0 %5816 }
0x13e3   : > { %v7653_v30 = vpop.f32.mrb[81].mxu1 }
0x13e4   : > { %v11915_v21 = vmax.f32 %v5951_v24, 0.0  ;;  %v7654_v6 = vadd.f32 %v7653_v30, %v7652_v25  ;;  %v7655_v39 = vpop.f32.mrb[82].mxu1  ;;  %5998 = vrot.lane.b32.xlu0 %v11913_v41, %s9401_s3  ;;  %v5822_v24 = vpop.permute.xlu1 %5821 }
0x13e5   : > { %v7656_v8 = vpop.f32.mrb[83].mxu1 }
0x13e6   : > { %v5856_v11 = vmul.f32 %v7654_v6, %v5787_v50  ;;  %v7657_v29 = vadd.f32 %v7656_v8, %v7655_v39  ;;  %6000 = vrot.lane.b32.xlu1 %v11915_v21, %s9401_s3  ;;  %v5913_v8 = vpop.permute.xlu0 %5912 }
0x13e8   : > { %v5857_v31 = vmul.f32 %v7657_v29, %v5792_v4  ;;  %6062 = vrot.lane.b32.xlu0 %v11913_v41, %s9402_s7  ;;  %v5952_v45 = vadd.f32 %v5883_v18, %v5856_v11  ;;  %v5918_v18 = vpop.permute.xlu1 %5917 }
0x13ea   : > { %v7658_v32 = vpop.f32.mrb[84].mxu1  ;;  %6064 = vrot.lane.b32.xlu1 %v11915_v21, %s9402_s7  ;;  %v5953_v36 = vadd.f32 %v5888_v46, %v5857_v31  ;;  %v11927_v7 = vmax.f32 %v5952_v45, 0.0 }
0x13eb   : > { %v7659_v60 = vpop.f32.mrb[85].mxu1 }
0x13ec   : > { %v7660_v53 = vadd.f32 %v7659_v60, %v7658_v32  ;;  %v7661_v35 = vpop.f32.mrb[86].mxu1  ;;  %6126 = vrot.lane.b32.xlu0 %v11913_v41, %s9403_s13  ;;  %v11931_v48 = vmax.f32 %v5953_v36, 0.0  ;;  %v5827_v60 = vpop.permute.xlu0 %5826 }
0x13ed   : > { %v7662_v5 = vpop.f32.mrb[87].mxu1 }
0x13ee   : > { %v7663_v34 = vadd.f32 %v7662_v5, %v7661_v35  ;;  %6128 = vrot.lane.b32.xlu1 %v11915_v21, %s9403_s13  ;;  %v5858_v51 = vmul.f32 %v7660_v53, %v5797_v61 }
0x13f0   : > { %6002 = vrot.lane.b32.xlu0 %v11927_v7, %s9401_s3  ;;  %v5859_v59 = vmul.f32 %v7663_v34, %v5802_v49  ;;  %v5954_v63 = vadd.f32 %v5893_v10, %v5858_v51  ;;  %v5832_v34 = vpop.permute.xlu1 %5831 }
0x13f2   : > { %v7664_v57 = vpop.f32.mrb[88].mxu1  ;;  %6004 = vrot.lane.b32.xlu1 %v11931_v48, %s9401_s3  ;;  %v5955_v0 = vadd.f32 %v5898_v27, %v5859_v59  ;;  %v11943_v28 = vmax.f32 %v5954_v63, 0.0 }
0x13f3   : > { %v7665_v16 = vpop.f32.mrb[89].mxu1 }
0x13f4   : > { %v7666_v47 = vadd.f32 %v7665_v16, %v7664_v57  ;;  %v7667_v55 = vpop.f32.mrb[90].mxu1  ;;  %6066 = vrot.lane.b32.xlu0 %v11927_v7, %s9402_s7  ;;  %v11947_v37 = vmax.f32 %v5955_v0, 0.0  ;;  %v5923_v16 = vpop.permute.xlu0 %5922 }
0x13f5   : > { %v7668_v58 = vpop.f32.mrb[91].mxu1 }
0x13f6   : > { %v7669_v23 = vadd.f32 %v7668_v58, %v7667_v55  ;;  %6068 = vrot.lane.b32.xlu1 %v11931_v48, %s9402_s7  ;;  %v5860_v40 = vmul.f32 %v7666_v47, %v5807_v3  ;;  %v5928_v47 = vpop.permute.xlu1 %5927 }
0x13f8   : > { %6130 = vrot.lane.b32.xlu0 %v11927_v7, %s9403_s13  ;;  %v5861_v1 = vmul.f32 %v7669_v23, %v5812_v12  ;;  %v5956_v33 = vadd.f32 %v5903_v2, %v5860_v40  ;;  %v5837_v58 = vpop.permute.xlu0 %5836 }
0x13fa   : > { %v7670_v22 = vpop.f32.mrb[92].mxu1  ;;  %6132 = vrot.lane.b32.xlu1 %v11931_v48, %s9403_s13  ;;  %v5957_v17 = vadd.f32 %v5908_v54, %v5861_v1  ;;  %v11959_v43 = vmax.f32 %v5956_v33, 0.0  ;;  %v5842_v23 = vpop.permute.xlu1 %5841 }
0x13fb   : > { %v7671_v13 = vpop.f32.mrb[93].mxu1 }
0x13fc   : > { %v7672_v26 = vadd.f32 %v7671_v13, %v7670_v22  ;;  %v7673_v56 = vpop.f32.mrb[94].mxu1  ;;  %6006 = vrot.lane.b32.xlu0 %v11943_v28, %s9401_s3  ;;  %v11963_v20 = vmax.f32 %v5957_v17, 0.0  ;;  %v5933_v22 = vpop.permute.xlu0 %5932 }
0x13fd   : > { %v7674_v62 = vpop.f32.mrb[95].mxu1 }
0x13fe   : > { %v7675_v14 = vadd.f32 %v7674_v62, %v7673_v56  ;;  %6008 = vrot.lane.b32.xlu1 %v11947_v37, %s9401_s3  ;;  %v5862_v25 = vmul.f32 %v7672_v26, %v5817_v44  ;;  %v5938_v13 = vpop.permute.xlu1 %5937 }
0x1400   : > { %6070 = vrot.lane.b32.xlu0 %v11943_v28, %s9402_s7  ;;  %v5863_v6 = vmul.f32 %v7675_v14, %v5822_v24  ;;  %v5958_v29 = vadd.f32 %v5913_v8, %v5862_v25  ;;  %v5847_v12 = vpop.permute.xlu0 %5846 }
0x1402   : > { %v7676_v52 = vpop.f32.mrb[96].mxu1  ;;  %6072 = vrot.lane.b32.xlu1 %v11947_v37, %s9402_s7  ;;  %v5959_v45 = vadd.f32 %v5918_v18, %v5863_v6  ;;  %v11975_v32 = vmax.f32 %v5958_v29, 0.0  ;;  %v5852_v40 = vpop.permute.xlu1 %5851 }
0x1403   : > { %v7677_v15 = vpop.f32.mrb[97].mxu1 }
0x1404   : > { %v7678_v19 = vadd.f32 %v7677_v15, %v7676_v52  ;;  %v7679_v42 = vpop.f32.mrb[98].mxu1  ;;  %6134 = vrot.lane.b32.xlu0 %v11943_v28, %s9403_s13  ;;  %v11979_v53 = vmax.f32 %v5959_v45, 0.0  ;;  %v5943_v2 = vpop.permute.xlu0 %5942 }
0x1405   : > { %v7680_v9 = vpop.f32.mrb[99].mxu1 }
0x1406   : > { %v7681_v38 = vadd.f32 %v7680_v9, %v7679_v42  ;;  %6136 = vrot.lane.b32.xlu1 %v11947_v37, %s9403_s13  ;;  %v5864_v49 = vmul.f32 %v7678_v19, %v5827_v60  ;;  %v5948_v52 = vpop.permute.xlu1 %5947 }
0x1408   : > { %6010 = vrot.lane.b32.xlu0 %v11959_v43, %s9401_s3  ;;  %v5865_v57 = vmul.f32 %v7681_v38, %v5832_v34  ;;  %v5960_v59 = vadd.f32 %v5923_v16, %v5864_v49 }
0x140a   : > { %v7682_v50 = vpop.f32.mrb[100].mxu1  ;;  %6012 = vrot.lane.b32.xlu1 %v11963_v20, %s9401_s3  ;;  %v5961_v55 = vadd.f32 %v5928_v47, %v5865_v57  ;;  %v11991_v10 = vmax.f32 %v5960_v59, 0.0  ;;  %v6296_v57 = vld [vmem:[%s939_s1] sm:$0x3] }
0x140b   : > { %v7683_v30 = vpop.f32.mrb[101].mxu1  ;;  %v6297_v59 = vpack.c.bf16 %v6296_v57, %v6296_v57 }
0x140c   : > { %v7684_v39 = vadd.f32 %v7683_v30, %v7682_v50  ;;  %v7685_v4 = vpop.f32.mrb[102].mxu1  ;;  %6074 = vrot.lane.b32.xlu0 %v11959_v43, %s9402_s7  ;;  %v11995_v63 = vmax.f32 %v5961_v55, 0.0 }
0x140d   : > { %v7686_v11 = vpop.f32.mrb[103].mxu1  ;;  %8028 = vmatprep.subr.msk.bf16.mxu0 %vm3915_vm0, %v6297_v59 }
0x140e   : > { %v7687_v31 = vadd.f32 %v7686_v11, %v7685_v4  ;;  %6076 = vrot.lane.b32.xlu1 %v11963_v20, %s9402_s7  ;;  %v5866_v27 = vmul.f32 %v7684_v39, %v5837_v58 }
0x1410   : > { %6138 = vrot.lane.b32.xlu0 %v11959_v43, %s9403_s13  ;;  %v5867_v0 = vmul.f32 %v7687_v31, %v5842_v23  ;;  %v5962_v3 = vadd.f32 %v5933_v22, %v5866_v27  ;;  %v6364_v23 = vsel %vm3915_vm0, %v6297_v59, 0 }
0x1411   : > { %7832 = vmatpush3.bf16.msra.mxu0 %v6364_v23 }
0x1412   : > { %v7688_v46 = vpop.f32.mrb[104].mxu1  ;;  %6140 = vrot.lane.b32.xlu1 %v11963_v20, %s9403_s13  ;;  %v5963_v26 = vadd.f32 %v5938_v13, %v5867_v0  ;;  %v12007_v56 = vmax.f32 %v5962_v3, 0.0  ;;  %v8694_v0 = vld [vmem:[%s13109_s12] sm:$0xff]  }
0x1413   : > { %v7689_v36 = vpop.f32.mrb[105].mxu1  ;;  %7833 = vmatprep.mubr.msk.bf16.mxu0 %vm6338_vm10, %v8694_v0 }
0x1414   : > { %v7690_v35 = vadd.f32 %v7689_v36, %v7688_v46  ;;  %v7691_v5 = vpop.f32.mrb[106].mxu1  ;;  %6014 = vrot.lane.b32.xlu0 %v11975_v32, %s9401_s3  ;;  %v12011_v62 = vmax.f32 %v5963_v26, 0.0 }
0x1415   : > { %v7692_v61 = vpop.f32.mrb[107].mxu1 }
0x1416   : > { %v7693_v51 = vadd.f32 %v7692_v61, %v7691_v5  ;;  %6016 = vrot.lane.b32.xlu1 %v11979_v53, %s9401_s3  ;;  %v5868_v14 = vmul.f32 %v7690_v35, %v5847_v12 }
0x1418   : > { %6078 = vrot.lane.b32.xlu0 %v11975_v32, %s9402_s7  ;;  %v5869_v1 = vmul.f32 %v7693_v51, %v5852_v40  ;;  %v5964_v33 = vadd.f32 %v5943_v2, %v5868_v14 }
0x141a   : > { %6080 = vrot.lane.b32.xlu1 %v11979_v53, %s9402_s7  ;;  %v5965_v54 = vadd.f32 %v5948_v52, %v5869_v1  ;;  %v12023_v15 = vmax.f32 %v5964_v33, 0.0 }
0x141c   : > { %6142 = vrot.lane.b32.xlu0 %v11975_v32, %s9403_s13  ;;  %v12027_v17 = vmax.f32 %v5965_v54, 0.0 }
0x141e   : > { %6144 = vrot.lane.b32.xlu1 %v11979_v53, %s9403_s13 }
0x1420   : > { %6018 = vrot.lane.b32.xlu0 %v11991_v10, %s9401_s3 }
0x1422   : > { %6020 = vrot.lane.b32.xlu1 %v11995_v63, %s9401_s3 }
0x1424   : > { %6082 = vrot.lane.b32.xlu0 %v11991_v10, %s9402_s7 }
0x1426   : > { %6084 = vrot.lane.b32.xlu1 %v11995_v63, %s9402_s7 }
0x1428   : > { %6146 = vrot.lane.b32.xlu0 %v11991_v10, %s9403_s13 }
0x142a   : > { %6148 = vrot.lane.b32.xlu1 %v11995_v63, %s9403_s13 }
0x142c   : > { %6022 = vrot.lane.b32.xlu0 %v12007_v56, %s9401_s3 }
0x142e   : > { %6024 = vrot.lane.b32.xlu1 %v12011_v62, %s9401_s3 }
0x1430   : > { %6086 = vrot.lane.b32.xlu0 %v12007_v56, %s9402_s7 }
0x1432   : > { %6088 = vrot.lane.b32.xlu1 %v12011_v62, %s9402_s7 }
0x1434   : > { %6150 = vrot.lane.b32.xlu0 %v12007_v56, %s9403_s13 }
0x1436   : > { %6152 = vrot.lane.b32.xlu1 %v12011_v62, %s9403_s13 }
0x1438   : > { %6026 = vrot.lane.b32.xlu0 %v12023_v15, %s9401_s3 }
0x143a   : > { %6028 = vrot.lane.b32.xlu1 %v12027_v17, %s9401_s3  ;;  %s7587_s3 = sshll.u32 %s13119_s26, 6 }
0x143c   : > { %6090 = vrot.lane.b32.xlu0 %v12023_v15, %s9402_s7 }
0x143e   : > { %6092 = vrot.lane.b32.xlu1 %v12027_v17, %s9402_s7 }
0x1440   : > { %6154 = vrot.lane.b32.xlu0 %v12023_v15, %s9403_s13 }
0x1442   : > { %6156 = vrot.lane.b32.xlu1 %v12027_v17, %s9403_s13  ;;  %s13111_s13 = sld [smem:[#allocation283_spill]] }
0x1456   : > { %v5999_v19 = vpop.permute.xlu0 %5998 }
0x1457   : > { %v6046_v38 = vmax.f32 %v11913_v41, %v5999_v19 }
0x1458   : > { %v6001_v42 = vpop.permute.xlu1 %6000 }
0x1459   : > { %v6047_v24 = vmax.f32 %v11915_v21, %v6001_v42 }
0x145a   : > { %v6063_v9 = vpop.permute.xlu0 %6062 }
0x145b   : > { %v6110_v25 = vmax.f32 %v6046_v38, %v6063_v9 }
0x145c   : > { %v6065_v44 = vpop.permute.xlu1 %6064 }
0x145d   : > { %v6111_v30 = vmax.f32 %v6047_v24, %v6065_v44 }
0x145e   : > { %v6127_v50 = vpop.permute.xlu0 %6126 }
0x145f   : > { %v6174_v6 = vmax.f32 %v6110_v25, %v6127_v50 }
0x1460   : > { %v6129_v39 = vpop.permute.xlu1 %6128 }
0x1461   : > { %v6175_v4 = vmax.f32 %v6111_v30, %v6129_v39  ;;  %v6191_v8 = vsel %vm6190_vm9, %v6174_v6, 0.0 }
0x1462   : > { %6192 = vadd.xlane.f32.xlu0 %v6191_v8  ;;  %v6003_v11 = vpop.permute.xlu0 %6002 }
0x1463   : > { %v6194_v31 = vsel %vm6190_vm9, %v6175_v4, 0.0  ;;  %v6048_v21 = vmax.f32 %v11927_v7, %v6003_v11 }
0x1464   : > { %v6005_v29 = vpop.permute.xlu1 %6004 }
0x1465   : > { %v6049_v45 = vmax.f32 %v11931_v48, %v6005_v29 }
0x1466   : > { %v6067_v41 = vpop.permute.xlu0 %6066  ;;  %6195 = vadd.xlane.f32.xlu1 %v6194_v31 }
0x1467   : > { %v6112_v46 = vmax.f32 %v6048_v21, %v6067_v41 }
0x1468   : > { %v6069_v18 = vpop.permute.xlu1 %6068 }
0x1469   : > { %v6113_v36 = vmax.f32 %v6049_v45, %v6069_v18 }
0x146a   : > { %v6131_v60 = vpop.permute.xlu0 %6130 }
0x146b   : > { %v6176_v35 = vmax.f32 %v6112_v46, %v6131_v60 }
0x146c   : > { %v6133_v5 = vpop.permute.xlu1 %6132 }
0x146d   : > { %v6177_v34 = vmax.f32 %v6113_v36, %v6133_v5  ;;  %v6197_v61 = vsel %vm6190_vm9, %v6176_v35, 0.0 }
0x146e   : > { %6198 = vadd.xlane.f32.xlu0 %v6197_v61  ;;  %v6007_v49 = vpop.permute.xlu0 %6006 }
0x146f   : > { %v6200_v7 = vsel %vm6190_vm9, %v6177_v34, 0.0  ;;  %v6050_v16 = vmax.f32 %v11943_v28, %v6007_v49  ;;  %v8695_v28 = vld [vmem:[%s13109_s12 + $0x8] sm:$0xff]  }
0x1470   : > { %v6009_v51 = vpop.permute.xlu1 %6008  ;;  %7834 = vmatmul.mubr.msk.bf16.vlgmr.msra.gmra.mrb[36].mxu0 %vm6338_vm10, %v8695_v28 }
0x1471   : > { %v6051_v55 = vmax.f32 %v11947_v37, %v6009_v51 }
0x1472   : > { %v6071_v48 = vpop.permute.xlu0 %6070  ;;  %6201 = vadd.xlane.f32.xlu0 %v6200_v7 }
0x1473   : > { %v6114_v58 = vmax.f32 %v6050_v16, %v6071_v48 }
0x1474   : > { %v6073_v47 = vpop.permute.xlu1 %6072 }
0x1475   : > { %v6115_v22 = vmax.f32 %v6051_v55, %v6073_v47 }
0x1476   : > { %v6135_v27 = vpop.permute.xlu0 %6134 }
0x1477   : > { %v6178_v3 = vmax.f32 %v6114_v58, %v6135_v27 }
0x1478   : > { %v6137_v13 = vpop.permute.xlu1 %6136 }
0x1479   : > { %v6179_v37 = vmax.f32 %v6115_v22, %v6137_v13  ;;  %v6203_v26 = vsel %vm6190_vm9, %v6178_v3, 0.0 }
0x147a   : > { %v6011_v12 = vpop.permute.xlu0 %6010  ;;  %6204 = vadd.xlane.f32.xlu1 %v6203_v26 }
0x147b   : > { %v6206_v40 = vsel %vm6190_vm9, %v6179_v37, 0.0  ;;  %v6052_v2 = vmax.f32 %v11959_v43, %v6011_v12 }
0x147c   : > { %6207 = vadd.xlane.f32.xlu0 %v6206_v40  ;;  %v6013_v14 = vpop.permute.xlu1 %6012 }
0x147d   : > { %v6053_v52 = vmax.f32 %v11963_v20, %v6013_v14 }
0x147e   : > { %v6075_v1 = vpop.permute.xlu0 %6074 }
0x147f   : > { %v6116_v54 = vmax.f32 %v6052_v2, %v6075_v1 }
0x1480   : > { %v6077_v33 = vpop.permute.xlu1 %6076 }
0x1481   : > { %v6117_v42 = vmax.f32 %v6053_v52, %v6077_v33  ;;  %v8696_v33 = vld [vmem:[%s13109_s12 + $0x10] sm:$0xff]   ;;  %v8697_v52 = vld [vmem:[%s13109_s12 + $0x18] sm:$0xff]  }
0x1482   : > { %v6139_v19 = vpop.permute.xlu0 %6138  ;;  %7837 = vmatprep.mubr.msk.bf16.mxu0 %vm6338_vm10, %v8696_v33 }
0x1483   : > { %v6180_v9 = vmax.f32 %v6116_v54, %v6139_v19  ;;  %7838 = vmatmul.mubr.msk.bf16.gmra.mrb[40].mxu0 %vm6338_vm10, %v8697_v52  ;;  %v6609_v52 = vld [vmem:[%s13110_s5 + $0x8] sm:$0xff] }
0x1484   : > { %v6141_v38 = vpop.permute.xlu1 %6140 }
0x1485   : > { %v6181_v44 = vmax.f32 %v6117_v42, %v6141_v38  ;;  %v6209_v24 = vsel %vm6190_vm9, %v6180_v9, 0.0  ;;  %v8699_v9 = vld [vmem:[%s13109_s12 + $0x28] sm:$0xff]   ;;  %v8700_v38 = vld [vmem:[%s13109_s12 + $0x30] sm:$0xff]  }
0x1486   : > { %v6015_v25 = vpop.permute.xlu0 %6014  ;;  %6210 = vadd.xlane.f32.xlu1 %v6209_v24  ;;  %v8702_v24 = vld [vmem:[#allocation15] sm:$0xff]  }
0x1487   : > { %v6212_v50 = vsel %vm6190_vm9, %v6181_v44, 0.0  ;;  %v6054_v43 = vmax.f32 %v11975_v32, %v6015_v25  ;;  %v8701_v44 = vld [vmem:[%s13109_s12 + $0x38] sm:$0xff]  }
0x1488   : > { %6213 = vadd.xlane.f32.xlu0 %v6212_v50  ;;  %v6017_v30 = vpop.permute.xlu1 %6016 }
0x1489   : > { %v6055_v20 = vmax.f32 %v11979_v53, %v6017_v30 }
0x148a   : > { %v6079_v6 = vpop.permute.xlu0 %6078 }
0x148b   : > { %v6118_v4 = vmax.f32 %v6054_v43, %v6079_v6 }
0x148c   : > { %v6081_v39 = vpop.permute.xlu1 %6080 }
0x148d   : > { %v6119_v11 = vmax.f32 %v6055_v20, %v6081_v39 }
0x148e   : > { %v6143_v8 = vpop.permute.xlu0 %6142 }
0x148f   : > { %v6182_v29 = vmax.f32 %v6118_v4, %v6143_v8 }
0x1490   : > { %v6145_v31 = vpop.permute.xlu1 %6144 }
0x1491   : > { %v6183_v41 = vmax.f32 %v6119_v11, %v6145_v31  ;;  %v6215_v21 = vsel %vm6190_vm9, %v6182_v29, 0.0 }
0x1492   : > { %v6019_v18 = vpop.permute.xlu0 %6018  ;;  %6216 = vadd.xlane.f32.xlu1 %v6215_v21 }
0x1493   : > { %v6218_v45 = vsel %vm6190_vm9, %v6183_v41, 0.0  ;;  %v6056_v32 = vmax.f32 %v11991_v10, %v6019_v18 }
0x1494   : > { %6219 = vadd.xlane.f32.xlu0 %v6218_v45  ;;  %v6021_v46 = vpop.permute.xlu1 %6020 }
0x1495   : > { %v6057_v53 = vmax.f32 %v11995_v63, %v6021_v46 }
0x1496   : > { %v6083_v60 = vpop.permute.xlu0 %6082 }
0x1497   : > { %v6120_v35 = vmax.f32 %v6056_v32, %v6083_v60 }
0x1498   : > { %v6085_v36 = vpop.permute.xlu1 %6084 }
0x1499   : > { %v6121_v34 = vmax.f32 %v6057_v53, %v6085_v36 }
0x149a   : > { %v6147_v5 = vpop.permute.xlu0 %6146 }
0x149b   : > { %v6184_v61 = vmax.f32 %v6120_v35, %v6147_v5 }
0x149c   : > { %v6149_v49 = vpop.permute.xlu1 %6148 }
0x149d   : > { %v6185_v51 = vmax.f32 %v6121_v34, %v6149_v49  ;;  %v6221_v7 = vsel %vm6190_vm9, %v6184_v61, 0.0 }
0x149e   : > { %v6023_v48 = vpop.permute.xlu0 %6022  ;;  %6222 = vadd.xlane.f32.xlu1 %v6221_v7 }
0x149f   : > { %v6224_v57 = vsel %vm6190_vm9, %v6185_v51, 0.0  ;;  %v6058_v10 = vmax.f32 %v12007_v56, %v6023_v48 }
0x14a0   : > { %6225 = vadd.xlane.f32.xlu0 %v6224_v57  ;;  %v6025_v16 = vpop.permute.xlu1 %6024 }
0x14a1   : > { %v6059_v63 = vmax.f32 %v12011_v62, %v6025_v16 }
0x14a2   : > { %v6087_v59 = vpop.permute.xlu0 %6086 }
0x14a3   : > { %v6122_v55 = vmax.f32 %v6058_v10, %v6087_v59 }
0x14a4   : > { %v6089_v47 = vpop.permute.xlu1 %6088 }
0x14a5   : > { %v6123_v23 = vmax.f32 %v6059_v63, %v6089_v47 }
0x14a6   : > { %v6151_v58 = vpop.permute.xlu0 %6150 }
0x14a7   : > { %v6186_v27 = vmax.f32 %v6122_v55, %v6151_v58 }
0x14a8   : > { %v6153_v0 = vpop.permute.xlu1 %6152 }
0x14a9   : > { %v6187_v22 = vmax.f32 %v6123_v23, %v6153_v0  ;;  %v6227_v3 = vsel %vm6190_vm9, %v6186_v27, 0.0 }
0x14aa   : > { %v6027_v13 = vpop.permute.xlu0 %6026  ;;  %6228 = vadd.xlane.f32.xlu1 %v6227_v3  ;;  %v8704_v3 = vld [vmem:[#allocation15 + $0x10] sm:$0xff]  }
0x14ab   : > { %v6230_v28 = vsel %vm6190_vm9, %v6187_v22, 0.0  ;;  %v6060_v56 = vmax.f32 %v12023_v15, %v6027_v13  ;;  %v8703_v22 = vld [vmem:[#allocation15 + $0x8] sm:$0xff]   ;;  %v8705_v13 = vld [vmem:[#allocation15 + $0x18] sm:$0xff]  }
0x14ac   : > { %6231 = vadd.xlane.f32.xlu0 %v6230_v28  ;;  %v6029_v37 = vpop.permute.xlu1 %6028  ;;  %v8706_v28 = vld [vmem:[#allocation15 + $0x20] sm:$0xff]  }
0x14ad   : > { %v6061_v62 = vmax.f32 %v12027_v17, %v6029_v37  ;;  %v8698_v17 = vld [vmem:[%s13109_s12 + $0x20] sm:$0xff]  }
0x14ae   : > { %v6091_v26 = vpop.permute.xlu0 %6090  ;;  %7841 = vmatprep.mubr.msk.bf16.mxu0 %vm6338_vm10, %v8698_v17  ;;  %v8707_v37 = vld [vmem:[#allocation15 + $0x28] sm:$0xff]  }
0x14af   : > { %v6124_v40 = vmax.f32 %v6060_v56, %v6091_v26  ;;  %7842 = vmatmul.mubr.msk.bf16.gmra.mrb[44].mxu0 %vm6338_vm10, %v8699_v9  ;;  %v8708_v26 = vld [vmem:[#allocation15 + $0x30] sm:$0xff]   ;;  %v8709_v56 = vld [vmem:[#allocation15 + $0x38] sm:$0xff]  }
0x14b0   : > { %v6093_v12 = vpop.permute.xlu1 %6092  ;;  %7845 = vmatprep.mubr.msk.bf16.mxu0 %vm6338_vm10, %v8700_v38 }
0x14b1   : > { %v6125_v1 = vmax.f32 %v6061_v62, %v6093_v12  ;;  %v8710_v12 = vld [vmem:[#allocation16] sm:$0xff]   ;;  %v6610_v62 = vld [vmem:[%s13110_s5 + $0x10] sm:$0xff] }
0x14b2   : > { %v6155_v14 = vpop.permute.xlu0 %6154 }
0x14b3   : > { %v6188_v2 = vmax.f32 %v6124_v40, %v6155_v14  ;;  %v6608_v40 = vld [vmem:[%s13110_s5] sm:$0xff] }
0x14b4   : > { %v6157_v54 = vpop.permute.xlu1 %6156 }
0x14b5   : > { %v6189_v19 = vmax.f32 %v6125_v1, %v6157_v54  ;;  %v6233_v42 = vsel %vm6190_vm9, %v6188_v2, 0.0  ;;  %v6611_v1 = vld [vmem:[%s13110_s5 + $0x18] sm:$0xff] }
0x14b6   : > { %6234 = vadd.xlane.f32.xlu1 %v6233_v42 }
0x14b7   : > { %v6236_v15 = vsel %vm6190_vm9, %v6189_v19, 0.0  ;;  %7846 = vmatmul.mubr.msk.bf16.gmra.mrb[48].mxu0 %vm6338_vm10, %v8701_v44 }
0x14b8   : > { %6237 = vadd.xlane.f32.xlu0 %v6236_v15  ;;  %7865 = vmatprep.mubr.bf16.mxu0 %v8702_v24 }
0x14ef   : > { %v6193_v25 = vpop.xlane.xlu0 %6192 }
0x14f0   : > { %v6240_v30 = vmul.f32 0.33333334, %v6193_v25  ;;  %v6614_v25 = vld [vmem:[%s13110_s5 + $0x30] sm:$0xff] }
0x14f3   : > { %v6196_v50 = vpop.xlane.xlu1 %6195 }
0x14f4   : > { %v6241_v6 = vmul.f32 0.33333334, %v6196_v50 }
0x14f6   : > { %v6272_v43 = vpack.c.bf16 %v6241_v6, %v6240_v30  ;;  %v6612_v30 = vld [vmem:[%s13110_s5 + $0x20] sm:$0xff] }
0x14f8   : > { %7849 = vmatprep.subr.bf16.mxu0 %v6272_v43 }
0x14f9   : > { %7850 = vmatpush3.bf16.msra.mxu0 %v6272_v43 }
0x14fb   : > { %v6199_v39 = vpop.xlane.xlu0 %6198 }
0x14fc   : > { %v6242_v4 = vmul.f32 0.33333334, %v6199_v39  ;;  %v6615_v39 = vld [vmem:[%s13110_s5 + $0x38] sm:$0xff] }
0x14ff   : > { %v6202_v20 = vpop.xlane.xlu0 %6201 }
0x1500   : > { %v6243_v8 = vmul.f32 0.33333334, %v6202_v20 }
0x1502   : > { %v6273_v11 = vpack.c.bf16 %v6243_v8, %v6242_v4  ;;  %v6613_v8 = vld [vmem:[%s13110_s5 + $0x28] sm:$0xff] }
0x1504   : > { %7851 = vmatprep.subr.bf16.mxu0 %v6273_v11 }
0x1505   : > { %7852 = vmatpush3.bf16.msra.mxu0 %v6273_v11 }
0x1507   : > { %v6205_v29 = vpop.xlane.xlu1 %6204 }
0x1508   : > { %v6244_v41 = vmul.f32 0.33333334, %v6205_v29 }
0x1509   : > { %v6208_v31 = vpop.xlane.xlu0 %6207 }
0x150a   : > { %v6245_v21 = vmul.f32 0.33333334, %v6208_v31 }
0x150c   : > { %v6274_v18 = vpack.c.bf16 %v6245_v21, %v6244_v41 }
0x150e   : > { %7853 = vmatprep.subr.bf16.mxu0 %v6274_v18 }
0x150f   : > { %7854 = vmatpush3.bf16.msra.mxu0 %v6274_v18 }
0x1513   : > { %v6211_v45 = vpop.xlane.xlu1 %6210 }
0x1514   : > { %v6246_v60 = vmul.f32 0.33333334, %v6211_v45 }
0x1515   : > { %v6214_v46 = vpop.xlane.xlu0 %6213 }
0x1516   : > { %v6247_v32 = vmul.f32 0.33333334, %v6214_v46 }
0x1518   : > { %v6275_v36 = vpack.c.bf16 %v6247_v32, %v6246_v60  ;;  %v6618_v32 = vld [vmem:[%s13110_s5 + $0x50] sm:$0xff] }
0x151a   : > { %7855 = vmatprep.subr.bf16.mxu0 %v6275_v36 }
0x151b   : > { %7856 = vmatpush3.bf16.msra.mxu0 %v6275_v36 }
0x151f   : > { %v6217_v53 = vpop.xlane.xlu1 %6216 }
0x1520   : > { %v6248_v5 = vmul.f32 0.33333334, %v6217_v53  ;;  %v6616_v53 = vld [vmem:[%s13110_s5 + $0x40] sm:$0xff] }
0x1521   : > { %v6220_v35 = vpop.xlane.xlu0 %6219 }
0x1522   : > { %v6249_v34 = vmul.f32 0.33333334, %v6220_v35 }
0x1524   : > { %v6276_v61 = vpack.c.bf16 %v6249_v34, %v6248_v5  ;;  %v6619_v34 = vld [vmem:[%s13110_s5 + $0x58] sm:$0xff] }
0x1526   : > { %7857 = vmatprep.subr.bf16.mxu0 %v6276_v61 }
0x1527   : > { %7858 = vmatpush3.bf16.msra.mxu0 %v6276_v61 }
0x152b   : > { %v6223_v49 = vpop.xlane.xlu1 %6222 }
0x152c   : > { %v6250_v7 = vmul.f32 0.33333334, %v6223_v49 }
0x152d   : > { %v6226_v51 = vpop.xlane.xlu0 %6225 }
0x152e   : > { %v6251_v48 = vmul.f32 0.33333334, %v6226_v51  ;;  %v6617_v51 = vld [vmem:[%s13110_s5 + $0x48] sm:$0xff] }
0x1530   : > { %v6277_v57 = vpack.c.bf16 %v6251_v48, %v6250_v7 }
0x1532   : > { %7859 = vmatprep.subr.bf16.mxu0 %v6277_v57 }
0x1533   : > { %7860 = vmatpush3.bf16.msra.mxu0 %v6277_v57 }
0x1537   : > { %v6229_v16 = vpop.xlane.xlu1 %6228 }
0x1538   : > { %v6252_v10 = vmul.f32 0.33333334, %v6229_v16 }
0x1539   : > { %v6232_v59 = vpop.xlane.xlu0 %6231 }
0x153a   : > { %v6253_v47 = vmul.f32 0.33333334, %v6232_v59 }
0x153c   : > { %v6278_v63 = vpack.c.bf16 %v6253_v47, %v6252_v10 }
0x153e   : > { %7861 = vmatprep.subr.bf16.mxu0 %v6278_v63 }
0x153f   : > { %7862 = vmatpush3.bf16.msra.mxu0 %v6278_v63 }
0x1543   : > { %v6235_v55 = vpop.xlane.xlu1 %6234 }
0x1544   : > { %v6254_v23 = vmul.f32 0.33333334, %v6235_v55 }
0x1545   : > { %v6238_v58 = vpop.xlane.xlu0 %6237 }
0x1546   : > { %v6255_v27 = vmul.f32 0.33333334, %v6238_v58  ;;  %v6622_v58 = vld [vmem:[%s13110_s5 + $0x70] sm:$0xff] }
0x1548   : > { %v6279_v0 = vpack.c.bf16 %v6255_v27, %v6254_v23  ;;  %v6620_v27 = vld [vmem:[%s13110_s5 + $0x60] sm:$0xff] }
0x154a   : > { %7863 = vmatprep.subr.bf16.mxu0 %v6279_v0 }
0x154b   : > { %7864 = vmatpush3.bf16.msra.mxu0 %v6279_v0 }
0x154e   : > { %7866 = vmatmul.mubr.bf16.vlgmr.msra.gmra.mrb[36].mxu0 %v8703_v22 }
0x154f   : > { %7869 = vmatprep.mubr.bf16.mxu0 %v8704_v3  ;;  %v6623_v3 = vld [vmem:[%s13110_s5 + $0x78] sm:$0xff] }
0x1556   : > { %7870 = vmatmul.mubr.bf16.gmra.mrb[40].mxu0 %v8705_v13 }
0x1557   : > { %7873 = vmatprep.mubr.bf16.mxu0 %v8706_v28 }
0x155e   : > { %7874 = vmatmul.mubr.bf16.gmra.mrb[44].mxu0 %v8707_v37  ;;  %v6621_v37 = vld [vmem:[%s13110_s5 + $0x68] sm:$0xff]  ;;  %s13113_s5 = sld [smem:[#allocation285_spill]] }
0x155f   : > { %7877 = vmatprep.mubr.bf16.mxu0 %v8708_v26 }
0x1564   : > { %s12221_s8 = scalar_lea.vmem %s13113_s5, %s7587_s3 }
0x1566   : > { %7878 = vmatmul.mubr.bf16.gmra.mrb[48].mxu0 %v8709_v56 }
0x1567   : > { %7897 = vmatprep.mubr.bf16.mxu0 %v8710_v12 }
0x1621   : > { %v7867_v14 = vpop.f32.mrb[36].mxu0 }
0x1622   : > { %v6626_v2 = vadd.f32 %v7867_v14, %v6610_v62  ;;  %v6545_v33 = vpop.f32.mrb[37].mxu0 }
0x1623   : > { %v6624_v54 = vadd.f32 %v6608_v40, %v6545_v33  ;;  %v7868_v19 = vpop.f32.mrb[38].mxu0 }
0x1624   : > { %v6627_v42 = vadd.f32 %v7868_v19, %v6611_v1  ;;  %v6548_v15 = vpop.f32.mrb[39].mxu0  ;;  %v6642_v9 = vmax.f32 %v6626_v2, 0.0  ;;  %v8711_v19 = vld [vmem:[#allocation16 + $0x8] sm:$0xff]  }
0x1625   : > { %v6625_v17 = vadd.f32 %v6609_v52, %v6548_v15  ;;  %v6640_v44 = vmax.f32 %v6624_v54, 0.0  ;;  %v8713_v15 = vld [vmem:[#allocation16 + $0x18] sm:$0xff]  }
0x1626   : > { %v6643_v38 = vmax.f32 %v6627_v42, 0.0  ;;  %v8712_v42 = vld [vmem:[#allocation16 + $0x10] sm:$0xff]  }
0x1627   : > { %v6641_v24 = vmax.f32 %v6625_v17, 0.0  ;;  %v8714_v17 = vld [vmem:[#allocation16 + $0x20] sm:$0xff]  }
0x1628   : > { %v6673_v50 = vpack.c.bf16 %v6643_v38, %v6642_v9  ;;  %v8715_v9 = vld [vmem:[#allocation16 + $0x28] sm:$0xff]   ;;  %v8716_v38 = vld [vmem:[#allocation16 + $0x30] sm:$0xff]  }
0x1629   : > { %v6672_v6 = vpack.c.bf16 %v6641_v24, %v6640_v44  ;;  %v7871_v43 = vpop.f32.mrb[40].mxu0  ;;  %v8717_v44 = vld [vmem:[#allocation16 + $0x38] sm:$0xff]   ;;  %v8718_v24 = vld [vmem:[#allocation18] sm:$0xff]  }
0x162a   : > { %v6630_v20 = vadd.f32 %v7871_v43, %v6614_v25  ;;  %v6561_v4 = vpop.f32.mrb[41].mxu0  ;;  %7929 = vmatprep.mubr.bf16.mxu1 %v8718_v24  ;;  %v6682_v25 = vld [vmem:[%s13111_s13 + $0x10] sm:$0xff] }
0x162b   : > { %v6628_v11 = vadd.f32 %v6612_v30, %v6561_v4  ;;  %v7872_v29 = vpop.f32.mrb[42].mxu0  ;;  %7881 = vmatprep.subr.bf16.mxu0 %v6672_v6 }
0x162c   : > { %v6631_v31 = vadd.f32 %v7872_v29, %v6615_v39  ;;  %v6564_v41 = vpop.f32.mrb[43].mxu0  ;;  %7882 = vmatpush3.bf16.msra.mxu0 %v6672_v6  ;;  %v6646_v18 = vmax.f32 %v6630_v20, 0.0  ;;  %v6683_v6 = vld [vmem:[%s13111_s13 + $0x18] sm:$0xff]  ;;  %v6681_v20 = vld [vmem:[%s13111_s13 + $0x8] sm:$0xff] }
0x162d   : > { %v6629_v21 = vadd.f32 %v6613_v8, %v6564_v41  ;;  %7883 = vmatprep.subr.bf16.mxu0 %v6673_v50  ;;  %v6644_v46 = vmax.f32 %v6628_v11, 0.0 }
0x162e   : > { %v6647_v45 = vmax.f32 %v6631_v31, 0.0 }
0x162f   : > { %v6645_v60 = vmax.f32 %v6629_v21, 0.0 }
0x1630   : > { %v6675_v36 = vpack.c.bf16 %v6647_v45, %v6646_v18  ;;  %7884 = vmatpush3.bf16.msra.mxu0 %v6673_v50  ;;  %v6680_v50 = vld [vmem:[%s13111_s13] sm:$0xff] }
0x1631   : > { %v6674_v35 = vpack.c.bf16 %v6645_v60, %v6644_v46  ;;  %v7875_v5 = vpop.f32.mrb[44].mxu0  ;;  %v6686_v46 = vld [vmem:[%s13111_s13 + $0x30] sm:$0xff] }
0x1632   : > { %v6634_v61 = vadd.f32 %v7875_v5, %v6618_v32  ;;  %v6577_v49 = vpop.f32.mrb[45].mxu0  ;;  %v6684_v32 = vld [vmem:[%s13111_s13 + $0x20] sm:$0xff] }
0x1633   : > { %v6632_v7 = vadd.f32 %v6616_v53, %v6577_v49  ;;  %v7876_v48 = vpop.f32.mrb[46].mxu0  ;;  %7885 = vmatprep.subr.bf16.mxu0 %v6674_v35 }
0x1634   : > { %v6635_v57 = vadd.f32 %v7876_v48, %v6619_v34  ;;  %v6580_v16 = vpop.f32.mrb[47].mxu0  ;;  %7886 = vmatpush3.bf16.msra.mxu0 %v6674_v35  ;;  %v6650_v10 = vmax.f32 %v6634_v61, 0.0  ;;  %v6687_v35 = vld [vmem:[%s13111_s13 + $0x38] sm:$0xff]  ;;  %v6685_v61 = vld [vmem:[%s13111_s13 + $0x28] sm:$0xff] }
0x1635   : > { %v6633_v59 = vadd.f32 %v6617_v51, %v6580_v16  ;;  %7887 = vmatprep.subr.bf16.mxu0 %v6675_v36  ;;  %v6648_v63 = vmax.f32 %v6632_v7, 0.0 }
0x1636   : > { %v6651_v47 = vmax.f32 %v6635_v57, 0.0 }
0x1637   : > { %v6649_v55 = vmax.f32 %v6633_v59, 0.0 }
0x1638   : > { %v6677_v23 = vpack.c.bf16 %v6651_v47, %v6650_v10  ;;  %7888 = vmatpush3.bf16.msra.mxu0 %v6675_v36 }
0x1639   : > { %v6676_v0 = vpack.c.bf16 %v6649_v55, %v6648_v63  ;;  %v7879_v22 = vpop.f32.mrb[48].mxu0  ;;  %v6690_v63 = vld [vmem:[%s13111_s13 + $0x50] sm:$0xff] }
0x163a   : > { %v6638_v13 = vadd.f32 %v7879_v22, %v6622_v58  ;;  %v6593_v28 = vpop.f32.mrb[49].mxu0  ;;  %v6688_v58 = vld [vmem:[%s13111_s13 + $0x40] sm:$0xff] }
0x163b   : > { %v6636_v26 = vadd.f32 %v6620_v27, %v6593_v28  ;;  %v7880_v56 = vpop.f32.mrb[50].mxu0  ;;  %7889 = vmatprep.subr.bf16.mxu0 %v6676_v0 }
0x163c   : > { %v6639_v12 = vadd.f32 %v7880_v56, %v6623_v3  ;;  %v6596_v62 = vpop.f32.mrb[51].mxu0  ;;  %7890 = vmatpush3.bf16.msra.mxu0 %v6676_v0  ;;  %v6654_v14 = vmax.f32 %v6638_v13, 0.0  ;;  %v6691_v0 = vld [vmem:[%s13111_s13 + $0x58] sm:$0xff]  ;;  %v6689_v13 = vld [vmem:[%s13111_s13 + $0x48] sm:$0xff] }
0x163d   : > { %v6637_v40 = vadd.f32 %v6621_v37, %v6596_v62  ;;  %7891 = vmatprep.subr.bf16.mxu0 %v6677_v23  ;;  %v6652_v2 = vmax.f32 %v6636_v26, 0.0 }
0x163e   : > { %v6655_v1 = vmax.f32 %v6639_v12, 0.0 }
0x163f   : > { %v6653_v33 = vmax.f32 %v6637_v40, 0.0 }
0x1640   : > { %v6679_v52 = vpack.c.bf16 %v6655_v1, %v6654_v14  ;;  %7892 = vmatpush3.bf16.msra.mxu0 %v6677_v23 }
0x1641   : > { %v6678_v54 = vpack.c.bf16 %v6653_v33, %v6652_v2  ;;  %v6694_v2 = vld [vmem:[%s13111_s13 + $0x70] sm:$0xff] }
0x1643   : > { %7893 = vmatprep.subr.bf16.mxu0 %v6678_v54 }
0x1644   : > { %7894 = vmatpush3.bf16.msra.mxu0 %v6678_v54 }
0x1645   : > { %7895 = vmatprep.subr.bf16.mxu0 %v6679_v52 }
0x1648   : > { %7896 = vmatpush3.bf16.msra.mxu0 %v6679_v52  ;;  %v6692_v52 = vld [vmem:[%s13111_s13 + $0x60] sm:$0xff] }
0x164b   : > { %7898 = vmatmul.mubr.bf16.vlgmr.msra.gmra.mrb[52].mxu0 %v8711_v19 }
0x164c   : > { %7901 = vmatprep.mubr.bf16.mxu0 %v8712_v42  ;;  %v6695_v42 = vld [vmem:[%s13111_s13 + $0x78] sm:$0xff] }
0x1653   : > { %7902 = vmatmul.mubr.bf16.gmra.mrb[56].mxu0 %v8713_v15 }
0x1654   : > { %7905 = vmatprep.mubr.bf16.mxu0 %v8714_v17 }
0x165b   : > { %7906 = vmatmul.mubr.bf16.gmra.mrb[60].mxu0 %v8715_v9  ;;  %v6693_v9 = vld [vmem:[%s13111_s13 + $0x68] sm:$0xff] }
0x165c   : > { %7909 = vmatprep.mubr.bf16.mxu0 %v8716_v38 }
0x1663   : > { %7910 = vmatmul.mubr.bf16.gmra.mrb[64].mxu0 %v8717_v44 }
0x171e   : > { %v7899_v30 = vpop.f32.mrb[52].mxu0 }
0x171f   : > { %v6787_v43 = vadd.f32 %v7899_v30, %v6682_v25  ;;  %v6778_v39 = vpop.f32.mrb[53].mxu0 }
0x1720   : > { %v6779_v4 = vadd.f32 %v6778_v39, %v6680_v50  ;;  %v7900_v8 = vpop.f32.mrb[54].mxu0 }
0x1721   : > { %v6790_v11 = vadd.f32 %v7900_v8, %v6683_v6  ;;  %v6781_v29 = vpop.f32.mrb[55].mxu0  ;;  %v6843_v41 = vmax.f32 %v6787_v43, 0.0  ;;  %v8719_v8 = vld [vmem:[#allocation18 + $0x8] sm:$0xff]  }
0x1722   : > { %v6782_v31 = vadd.f32 %v6781_v29, %v6681_v20  ;;  %v6841_v18 = vmax.f32 %v6779_v4, 0.0  ;;  %v8721_v29 = vld [vmem:[#allocation18 + $0x18] sm:$0xff]  }
0x1723   : > { %v6844_v21 = vmax.f32 %v6790_v11, 0.0  ;;  %v8720_v11 = vld [vmem:[#allocation18 + $0x10] sm:$0xff]  }
0x1724   : > { %v6842_v45 = vmax.f32 %v6782_v31, 0.0  ;;  %v6875_v31 = vld [vmem:[%s13112_s0 + $0x10] sm:$0xff] }
0x1725   : > { %v6866_v60 = vpack.c.bf16 %v6844_v21, %v6843_v41  ;;  %v6873_v41 = vld [vmem:[%s13112_s0] sm:$0xff] }
0x1726   : > { %v6865_v36 = vpack.c.bf16 %v6842_v45, %v6841_v18  ;;  %v7903_v53 = vpop.f32.mrb[56].mxu0  ;;  %v6876_v18 = vld [vmem:[%s13112_s0 + $0x18] sm:$0xff] }
0x1727   : > { %v6803_v5 = vadd.f32 %v7903_v53, %v6686_v46  ;;  %v6794_v34 = vpop.f32.mrb[57].mxu0 }
0x1728   : > { %v6795_v49 = vadd.f32 %v6794_v34, %v6684_v32  ;;  %v7904_v51 = vpop.f32.mrb[58].mxu0  ;;  %7913 = vmatprep.subr.bf16.mxu1 %v6865_v36  ;;  %v6879_v34 = vld [vmem:[%s13112_s0 + $0x30] sm:$0xff] }
0x1729   : > { %v6806_v7 = vadd.f32 %v7904_v51, %v6687_v35  ;;  %v6797_v48 = vpop.f32.mrb[59].mxu0  ;;  %7914 = vmatpush3.bf16.msra.mxu1 %v6865_v36  ;;  %v6847_v16 = vmax.f32 %v6803_v5, 0.0  ;;  %v6880_v51 = vld [vmem:[%s13112_s0 + $0x38] sm:$0xff] }
0x172a   : > { %v6798_v57 = vadd.f32 %v6797_v48, %v6685_v61  ;;  %7915 = vmatprep.subr.bf16.mxu1 %v6866_v60  ;;  %v6845_v10 = vmax.f32 %v6795_v49, 0.0  ;;  %v6877_v61 = vld [vmem:[%s13112_s0 + $0x20] sm:$0xff] }
0x172b   : > { %v6848_v59 = vmax.f32 %v6806_v7, 0.0 }
0x172c   : > { %v6846_v47 = vmax.f32 %v6798_v57, 0.0  ;;  %v6878_v57 = vld [vmem:[%s13112_s0 + $0x28] sm:$0xff] }
0x172d   : > { %v6868_v55 = vpack.c.bf16 %v6848_v59, %v6847_v16  ;;  %7916 = vmatpush3.bf16.msra.mxu1 %v6866_v60  ;;  %v6874_v60 = vld [vmem:[%s13112_s0 + $0x8] sm:$0xff] }
0x172e   : > { %v6867_v23 = vpack.c.bf16 %v6846_v47, %v6845_v10  ;;  %v7907_v27 = vpop.f32.mrb[60].mxu0 }
0x172f   : > { %v6819_v22 = vadd.f32 %v7907_v27, %v6690_v63  ;;  %v6810_v3 = vpop.f32.mrb[61].mxu0 }
0x1730   : > { %7917 = vmatprep.subr.bf16.mxu1 %v6867_v23  ;;  %v6811_v28 = vadd.f32 %v6810_v3, %v6688_v58  ;;  %v7908_v37 = vpop.f32.mrb[62].mxu0 }
0x1731   : > { %7918 = vmatpush3.bf16.msra.mxu1 %v6867_v23  ;;  %v6822_v26 = vadd.f32 %v7908_v37, %v6691_v0  ;;  %v6813_v56 = vpop.f32.mrb[63].mxu0  ;;  %v6851_v62 = vmax.f32 %v6819_v22, 0.0 }
0x1732   : > { %7919 = vmatprep.subr.bf16.mxu1 %v6868_v55  ;;  %v6814_v12 = vadd.f32 %v6813_v56, %v6689_v13  ;;  %v6849_v14 = vmax.f32 %v6811_v28, 0.0 }
0x1733   : > { %v6852_v40 = vmax.f32 %v6822_v26, 0.0 }
0x1734   : > { %v6850_v1 = vmax.f32 %v6814_v12, 0.0 }
0x1735   : > { %7920 = vmatpush3.bf16.msra.mxu1 %v6868_v55  ;;  %v6870_v33 = vpack.c.bf16 %v6852_v40, %v6851_v62 }
0x1736   : > { %v6869_v54 = vpack.c.bf16 %v6850_v1, %v6849_v14  ;;  %v7911_v19 = vpop.f32.mrb[64].mxu0 }
0x1737   : > { %v6835_v15 = vadd.f32 %v7911_v19, %v6694_v2  ;;  %v6826_v17 = vpop.f32.mrb[65].mxu0 }
0x1738   : > { %7921 = vmatprep.subr.bf16.mxu1 %v6869_v54  ;;  %v6827_v38 = vadd.f32 %v6826_v17, %v6692_v52  ;;  %v7912_v44 = vpop.f32.mrb[66].mxu0 }
0x1739   : > { %7922 = vmatpush3.bf16.msra.mxu1 %v6869_v54  ;;  %v6838_v24 = vadd.f32 %v7912_v44, %v6695_v42  ;;  %v6829_v25 = vpop.f32.mrb[67].mxu0  ;;  %v6855_v30 = vmax.f32 %v6835_v15, 0.0 }
0x173a   : > { %7923 = vmatprep.subr.bf16.mxu1 %v6870_v33  ;;  %v6830_v50 = vadd.f32 %v6829_v25, %v6693_v9  ;;  %v6853_v43 = vmax.f32 %v6827_v38, 0.0 }
0x173b   : > { %v6856_v6 = vmax.f32 %v6838_v24, 0.0 }
0x173c   : > { %v6854_v39 = vmax.f32 %v6830_v50, 0.0 }
0x173d   : > { %7924 = vmatpush3.bf16.msra.mxu1 %v6870_v33  ;;  %v6872_v20 = vpack.c.bf16 %v6856_v6, %v6855_v30 }
0x173e   : > { %v6871_v4 = vpack.c.bf16 %v6854_v39, %v6853_v43 }
0x1740   : > { %7925 = vmatprep.subr.bf16.mxu1 %v6871_v4 }
0x1741   : > { %7926 = vmatpush3.bf16.msra.mxu1 %v6871_v4 }
0x1742   : > { %7927 = vmatprep.subr.bf16.mxu1 %v6872_v20 }
0x1745   : > { %7928 = vmatpush3.bf16.msra.mxu1 %v6872_v20 }
0x1748   : > { %7930 = vmatmul.mubr.bf16.vlgmr.msra.gmra.mrb[108].mxu1 %v8719_v8 }
0x1749   : > { %7933 = vmatprep.mubr.bf16.mxu1 %v8720_v11 }
0x1750   : > { %7934 = vmatmul.mubr.bf16.gmra.mrb[112].mxu1 %v8721_v29 }
0x181b   : > { %v7931_v21 = vpop.f32.mrb[108].mxu1 }
0x181c   : > { %v6948_v45 = vadd.f32 %v7931_v21, %v6875_v31  ;;  %v6939_v46 = vpop.f32.mrb[109].mxu1 }
0x181d   : > { %v6940_v32 = vadd.f32 %v6939_v46, %v6873_v41  ;;  %v7932_v36 = vpop.f32.mrb[110].mxu1 }
0x181e   : > { %6973 = vst.msk [vmem:[%s12221_s8 + $0x10] sm:$0xff] %vm6970_vm11, %v6948_v45  ;;  %v6951_v53 = vadd.f32 %v7932_v36, %v6876_v18  ;;  %v6942_v35 = vpop.f32.mrb[111].mxu1 }
0x181f   : > { %6971 = vst.msk [vmem:[%s12221_s8] sm:$0xff] %vm6970_vm11, %v6940_v32  ;;  %v6943_v5 = vadd.f32 %v6942_v35, %v6874_v60 }
0x1820   : > { %6974 = vst.msk [vmem:[%s12221_s8 + $0x18] sm:$0xff] %vm6970_vm11, %v6951_v53 }
0x1821   : > { %6972 = vst.msk [vmem:[%s12221_s8 + $0x8] sm:$0xff] %vm6970_vm11, %v6943_v5 }
0x1823   : > { %v7935_v49 = vpop.f32.mrb[112].mxu1 }
0x1824   : > { %v6964_v7 = vadd.f32 %v7935_v49, %v6879_v34  ;;  %v6955_v48 = vpop.f32.mrb[113].mxu1 }
0x1825   : > { %v6956_v16 = vadd.f32 %v6955_v48, %v6877_v61  ;;  %v7936_v59 = vpop.f32.mrb[114].mxu1 }
0x1826   : > { %6977 = vst.msk [vmem:[%s12221_s8 + $0x30] sm:$0xff] %vm6970_vm11, %v6964_v7  ;;  %v6967_v10 = vadd.f32 %v7936_v59, %v6880_v51  ;;  %v6958_v47 = vpop.f32.mrb[115].mxu1 }
0x1827   : > { %6975 = vst.msk [vmem:[%s12221_s8 + $0x20] sm:$0xff] %vm6970_vm11, %v6956_v16  ;;  %v6959_v63 = vadd.f32 %v6958_v47, %v6878_v57 }
0x1828   : > { %6978 = vst.msk [vmem:[%s12221_s8 + $0x38] sm:$0xff] %vm6970_vm11, %v6967_v10 }
0x1829   : > { %6976 = vst.msk [vmem:[%s12221_s8 + $0x28] sm:$0xff] %vm6970_vm11, %v6959_v63 }
0x182a PF: > { %p40_p7 = scmp.ge.s32.totalorder %s9803_s4, 4   ;;  %s13114_s29 = smov %s9366_s2 }
0x182b   : > { %s13115_s2 = smov %s9370_s6  ;;  %s13116_s6 = smov %s9815_s16 }
0x182c   : > { %s13117_s30 = smov %s9803_s4  ;;  %42 = sbr.rel (!%p40_p7) target bundleno = 29 (0x1d), region = 203 }
0x1833   :  { %7000 = vsyncpa [#allocation3], 1 }
0x1834   :  { %7002 = vsyncpa [#allocation3 + $0x1], 1 }
0x1835   :  { %7003 = vsyncpa [#allocation5], 1 }
0x1836   :  { %7004 = vsyncpa [#allocation8], 1 }
0x1837   :  { %7005 = vsyncpa [#allocation11], 1 }
0x1838   :  { %7006 = vsyncpa [#allocation14], 1 }
0x1839   :  { %7007 = vsyncpa [#allocation17], 1 }

</bundles_post_ra>
